<compile_context>
chip_gen: v7x
topology: tpu7x:2x2x1
jax: 0.10.0
libtpu: 0.0.40
codegen_flags: <defaults>
</compile_context>

<pallas_src>
import functools

import jax
import jax.numpy as jnp
from jax.experimental import pallas as pl
from jax.experimental.pallas import tpu as pltpu


# ============================================================================
# Kernel 1: Linear with fused affine (+ optional ReLU) epilogue, tiled over N.
#   y = maybe_relu((x @ W) * scale + shift)
# Used for: LSTM input projections (scale=1, shift=bias) and the Output_MLP
# layers (scale/shift fold eval-mode BatchNorm; relu=True).
# ============================================================================
def _affine_matmul_kernel(x_ref, w_ref, s_ref, t_ref, o_ref, *, relu):
    y = jnp.dot(x_ref[...].astype(w_ref.dtype), w_ref[...],
                preferred_element_type=jnp.float32)
    y = y * s_ref[...] + t_ref[...]
    if relu:
        y = jnp.maximum(y, 0.0)
    o_ref[...] = y


def linear_affine(x, w, shift, scale=None, relu=False):
    """x: (M, K) f32; w: (K, N) f32/bf16; shift/scale: (N,). Returns (M, N) f32."""
    M, K = x.shape
    N = w.shape[1]
    if scale is None:
        scale = jnp.ones((N,), jnp.float32)
    if N % 512 == 0:
        tn = 512
    elif N % 256 == 0:
        tn = 256
    elif N % 128 == 0:
        tn = 128
    else:
        tn = N
    kernel = functools.partial(_affine_matmul_kernel, relu=relu)
    return pl.pallas_call(
        kernel,
        out_shape=jax.ShapeDtypeStruct((M, N), jnp.float32),
        grid_spec=pltpu.PrefetchScalarGridSpec(
            num_scalar_prefetch=0,
            grid=(N // tn,),
            in_specs=[
                pl.BlockSpec((M, K), lambda j: (0, 0)),
                pl.BlockSpec((K, tn), lambda j: (0, j)),
                pl.BlockSpec((1, tn), lambda j: (0, j)),
                pl.BlockSpec((1, tn), lambda j: (0, j)),
            ],
            out_specs=pl.BlockSpec((M, tn), lambda j: (0, j)),
        ),
        compiler_params=pltpu.CompilerParams(
            dimension_semantics=("parallel",),
            vmem_limit_bytes=48 * 1024 * 1024),   # <= 64 MiB physical VMEM on v7x
    )(x, w, scale.reshape(1, N).astype(jnp.float32),
      shift.reshape(1, N).astype(jnp.float32))


# ============================================================================
# Kernel 2: masked (packed-sequence) LSTM recurrence.
#   Inputs are pre-projected gates xg[b, t, :] = x[b, t] @ W_ih + b_ih + b_hh.
#   Per step the kernel only does h @ W_hh (MXU) + element-wise gate math (VPU/EUP).
#   Validity window [lo, hi) per (batch, state-column): outside it the state is
#   frozen and the output is 0 (== packed LSTM + pad_packed_sequence semantics).
#   A chunk of `t_chunk` timesteps is processed per grid step; h/c live in VMEM
#   scratch and persist across the (sequential) time axis of the grid.
# ============================================================================
def _lstm_rec_kernel(xg_ref, lo_ref, hi_ref, whh_ref, out_ref, h_sc, c_sc,
                     *, n_state, t_chunk):
    tchunk_id = pl.program_id(1)          # time-chunk index (sequential axis)

    @pl.when(tchunk_id == 0)
    def _():
        h_sc[...] = jnp.zeros_like(h_sc)
        c_sc[...] = jnp.zeros_like(c_sc)

    xg = xg_ref[...]                      # (Bb, Tc, 4*n_state)
    lo = lo_ref[...][:, 0, :]             # (Bb, n_state) int32
    hi = hi_ref[...][:, 0, :]             # (Bb, n_state) int32
    whh = whh_ref[...]                    # (n_state, 4*n_state)
    h = h_sc[...]
    c = c_sc[...]
    t_base = tchunk_id * t_chunk

    outs = []
    for tt in range(t_chunk):             # unrolled; static indices
        gates = xg[:, tt, :] + jnp.dot(h, whh, preferred_element_type=jnp.float32)
        i = jax.nn.sigmoid(gates[:, 0 * n_state:1 * n_state])
        f = jax.nn.sigmoid(gates[:, 1 * n_state:2 * n_state])
        g = jnp.tanh(gates[:, 2 * n_state:3 * n_state])
        o = jax.nn.sigmoid(gates[:, 3 * n_state:4 * n_state])
        c_new = f * c + i * g
        h_new = o * jnp.tanh(c_new)
        t_g = t_base + tt
        m = jnp.logical_and(t_g >= lo, t_g < hi).astype(jnp.float32)
        h = m * h_new + (1.0 - m) * h
        c = m * c_new + (1.0 - m) * c
        outs.append(m * h_new)

    out_ref[...] = jnp.stack(outs, axis=1)    # (Bb, Tc, n_state)
    h_sc[...] = h
    c_sc[...] = c


def lstm_recurrence(xg, lo, hi, w_hh, *, t_chunk):
    """xg: (B, T_pad, 4*n_state) f32; lo/hi: (B, n_state) int32;
    w_hh: (n_state, 4*n_state).  Returns (B, T_pad, n_state) f32."""
    B, T_pad, G = xg.shape
    n_state = G // 4
    nb = 2 if (B % 2 == 0 and B >= 2) else 1    # batch "parallel" axis (v7x 2 TCs)
    Bb = B // nb
    lo3 = lo.reshape(B, 1, n_state)
    hi3 = hi.reshape(B, 1, n_state)
    kernel = functools.partial(_lstm_rec_kernel, n_state=n_state, t_chunk=t_chunk)
    return pl.pallas_call(
        kernel,
        out_shape=jax.ShapeDtypeStruct((B, T_pad, n_state), jnp.float32),
        grid_spec=pltpu.PrefetchScalarGridSpec(
            num_scalar_prefetch=0,
            grid=(nb, T_pad // t_chunk),
            in_specs=[
                pl.BlockSpec((Bb, t_chunk, G), lambda b, t: (b, t, 0)),
                pl.BlockSpec((Bb, 1, n_state), lambda b, t: (b, 0, 0)),
                pl.BlockSpec((Bb, 1, n_state), lambda b, t: (b, 0, 0)),
                pl.BlockSpec((n_state, G), lambda b, t: (0, 0)),
            ],
            out_specs=pl.BlockSpec((Bb, t_chunk, n_state), lambda b, t: (b, t, 0)),
            scratch_shapes=[pltpu.VMEM((Bb, n_state), jnp.float32),
                            pltpu.VMEM((Bb, n_state), jnp.float32)],
        ),
        compiler_params=pltpu.CompilerParams(
            dimension_semantics=("parallel", "arbitrary")),
    )(xg, lo3, hi3, w_hh)


# ============================================================================
# Plain-JAX glue (layernorm, eval BN, parameter construction).
# ============================================================================
def layernorm(x, gamma, beta, eps=1e-5):
    mu = jnp.mean(x, axis=-1, keepdims=True)
    var = jnp.mean((x - mu) ** 2, axis=-1, keepdims=True)
    return (x - mu) * jax.lax.rsqrt(var + eps) * gamma + beta


def _bn_fold(bn, bias, eps=1e-5):
    """Fold eval-mode BatchNorm (+ linear bias) into per-column scale/shift."""
    scale = bn["gamma"] * jax.lax.rsqrt(bn["var"] + eps)
    shift = (bias - bn["mean"]) * scale + bn["beta"]
    return scale, shift


def _uniform(key, shape, scale):
    return jax.random.uniform(key, shape, jnp.float32, -scale, scale)


def _lstm_dir_params(key, in_size, hidden):
    k1, k2, k3, k4 = jax.random.split(key, 4)
    s = float(hidden) ** -0.5
    w_ih = _uniform(k1, (in_size, 4 * hidden), s)           # (in, 4H), gates [i,f,g,o]
    w_hh = _uniform(k2, (hidden, 4 * hidden), s)             # (H, 4H)
    b = _uniform(k3, (4 * hidden,), s) + _uniform(k4, (4 * hidden,), s)
    return w_ih, w_hh, b


def _bidir_merge(wf_ih, wf_hh, bf, wb_ih, wb_hh, bb):
    """Fuse fwd/bwd direction weights.
    Input proj: direction-major columns [fwd 4H | bwd 4H] (bwd half gets flipped in time
    after projection).  Recurrent: block-diagonal (2H, 8H) in gate-major interleaved
    layout [i_f,i_b | f_f,f_b | g_f,g_b | o_f,o_b] acting on state [h_f | h_b]."""
    H = wf_hh.shape[0]
    w_in = jnp.concatenate([wf_ih, wb_ih], axis=1)           # (E, 8H)
    b_in = jnp.concatenate([bf, bb], axis=0)                 # (8H,)
    wf4 = wf_hh.reshape(H, 4, H)
    wb4 = wb_hh.reshape(H, 4, H)
    top = jnp.concatenate([wf4, jnp.zeros_like(wf4)], axis=2)   # h_f rows
    bot = jnp.concatenate([jnp.zeros_like(wb4), wb4], axis=2)   # h_b rows
    w_hh = jnp.concatenate([top, bot], axis=0).reshape(2 * H, 8 * H)
    return w_in, b_in, w_hh


def _linear_params(key, in_size, out_size, dtype=jnp.float32):
    k1, k2 = jax.random.split(key)
    s = float(in_size) ** -0.5
    return _uniform(k1, (in_size, out_size), s).astype(dtype), _uniform(k2, (out_size,), s)


def _bn_params(n):
    return dict(mean=jnp.zeros((n,), jnp.float32), var=jnp.ones((n,), jnp.float32),
                gamma=jnp.ones((n,), jnp.float32), beta=jnp.zeros((n,), jnp.float32))


def init_params(key, out_size, embed_size, hidden_size):
    ks = jax.random.split(key, 7)
    H, H2 = hidden_size, 2 * hidden_size
    wf_ih, wf_hh, bf = _lstm_dir_params(ks[0], embed_size, H)
    wb_ih, wb_hh, bb = _lstm_dir_params(ks[1], embed_size, H)
    w_in_bi, b_in_bi, whh_bi = _bidir_merge(wf_ih, wf_hh, bf, wb_ih, wb_hh, bb)
    w_in_1, whh_1, b_1 = _lstm_dir_params(ks[2], H2, H2)
    w_in_2, whh_2, b_2 = _lstm_dir_params(ks[3], H2, H2)
    w1, bias1 = _linear_params(ks[4], 4 * H, 4096, dtype=jnp.bfloat16)   # weight-streaming
    w2, bias2 = _linear_params(ks[5], 4096, 2048, dtype=jnp.bfloat16)    # bound -> bf16
    w3, bias3 = _linear_params(ks[6], 2048, out_size, dtype=jnp.bfloat16)
    return dict(
        w_in_bi=w_in_bi, b_in_bi=b_in_bi, whh_bi=whh_bi,
        w_in_1=w_in_1, b_in_1=b_1, whh_1=whh_1,
        w_in_2=w_in_2, b_in_2=b_2, whh_2=whh_2,
        ln1_g=jnp.ones((H2,), jnp.float32), ln1_b=jnp.zeros((H2,), jnp.float32),
        ln2_g=jnp.ones((H2,), jnp.float32), ln2_b=jnp.zeros((H2,), jnp.float32),
        bn_head=_bn_params(4 * H),
        w1=w1, b1=bias1, bn1=_bn_params(4096),
        w2=w2, b2=bias2, bn2=_bn_params(2048),
        w3=w3, b3=bias3,
    )


# ============================================================================
# Full forward pass of Final_LSTM (eval mode; dropout = identity).
# ============================================================================
def final_lstm_forward(params, inp, inp_len):
    B, T, E = inp.shape
    H2 = params["whh_bi"].shape[0]       # 2 * hidden_size (state width of every layer)
    H = H2 // 2
    T_pad = ((T + 7) // 8) * 8
    if T_pad % 32 == 0:
        tc = 32
    elif T_pad % 16 == 0:
        tc = 16
    else:
        tc = 8

    lens = inp_len.astype(jnp.int32)
    len_col = lens[:, None]                                   # (B, 1)

    # Valid windows (t in [lo, hi)) per state column.
    lo_bi = jnp.concatenate(
        [jnp.zeros((B, H), jnp.int32),
         jnp.broadcast_to(T_pad - len_col, (B, H)).astype(jnp.int32)], axis=1)
    hi_bi = jnp.concatenate(
        [jnp.broadcast_to(len_col, (B, H)).astype(jnp.int32),
         jnp.full((B, H), T_pad, jnp.int32)], axis=1)
    lo_uni = jnp.zeros((B, H2), jnp.int32)
    hi_uni = jnp.broadcast_to(len_col, (B, H2)).astype(jnp.int32)

    def pad_time(x):
        return jnp.pad(x, ((0, 0), (0, T_pad - T), (0, 0)))

    # ---------------- Extraction_LSTM ----------------
    # Bidirectional layer: one big input projection (both directions), then a single
    # fused recurrence over [h_f | h_b] with a block-diagonal W_hh.
    xg = linear_affine(inp.reshape(B * T, E), params["w_in_bi"],
                       params["b_in_bi"]).reshape(B, T, 8 * H)
    xg = pad_time(xg)                                         # (B, T_pad, 8H)
    xg_f = xg[..., :4 * H].reshape(B, T_pad, 4, H)
    xg_b = jnp.flip(xg[..., 4 * H:], axis=1).reshape(B, T_pad, 4, H)  # reversed-time bwd
    xg_bi = jnp.concatenate([xg_f, xg_b], axis=-1).reshape(B, T_pad, 8 * H)
    rec = lstm_recurrence(xg_bi, lo_bi, hi_bi, params["whh_bi"], t_chunk=tc)
    y_f = rec[:, :T, :H]
    y_b = jnp.flip(rec[:, :, H:], axis=1)[:, :T, :]
    y = jnp.concatenate([y_f, y_b], axis=-1)                  # (B, T, 2H), zeros at pads
    # dropout_1: identity (eval)

    # layernorm_1 -> lstm_1 -> residual
    y1 = layernorm(y, params["ln1_g"], params["ln1_b"])
    xg1 = linear_affine(y1.reshape(B * T, H2), params["w_in_1"],
                        params["b_in_1"]).reshape(B, T, 4 * H2)
    z = lstm_recurrence(pad_time(xg1), lo_uni, hi_uni, params["whh_1"],
                        t_chunk=tc)[:, :T]
    y = y + z                                                 # dropout_2: identity (eval)

    # layernorm_2 -> lstm_2
    y2 = layernorm(y, params["ln2_g"], params["ln2_b"])
    xg2 = linear_affine(y2.reshape(B * T, H2), params["w_in_2"],
                        params["b_in_2"]).reshape(B, T, 4 * H2)
    feat = lstm_recurrence(pad_time(xg2), lo_uni, hi_uni, params["whh_2"],
                           t_chunk=tc)[:, :T]                 # (B, T, 2H)

    # ---------------- pooling head ----------------
    mask = jnp.arange(T)[None, :] < len_col                   # (B, T) bool
    last_idx = jnp.clip(lens - 1, 0, T - 1)
    out1 = feat[jnp.arange(B), last_idx, :]                   # last valid step  (B, 2H)
    neg = jnp.finfo(jnp.float32).min
    out2 = jnp.max(jnp.where(mask[:, :, None], feat, neg), axis=1)   # max over valid steps
    pooled = jnp.concatenate([out1, out2], axis=1)            # (B, 4H)

    bnh = params["bn_head"]
    pooled = jax.nn.relu((pooled - bnh["mean"]) * jax.lax.rsqrt(bnh["var"] + 1e-5)
                         * bnh["gamma"] + bnh["beta"])
    # dropout_layer: identity (eval)

    # ---------------- Output_MLP (BN+ReLU fused into the Linear epilogue) ----------------
    s1, t1 = _bn_fold(params["bn1"], params["b1"])
    h1 = linear_affine(pooled, params["w1"], t1, scale=s1, relu=True)
    s2, t2 = _bn_fold(params["bn2"], params["b2"])
    h2 = linear_affine(h1, params["w2"], t2, scale=s2, relu=True)
    return linear_affine(h2, params["w3"], params["b3"])


if __name__ == "__main__":
    # Small deterministic example.
    B, T = 2, 8                      # batch, max_seq_len
    embed_size, hidden_size, out_size = 16, 32, 8

    key = jax.random.PRNGKey(0)
    k_par, k_inp = jax.random.split(key)
    params = init_params(k_par, out_size, embed_size, hidden_size)

    inp = jax.random.normal(k_inp, (B, T, embed_size), jnp.float32)
    inp_len = jnp.array([8, 5], dtype=jnp.int32)

    fwd = jax.jit(final_lstm_forward)
    out = jax.block_until_ready(fwd(params, inp, inp_len))
    assert out.shape == (B, out_size)
    assert bool(jnp.all(jnp.isfinite(out)))
    print("KERNEL_OK")
</pallas_src>

<mosaic_0001>
module attributes {stable_mosaic.version = 11 : i64} {
  func.func @_affine_matmul_kernel(%arg0: i32, %arg1: memref<16x16xf32, #tpu.memory_space<vmem>>, %arg2: memref<16x256xf32, #tpu.memory_space<vmem>>, %arg3: memref<1x256xf32, #tpu.memory_space<vmem>>, %arg4: memref<1x256xf32, #tpu.memory_space<vmem>>, %arg5: memref<16x256xf32, #tpu.memory_space<vmem>>) attributes {dimension_semantics = [#tpu.dimension_semantics<parallel>], iteration_bounds = array<i64: 1>, scalar_prefetch = 0 : i64, scratch_operands = 0 : i64, tpu.core_type = #tpu.core_type<tc>, window_params = [{pipeline_mode = #tpu.pipeline_mode<synchronous>, transform_indices = @transform_0, window_bounds = array<i64: 16, 16>}, {transform_indices = @transform_1, window_bounds = array<i64: 16, 256>}, {transform_indices = @transform_2, window_bounds = array<i64: 1, 256>}, {transform_indices = @transform_3, window_bounds = array<i64: 1, 256>}, {transform_indices = @transform_4, window_bounds = array<i64: 16, 256>}]} {
    %c0 = arith.constant 0 : index
    %c0_0 = arith.constant 0 : index
    %0 = vector.load %arg1[%c0, %c0_0] : memref<16x16xf32, #tpu.memory_space<vmem>>, vector<16x16xf32>
    %c0_1 = arith.constant 0 : index
    %c0_2 = arith.constant 0 : index
    %1 = vector.load %arg2[%c0_1, %c0_2] : memref<16x256xf32, #tpu.memory_space<vmem>>, vector<16x256xf32>
    %cst = arith.constant dense<0.000000e+00> : vector<16x256xf32>
    %2 = tpu.matmul %0, %1, %cst {dimension_numbers = #tpu.dot_dimension_numbers<[1], [0], [0], [1], [0, 0, 1, 1], [], []>} : vector<16x16xf32>, vector<16x256xf32>, vector<16x256xf32> -> vector<16x256xf32>
    %c0_3 = arith.constant 0 : index
    %c0_4 = arith.constant 0 : index
    %3 = vector.load %arg3[%c0_3, %c0_4] : memref<1x256xf32, #tpu.memory_space<vmem>>, vector<1x256xf32>
    %4 = vector.broadcast %3 : vector<1x256xf32> to vector<16x256xf32>
    %5 = arith.mulf %2, %4 : vector<16x256xf32>
    %c0_5 = arith.constant 0 : index
    %c0_6 = arith.constant 0 : index
    %6 = vector.load %arg4[%c0_5, %c0_6] : memref<1x256xf32, #tpu.memory_space<vmem>>, vector<1x256xf32>
    %7 = vector.broadcast %6 : vector<1x256xf32> to vector<16x256xf32>
    %8 = arith.addf %5, %7 : vector<16x256xf32>
    %c0_7 = arith.constant 0 : index
    %c0_8 = arith.constant 0 : index
    %9 = vector.load %arg5[%c0_7, %c0_8] : memref<16x256xf32, #tpu.memory_space<vmem>>, vector<16x256xf32>
    tpu.vector_store %arg5[%c0_7, %c0_8], %8 {strides = array<i32>} : memref<16x256xf32, #tpu.memory_space<vmem>>, vector<16x256xf32>,
    return
  }
  func.func @transform_0(%arg0: i32) -> (i32, i32) {
    %c0_i32 = arith.constant 0 : i32
    %c0_i32_0 = arith.constant 0 : i32
    %c0_i32_1 = arith.constant 0 : i32
    return %c0_i32, %c0_i32_0 : i32, i32
  }
  func.func @transform_1(%arg0: i32) -> (i32, i32) {
    %c0_i32 = arith.constant 0 : i32
    %c0_i32_0 = arith.constant 0 : i32
    return %c0_i32, %arg0 : i32, i32
  }
  func.func @transform_2(%arg0: i32) -> (i32, i32) {
    %c0_i32 = arith.constant 0 : i32
    %c0_i32_0 = arith.constant 0 : i32
    return %c0_i32, %arg0 : i32, i32
  }
  func.func @transform_3(%arg0: i32) -> (i32, i32) {
    %c0_i32 = arith.constant 0 : i32
    %c0_i32_0 = arith.constant 0 : i32
    return %c0_i32, %arg0 : i32, i32
  }
  func.func @transform_4(%arg0: i32) -> (i32, i32) {
    %c0_i32 = arith.constant 0 : i32
    %c0_i32_0 = arith.constant 0 : i32
    return %c0_i32, %arg0 : i32, i32
  }
}

module attributes {stable_mosaic.version = 11 : i64} {
  func.func @_lstm_rec_kernel(%arg0: i32, %arg1: i32, %arg2: memref<1x8x256xf32, #tpu.memory_space<vmem>>, %arg3: memref<1x1x64xi32, #tpu.memory_space<vmem>>, %arg4: memref<1x1x64xi32, #tpu.memory_space<vmem>>, %arg5: memref<64x256xf32, #tpu.memory_space<vmem>>, %arg6: memref<1x8x64xf32, #tpu.memory_space<vmem>>, %arg7: memref<1x64xf32, #tpu.memory_space<vmem>>, %arg8: memref<1x64xf32, #tpu.memory_space<vmem>>) attributes {dimension_semantics = [#tpu.dimension_semantics<parallel>, #tpu.dimension_semantics<arbitrary>], iteration_bounds = array<i64: 2, 1>, scalar_prefetch = 0 : i64, scratch_operands = 2 : i64, tpu.core_type = #tpu.core_type<tc>, window_params = [{transform_indices = @transform_0, window_bounds = array<i64: 1, 8, 256>}, {transform_indices = @transform_1, window_bounds = array<i64: 1, 1, 64>}, {transform_indices = @transform_2, window_bounds = array<i64: 1, 1, 64>}, {pipeline_mode = #tpu.pipeline_mode<synchronous>, transform_indices = @transform_3, window_bounds = array<i64: 64, 256>}, {transform_indices = @transform_4, window_bounds = array<i64: 1, 8, 64>}]} {
    %c0_i32 = arith.constant 0 : i32
    %0 = arith.cmpi eq, %arg1, %c0_i32 : i32
    %1 = arith.extui %0 : i1 to i32
    %c0_i32_0 = arith.constant 0 : i32
    %2 = arith.cmpi ne, %1, %c0_i32_0 : i32
    scf.if %2 {
      %cst_70 = arith.constant 0.000000e+00 : f32
      %408 = vector.broadcast %cst_70 : f32 to vector<1x64xf32>
      %c0_71 = arith.constant 0 : index
      %c0_72 = arith.constant 0 : index
      %409 = vector.load %arg7[%c0_71, %c0_72] : memref<1x64xf32, #tpu.memory_space<vmem>>, vector<1x64xf32>
      tpu.vector_store %arg7[%c0_71, %c0_72], %408 {strides = array<i32>} : memref<1x64xf32, #tpu.memory_space<vmem>>, vector<1x64xf32>,
      %cst_73 = arith.constant 0.000000e+00 : f32
      %410 = vector.broadcast %cst_73 : f32 to vector<1x64xf32>
      %c0_74 = arith.constant 0 : index
      %c0_75 = arith.constant 0 : index
      %411 = vector.load %arg8[%c0_74, %c0_75] : memref<1x64xf32, #tpu.memory_space<vmem>>, vector<1x64xf32>
      tpu.vector_store %arg8[%c0_74, %c0_75], %410 {strides = array<i32>} : memref<1x64xf32, #tpu.memory_space<vmem>>, vector<1x64xf32>,
    } else {
    }
    %c0 = arith.constant 0 : index
    %c0_1 = arith.constant 0 : index
    %c0_2 = arith.constant 0 : index
    %3 = vector.load %arg2[%c0, %c0_1, %c0_2] : memref<1x8x256xf32, #tpu.memory_space<vmem>>, vector<1x8x256xf32>
    %c0_3 = arith.constant 0 : index
    %c0_4 = arith.constant 0 : index
    %c0_5 = arith.constant 0 : index
    %4 = vector.load %arg3[%c0_3, %c0_4, %c0_5] : memref<1x1x64xi32, #tpu.memory_space<vmem>>, vector<1x1x64xi32>
    %5 = vector.shape_cast %4 : vector<1x1x64xi32> to vector<1x64xi32>
    %c0_6 = arith.constant 0 : index
    %c0_7 = arith.constant 0 : index
    %c0_8 = arith.constant 0 : index
    %6 = vector.load %arg4[%c0_6, %c0_7, %c0_8] : memref<1x1x64xi32, #tpu.memory_space<vmem>>, vector<1x1x64xi32>
    %7 = vector.shape_cast %6 : vector<1x1x64xi32> to vector<1x64xi32>
    %c0_9 = arith.constant 0 : index
    %c0_10 = arith.constant 0 : index
    %8 = vector.load %arg5[%c0_9, %c0_10] : memref<64x256xf32, #tpu.memory_space<vmem>>, vector<64x256xf32>
    %c0_11 = arith.constant 0 : index
    %c0_12 = arith.constant 0 : index
    %9 = vector.load %arg7[%c0_11, %c0_12] : memref<1x64xf32, #tpu.memory_space<vmem>>, vector<1x64xf32>
    %c0_13 = arith.constant 0 : index
    %c0_14 = arith.constant 0 : index
    %10 = vector.load %arg8[%c0_13, %c0_14] : memref<1x64xf32, #tpu.memory_space<vmem>>, vector<1x64xf32>
    %c8_i32 = arith.constant 8 : i32
    %11 = arith.muli %arg1, %c8_i32 : i32
    %12 = vector.extract_strided_slice %3 {offsets = [0, 0, 0], sizes = [1, 1, 256], strides = [1, 1, 1]} : vector<1x8x256xf32> to vector<1x1x256xf32>
    %13 = vector.shape_cast %12 : vector<1x1x256xf32> to vector<1x256xf32>
    %cst = arith.constant dense<0.000000e+00> : vector<1x256xf32>
    %14 = tpu.matmul %9, %8, %cst {dimension_numbers = #tpu.dot_dimension_numbers<[1], [0], [0], [1], [0, 0, 1, 1], [], []>} : vector<1x64xf32>, vector<64x256xf32>, vector<1x256xf32> -> vector<1x256xf32>
    %15 = arith.addf %13, %14 : vector<1x256xf32>
    %16 = vector.extract_strided_slice %15 {offsets = [0, 0], sizes = [1, 64], strides = [1, 1]} : vector<1x256xf32> to vector<1x64xf32>
    %17 = arith.negf %16 : vector<1x64xf32>
    %18 = math.exp %17 : vector<1x64xf32>
    %cst_15 = arith.constant 1.000000e+00 : f32
    %19 = vector.broadcast %cst_15 : f32 to vector<1x64xf32>
    %20 = arith.addf %19, %18 : vector<1x64xf32>
    %21 = arith.divf %19, %20 : vector<1x64xf32>
    %22 = vector.extract_strided_slice %15 {offsets = [0, 64], sizes = [1, 64], strides = [1, 1]} : vector<1x256xf32> to vector<1x64xf32>
    %23 = arith.negf %22 : vector<1x64xf32>
    %24 = math.exp %23 : vector<1x64xf32>
    %cst_16 = arith.constant 1.000000e+00 : f32
    %25 = vector.broadcast %cst_16 : f32 to vector<1x64xf32>
    %26 = arith.addf %25, %24 : vector<1x64xf32>
    %27 = arith.divf %25, %26 : vector<1x64xf32>
    %28 = vector.extract_strided_slice %15 {offsets = [0, 128], sizes = [1, 64], strides = [1, 1]} : vector<1x256xf32> to vector<1x64xf32>
    %29 = math.tanh %28 : vector<1x64xf32>
    %30 = vector.extract_strided_slice %15 {offsets = [0, 192], sizes = [1, 64], strides = [1, 1]} : vector<1x256xf32> to vector<1x64xf32>
    %31 = arith.negf %30 : vector<1x64xf32>
    %32 = math.exp %31 : vector<1x64xf32>
    %cst_17 = arith.constant 1.000000e+00 : f32
    %33 = vector.broadcast %cst_17 : f32 to vector<1x64xf32>
    %34 = arith.addf %33, %32 : vector<1x64xf32>
    %35 = arith.divf %33, %34 : vector<1x64xf32>
    %36 = arith.mulf %27, %10 : vector<1x64xf32>
    %37 = arith.mulf %21, %29 : vector<1x64xf32>
    %38 = arith.addf %36, %37 : vector<1x64xf32>
    %39 = math.tanh %38 : vector<1x64xf32>
    %40 = arith.mulf %35, %39 : vector<1x64xf32>
    %c0_i32_18 = arith.constant 0 : i32
    %41 = arith.addi %11, %c0_i32_18 : i32
    %42 = vector.broadcast %41 : i32 to vector<1x64xi32>
    %43 = arith.cmpi sge, %42, %5 : vector<1x64xi32>
    %44 = vector.broadcast %41 : i32 to vector<1x64xi32>
    %45 = arith.cmpi slt, %44, %7 : vector<1x64xi32>
    %46 = arith.andi %43, %45 : vector<1x64xi1>
    %47 = arith.extui %46 : vector<1x64xi1> to vector<1x64xi32>
    %48 = arith.sitofp %47 : vector<1x64xi32> to vector<1x64xf32>
    %49 = arith.mulf %48, %40 : vector<1x64xf32>
    %cst_19 = arith.constant 1.000000e+00 : f32
    %50 = vector.broadcast %cst_19 : f32 to vector<1x64xf32>
    %51 = arith.subf %50, %48 : vector<1x64xf32>
    %52 = arith.mulf %51, %9 : vector<1x64xf32>
    %53 = arith.addf %49, %52 : vector<1x64xf32>
    %54 = arith.mulf %48, %38 : vector<1x64xf32>
    %cst_20 = arith.constant 1.000000e+00 : f32
    %55 = vector.broadcast %cst_20 : f32 to vector<1x64xf32>
    %56 = arith.subf %55, %48 : vector<1x64xf32>
    %57 = arith.mulf %56, %10 : vector<1x64xf32>
    %58 = arith.addf %54, %57 : vector<1x64xf32>
    %59 = arith.mulf %48, %40 : vector<1x64xf32>
    %60 = vector.extract_strided_slice %3 {offsets = [0, 1, 0], sizes = [1, 1, 256], strides = [1, 1, 1]} : vector<1x8x256xf32> to vector<1x1x256xf32>
    %61 = vector.shape_cast %60 : vector<1x1x256xf32> to vector<1x256xf32>
    %cst_21 = arith.constant dense<0.000000e+00> : vector<1x256xf32>
    %62 = tpu.matmul %53, %8, %cst_21 {dimension_numbers = #tpu.dot_dimension_numbers<[1], [0], [0], [1], [0, 0, 1, 1], [], []>} : vector<1x64xf32>, vector<64x256xf32>, vector<1x256xf32> -> vector<1x256xf32>
    %63 = arith.addf %61, %62 : vector<1x256xf32>
    %64 = vector.extract_strided_slice %63 {offsets = [0, 0], sizes = [1, 64], strides = [1, 1]} : vector<1x256xf32> to vector<1x64xf32>
    %65 = arith.negf %64 : vector<1x64xf32>
    %66 = math.exp %65 : vector<1x64xf32>
    %cst_22 = arith.constant 1.000000e+00 : f32
    %67 = vector.broadcast %cst_22 : f32 to vector<1x64xf32>
    %68 = arith.addf %67, %66 : vector<1x64xf32>
    %69 = arith.divf %67, %68 : vector<1x64xf32>
    %70 = vector.extract_strided_slice %63 {offsets = [0, 64], sizes = [1, 64], strides = [1, 1]} : vector<1x256xf32> to vector<1x64xf32>
    %71 = arith.negf %70 : vector<1x64xf32>
    %72 = math.exp %71 : vector<1x64xf32>
    %cst_23 = arith.constant 1.000000e+00 : f32
    %73 = vector.broadcast %cst_23 : f32 to vector<1x64xf32>
    %74 = arith.addf %73, %72 : vector<1x64xf32>
    %75 = arith.divf %73, %74 : vector<1x64xf32>
    %76 = vector.extract_strided_slice %63 {offsets = [0, 128], sizes = [1, 64], strides = [1, 1]} : vector<1x256xf32> to vector<1x64xf32>
    %77 = math.tanh %76 : vector<1x64xf32>
    %78 = vector.extract_strided_slice %63 {offsets = [0, 192], sizes = [1, 64], strides = [1, 1]} : vector<1x256xf32> to vector<1x64xf32>
    %79 = arith.negf %78 : vector<1x64xf32>
    %80 = math.exp %79 : vector<1x64xf32>
    %cst_24 = arith.constant 1.000000e+00 : f32
    %81 = vector.broadcast %cst_24 : f32 to vector<1x64xf32>
    %82 = arith.addf %81, %80 : vector<1x64xf32>
    %83 = arith.divf %81, %82 : vector<1x64xf32>
    %84 = arith.mulf %75, %58 : vector<1x64xf32>
    %85 = arith.mulf %69, %77 : vector<1x64xf32>
    %86 = arith.addf %84, %85 : vector<1x64xf32>
    %87 = math.tanh %86 : vector<1x64xf32>
    %88 = arith.mulf %83, %87 : vector<1x64xf32>
    %c1_i32 = arith.constant 1 : i32
    %89 = arith.addi %11, %c1_i32 : i32
    %90 = vector.broadcast %89 : i32 to vector<1x64xi32>
    %91 = arith.cmpi sge, %90, %5 : vector<1x64xi32>
    %92 = vector.broadcast %89 : i32 to vector<1x64xi32>
    %93 = arith.cmpi slt, %92, %7 : vector<1x64xi32>
    %94 = arith.andi %91, %93 : vector<1x64xi1>
    %95 = arith.extui %94 : vector<1x64xi1> to vector<1x64xi32>
    %96 = arith.sitofp %95 : vector<1x64xi32> to vector<1x64xf32>
    %97 = arith.mulf %96, %88 : vector<1x64xf32>
    %cst_25 = arith.constant 1.000000e+00 : f32
    %98 = vector.broadcast %cst_25 : f32 to vector<1x64xf32>
    %99 = arith.subf %98, %96 : vector<1x64xf32>
    %100 = arith.mulf %99, %53 : vector<1x64xf32>
    %101 = arith.addf %97, %100 : vector<1x64xf32>
    %102 = arith.mulf %96, %86 : vector<1x64xf32>
    %cst_26 = arith.constant 1.000000e+00 : f32
    %103 = vector.broadcast %cst_26 : f32 to vector<1x64xf32>
    %104 = arith.subf %103, %96 : vector<1x64xf32>
    %105 = arith.mulf %104, %58 : vector<1x64xf32>
    %106 = arith.addf %102, %105 : vector<1x64xf32>
    %107 = arith.mulf %96, %88 : vector<1x64xf32>
    %108 = vector.extract_strided_slice %3 {offsets = [0, 2, 0], sizes = [1, 1, 256], strides = [1, 1, 1]} : vector<1x8x256xf32> to vector<1x1x256xf32>
    %109 = vector.shape_cast %108 : vector<1x1x256xf32> to vector<1x256xf32>
    %cst_27 = arith.constant dense<0.000000e+00> : vector<1x256xf32>
    %110 = tpu.matmul %101, %8, %cst_27 {dimension_numbers = #tpu.dot_dimension_numbers<[1], [0], [0], [1], [0, 0, 1, 1], [], []>} : vector<1x64xf32>, vector<64x256xf32>, vector<1x256xf32> -> vector<1x256xf32>
    %111 = arith.addf %109, %110 : vector<1x256xf32>
    %112 = vector.extract_strided_slice %111 {offsets = [0, 0], sizes = [1, 64], strides = [1, 1]} : vector<1x256xf32> to vector<1x64xf32>
    %113 = arith.negf %112 : vector<1x64xf32>
    %114 = math.exp %113 : vector<1x64xf32>
    %cst_28 = arith.constant 1.000000e+00 : f32
    %115 = vector.broadcast %cst_28 : f32 to vector<1x64xf32>
    %116 = arith.addf %115, %114 : vector<1x64xf32>
    %117 = arith.divf %115, %116 : vector<1x64xf32>
    %118 = vector.extract_strided_slice %111 {offsets = [0, 64], sizes = [1, 64], strides = [1, 1]} : vector<1x256xf32> to vector<1x64xf32>
    %119 = arith.negf %118 : vector<1x64xf32>
    %120 = math.exp %119 : vector<1x64xf32>
    %cst_29 = arith.constant 1.000000e+00 : f32
    %121 = vector.broadcast %cst_29 : f32 to vector<1x64xf32>
    %122 = arith.addf %121, %120 : vector<1x64xf32>
    %123 = arith.divf %121, %122 : vector<1x64xf32>
    %124 = vector.extract_strided_slice %111 {offsets = [0, 128], sizes = [1, 64], strides = [1, 1]} : vector<1x256xf32> to vector<1x64xf32>
    %125 = math.tanh %124 : vector<1x64xf32>
    %126 = vector.extract_strided_slice %111 {offsets = [0, 192], sizes = [1, 64], strides = [1, 1]} : vector<1x256xf32> to vector<1x64xf32>
    %127 = arith.negf %126 : vector<1x64xf32>
    %128 = math.exp %127 : vector<1x64xf32>
    %cst_30 = arith.constant 1.000000e+00 : f32
    %129 = vector.broadcast %cst_30 : f32 to vector<1x64xf32>
    %130 = arith.addf %129, %128 : vector<1x64xf32>
    %131 = arith.divf %129, %130 : vector<1x64xf32>
    %132 = arith.mulf %123, %106 : vector<1x64xf32>
    %133 = arith.mulf %117, %125 : vector<1x64xf32>
    %134 = arith.addf %132, %133 : vector<1x64xf32>
    %135 = math.tanh %134 : vector<1x64xf32>
    %136 = arith.mulf %131, %135 : vector<1x64xf32>
    %c2_i32 = arith.constant 2 : i32
    %137 = arith.addi %11, %c2_i32 : i32
    %138 = vector.broadcast %137 : i32 to vector<1x64xi32>
    %139 = arith.cmpi sge, %138, %5 : vector<1x64xi32>
    %140 = vector.broadcast %137 : i32 to vector<1x64xi32>
    %141 = arith.cmpi slt, %140, %7 : vector<1x64xi32>
    %142 = arith.andi %139, %141 : vector<1x64xi1>
    %143 = arith.extui %142 : vector<1x64xi1> to vector<1x64xi32>
    %144 = arith.sitofp %143 : vector<1x64xi32> to vector<1x64xf32>
    %145 = arith.mulf %144, %136 : vector<1x64xf32>
    %cst_31 = arith.constant 1.000000e+00 : f32
    %146 = vector.broadcast %cst_31 : f32 to vector<1x64xf32>
    %147 = arith.subf %146, %144 : vector<1x64xf32>
    %148 = arith.mulf %147, %101 : vector<1x64xf32>
    %149 = arith.addf %145, %148 : vector<1x64xf32>
    %150 = arith.mulf %144, %134 : vector<1x64xf32>
    %cst_32 = arith.constant 1.000000e+00 : f32
    %151 = vector.broadcast %cst_32 : f32 to vector<1x64xf32>
    %152 = arith.subf %151, %144 : vector<1x64xf32>
    %153 = arith.mulf %152, %106 : vector<1x64xf32>
    %154 = arith.addf %150, %153 : vector<1x64xf32>
    %155 = arith.mulf %144, %136 : vector<1x64xf32>
    %156 = vector.extract_strided_slice %3 {offsets = [0, 3, 0], sizes = [1, 1, 256], strides = [1, 1, 1]} : vector<1x8x256xf32> to vector<1x1x256xf32>
    %157 = vector.shape_cast %156 : vector<1x1x256xf32> to vector<1x256xf32>
    %cst_33 = arith.constant dense<0.000000e+00> : vector<1x256xf32>
    %158 = tpu.matmul %149, %8, %cst_33 {dimension_numbers = #tpu.dot_dimension_numbers<[1], [0], [0], [1], [0, 0, 1, 1], [], []>} : vector<1x64xf32>, vector<64x256xf32>, vector<1x256xf32> -> vector<1x256xf32>
    %159 = arith.addf %157, %158 : vector<1x256xf32>
    %160 = vector.extract_strided_slice %159 {offsets = [0, 0], sizes = [1, 64], strides = [1, 1]} : vector<1x256xf32> to vector<1x64xf32>
    %161 = arith.negf %160 : vector<1x64xf32>
    %162 = math.exp %161 : vector<1x64xf32>
    %cst_34 = arith.constant 1.000000e+00 : f32
    %163 = vector.broadcast %cst_34 : f32 to vector<1x64xf32>
    %164 = arith.addf %163, %162 : vector<1x64xf32>
    %165 = arith.divf %163, %164 : vector<1x64xf32>
    %166 = vector.extract_strided_slice %159 {offsets = [0, 64], sizes = [1, 64], strides = [1, 1]} : vector<1x256xf32> to vector<1x64xf32>
    %167 = arith.negf %166 : vector<1x64xf32>
    %168 = math.exp %167 : vector<1x64xf32>
    %cst_35 = arith.constant 1.000000e+00 : f32
    %169 = vector.broadcast %cst_35 : f32 to vector<1x64xf32>
    %170 = arith.addf %169, %168 : vector<1x64xf32>
    %171 = arith.divf %169, %170 : vector<1x64xf32>
    %172 = vector.extract_strided_slice %159 {offsets = [0, 128], sizes = [1, 64], strides = [1, 1]} : vector<1x256xf32> to vector<1x64xf32>
    %173 = math.tanh %172 : vector<1x64xf32>
    %174 = vector.extract_strided_slice %159 {offsets = [0, 192], sizes = [1, 64], strides = [1, 1]} : vector<1x256xf32> to vector<1x64xf32>
    %175 = arith.negf %174 : vector<1x64xf32>
    %176 = math.exp %175 : vector<1x64xf32>
    %cst_36 = arith.constant 1.000000e+00 : f32
    %177 = vector.broadcast %cst_36 : f32 to vector<1x64xf32>
    %178 = arith.addf %177, %176 : vector<1x64xf32>
    %179 = arith.divf %177, %178 : vector<1x64xf32>
    %180 = arith.mulf %171, %154 : vector<1x64xf32>
    %181 = arith.mulf %165, %173 : vector<1x64xf32>
    %182 = arith.addf %180, %181 : vector<1x64xf32>
    %183 = math.tanh %182 : vector<1x64xf32>
    %184 = arith.mulf %179, %183 : vector<1x64xf32>
    %c3_i32 = arith.constant 3 : i32
    %185 = arith.addi %11, %c3_i32 : i32
    %186 = vector.broadcast %185 : i32 to vector<1x64xi32>
    %187 = arith.cmpi sge, %186, %5 : vector<1x64xi32>
    %188 = vector.broadcast %185 : i32 to vector<1x64xi32>
    %189 = arith.cmpi slt, %188, %7 : vector<1x64xi32>
    %190 = arith.andi %187, %189 : vector<1x64xi1>
    %191 = arith.extui %190 : vector<1x64xi1> to vector<1x64xi32>
    %192 = arith.sitofp %191 : vector<1x64xi32> to vector<1x64xf32>
    %193 = arith.mulf %192, %184 : vector<1x64xf32>
    %cst_37 = arith.constant 1.000000e+00 : f32
    %194 = vector.broadcast %cst_37 : f32 to vector<1x64xf32>
    %195 = arith.subf %194, %192 : vector<1x64xf32>
    %196 = arith.mulf %195, %149 : vector<1x64xf32>
    %197 = arith.addf %193, %196 : vector<1x64xf32>
    %198 = arith.mulf %192, %182 : vector<1x64xf32>
    %cst_38 = arith.constant 1.000000e+00 : f32
    %199 = vector.broadcast %cst_38 : f32 to vector<1x64xf32>
    %200 = arith.subf %199, %192 : vector<1x64xf32>
    %201 = arith.mulf %200, %154 : vector<1x64xf32>
    %202 = arith.addf %198, %201 : vector<1x64xf32>
    %203 = arith.mulf %192, %184 : vector<1x64xf32>
    %204 = vector.extract_strided_slice %3 {offsets = [0, 4, 0], sizes = [1, 1, 256], strides = [1, 1, 1]} : vector<1x8x256xf32> to vector<1x1x256xf32>
    %205 = vector.shape_cast %204 : vector<1x1x256xf32> to vector<1x256xf32>
    %cst_39 = arith.constant dense<0.000000e+00> : vector<1x256xf32>
    %206 = tpu.matmul %197, %8, %cst_39 {dimension_numbers = #tpu.dot_dimension_numbers<[1], [0], [0], [1], [0, 0, 1, 1], [], []>} : vector<1x64xf32>, vector<64x256xf32>, vector<1x256xf32> -> vector<1x256xf32>
    %207 = arith.addf %205, %206 : vector<1x256xf32>
    %208 = vector.extract_strided_slice %207 {offsets = [0, 0], sizes = [1, 64], strides = [1, 1]} : vector<1x256xf32> to vector<1x64xf32>
    %209 = arith.negf %208 : vector<1x64xf32>
    %210 = math.exp %209 : vector<1x64xf32>
    %cst_40 = arith.constant 1.000000e+00 : f32
    %211 = vector.broadcast %cst_40 : f32 to vector<1x64xf32>
    %212 = arith.addf %211, %210 : vector<1x64xf32>
    %213 = arith.divf %211, %212 : vector<1x64xf32>
    %214 = vector.extract_strided_slice %207 {offsets = [0, 64], sizes = [1, 64], strides = [1, 1]} : vector<1x256xf32> to vector<1x64xf32>
    %215 = arith.negf %214 : vector<1x64xf32>
    %216 = math.exp %215 : vector<1x64xf32>
    %cst_41 = arith.constant 1.000000e+00 : f32
    %217 = vector.broadcast %cst_41 : f32 to vector<1x64xf32>
    %218 = arith.addf %217, %216 : vector<1x64xf32>
    %219 = arith.divf %217, %218 : vector<1x64xf32>
    %220 = vector.extract_strided_slice %207 {offsets = [0, 128], sizes = [1, 64], strides = [1, 1]} : vector<1x256xf32> to vector<1x64xf32>
    %221 = math.tanh %220 : vector<1x64xf32>
    %222 = vector.extract_strided_slice %207 {offsets = [0, 192], sizes = [1, 64], strides = [1, 1]} : vector<1x256xf32> to vector<1x64xf32>
    %223 = arith.negf %222 : vector<1x64xf32>
    %224 = math.exp %223 : vector<1x64xf32>
    %cst_42 = arith.constant 1.000000e+00 : f32
    %225 = vector.broadcast %cst_42 : f32 to vector<1x64xf32>
    %226 = arith.addf %225, %224 : vector<1x64xf32>
    %227 = arith.divf %225, %226 : vector<1x64xf32>
    %228 = arith.mulf %219, %202 : vector<1x64xf32>
    %229 = arith.mulf %213, %221 : vector<1x64xf32>
    %230 = arith.addf %228, %229 : vector<1x64xf32>
    %231 = math.tanh %230 : vector<1x64xf32>
    %232 = arith.mulf %227, %231 : vector<1x64xf32>
    %c4_i32 = arith.constant 4 : i32
    %233 = arith.addi %11, %c4_i32 : i32
    %234 = vector.broadcast %233 : i32 to vector<1x64xi32>
    %235 = arith.cmpi sge, %234, %5 : vector<1x64xi32>
    %236 = vector.broadcast %233 : i32 to vector<1x64xi32>
    %237 = arith.cmpi slt, %236, %7 : vector<1x64xi32>
    %238 = arith.andi %235, %237 : vector<1x64xi1>
    %239 = arith.extui %238 : vector<1x64xi1> to vector<1x64xi32>
    %240 = arith.sitofp %239 : vector<1x64xi32> to vector<1x64xf32>
    %241 = arith.mulf %240, %232 : vector<1x64xf32>
    %cst_43 = arith.constant 1.000000e+00 : f32
    %242 = vector.broadcast %cst_43 : f32 to vector<1x64xf32>
    %243 = arith.subf %242, %240 : vector<1x64xf32>
    %244 = arith.mulf %243, %197 : vector<1x64xf32>
    %245 = arith.addf %241, %244 : vector<1x64xf32>
    %246 = arith.mulf %240, %230 : vector<1x64xf32>
    %cst_44 = arith.constant 1.000000e+00 : f32
    %247 = vector.broadcast %cst_44 : f32 to vector<1x64xf32>
    %248 = arith.subf %247, %240 : vector<1x64xf32>
    %249 = arith.mulf %248, %202 : vector<1x64xf32>
    %250 = arith.addf %246, %249 : vector<1x64xf32>
    %251 = arith.mulf %240, %232 : vector<1x64xf32>
    %252 = vector.extract_strided_slice %3 {offsets = [0, 5, 0], sizes = [1, 1, 256], strides = [1, 1, 1]} : vector<1x8x256xf32> to vector<1x1x256xf32>
    %253 = vector.shape_cast %252 : vector<1x1x256xf32> to vector<1x256xf32>
    %cst_45 = arith.constant dense<0.000000e+00> : vector<1x256xf32>
    %254 = tpu.matmul %245, %8, %cst_45 {dimension_numbers = #tpu.dot_dimension_numbers<[1], [0], [0], [1], [0, 0, 1, 1], [], []>} : vector<1x64xf32>, vector<64x256xf32>, vector<1x256xf32> -> vector<1x256xf32>
    %255 = arith.addf %253, %254 : vector<1x256xf32>
    %256 = vector.extract_strided_slice %255 {offsets = [0, 0], sizes = [1, 64], strides = [1, 1]} : vector<1x256xf32> to vector<1x64xf32>
    %257 = arith.negf %256 : vector<1x64xf32>
    %258 = math.exp %257 : vector<1x64xf32>
    %cst_46 = arith.constant 1.000000e+00 : f32
    %259 = vector.broadcast %cst_46 : f32 to vector<1x64xf32>
    %260 = arith.addf %259, %258 : vector<1x64xf32>
    %261 = arith.divf %259, %260 : vector<1x64xf32>
    %262 = vector.extract_strided_slice %255 {offsets = [0, 64], sizes = [1, 64], strides = [1, 1]} : vector<1x256xf32> to vector<1x64xf32>
    %263 = arith.negf %262 : vector<1x64xf32>
    %264 = math.exp %263 : vector<1x64xf32>
    %cst_47 = arith.constant 1.000000e+00 : f32
    %265 = vector.broadcast %cst_47 : f32 to vector<1x64xf32>
    %266 = arith.addf %265, %264 : vector<1x64xf32>
    %267 = arith.divf %265, %266 : vector<1x64xf32>
    %268 = vector.extract_strided_slice %255 {offsets = [0, 128], sizes = [1, 64], strides = [1, 1]} : vector<1x256xf32> to vector<1x64xf32>
    %269 = math.tanh %268 : vector<1x64xf32>
    %270 = vector.extract_strided_slice %255 {offsets = [0, 192], sizes = [1, 64], strides = [1, 1]} : vector<1x256xf32> to vector<1x64xf32>
    %271 = arith.negf %270 : vector<1x64xf32>
    %272 = math.exp %271 : vector<1x64xf32>
    %cst_48 = arith.constant 1.000000e+00 : f32
    %273 = vector.broadcast %cst_48 : f32 to vector<1x64xf32>
    %274 = arith.addf %273, %272 : vector<1x64xf32>
    %275 = arith.divf %273, %274 : vector<1x64xf32>
    %276 = arith.mulf %267, %250 : vector<1x64xf32>
    %277 = arith.mulf %261, %269 : vector<1x64xf32>
    %278 = arith.addf %276, %277 : vector<1x64xf32>
    %279 = math.tanh %278 : vector<1x64xf32>
    %280 = arith.mulf %275, %279 : vector<1x64xf32>
    %c5_i32 = arith.constant 5 : i32
    %281 = arith.addi %11, %c5_i32 : i32
    %282 = vector.broadcast %281 : i32 to vector<1x64xi32>
    %283 = arith.cmpi sge, %282, %5 : vector<1x64xi32>
    %284 = vector.broadcast %281 : i32 to vector<1x64xi32>
    %285 = arith.cmpi slt, %284, %7 : vector<1x64xi32>
    %286 = arith.andi %283, %285 : vector<1x64xi1>
    %287 = arith.extui %286 : vector<1x64xi1> to vector<1x64xi32>
    %288 = arith.sitofp %287 : vector<1x64xi32> to vector<1x64xf32>
    %289 = arith.mulf %288, %280 : vector<1x64xf32>
    %cst_49 = arith.constant 1.000000e+00 : f32
    %290 = vector.broadcast %cst_49 : f32 to vector<1x64xf32>
    %291 = arith.subf %290, %288 : vector<1x64xf32>
    %292 = arith.mulf %291, %245 : vector<1x64xf32>
    %293 = arith.addf %289, %292 : vector<1x64xf32>
    %294 = arith.mulf %288, %278 : vector<1x64xf32>
    %cst_50 = arith.constant 1.000000e+00 : f32
    %295 = vector.broadcast %cst_50 : f32 to vector<1x64xf32>
    %296 = arith.subf %295, %288 : vector<1x64xf32>
    %297 = arith.mulf %296, %250 : vector<1x64xf32>
    %298 = arith.addf %294, %297 : vector<1x64xf32>
    %299 = arith.mulf %288, %280 : vector<1x64xf32>
    %300 = vector.extract_strided_slice %3 {offsets = [0, 6, 0], sizes = [1, 1, 256], strides = [1, 1, 1]} : vector<1x8x256xf32> to vector<1x1x256xf32>
    %301 = vector.shape_cast %300 : vector<1x1x256xf32> to vector<1x256xf32>
    %cst_51 = arith.constant dense<0.000000e+00> : vector<1x256xf32>
    %302 = tpu.matmul %293, %8, %cst_51 {dimension_numbers = #tpu.dot_dimension_numbers<[1], [0], [0], [1], [0, 0, 1, 1], [], []>} : vector<1x64xf32>, vector<64x256xf32>, vector<1x256xf32> -> vector<1x256xf32>
    %303 = arith.addf %301, %302 : vector<1x256xf32>
    %304 = vector.extract_strided_slice %303 {offsets = [0, 0], sizes = [1, 64], strides = [1, 1]} : vector<1x256xf32> to vector<1x64xf32>
    %305 = arith.negf %304 : vector<1x64xf32>
    %306 = math.exp %305 : vector<1x64xf32>
    %cst_52 = arith.constant 1.000000e+00 : f32
    %307 = vector.broadcast %cst_52 : f32 to vector<1x64xf32>
    %308 = arith.addf %307, %306 : vector<1x64xf32>
    %309 = arith.divf %307, %308 : vector<1x64xf32>
    %310 = vector.extract_strided_slice %303 {offsets = [0, 64], sizes = [1, 64], strides = [1, 1]} : vector<1x256xf32> to vector<1x64xf32>
    %311 = arith.negf %310 : vector<1x64xf32>
    %312 = math.exp %311 : vector<1x64xf32>
    %cst_53 = arith.constant 1.000000e+00 : f32
    %313 = vector.broadcast %cst_53 : f32 to vector<1x64xf32>
    %314 = arith.addf %313, %312 : vector<1x64xf32>
    %315 = arith.divf %313, %314 : vector<1x64xf32>
    %316 = vector.extract_strided_slice %303 {offsets = [0, 128], sizes = [1, 64], strides = [1, 1]} : vector<1x256xf32> to vector<1x64xf32>
    %317 = math.tanh %316 : vector<1x64xf32>
    %318 = vector.extract_strided_slice %303 {offsets = [0, 192], sizes = [1, 64], strides = [1, 1]} : vector<1x256xf32> to vector<1x64xf32>
    %319 = arith.negf %318 : vector<1x64xf32>
    %320 = math.exp %319 : vector<1x64xf32>
    %cst_54 = arith.constant 1.000000e+00 : f32
    %321 = vector.broadcast %cst_54 : f32 to vector<1x64xf32>
    %322 = arith.addf %321, %320 : vector<1x64xf32>
    %323 = arith.divf %321, %322 : vector<1x64xf32>
    %324 = arith.mulf %315, %298 : vector<1x64xf32>
    %325 = arith.mulf %309, %317 : vector<1x64xf32>
    %326 = arith.addf %324, %325 : vector<1x64xf32>
    %327 = math.tanh %326 : vector<1x64xf32>
    %328 = arith.mulf %323, %327 : vector<1x64xf32>
    %c6_i32 = arith.constant 6 : i32
    %329 = arith.addi %11, %c6_i32 : i32
    %330 = vector.broadcast %329 : i32 to vector<1x64xi32>
    %331 = arith.cmpi sge, %330, %5 : vector<1x64xi32>
    %332 = vector.broadcast %329 : i32 to vector<1x64xi32>
    %333 = arith.cmpi slt, %332, %7 : vector<1x64xi32>
    %334 = arith.andi %331, %333 : vector<1x64xi1>
    %335 = arith.extui %334 : vector<1x64xi1> to vector<1x64xi32>
    %336 = arith.sitofp %335 : vector<1x64xi32> to vector<1x64xf32>
    %337 = arith.mulf %336, %328 : vector<1x64xf32>
    %cst_55 = arith.constant 1.000000e+00 : f32
    %338 = vector.broadcast %cst_55 : f32 to vector<1x64xf32>
    %339 = arith.subf %338, %336 : vector<1x64xf32>
    %340 = arith.mulf %339, %293 : vector<1x64xf32>
    %341 = arith.addf %337, %340 : vector<1x64xf32>
    %342 = arith.mulf %336, %326 : vector<1x64xf32>
    %cst_56 = arith.constant 1.000000e+00 : f32
    %343 = vector.broadcast %cst_56 : f32 to vector<1x64xf32>
    %344 = arith.subf %343, %336 : vector<1x64xf32>
    %345 = arith.mulf %344, %298 : vector<1x64xf32>
    %346 = arith.addf %342, %345 : vector<1x64xf32>
    %347 = arith.mulf %336, %328 : vector<1x64xf32>
    %348 = vector.extract_strided_slice %3 {offsets = [0, 7, 0], sizes = [1, 1, 256], strides = [1, 1, 1]} : vector<1x8x256xf32> to vector<1x1x256xf32>
    %349 = vector.shape_cast %348 : vector<1x1x256xf32> to vector<1x256xf32>
    %cst_57 = arith.constant dense<0.000000e+00> : vector<1x256xf32>
    %350 = tpu.matmul %341, %8, %cst_57 {dimension_numbers = #tpu.dot_dimension_numbers<[1], [0], [0], [1], [0, 0, 1, 1], [], []>} : vector<1x64xf32>, vector<64x256xf32>, vector<1x256xf32> -> vector<1x256xf32>
    %351 = arith.addf %349, %350 : vector<1x256xf32>
    %352 = vector.extract_strided_slice %351 {offsets = [0, 0], sizes = [1, 64], strides = [1, 1]} : vector<1x256xf32> to vector<1x64xf32>
    %353 = arith.negf %352 : vector<1x64xf32>
    %354 = math.exp %353 : vector<1x64xf32>
    %cst_58 = arith.constant 1.000000e+00 : f32
    %355 = vector.broadcast %cst_58 : f32 to vector<1x64xf32>
    %356 = arith.addf %355, %354 : vector<1x64xf32>
    %357 = arith.divf %355, %356 : vector<1x64xf32>
    %358 = vector.extract_strided_slice %351 {offsets = [0, 64], sizes = [1, 64], strides = [1, 1]} : vector<1x256xf32> to vector<1x64xf32>
    %359 = arith.negf %358 : vector<1x64xf32>
    %360 = math.exp %359 : vector<1x64xf32>
    %cst_59 = arith.constant 1.000000e+00 : f32
    %361 = vector.broadcast %cst_59 : f32 to vector<1x64xf32>
    %362 = arith.addf %361, %360 : vector<1x64xf32>
    %363 = arith.divf %361, %362 : vector<1x64xf32>
    %364 = vector.extract_strided_slice %351 {offsets = [0, 128], sizes = [1, 64], strides = [1, 1]} : vector<1x256xf32> to vector<1x64xf32>
    %365 = math.tanh %364 : vector<1x64xf32>
    %366 = vector.extract_strided_slice %351 {offsets = [0, 192], sizes = [1, 64], strides = [1, 1]} : vector<1x256xf32> to vector<1x64xf32>
    %367 = arith.negf %366 : vector<1x64xf32>
    %368 = math.exp %367 : vector<1x64xf32>
    %cst_60 = arith.constant 1.000000e+00 : f32
    %369 = vector.broadcast %cst_60 : f32 to vector<1x64xf32>
    %370 = arith.addf %369, %368 : vector<1x64xf32>
    %371 = arith.divf %369, %370 : vector<1x64xf32>
    %372 = arith.mulf %363, %346 : vector<1x64xf32>
    %373 = arith.mulf %357, %365 : vector<1x64xf32>
    %374 = arith.addf %372, %373 : vector<1x64xf32>
    %375 = math.tanh %374 : vector<1x64xf32>
    %376 = arith.mulf %371, %375 : vector<1x64xf32>
    %c7_i32 = arith.constant 7 : i32
    %377 = arith.addi %11, %c7_i32 : i32
    %378 = vector.broadcast %377 : i32 to vector<1x64xi32>
    %379 = arith.cmpi sge, %378, %5 : vector<1x64xi32>
    %380 = vector.broadcast %377 : i32 to vector<1x64xi32>
    %381 = arith.cmpi slt, %380, %7 : vector<1x64xi32>
    %382 = arith.andi %379, %381 : vector<1x64xi1>
    %383 = arith.extui %382 : vector<1x64xi1> to vector<1x64xi32>
    %384 = arith.sitofp %383 : vector<1x64xi32> to vector<1x64xf32>
    %385 = arith.mulf %384, %376 : vector<1x64xf32>
    %cst_61 = arith.constant 1.000000e+00 : f32
    %386 = vector.broadcast %cst_61 : f32 to vector<1x64xf32>
    %387 = arith.subf %386, %384 : vector<1x64xf32>
    %388 = arith.mulf %387, %341 : vector<1x64xf32>
    %389 = arith.addf %385, %388 : vector<1x64xf32>
    %390 = arith.mulf %384, %374 : vector<1x64xf32>
    %cst_62 = arith.constant 1.000000e+00 : f32
    %391 = vector.broadcast %cst_62 : f32 to vector<1x64xf32>
    %392 = arith.subf %391, %384 : vector<1x64xf32>
    %393 = arith.mulf %392, %346 : vector<1x64xf32>
    %394 = arith.addf %390, %393 : vector<1x64xf32>
    %395 = arith.mulf %384, %376 : vector<1x64xf32>
    %396 = vector.shape_cast %59 : vector<1x64xf32> to vector<1x1x64xf32>
    %397 = vector.shape_cast %107 : vector<1x64xf32> to vector<1x1x64xf32>
    %398 = vector.shape_cast %155 : vector<1x64xf32> to vector<1x1x64xf32>
    %399 = vector.shape_cast %203 : vector<1x64xf32> to vector<1x1x64xf32>
    %400 = vector.shape_cast %251 : vector<1x64xf32> to vector<1x1x64xf32>
    %401 = vector.shape_cast %299 : vector<1x64xf32> to vector<1x1x64xf32>
    %402 = vector.shape_cast %347 : vector<1x64xf32> to vector<1x1x64xf32>
    %403 = vector.shape_cast %395 : vector<1x64xf32> to vector<1x1x64xf32>
    %404 = tpu.concatenate %396, %397, %398, %399, %400, %401, %402, %403 in 1 : vector<1x1x64xf32>, vector<1x1x64xf32>, vector<1x1x64xf32>, vector<1x1x64xf32>, vector<1x1x64xf32>, vector<1x1x64xf32>, vector<1x1x64xf32>, vector<1x1x64xf32> -> vector<1x8x64xf32>
    %c0_63 = arith.constant 0 : index
    %c0_64 = arith.constant 0 : index
    %c0_65 = arith.constant 0 : index
    %405 = vector.load %arg6[%c0_63, %c0_64, %c0_65] : memref<1x8x64xf32, #tpu.memory_space<vmem>>, vector<1x8x64xf32>
    tpu.vector_store %arg6[%c0_63, %c0_64, %c0_65], %404 {strides = array<i32>} : memref<1x8x64xf32, #tpu.memory_space<vmem>>, vector<1x8x64xf32>,
    %c0_66 = arith.constant 0 : index
    %c0_67 = arith.constant 0 : index
    %406 = vector.load %arg7[%c0_66, %c0_67] : memref<1x64xf32, #tpu.memory_space<vmem>>, vector<1x64xf32>
    tpu.vector_store %arg7[%c0_66, %c0_67], %389 {strides = array<i32>} : memref<1x64xf32, #tpu.memory_space<vmem>>, vector<1x64xf32>,
    %c0_68 = arith.constant 0 : index
    %c0_69 = arith.constant 0 : index
    %407 = vector.load %arg8[%c0_68, %c0_69] : memref<1x64xf32, #tpu.memory_space<vmem>>, vector<1x64xf32>
    tpu.vector_store %arg8[%c0_68, %c0_69], %394 {strides = array<i32>} : memref<1x64xf32, #tpu.memory_space<vmem>>, vector<1x64xf32>,
    return
  }
  func.func @transform_0(%arg0: i32, %arg1: i32) -> (i32, i32, i32) {
    %c0_i32 = arith.constant 0 : i32
    %c0_i32_0 = arith.constant 0 : i32
    return %arg0, %arg1, %c0_i32 : i32, i32, i32
  }
  func.func @transform_1(%arg0: i32, %arg1: i32) -> (i32, i32, i32) {
    %c0_i32 = arith.constant 0 : i32
    %c0_i32_0 = arith.constant 0 : i32
    %c0_i32_1 = arith.constant 0 : i32
    return %arg0, %c0_i32, %c0_i32_0 : i32, i32, i32
  }
  func.func @transform_2(%arg0: i32, %arg1: i32) -> (i32, i32, i32) {
    %c0_i32 = arith.constant 0 : i32
    %c0_i32_0 = arith.constant 0 : i32
    %c0_i32_1 = arith.constant 0 : i32
    return %arg0, %c0_i32, %c0_i32_0 : i32, i32, i32
  }
  func.func @transform_3(%arg0: i32, %arg1: i32) -> (i32, i32) {
    %c0_i32 = arith.constant 0 : i32
    %c0_i32_0 = arith.constant 0 : i32
    %c0_i32_1 = arith.constant 0 : i32
    return %c0_i32, %c0_i32_0 : i32, i32
  }
  func.func @transform_4(%arg0: i32, %arg1: i32) -> (i32, i32, i32) {
    %c0_i32 = arith.constant 0 : i32
    %c0_i32_0 = arith.constant 0 : i32
    return %arg0, %arg1, %c0_i32 : i32, i32, i32
  }
}

module attributes {stable_mosaic.version = 11 : i64} {
  func.func @_affine_matmul_kernel(%arg0: i32, %arg1: memref<16x64xf32, #tpu.memory_space<vmem>>, %arg2: memref<64x256xf32, #tpu.memory_space<vmem>>, %arg3: memref<1x256xf32, #tpu.memory_space<vmem>>, %arg4: memref<1x256xf32, #tpu.memory_space<vmem>>, %arg5: memref<16x256xf32, #tpu.memory_space<vmem>>) attributes {dimension_semantics = [#tpu.dimension_semantics<parallel>], iteration_bounds = array<i64: 1>, scalar_prefetch = 0 : i64, scratch_operands = 0 : i64, tpu.core_type = #tpu.core_type<tc>, window_params = [{pipeline_mode = #tpu.pipeline_mode<synchronous>, transform_indices = @transform_0, window_bounds = array<i64: 16, 64>}, {transform_indices = @transform_1, window_bounds = array<i64: 64, 256>}, {transform_indices = @transform_2, window_bounds = array<i64: 1, 256>}, {transform_indices = @transform_3, window_bounds = array<i64: 1, 256>}, {transform_indices = @transform_4, window_bounds = array<i64: 16, 256>}]} {
    %c0 = arith.constant 0 : index
    %c0_0 = arith.constant 0 : index
    %0 = vector.load %arg1[%c0, %c0_0] : memref<16x64xf32, #tpu.memory_space<vmem>>, vector<16x64xf32>
    %c0_1 = arith.constant 0 : index
    %c0_2 = arith.constant 0 : index
    %1 = vector.load %arg2[%c0_1, %c0_2] : memref<64x256xf32, #tpu.memory_space<vmem>>, vector<64x256xf32>
    %cst = arith.constant dense<0.000000e+00> : vector<16x256xf32>
    %2 = tpu.matmul %0, %1, %cst {dimension_numbers = #tpu.dot_dimension_numbers<[1], [0], [0], [1], [0, 0, 1, 1], [], []>} : vector<16x64xf32>, vector<64x256xf32>, vector<16x256xf32> -> vector<16x256xf32>
    %c0_3 = arith.constant 0 : index
    %c0_4 = arith.constant 0 : index
    %3 = vector.load %arg3[%c0_3, %c0_4] : memref<1x256xf32, #tpu.memory_space<vmem>>, vector<1x256xf32>
    %4 = vector.broadcast %3 : vector<1x256xf32> to vector<16x256xf32>
    %5 = arith.mulf %2, %4 : vector<16x256xf32>
    %c0_5 = arith.constant 0 : index
    %c0_6 = arith.constant 0 : index
    %6 = vector.load %arg4[%c0_5, %c0_6] : memref<1x256xf32, #tpu.memory_space<vmem>>, vector<1x256xf32>
    %7 = vector.broadcast %6 : vector<1x256xf32> to vector<16x256xf32>
    %8 = arith.addf %5, %7 : vector<16x256xf32>
    %c0_7 = arith.constant 0 : index
    %c0_8 = arith.constant 0 : index
    %9 = vector.load %arg5[%c0_7, %c0_8] : memref<16x256xf32, #tpu.memory_space<vmem>>, vector<16x256xf32>
    tpu.vector_store %arg5[%c0_7, %c0_8], %8 {strides = array<i32>} : memref<16x256xf32, #tpu.memory_space<vmem>>, vector<16x256xf32>,
    return
  }
  func.func @transform_0(%arg0: i32) -> (i32, i32) {
    %c0_i32 = arith.constant 0 : i32
    %c0_i32_0 = arith.constant 0 : i32
    %c0_i32_1 = arith.constant 0 : i32
    return %c0_i32, %c0_i32_0 : i32, i32
  }
  func.func @transform_1(%arg0: i32) -> (i32, i32) {
    %c0_i32 = arith.constant 0 : i32
    %c0_i32_0 = arith.constant 0 : i32
    return %c0_i32, %arg0 : i32, i32
  }
  func.func @transform_2(%arg0: i32) -> (i32, i32) {
    %c0_i32 = arith.constant 0 : i32
    %c0_i32_0 = arith.constant 0 : i32
    return %c0_i32, %arg0 : i32, i32
  }
  func.func @transform_3(%arg0: i32) -> (i32, i32) {
    %c0_i32 = arith.constant 0 : i32
    %c0_i32_0 = arith.constant 0 : i32
    return %c0_i32, %arg0 : i32, i32
  }
  func.func @transform_4(%arg0: i32) -> (i32, i32) {
    %c0_i32 = arith.constant 0 : i32
    %c0_i32_0 = arith.constant 0 : i32
    return %c0_i32, %arg0 : i32, i32
  }
}

module attributes {stable_mosaic.version = 11 : i64} {
  func.func @_affine_matmul_kernel(%arg0: i32, %arg1: memref<2x4096xf32, #tpu.memory_space<vmem>>, %arg2: memref<4096x512xbf16, #tpu.memory_space<vmem>>, %arg3: memref<1x512xf32, #tpu.memory_space<vmem>>, %arg4: memref<1x512xf32, #tpu.memory_space<vmem>>, %arg5: memref<2x512xf32, #tpu.memory_space<vmem>>) attributes {dimension_semantics = [#tpu.dimension_semantics<parallel>], iteration_bounds = array<i64: 4>, scalar_prefetch = 0 : i64, scratch_operands = 0 : i64, tpu.core_type = #tpu.core_type<tc>, window_params = [{pipeline_mode = #tpu.pipeline_mode<synchronous>, transform_indices = @transform_0, window_bounds = array<i64: 2, 4096>}, {transform_indices = @transform_1, window_bounds = array<i64: 4096, 512>}, {transform_indices = @transform_2, window_bounds = array<i64: 1, 512>}, {transform_indices = @transform_3, window_bounds = array<i64: 1, 512>}, {transform_indices = @transform_4, window_bounds = array<i64: 2, 512>}]} {
    %c0 = arith.constant 0 : index
    %c0_0 = arith.constant 0 : index
    %0 = vector.load %arg1[%c0, %c0_0] : memref<2x4096xf32, #tpu.memory_space<vmem>>, vector<2x4096xf32>
    %1 = arith.truncf %0 : vector<2x4096xf32> to vector<2x4096xbf16>
    %c0_1 = arith.constant 0 : index
    %c0_2 = arith.constant 0 : index
    %2 = vector.load %arg2[%c0_1, %c0_2] : memref<4096x512xbf16, #tpu.memory_space<vmem>>, vector<4096x512xbf16>
    %cst = arith.constant dense<0.000000e+00> : vector<2x512xf32>
    %3 = tpu.matmul %1, %2, %cst {dimension_numbers = #tpu.dot_dimension_numbers<[1], [0], [0], [1], [0, 0, 1, 1], [], []>} : vector<2x4096xbf16>, vector<4096x512xbf16>, vector<2x512xf32> -> vector<2x512xf32>
    %c0_3 = arith.constant 0 : index
    %c0_4 = arith.constant 0 : index
    %4 = vector.load %arg3[%c0_3, %c0_4] : memref<1x512xf32, #tpu.memory_space<vmem>>, vector<1x512xf32>
    %5 = vector.broadcast %4 : vector<1x512xf32> to vector<2x512xf32>
    %6 = arith.mulf %3, %5 : vector<2x512xf32>
    %c0_5 = arith.constant 0 : index
    %c0_6 = arith.constant 0 : index
    %7 = vector.load %arg4[%c0_5, %c0_6] : memref<1x512xf32, #tpu.memory_space<vmem>>, vector<1x512xf32>
    %8 = vector.broadcast %7 : vector<1x512xf32> to vector<2x512xf32>
    %9 = arith.addf %6, %8 : vector<2x512xf32>
    %cst_7 = arith.constant 0.000000e+00 : f32
    %10 = vector.broadcast %cst_7 : f32 to vector<2x512xf32>
    %11 = arith.maximumf %9, %10 : vector<2x512xf32>
    %c0_8 = arith.constant 0 : index
    %c0_9 = arith.constant 0 : index
    %12 = vector.load %arg5[%c0_8, %c0_9] : memref<2x512xf32, #tpu.memory_space<vmem>>, vector<2x512xf32>
    tpu.vector_store %arg5[%c0_8, %c0_9], %11 {strides = array<i32>} : memref<2x512xf32, #tpu.memory_space<vmem>>, vector<2x512xf32>,
    return
  }
  func.func @transform_0(%arg0: i32) -> (i32, i32) {
    %c0_i32 = arith.constant 0 : i32
    %c0_i32_0 = arith.constant 0 : i32
    %c0_i32_1 = arith.constant 0 : i32
    return %c0_i32, %c0_i32_0 : i32, i32
  }
  func.func @transform_1(%arg0: i32) -> (i32, i32) {
    %c0_i32 = arith.constant 0 : i32
    %c0_i32_0 = arith.constant 0 : i32
    return %c0_i32, %arg0 : i32, i32
  }
  func.func @transform_2(%arg0: i32) -> (i32, i32) {
    %c0_i32 = arith.constant 0 : i32
    %c0_i32_0 = arith.constant 0 : i32
    return %c0_i32, %arg0 : i32, i32
  }
  func.func @transform_3(%arg0: i32) -> (i32, i32) {
    %c0_i32 = arith.constant 0 : i32
    %c0_i32_0 = arith.constant 0 : i32
    return %c0_i32, %arg0 : i32, i32
  }
  func.func @transform_4(%arg0: i32) -> (i32, i32) {
    %c0_i32 = arith.constant 0 : i32
    %c0_i32_0 = arith.constant 0 : i32
    return %c0_i32, %arg0 : i32, i32
  }
}

module attributes {stable_mosaic.version = 11 : i64} {
  func.func @_affine_matmul_kernel(%arg0: i32, %arg1: memref<2x128xf32, #tpu.memory_space<vmem>>, %arg2: memref<128x512xbf16, #tpu.memory_space<vmem>>, %arg3: memref<1x512xf32, #tpu.memory_space<vmem>>, %arg4: memref<1x512xf32, #tpu.memory_space<vmem>>, %arg5: memref<2x512xf32, #tpu.memory_space<vmem>>) attributes {dimension_semantics = [#tpu.dimension_semantics<parallel>], iteration_bounds = array<i64: 8>, scalar_prefetch = 0 : i64, scratch_operands = 0 : i64, tpu.core_type = #tpu.core_type<tc>, window_params = [{pipeline_mode = #tpu.pipeline_mode<synchronous>, transform_indices = @transform_0, window_bounds = array<i64: 2, 128>}, {transform_indices = @transform_1, window_bounds = array<i64: 128, 512>}, {transform_indices = @transform_2, window_bounds = array<i64: 1, 512>}, {transform_indices = @transform_3, window_bounds = array<i64: 1, 512>}, {transform_indices = @transform_4, window_bounds = array<i64: 2, 512>}]} {
    %c0 = arith.constant 0 : index
    %c0_0 = arith.constant 0 : index
    %0 = vector.load %arg1[%c0, %c0_0] : memref<2x128xf32, #tpu.memory_space<vmem>>, vector<2x128xf32>
    %1 = arith.truncf %0 : vector<2x128xf32> to vector<2x128xbf16>
    %c0_1 = arith.constant 0 : index
    %c0_2 = arith.constant 0 : index
    %2 = vector.load %arg2[%c0_1, %c0_2] : memref<128x512xbf16, #tpu.memory_space<vmem>>, vector<128x512xbf16>
    %cst = arith.constant dense<0.000000e+00> : vector<2x512xf32>
    %3 = tpu.matmul %1, %2, %cst {dimension_numbers = #tpu.dot_dimension_numbers<[1], [0], [0], [1], [0, 0, 1, 1], [], []>} : vector<2x128xbf16>, vector<128x512xbf16>, vector<2x512xf32> -> vector<2x512xf32>
    %c0_3 = arith.constant 0 : index
    %c0_4 = arith.constant 0 : index
    %4 = vector.load %arg3[%c0_3, %c0_4] : memref<1x512xf32, #tpu.memory_space<vmem>>, vector<1x512xf32>
    %5 = vector.broadcast %4 : vector<1x512xf32> to vector<2x512xf32>
    %6 = arith.mulf %3, %5 : vector<2x512xf32>
    %c0_5 = arith.constant 0 : index
    %c0_6 = arith.constant 0 : index
    %7 = vector.load %arg4[%c0_5, %c0_6] : memref<1x512xf32, #tpu.memory_space<vmem>>, vector<1x512xf32>
    %8 = vector.broadcast %7 : vector<1x512xf32> to vector<2x512xf32>
    %9 = arith.addf %6, %8 : vector<2x512xf32>
    %cst_7 = arith.constant 0.000000e+00 : f32
    %10 = vector.broadcast %cst_7 : f32 to vector<2x512xf32>
    %11 = arith.maximumf %9, %10 : vector<2x512xf32>
    %c0_8 = arith.constant 0 : index
    %c0_9 = arith.constant 0 : index
    %12 = vector.load %arg5[%c0_8, %c0_9] : memref<2x512xf32, #tpu.memory_space<vmem>>, vector<2x512xf32>
    tpu.vector_store %arg5[%c0_8, %c0_9], %11 {strides = array<i32>} : memref<2x512xf32, #tpu.memory_space<vmem>>, vector<2x512xf32>,
    return
  }
  func.func @transform_0(%arg0: i32) -> (i32, i32) {
    %c0_i32 = arith.constant 0 : i32
    %c0_i32_0 = arith.constant 0 : i32
    %c0_i32_1 = arith.constant 0 : i32
    return %c0_i32, %c0_i32_0 : i32, i32
  }
  func.func @transform_1(%arg0: i32) -> (i32, i32) {
    %c0_i32 = arith.constant 0 : i32
    %c0_i32_0 = arith.constant 0 : i32
    return %c0_i32, %arg0 : i32, i32
  }
  func.func @transform_2(%arg0: i32) -> (i32, i32) {
    %c0_i32 = arith.constant 0 : i32
    %c0_i32_0 = arith.constant 0 : i32
    return %c0_i32, %arg0 : i32, i32
  }
  func.func @transform_3(%arg0: i32) -> (i32, i32) {
    %c0_i32 = arith.constant 0 : i32
    %c0_i32_0 = arith.constant 0 : i32
    return %c0_i32, %arg0 : i32, i32
  }
  func.func @transform_4(%arg0: i32) -> (i32, i32) {
    %c0_i32 = arith.constant 0 : i32
    %c0_i32_0 = arith.constant 0 : i32
    return %c0_i32, %arg0 : i32, i32
  }
}

module attributes {stable_mosaic.version = 11 : i64} {
  func.func @_affine_matmul_kernel(%arg0: i32, %arg1: memref<2x2048xf32, #tpu.memory_space<vmem>>, %arg2: memref<2048x8xbf16, #tpu.memory_space<vmem>>, %arg3: memref<1x8xf32, #tpu.memory_space<vmem>>, %arg4: memref<1x8xf32, #tpu.memory_space<vmem>>, %arg5: memref<2x8xf32, #tpu.memory_space<vmem>>) attributes {dimension_semantics = [#tpu.dimension_semantics<parallel>], iteration_bounds = array<i64: 1>, scalar_prefetch = 0 : i64, scratch_operands = 0 : i64, tpu.core_type = #tpu.core_type<tc>, window_params = [{pipeline_mode = #tpu.pipeline_mode<synchronous>, transform_indices = @transform_0, window_bounds = array<i64: 2, 2048>}, {transform_indices = @transform_1, window_bounds = array<i64: 2048, 8>}, {transform_indices = @transform_2, window_bounds = array<i64: 1, 8>}, {transform_indices = @transform_3, window_bounds = array<i64: 1, 8>}, {transform_indices = @transform_4, window_bounds = array<i64: 2, 8>}]} {
    %c0 = arith.constant 0 : index
    %c0_0 = arith.constant 0 : index
    %0 = vector.load %arg1[%c0, %c0_0] : memref<2x2048xf32, #tpu.memory_space<vmem>>, vector<2x2048xf32>
    %1 = arith.truncf %0 : vector<2x2048xf32> to vector<2x2048xbf16>
    %c0_1 = arith.constant 0 : index
    %c0_2 = arith.constant 0 : index
    %2 = vector.load %arg2[%c0_1, %c0_2] : memref<2048x8xbf16, #tpu.memory_space<vmem>>, vector<2048x8xbf16>
    %cst = arith.constant dense<0.000000e+00> : vector<2x8xf32>
    %3 = tpu.matmul %1, %2, %cst {dimension_numbers = #tpu.dot_dimension_numbers<[1], [0], [0], [1], [0, 0, 1, 1], [], []>} : vector<2x2048xbf16>, vector<2048x8xbf16>, vector<2x8xf32> -> vector<2x8xf32>
    %c0_3 = arith.constant 0 : index
    %c0_4 = arith.constant 0 : index
    %4 = vector.load %arg3[%c0_3, %c0_4] : memref<1x8xf32, #tpu.memory_space<vmem>>, vector<1x8xf32>
    %5 = vector.broadcast %4 : vector<1x8xf32> to vector<2x8xf32>
    %6 = arith.mulf %3, %5 : vector<2x8xf32>
    %c0_5 = arith.constant 0 : index
    %c0_6 = arith.constant 0 : index
    %7 = vector.load %arg4[%c0_5, %c0_6] : memref<1x8xf32, #tpu.memory_space<vmem>>, vector<1x8xf32>
    %8 = vector.broadcast %7 : vector<1x8xf32> to vector<2x8xf32>
    %9 = arith.addf %6, %8 : vector<2x8xf32>
    %c0_7 = arith.constant 0 : index
    %c0_8 = arith.constant 0 : index
    %10 = vector.load %arg5[%c0_7, %c0_8] : memref<2x8xf32, #tpu.memory_space<vmem>>, vector<2x8xf32>
    tpu.vector_store %arg5[%c0_7, %c0_8], %9 {strides = array<i32>} : memref<2x8xf32, #tpu.memory_space<vmem>>, vector<2x8xf32>,
    return
  }
  func.func @transform_0(%arg0: i32) -> (i32, i32) {
    %c0_i32 = arith.constant 0 : i32
    %c0_i32_0 = arith.constant 0 : i32
    %c0_i32_1 = arith.constant 0 : i32
    return %c0_i32, %c0_i32_0 : i32, i32
  }
  func.func @transform_1(%arg0: i32) -> (i32, i32) {
    %c0_i32 = arith.constant 0 : i32
    %c0_i32_0 = arith.constant 0 : i32
    return %c0_i32, %arg0 : i32, i32
  }
  func.func @transform_2(%arg0: i32) -> (i32, i32) {
    %c0_i32 = arith.constant 0 : i32
    %c0_i32_0 = arith.constant 0 : i32
    return %c0_i32, %arg0 : i32, i32
  }
  func.func @transform_3(%arg0: i32) -> (i32, i32) {
    %c0_i32 = arith.constant 0 : i32
    %c0_i32_0 = arith.constant 0 : i32
    return %c0_i32, %arg0 : i32, i32
  }
  func.func @transform_4(%arg0: i32) -> (i32, i32) {
    %c0_i32 = arith.constant 0 : i32
    %c0_i32_0 = arith.constant 0 : i32
    return %c0_i32, %arg0 : i32, i32
  }
}

</mosaic_0001>

<bundles_post_ra>
// kernel: final_lstm_forward.9
= control target key start
LH: loop header
LB: loop body
LE: loop exit
PB: predicated region body
PF: predicated region fallthrough
CT: control target
= control target key end

     0   :  { %9 = vsyncpa [#allocation3], 0  ;;  %s358_s0 = inlined_call_operand.hbm [shape: f32[16,16], index: 0, kind: input, shape index: {}]   ;;  %s359_s1 = inlined_call_operand.hbm [shape: f32[16,256], index: 1, kind: input, shape index: {}]   ;;  %s360_s2 = inlined_call_operand.vmem [shape: f32[1,256], index: 2, kind: input, shape index: {}]   ;;  %s361_s3 = inlined_call_operand.hbm [shape: f32[1,256], index: 3, kind: input, shape index: {}]   ;;  %s362_s4 = inlined_call_operand.vmem [shape: f32[16,256], index: 4, kind: output, shape index: {}]  }
   0x1   :  { %10 = vsyncpa [#allocation5], 0  ;;  %s274_s15 = smov [#allocation4]   ;;  %s204_s19 = scalar_lea.hbm %s359_s1, 512 }
   0x2   :  { %s28_s16 = sshll.u32 %s274_s15, 4  ;;  %p205_p0 = scmp.ne.s32.totalorder %s359_s1, %s204_s19  ;;  %s29_s16 = int_to_ptr.vmem [resolvable:$true] %s28_s16 }
   0x3   :  { %p208_p1 = scmp.lt.u32.totalorder %s204_s19, %s359_s1 }
   0x5   :  { %p210_p2 = pnand %p208_p1, %p205_p0 }
   0x7   :  { %213 = shalt.err (!%p210_p2)
}
   0x8   :  { %s214_s24 = scalar_lea.vmem %s29_s16, 512  ;;  %p219_p4 = scmp.lt.s32.totalorder %s29_s16, %s29_s16 }
   0x9   :  { %p215_p3 = scmp.ne.s32.totalorder %s29_s16, %s214_s24  ;;  %p220_p5 = scmp.lt.s32.totalorder %s214_s24, %s214_s24 }
   0xb   :  { %p221_p6 = por %p220_p5, %p219_p4 }
   0xd   :  { %p222_p7 = pnand %p221_p6, %p215_p3 }
   0xf   :  { %225 = shalt.err (!%p222_p7)
}
  0x10   :  { %s275_s25 = smov 256   ;;  %s276_s26 = smov 16  }
  0x11   :  { %34 = dma.hbm_to_vmem [thread:$0]  %s359_s1, 512, %s29_s16, [#allocation5], %s275_s25, %s275_s25, %s276_s26  }
  0x12   :  { %s277_s29 = smov [#allocation2]   ;;  %s226_s7 = scalar_lea.hbm %s358_s0, 256 }
  0x13   :  { %s16_s30 = sshll.u32 %s277_s29, 4  ;;  %p227_p8 = scmp.ne.s32.totalorder %s358_s0, %s226_s7  ;;  %s17_s30 = int_to_ptr.vmem [resolvable:$true] %s16_s30 }
  0x14   :  { %p230_p9 = scmp.lt.u32.totalorder %s226_s7, %s358_s0 }
  0x16   :  { %p232_p10 = pnand %p230_p9, %p227_p8 }
  0x18   :  { %235 = shalt.err (!%p232_p10)
}
  0x19   :  { %s236_s12 = scalar_lea.vmem %s17_s30, 256  ;;  %p241_p12 = scmp.lt.s32.totalorder %s17_s30, %s17_s30 }
  0x1a   :  { %p237_p11 = scmp.ne.s32.totalorder %s17_s30, %s236_s12  ;;  %p242_p13 = scmp.lt.s32.totalorder %s236_s12, %s236_s12 }
  0x1c   :  { %p243_p0 = por %p242_p13, %p241_p12 }
  0x1e   :  { %p244_p1 = pnand %p243_p0, %p237_p11 }
  0x20   :  { %247 = shalt.err (!%p244_p1)
}
  0x21   :  { %s278_s1 = smov 128   ;;  %s279_s13 = smov 8  }
  0x22   :  { %22 = dma.hbm_to_vmem [thread:$0]  %s358_s0, 256, %s17_s30, [#allocation3], %s278_s1, %s278_s1, %s279_s13  }
  0x23   :  { %s280_s16 = smov [#allocation6]   ;;  %s248_s20 = scalar_lea.hbm %s361_s3, 32 }
  0x24   :  { %s43_s17 = sshll.u32 %s280_s16, 4  ;;  %p249_p2 = scmp.ne.s32.totalorder %s361_s3, %s248_s20  ;;  %s44_s17 = int_to_ptr.vmem [resolvable:$true] %s43_s17 }
  0x25   :  { %p252_p3 = scmp.lt.u32.totalorder %s248_s20, %s361_s3 }
  0x27   :  { %p254_p4 = pnand %p252_p3, %p249_p2 }
  0x29   :  { %257 = shalt.err (!%p254_p4)
}
  0x2a   :  { %s258_s25 = scalar_lea.vmem %s44_s17, 32  ;;  %p263_p6 = scmp.lt.s32.totalorder %s44_s17, %s44_s17 }
  0x2b   :  { %p259_p5 = scmp.ne.s32.totalorder %s44_s17, %s258_s25  ;;  %p264_p7 = scmp.lt.s32.totalorder %s258_s25, %s258_s25 }
  0x2d   :  { %p265_p8 = por %p264_p7, %p263_p6 }
  0x2f   :  { %p266_p9 = pnand %p265_p8, %p259_p5 }
  0x31   :  { %269 = shalt.err (!%p266_p9)
}
  0x32   :  { %46 = dma.hbm_to_vmem [thread:$0]  %s361_s3, 32, %s44_s17, [#allocation5]  }
  0x33   :  { %270 = dma.done.wait [#allocation3], 256  }
  0x34   :  { %271 = vsyncadd [#allocation3], 4294967040 }
  0x35   :  { %272 = dma.done.wait [#allocation5], 544  }
  0x36   :  { %273 = vsyncadd [#allocation5], 4294966752  ;;  %v281_v0 = vmov 0.0   ;;  %v59_v1 = vld [vmem:[#allocation4 + $0x8] sm:$0xff]  ;;  %v61_v2 = vld [vmem:[#allocation4 + $0x18] sm:$0xff]  ;;  %vm62_vm0 = vcmask 130048   ;;  %v148_v9 = vlaneseq }
  0x37   :  { %133 = vmatprep.mubr.f32.mxu0 %v281_v0  ;;  %139 = vmatprep.mubr.f32.mxu1 %v281_v0  ;;  %v58_v3 = vld [vmem:[#allocation4] sm:$0xff]  ;;  %v190_v4 = vpack.c.bf16 %v61_v2, %v59_v1  ;;  %v60_v5 = vld [vmem:[#allocation4 + $0x10] sm:$0xff]  ;;  %v57_v8 = vld [vmem:[#allocation2 + $0x8] sm:$0xff] }
  0x38   :  { %v192_v6 = vpack.c.bf16 %v60_v5, %v58_v3  ;;  %v56_v7 = vld [vmem:[#allocation2] sm:$0xff]  ;;  %v149_v10 = vshrl.u32 %v148_v9, 7  ;;  %v162_v14 = vld [vmem:[#allocation6] sm:$0x3] }
  0x39   :  { %191 = vmatprep.subr.bf16.mxu0 %v190_v4  ;;  %194 = vmatprep.subr.bf16.mxu1 %v190_v4  ;;  %v146_v12 = vld [vmem:[%s360_s2] sm:$0x3] }
  0x3a   :  { %193 = vmatpush1.bf16.msra.mxu0 %v192_v6  ;;  %195 = vmatpush1.bf16.msra.mxu1 %v192_v6  ;;  %v150_v11 = vsub.s32 0, %v149_v10  ;;  %v154_v13 = vsub.s32 1, %v149_v10 }
  0x3c   :  { %v151_v15 = vrot.slane %v146_v12, %v150_v11  ;;  %v155_v16 = vrot.slane %v146_v12, %v154_v13  ;;  %v167_v17 = vrot.slane %v162_v14, %v150_v11  ;;  %v171_v20 = vrot.slane %v162_v14, %v154_v13 }
  0x3d   :  { %188 = vmatmul.mubr.msk.f32.vlgmr.msra.gmra.mrb[0].mxu0 %vm62_vm0, %v56_v7  ;;  %189 = vmatmul.mubr.msk.f32.vlgmr.msra.gmra.mrb[0].mxu1 %vm62_vm0, %v57_v8 }
 0x110   :  { %v135_v18 = vpop.f32.mrb[0].mxu0  ;;  %v141_v19 = vpop.f32.mrb[0].mxu1 }
 0x111   :  { %v158_v21 = vmul.f32 %v151_v15, %v135_v18  ;;  %v160_v22 = vmul.f32 %v151_v15, %v141_v19  ;;  %v137_v23 = vpop.f32.mrb[1].mxu0  ;;  %v143_v24 = vpop.f32.mrb[1].mxu1 }
 0x112   :  { %v159_v25 = vmul.f32 %v155_v16, %v137_v23  ;;  %v161_v26 = vmul.f32 %v155_v16, %v143_v24 }
 0x113   :  { %v174_v27 = vadd.f32 %v167_v17, %v158_v21  ;;  %v176_v28 = vadd.f32 %v167_v17, %v160_v22 }
 0x114   :  { %v175_v29 = vadd.f32 %v171_v20, %v159_v25  ;;  %v177_v30 = vadd.f32 %v171_v20, %v161_v26 }
 0x115   :  { %178 = vst [vmem:[%s362_s4] sm:$0xff] %v174_v27  ;;  %180 = vst [vmem:[%s362_s4 + $0x10] sm:$0xff] %v176_v28 }
 0x116   :  { %179 = vst [vmem:[%s362_s4 + $0x8] sm:$0xff] %v175_v29  ;;  %181 = vst [vmem:[%s362_s4 + $0x18] sm:$0xff] %v177_v30 }
 0x117   :  { %186 = vsyncpa [#allocation3], 1 }
 0x118   :  { %187 = vsyncpa [#allocation5], 1 }

// kernel: final_lstm_forward.11
= control target key start
LH: loop header
LB: loop body
LE: loop exit
PB: predicated region body
PF: predicated region fallthrough
CT: control target
= control target key end

     0   :  { %9 = vsyncpa [#allocation3], 0  ;;  %s341_s0 = inlined_call_operand.vmem [shape: f32[16,64], index: 0, kind: input, shape index: {}]   ;;  %s342_s1 = inlined_call_operand.hbm [shape: f32[64,256], index: 1, kind: input, shape index: {}]   ;;  %s343_s2 = inlined_call_operand.vmem [shape: f32[1,256], index: 2, kind: input, shape index: {}]   ;;  %s344_s3 = inlined_call_operand.hbm [shape: f32[1,256], index: 3, kind: input, shape index: {}]   ;;  %s345_s4 = inlined_call_operand.vmem [shape: f32[16,256], index: 4, kind: output, shape index: {}]  }
   0x1   :  { %10 = vsyncpa [#allocation5], 0  ;;  %s266_s15 = smov [#allocation2]   ;;  %s218_s19 = scalar_lea.hbm %s342_s1, 2048 }
   0x2   :  { %s18_s16 = sshll.u32 %s266_s15, 4  ;;  %p219_p0 = scmp.ne.s32.totalorder %s342_s1, %s218_s19  ;;  %s19_s16 = int_to_ptr.vmem [resolvable:$true] %s18_s16 }
   0x3   :  { %p222_p1 = scmp.lt.u32.totalorder %s218_s19, %s342_s1 }
   0x5   :  { %p224_p2 = pnand %p222_p1, %p219_p0 }
   0x7   :  { %227 = shalt.err (!%p224_p2)
}
   0x8   :  { %s228_s24 = scalar_lea.vmem %s19_s16, 2048  ;;  %p233_p4 = scmp.lt.s32.totalorder %s19_s16, %s19_s16 }
   0x9   :  { %p229_p3 = scmp.ne.s32.totalorder %s19_s16, %s228_s24  ;;  %p234_p5 = scmp.lt.s32.totalorder %s228_s24, %s228_s24 }
   0xb   :  { %p235_p6 = por %p234_p5, %p233_p4 }
   0xd   :  { %p236_p7 = pnand %p235_p6, %p229_p3 }
   0xf   :  { %239 = shalt.err (!%p236_p7)
}
  0x10   :  { %s267_s25 = smov 256   ;;  %s268_s26 = smov 16  }
  0x11   :  { %24 = dma.hbm_to_vmem [thread:$0]  %s342_s1, 2048, %s19_s16, [#allocation3], %s267_s25, %s267_s25, %s268_s26  }
  0x12   :  { %s269_s29 = smov [#allocation4]   ;;  %s240_s7 = scalar_lea.hbm %s344_s3, 32 }
  0x13   :  { %s33_s30 = sshll.u32 %s269_s29, 4  ;;  %p241_p8 = scmp.ne.s32.totalorder %s344_s3, %s240_s7  ;;  %s34_s30 = int_to_ptr.vmem [resolvable:$true] %s33_s30 }
  0x14   :  { %p244_p9 = scmp.lt.u32.totalorder %s240_s7, %s344_s3 }
  0x16   :  { %p246_p10 = pnand %p244_p9, %p241_p8 }
  0x18   :  { %249 = shalt.err (!%p246_p10)
}
  0x19   :  { %s250_s12 = scalar_lea.vmem %s34_s30, 32  ;;  %p255_p12 = scmp.lt.s32.totalorder %s34_s30, %s34_s30 }
  0x1a   :  { %p251_p11 = scmp.ne.s32.totalorder %s34_s30, %s250_s12  ;;  %p256_p13 = scmp.lt.s32.totalorder %s250_s12, %s250_s12 }
  0x1c   :  { %p257_p0 = por %p256_p13, %p255_p12 }
  0x1e   :  { %p258_p1 = pnand %p257_p0, %p251_p11 }
  0x20   :  { %261 = shalt.err (!%p258_p1)
}
  0x21   :  { %36 = dma.hbm_to_vmem [thread:$0]  %s344_s3, 32, %s34_s30, [#allocation5]  }
  0x22   :  { %262 = dma.done.wait [#allocation3], 2048  }
  0x23   :  { %263 = vsyncadd [#allocation3], 4294965248 }
  0x24   :  { %264 = dma.done.wait [#allocation5], 32  }
  0x25   :  { %265 = vsyncadd [#allocation5], 4294967264  ;;  %v270_v0 = vmov 0.0   ;;  %v46_v1 = vld [vmem:[#allocation2 + $0x8] sm:$0xff]  ;;  %v48_v2 = vld [vmem:[#allocation2 + $0x18] sm:$0xff]  ;;  %vm61_vm0 = vcmask 523264   ;;  %v147_v27 = vlaneseq }
  0x26   :  { %132 = vmatprep.mubr.f32.mxu0 %v270_v0  ;;  %138 = vmatprep.mubr.f32.mxu1 %v270_v0  ;;  %v45_v3 = vld [vmem:[#allocation2] sm:$0xff]  ;;  %v189_v4 = vpack.c.bf16 %v48_v2, %v46_v1  ;;  %v47_v5 = vld [vmem:[#allocation2 + $0x10] sm:$0xff]  ;;  %v50_v6 = vld [vmem:[#allocation2 + $0x28] sm:$0xff] }
  0x27   :  { %v52_v7 = vld [vmem:[#allocation2 + $0x38] sm:$0xff]  ;;  %v191_v8 = vpack.c.bf16 %v47_v5, %v45_v3  ;;  %v49_v10 = vld [vmem:[#allocation2 + $0x20] sm:$0xff]  ;;  %v51_v11 = vld [vmem:[#allocation2 + $0x30] sm:$0xff]  ;;  %v148_v28 = vshrl.u32 %v147_v27, 7 }
  0x28   :  { %v193_v9 = vpack.c.bf16 %v52_v7, %v50_v6  ;;  %v54_v12 = vld [vmem:[#allocation2 + $0x48] sm:$0xff]  ;;  %190 = vmatprep.subr.bf16.mxu0 %v189_v4  ;;  %205 = vmatprep.subr.bf16.mxu1 %v189_v4  ;;  %v56_v13 = vld [vmem:[#allocation2 + $0x58] sm:$0xff]  ;;  %v195_v14 = vpack.c.bf16 %v51_v11, %v49_v10  ;;  %v53_v16 = vld [vmem:[#allocation2 + $0x40] sm:$0xff] }
  0x29   :  { %192 = vmatpush1.bf16.msra.mxu0 %v191_v8  ;;  %209 = vmatpush1.bf16.msra.mxu1 %v191_v8  ;;  %v197_v15 = vpack.c.bf16 %v56_v13, %v54_v12  ;;  %v55_v17 = vld [vmem:[#allocation2 + $0x50] sm:$0xff]  ;;  %v58_v18 = vld [vmem:[#allocation2 + $0x68] sm:$0xff]  ;;  %v60_v19 = vld [vmem:[#allocation2 + $0x78] sm:$0xff]  ;;  %v149_v29 = vsub.s32 0, %v148_v28  ;;  %v153_v31 = vsub.s32 1, %v148_v28 }
  0x2a   :  { %194 = vmatprep.subr.bf16.mxu0 %v193_v9  ;;  %206 = vmatprep.subr.bf16.mxu1 %v193_v9  ;;  %v199_v20 = vpack.c.bf16 %v55_v17, %v53_v16  ;;  %v201_v21 = vpack.c.bf16 %v60_v19, %v58_v18  ;;  %v57_v22 = vld [vmem:[#allocation2 + $0x60] sm:$0xff]  ;;  %v59_v23 = vld [vmem:[#allocation2 + $0x70] sm:$0xff]  ;;  %v44_v26 = vld [vmem:[%s341_s0 + $0x8] sm:$0xff] }
  0x2b   :  { %v203_v24 = vpack.c.bf16 %v59_v23, %v57_v22  ;;  %v43_v25 = vld [vmem:[%s341_s0] sm:$0xff] }
  0x2c   :  { %v145_v30 = vld [vmem:[%s343_s2] sm:$0x3] }
  0x2d   :  { %196 = vmatpush1.bf16.msra.mxu0 %v195_v14  ;;  %210 = vmatpush1.bf16.msra.mxu1 %v195_v14  ;;  %v161_v32 = vld [vmem:[#allocation4] sm:$0x3]  ;;  %v150_v33 = vrot.slane %v145_v30, %v149_v29  ;;  %v154_v34 = vrot.slane %v145_v30, %v153_v31 }
  0x2e   :  { %198 = vmatprep.subr.bf16.mxu0 %v197_v15  ;;  %207 = vmatprep.subr.bf16.mxu1 %v197_v15  ;;  %v166_v35 = vrot.slane %v161_v32, %v149_v29  ;;  %v170_v38 = vrot.slane %v161_v32, %v153_v31 }
  0x31   :  { %200 = vmatpush1.bf16.msra.mxu0 %v199_v20  ;;  %211 = vmatpush1.bf16.msra.mxu1 %v199_v20 }
  0x32   :  { %202 = vmatprep.subr.bf16.mxu0 %v201_v21  ;;  %208 = vmatprep.subr.bf16.mxu1 %v201_v21 }
  0x35   :  { %204 = vmatpush1.bf16.msra.mxu0 %v203_v24  ;;  %212 = vmatpush1.bf16.msra.mxu1 %v203_v24 }
  0x38   :  { %187 = vmatmul.mubr.msk.f32.vlgmr.msra.gmra.mrb[0].mxu0 %vm61_vm0, %v43_v25  ;;  %188 = vmatmul.mubr.msk.f32.vlgmr.msra.gmra.mrb[0].mxu1 %vm61_vm0, %v44_v26 }
 0x10b   :  { %v134_v36 = vpop.f32.mrb[0].mxu0  ;;  %v140_v37 = vpop.f32.mrb[0].mxu1 }
 0x10c   :  { %v157_v39 = vmul.f32 %v150_v33, %v134_v36  ;;  %v159_v40 = vmul.f32 %v150_v33, %v140_v37  ;;  %v136_v41 = vpop.f32.mrb[1].mxu0  ;;  %v142_v42 = vpop.f32.mrb[1].mxu1 }
 0x10d   :  { %v158_v43 = vmul.f32 %v154_v34, %v136_v41  ;;  %v160_v44 = vmul.f32 %v154_v34, %v142_v42 }
 0x10e   :  { %v173_v45 = vadd.f32 %v166_v35, %v157_v39  ;;  %v175_v46 = vadd.f32 %v166_v35, %v159_v40 }
 0x10f   :  { %v174_v47 = vadd.f32 %v170_v38, %v158_v43  ;;  %v176_v48 = vadd.f32 %v170_v38, %v160_v44 }
 0x110   :  { %177 = vst [vmem:[%s345_s4] sm:$0xff] %v173_v45  ;;  %179 = vst [vmem:[%s345_s4 + $0x10] sm:$0xff] %v175_v46 }
 0x111   :  { %178 = vst [vmem:[%s345_s4 + $0x8] sm:$0xff] %v174_v47  ;;  %180 = vst [vmem:[%s345_s4 + $0x18] sm:$0xff] %v176_v48 }
 0x112   :  { %185 = vsyncpa [#allocation3], 1 }
 0x113   :  { %186 = vsyncpa [#allocation5], 1 }

// kernel: final_lstm_forward.10
= control target key start
LH: loop header
LB: loop body
LE: loop exit
PB: predicated region body
PF: predicated region fallthrough
CT: control target
= control target key end

     0   :  { %9 = vsyncpa [#allocation5], 0  ;;  %s2200_s15 = smov 0   ;;  %s2202_s16 = smov 0   ;;  %s2571_s0 = inlined_call_operand.vmem [shape: f32[2,8,256], index: 0, kind: input, shape index: {}]   ;;  %s2572_s1 = inlined_call_operand.vmem [shape: s32[2,1,64], index: 1, kind: input, shape index: {}]   ;;  %s2573_s2 = inlined_call_operand.vmem [shape: s32[2,1,64], index: 2, kind: input, shape index: {}]   ;;  %s2574_s3 = inlined_call_operand.hbm [shape: f32[64,256], index: 3, kind: input, shape index: {}]   ;;  %s2575_s4 = inlined_call_operand.vmem [shape: f32[2,8,64], index: 4, kind: output, shape index: {}]  }
   0x1   :  { %s2204_s17 = smov 0  }
   0x2 LB: > { %s1788_s18 = sadd.s32 4294967295, %s2167_s17   ;;  %s27_s19 = sadd.s32 1, %s2163_s16  ;;  %s2167_s17 = sphi %s2204_s17, %s15_s17   ;;  %s2163_s16 = sphi %s2202_s16, %s2585_s16   ;;  %s2159_s15 = sphi %s2200_s15, %s2584_s15  }
   0x3   : > { %p29_p0 = scmp.ge.s32.totalorder %s27_s19, 2  ;;  %p1790_p1 = scmp.ge.s32.totalorder %s2167_s17, 1 }
   0x4   : > { %p161_p2 = scmp.lt.s32.totalorder %s2167_s17, 3  ;;  %p2225_p4 = scmp.eq.s32.totalorder %s1788_s18, 0 }
   0x5   : > { %s2587_s19 = smov (%p29_p0, %s27_s19), 0  ;;  %s2169_s22 = smov [#allocation4]  }
   0x6   : > { %p2221_p3 = pnand %p1790_p1, %p161_p2  ;;  %s173_s23 = sshll.u32 %s2169_s22, 4  ;;  %s174_s23 = int_to_ptr.vmem [resolvable:$true] %s173_s23 }
   0x7   : > { %s2580_s21 = scalar_select %p2225_p4, 1, 0 }
   0x8   : > { %s2579_s20 = scalar_select %p2221_p3, 1, 0 }
   0x9   : > { %p1981_p5 = pneg %p2221_p3  ;;  %s2113_s27 = scalar_lea.hbm %s2574_s3, 2048 }
   0xa   : > { %p2114_p7 = scmp.ne.s32.totalorder %s2574_s3, %s2113_s27  ;;  %p2120_p11 = scmp.lt.u32.totalorder %s2113_s27, %s2574_s3 }
   0xb   : > { %p2233_p6 = pnand %p2225_p4, %p1981_p5 }
   0xd   : > { %p2115_p8 = pneg %p2233_p6 }
   0xf   : > { %p2116_p9 = pnand %p2115_p8, %p2114_p7 }
  0x11   : > { %p2117_p10 = pneg %p2116_p9 }
  0x13   : > { %p2122_p12 = pnand %p2120_p11, %p2117_p10 }
  0x15   : > { %2125 = shalt.err (!%p2122_p12)
}
  0x16   : > { %s2126_s6 = scalar_lea.vmem %s174_s23, 2048  ;;  %p2134_p2 = scmp.lt.s32.totalorder %s174_s23, %s174_s23 }
  0x17   : > { %p2127_p13 = scmp.ne.s32.totalorder %s174_s23, %s2126_s6  ;;  %p2135_p5 = scmp.lt.s32.totalorder %s2126_s6, %s2126_s6 }
  0x19   : > { %p2129_p0 = pnand %p2127_p13, %p2115_p8  ;;  %p2136_p4 = por %p2135_p5, %p2134_p2 }
  0x1b   : > { %p2130_p1 = pneg %p2129_p0 }
  0x1d   : > { %p2137_p3 = pnand %p2136_p4, %p2130_p1 }
  0x1f   : > { %2140 = shalt.err (!%p2137_p3)
}
  0x20   : > { %s2170_s7 = smov 256   ;;  %s2171_s8 = smov 16  }
  0x21   : > { %1984 = dma.hbm_to_vmem [thread:$0]  (!%p2233_p6), %s2574_s3, 2048, %s174_s23, [#allocation5], %s2170_s7, %s2170_s7, %s2171_s8  }
  0x22   : > { %p2582_p7 = scmp.ne.s32.totalorder %s2579_s20, 0 }
  0x23   : > { %p2583_p9 = scmp.ne.s32.totalorder (!%p2582_p7), %s2580_s21, 0 }
  0x24   : > { %213 = sbr.rel (%p2582_p7) target bundleno = 4063 (0xfdf), region = 36 }
  0x2b   : > { %2154 = dma.done.wait (%p2583_p9), [#allocation5], 2048  }
  0x2c   : > { %2156 = vsyncadd (%p2583_p9), [#allocation5], 4294965248  ;;  %vm277_vm0 = vcmask 516096   ;;  %v2172_v0 = vmov 0.0   ;;  %v394_v1 = vlaneseq  ;;  %v285_v3 = vld [vmem:[#allocation4 + $0x8] sm:$0xff]  ;;  %v287_v4 = vld [vmem:[#allocation4 + $0x18] sm:$0xff] }
  0x2d   : > { %371 = vmatprep.mubr.f32.mxu0 %v2172_v0  ;;  %278 = vst.msk [vmem:[#allocation2] sm:$0x1] %vm277_vm0, %v2172_v0  ;;  %279 = vst.msk [vmem:[#allocation3] sm:$0x1] %vm277_vm0, %v2172_v0  ;;  %526 = vmatprep.mubr.f32.mxu1 %v2172_v0  ;;  %v284_v5 = vld [vmem:[#allocation4] sm:$0xff]  ;;  %v2267_v6 = vpack.c.bf16 %v287_v4, %v285_v3  ;;  %v286_v7 = vld [vmem:[#allocation4 + $0x10] sm:$0xff] }
  0x2e   : > { %v2265_v2 = vshrl.u32 %v394_v1, 7  ;;  %v289_v8 = vld [vmem:[#allocation4 + $0x28] sm:$0xff]  ;;  %v291_v9 = vld [vmem:[#allocation4 + $0x38] sm:$0xff]  ;;  %v2269_v10 = vpack.c.bf16 %v286_v7, %v284_v5  ;;  %v288_v12 = vld [vmem:[#allocation4 + $0x20] sm:$0xff]  ;;  %s2173_s11 = smov 64   ;;  %vm303_vm1 = vcmask 523264  }
  0x2f   : > { %v2271_v11 = vpack.c.bf16 %v291_v9, %v289_v8  ;;  %v290_v13 = vld [vmem:[#allocation4 + $0x30] sm:$0xff]  ;;  %v293_v14 = vld [vmem:[#allocation4 + $0x48] sm:$0xff]  ;;  %1850 = vmatprep.subr.bf16.mxu0 %v2267_v6  ;;  %v295_v16 = vld [vmem:[#allocation4 + $0x58] sm:$0xff]  ;;  %1866 = vmatprep.subr.bf16.mxu1 %v2267_v6  ;;  %p251_p3 = scmp.lt.s32.totalorder %s2159_s15, 1  ;;  %v2174_v50 = vmov 1966171168  }
  0x30   : > { %v2274_v15 = vsub.s32 0, %v2265_v2  ;;  %1852 = vmatpush1.bf16.msra.mxu0 %v2269_v10  ;;  %v2279_v17 = vpack.c.bf16 %v290_v13, %v288_v12  ;;  %1868 = vmatpush1.bf16.msra.mxu1 %v2269_v10  ;;  %v2283_v18 = vpack.c.bf16 %v295_v16, %v293_v14  ;;  %v292_v19 = vld [vmem:[#allocation4 + $0x40] sm:$0xff]  ;;  %v294_v20 = vld [vmem:[#allocation4 + $0x50] sm:$0xff]  ;;  %v297_v22 = vld [vmem:[#allocation4 + $0x68] sm:$0xff]  ;;  %v418_v51 = vunpack.c.l.s4 %v2174_v50 }
  0x31   : > { %1854 = vmatprep.subr.bf16.mxu0 %v2271_v11  ;;  %1870 = vmatprep.subr.bf16.mxu1 %v2271_v11  ;;  %v299_v23 = vld [vmem:[#allocation4 + $0x78] sm:$0xff]  ;;  %v2291_v25 = vpack.c.bf16 %v294_v20, %v292_v19  ;;  %v296_v27 = vld [vmem:[#allocation4 + $0x60] sm:$0xff]  ;;  %v298_v28 = vld [vmem:[#allocation4 + $0x70] sm:$0xff]  ;;  %s2589_s15 = smov (!%p251_p3, %s2159_s15), 1  ;;  %vm1659_vm11 = vcmask 1040384   ;;  %vm1661_vm12 = vcmask 1041408  }
  0x32   : > { %v2295_v26 = vpack.c.bf16 %v299_v23, %v297_v22  ;;  %v2300_v29 = vpack.c.bf16 %v298_v28, %v296_v27  ;;  %s1848_s12 = sshll.u32 %s2589_s15, 4  ;;  %v419_v52 = vunpack.c.0.s8 %v418_v51  ;;  %s262_s22 = scalar_lea.vmem %s2572_s1, %s2589_s15 }
  0x33   : > { %s259_s18 = scalar_lea.vmem %s2571_s0, %s1848_s12  ;;  %s265_s25 = scalar_lea.vmem %s2573_s2, %s2589_s15  ;;  %v2354_v61 = vld [vmem:[%s262_s22] sm:$0x1] }
  0x34   : > { %v2285_v21 = vld [vmem:[#allocation3] sm:$0x1]  ;;  %1856 = vmatpush1.bf16.msra.mxu0 %v2279_v17  ;;  %1872 = vmatpush1.bf16.msra.mxu1 %v2279_v17  ;;  %v2306_v30 = vld [vmem:[#allocation2] sm:$0x1]  ;;  %v2333_v36 = vld [vmem:[%s259_s18 + $0x8] sm:$0xff]  ;;  %v2338_v55 = vsub.s32 %v419_v52, %v2265_v2  ;;  %vm1801_vm2 = vcmp.le.s32.totalorder %v2354_v61, 0 }
  0x35   : > { %v397_v24 = vrot.slane %v2285_v21, %v2274_v15  ;;  %1858 = vmatprep.subr.bf16.mxu0 %v2283_v18  ;;  %1874 = vmatprep.subr.bf16.mxu1 %v2283_v18  ;;  %v2330_v31 = vld [vmem:[%s259_s18] sm:$0xff]  ;;  %vm1807_vm5 = vcmp.le.s32.totalorder %v2354_v61, 1  ;;  %vm1813_vm8 = vcmp.le.s32.totalorder %v2354_v61, 2  ;;  %vm1819_vm13 = vcmp.le.s32.totalorder %v2354_v61, 3  ;;  %s1797_s26 = sshll.u32 %s2589_s15, 3 }
  0x36   : > { %v2356_v62 = vld [vmem:[%s265_s25] sm:$0x1]  ;;  %s272_s29 = scalar_lea.vmem %s2575_s4, %s1797_s26 }
  0x37   : > { %398 = vrot.lane.b32.xlu0 %v397_v24, %s2173_s11  ;;  %vm1802_vm3 = vcmp.gt.s32.totalorder %v2356_v62, 0  ;;  %vm1808_vm6 = vcmp.gt.s32.totalorder %v2356_v62, 1  ;;  %vm1814_vm9 = vcmp.gt.s32.totalorder %v2356_v62, 2  ;;  %vm1820_vm14 = vcmp.gt.s32.totalorder %v2356_v62, 3 }
  0x38   : > { %1860 = vmatpush1.bf16.msra.mxu0 %v2291_v25  ;;  %1876 = vmatpush1.bf16.msra.mxu1 %v2291_v25  ;;  %vm413_vm4 = vmand %vm1801_vm2, %vm1802_vm3  ;;  %vm1663_vm2 = vcmask 1042432   ;;  %vm1825_vm3 = vcmp.le.s32.totalorder %v2354_v61, 4 }
  0x39   : > { %1862 = vmatprep.subr.bf16.mxu0 %v2295_v26  ;;  %1878 = vmatprep.subr.bf16.mxu1 %v2295_v26  ;;  %v1803_v63 = vsel %vm413_vm4, 1.0, %v2172_v0  ;;  %vm575_vm7 = vmand %vm1807_vm5, %vm1808_vm6  ;;  %vm1826_vm4 = vcmp.gt.s32.totalorder %v2356_v62, 4  ;;  %vm1665_vm6 = vcmask 1043456  }
  0x3a   : > { %v435_v1 = vsub.f32 1.0, %v1803_v63  ;;  %v1809_v50 = vsel %vm575_vm7, 1.0, %v2172_v0  ;;  %vm739_vm10 = vmand %vm1813_vm8, %vm1814_vm9  ;;  %vm1831_vm7 = vcmp.le.s32.totalorder %v2354_v61, 5  ;;  %vm1832_vm8 = vcmp.gt.s32.totalorder %v2356_v62, 5 }
  0x3b   : > { %v598_v51 = vsub.f32 1.0, %v1809_v50  ;;  %vm903_vm15 = vmand %vm1819_vm13, %vm1820_vm14  ;;  %vm1669_vm14 = vcmask 1045504  }
  0x3c   : > { %1864 = vmatpush1.bf16.msra.mxu0 %v2300_v29  ;;  %1880 = vmatpush1.bf16.msra.mxu1 %v2300_v29  ;;  %v436_v2 = vmul.f32 %v435_v1, %v2306_v30  ;;  %v457_v7 = vmul.f32 %v435_v1, %v2285_v21  ;;  %vm1069_vm5 = vmand %vm1825_vm3, %vm1826_vm4  ;;  %vm1671_vm4 = vcmask 1046528  }
  0x3d   : > { %1882 = vmatprep.subr.bf16.mxu0 %v2267_v6  ;;  %1898 = vmatprep.subr.bf16.mxu1 %v2267_v6  ;;  %vm1233_vm9 = vmand %vm1831_vm7, %vm1832_vm8 }
  0x3f   : > { %1798 = vmatmul.mubr.msk.f32.vlgmr.msra.gmra.mrb[0].mxu0 %vm303_vm1, %v2306_v30 }
  0x40   : > { %1884 = vmatpush1.bf16.msra.mxu0 %v2269_v10  ;;  %690 = vmatprep.mubr.f32.mxu0 %v2172_v0 }
  0x41   : > { %1886 = vmatprep.subr.bf16.mxu0 %v2271_v11 }
  0x44   : > { %1888 = vmatpush1.bf16.msra.mxu0 %v2279_v17 }
  0x45   : > { %1890 = vmatprep.subr.bf16.mxu0 %v2283_v18 }
  0x48   : > { %1892 = vmatpush1.bf16.msra.mxu0 %v2291_v25 }
  0x49   : > { %1894 = vmatprep.subr.bf16.mxu0 %v2295_v26 }
  0x4c   : > { %1896 = vmatpush1.bf16.msra.mxu0 %v2300_v29 }
  0x4d   : > { %1914 = vmatprep.subr.bf16.mxu0 %v2267_v6 }
  0xa9   : > { %v399_v45 = vpop.permute.xlu0 %398 }
 0x112   : > { %v373_v32 = vpop.f32.mrb[0].mxu0 }
 0x113   : > { %v378_v33 = vadd.f32 %v373_v32, %v2330_v31  ;;  %v375_v34 = vpop.f32.mrb[1].mxu0 }
 0x114   : > { %v379_v37 = vadd.f32 %v375_v34, %v2333_v36 }
 0x115   : > { %v1799_v35 = vmul.f32 -1.442695, %v378_v33 }
 0x116   : > { %v1800_v43 = vmul.f32 -1.442695, %v379_v37 }
 0x117   : > { %2017 = vpow2.f32 %v1799_v35 }
 0x118   : > { %2019 = vtanh.f32 %v379_v37 }
 0x121   : > { %v2018_v38 = vpop.eup %2017 }
 0x122   : > { %v383_v39 = vadd.f32 1.0, %v2018_v38  ;;  %v2020_v40 = vpop.eup %2019 }
 0x124   : > { %2021 = vrcp.f32 %v383_v39 }
 0x125   : > { %2023 = vpow2.f32 %v1800_v43 }
 0x12e   : > { %v2022_v41 = vpop.eup %2021 }
 0x12f   : > { %v402_v42 = vmul.f32 %v2022_v41, %v2020_v40  ;;  %v2024_v44 = vpop.eup %2023  ;;  %v401_v47 = vmul.f32 %v2022_v41, %v399_v45 }
 0x130   : > { %v390_v46 = vadd.f32 1.0, %v2024_v44 }
 0x131   : > { %404 = vrot.lane.b32.xlu0 %v402_v42, %s2173_s11 }
 0x132   : > { %2025 = vrcp.f32 %v390_v46 }
 0x13c   : > { %v2026_v53 = vpop.eup %2025 }
 0x1a3   : > { %v405_v48 = vpop.permute.xlu0 %404 }
 0x1a4   : > { %v407_v49 = vadd.f32 %v405_v48, %v401_v47 }
 0x1a6   : > { %2027 = vtanh.f32 %v407_v49  ;;  %v445_v58 = vrot.slane %v407_v49, %v2338_v55 }
 0x1a8   : > { %v452_v60 = vrot.slane %v445_v58, %v2338_v55 }
 0x1b0   : > { %v2028_v54 = vpop.eup %2027 }
 0x1b1   : > { %v409_v56 = vmul.f32 %v2028_v54, %v2026_v53 }
 0x1b3   : > { %v423_v57 = vrot.slane %v409_v56, %v2338_v55 }
 0x1b5   : > { %v430_v59 = vrot.slane %v423_v57, %v2338_v55 }
 0x1b7   : > { %431 = vrot.lane.b32.xlu1 %v430_v59, %s2173_s11 }
 0x1bb   : > { %453 = vrot.lane.b32.xlu1 %v452_v60, %s2173_s11 }
 0x229   : > { %v432_v3 = vpop.permute.xlu1 %431 }
 0x22a   : > { %v2362_v4 = vmul.f32 %v1803_v63, %v432_v3 }
 0x22c   : > { %v2365_v5 = vadd.f32 %v436_v2, %v2362_v4 }
 0x22d   : > { %v454_v8 = vpop.permute.xlu1 %453 }
 0x22e   : > { %v456_v9 = vmul.f32 %v1803_v63, %v454_v8  ;;  %1804 = vmatmul.mubr.msk.f32.vlgmr.msra.gmra.mrb[0].mxu1 %vm303_vm1, %v2365_v5  ;;  %v599_v59 = vmul.f32 %v598_v51, %v2365_v5 }
 0x22f   : > { %1900 = vmatpush1.bf16.msra.mxu1 %v2269_v10  ;;  %854 = vmatprep.mubr.f32.mxu1 %v2172_v0 }
 0x230   : > { %v458_v12 = vadd.f32 %v457_v7, %v456_v9  ;;  %1902 = vmatprep.subr.bf16.mxu1 %v2271_v11 }
 0x232   : > { %v558_v13 = vrot.slane %v458_v12, %v2274_v15  ;;  %v621_v53 = vmul.f32 %v598_v51, %v458_v12 }
 0x233   : > { %1904 = vmatpush1.bf16.msra.mxu1 %v2279_v17 }
 0x234   : > { %559 = vrot.lane.b32.xlu0 %v558_v13, %s2173_s11  ;;  %1906 = vmatprep.subr.bf16.mxu1 %v2283_v18 }
 0x237   : > { %1908 = vmatpush1.bf16.msra.mxu1 %v2291_v25 }
 0x238   : > { %1910 = vmatprep.subr.bf16.mxu1 %v2295_v26 }
 0x23b   : > { %1912 = vmatpush1.bf16.msra.mxu1 %v2300_v29 }
 0x23c   : > { %1930 = vmatprep.subr.bf16.mxu1 %v2267_v6 }
 0x2a6   : > { %v560_v35 = vpop.permute.xlu0 %559 }
 0x301   : > { %v528_v14 = vpop.f32.mrb[0].mxu1 }
 0x302   : > { %v535_v16 = vrot.slane %v528_v14, 7  ;;  %v530_v19 = vpop.f32.mrb[1].mxu1 }
 0x303   : > { %v536_v22 = vrot.slane %v530_v19, 7 }
 0x304   : > { %v539_v20 = vadd.f32 %v535_v16, %v2330_v31 }
 0x305   : > { %v540_v23 = vadd.f32 %v536_v22, %v2333_v36 }
 0x306   : > { %v1805_v21 = vmul.f32 -1.442695, %v539_v20 }
 0x307   : > { %v1806_v33 = vmul.f32 -1.442695, %v540_v23 }
 0x308   : > { %2029 = vpow2.f32 %v1805_v21 }
 0x309   : > { %2031 = vtanh.f32 %v540_v23 }
 0x312   : > { %v2030_v24 = vpop.eup %2029 }
 0x313   : > { %v544_v27 = vadd.f32 1.0, %v2030_v24  ;;  %v2032_v28 = vpop.eup %2031 }
 0x315   : > { %2033 = vrcp.f32 %v544_v27 }
 0x316   : > { %2035 = vpow2.f32 %v1806_v33 }
 0x31f   : > { %v2034_v30 = vpop.eup %2033 }
 0x320   : > { %v563_v32 = vmul.f32 %v2034_v30, %v2032_v28  ;;  %v2036_v34 = vpop.eup %2035  ;;  %v562_v38 = vmul.f32 %v2034_v30, %v560_v35 }
 0x321   : > { %v551_v37 = vadd.f32 1.0, %v2036_v34 }
 0x322   : > { %565 = vrot.lane.b32.xlu1 %v563_v32, %s2173_s11 }
 0x323   : > { %2037 = vrcp.f32 %v551_v37 }
 0x32d   : > { %v2038_v44 = vpop.eup %2037 }
 0x394   : > { %v566_v39 = vpop.permute.xlu1 %565 }
 0x395   : > { %v568_v40 = vadd.f32 %v566_v39, %v562_v38 }
 0x397   : > { %2039 = vtanh.f32 %v568_v40  ;;  %v608_v41 = vrot.slane %v568_v40, %v2338_v55 }
 0x399   : > { %v609_v42 = vcombine.high %v608_v41, %v608_v41  ;;  %v1815_v41 = vsel %vm739_vm10, 1.0, %v2172_v0  ;;  %vm1667_vm10 = vcmask 1044480  }
 0x39b   : > { %v616_v43 = vrot.slane %v609_v42, %v2338_v55  ;;  %v762_v42 = vsub.f32 1.0, %v1815_v41 }
 0x39d   : > { %617 = vrot.lane.b32.xlu1 %v616_v43, %s2173_s11 }
 0x3a1   : > { %v2040_v45 = vpop.eup %2039 }
 0x3a2   : > { %v570_v46 = vmul.f32 %v2040_v45, %v2038_v44 }
 0x3a4   : > { %v585_v47 = vrot.slane %v570_v46, %v2338_v55 }
 0x3a6   : > { %v586_v48 = vcombine.high %v585_v47, %v585_v47 }
 0x3a8   : > { %v593_v49 = vrot.slane %v586_v48, %v2338_v55 }
 0x3aa   : > { %594 = vrot.lane.b32.xlu0 %v593_v49, %s2173_s11 }
 0x40f   : > { %v618_v52 = vpop.permute.xlu1 %617 }
 0x410   : > { %v620_v54 = vmul.f32 %v1809_v50, %v618_v52 }
 0x412   : > { %v622_v56 = vadd.f32 %v621_v53, %v620_v54 }
 0x414   : > { %v722_v57 = vrot.slane %v622_v56, %v2274_v15  ;;  %v785_v44 = vmul.f32 %v762_v42, %v622_v56 }
 0x416   : > { %723 = vrot.lane.b32.xlu0 %v722_v57, %s2173_s11 }
 0x41c   : > { %v595_v58 = vpop.permute.xlu0 %594 }
 0x41d   : > { %v2396_v60 = vmul.f32 %v1809_v50, %v595_v58 }
 0x41f   : > { %v600_v63 = vadd.f32 %v599_v59, %v2396_v60  ;;  %v1621_v48 = vrot.slane %v2396_v60, %v2274_v15 }
 0x421   : > { %1810 = vmatmul.mubr.msk.f32.vlgmr.msra.gmra.mrb[2].mxu0 %vm303_vm1, %v600_v63  ;;  %v763_v50 = vmul.f32 %v762_v42, %v600_v63  ;;  %v1660_v54 = vsel %vm1659_vm11, %v2362_v4, %v1621_v48  ;;  %vm1837_vm11 = vcmp.le.s32.totalorder %v2354_v61, 6 }
 0x422   : > { %1916 = vmatpush1.bf16.msra.mxu0 %v2269_v10  ;;  %1020 = vmatprep.mubr.f32.mxu0 %v2172_v0 }
 0x423   : > { %1918 = vmatprep.subr.bf16.mxu0 %v2271_v11 }
 0x426   : > { %1920 = vmatpush1.bf16.msra.mxu0 %v2279_v17 }
 0x427   : > { %1922 = vmatprep.subr.bf16.mxu0 %v2283_v18 }
 0x42a   : > { %1924 = vmatpush1.bf16.msra.mxu0 %v2291_v25 }
 0x42b   : > { %1926 = vmatprep.subr.bf16.mxu0 %v2295_v26 }
 0x42e   : > { %1928 = vmatpush1.bf16.msra.mxu0 %v2300_v29 }
 0x42f   : > { %1946 = vmatprep.subr.bf16.mxu0 %v2267_v6 }
 0x488   : > { %v724_v22 = vpop.permute.xlu0 %723 }
 0x4f4   : > { %v692_v1 = vpop.f32.mrb[2].mxu0 }
 0x4f5   : > { %v699_v2 = vrot.slane %v692_v1, 6  ;;  %v694_v3 = vpop.f32.mrb[3].mxu0 }
 0x4f6   : > { %v700_v8 = vrot.slane %v694_v3, 6 }
 0x4f7   : > { %v703_v5 = vadd.f32 %v699_v2, %v2330_v31 }
 0x4f8   : > { %v704_v9 = vadd.f32 %v700_v8, %v2333_v36 }
 0x4f9   : > { %v1811_v7 = vmul.f32 -1.442695, %v703_v5 }
 0x4fa   : > { %v1812_v20 = vmul.f32 -1.442695, %v704_v9 }
 0x4fb   : > { %2041 = vpow2.f32 %v1811_v7 }
 0x4fc   : > { %2043 = vtanh.f32 %v704_v9 }
 0x505   : > { %v2042_v12 = vpop.eup %2041 }
 0x506   : > { %v708_v13 = vadd.f32 1.0, %v2042_v12  ;;  %v2044_v14 = vpop.eup %2043 }
 0x508   : > { %2045 = vrcp.f32 %v708_v13 }
 0x509   : > { %2047 = vpow2.f32 %v1812_v20 }
 0x512   : > { %v2046_v16 = vpop.eup %2045 }
 0x513   : > { %v727_v19 = vmul.f32 %v2046_v16, %v2044_v14  ;;  %v2048_v21 = vpop.eup %2047  ;;  %v726_v24 = vmul.f32 %v2046_v16, %v724_v22 }
 0x514   : > { %v715_v23 = vadd.f32 1.0, %v2048_v21 }
 0x515   : > { %729 = vrot.lane.b32.xlu1 %v727_v19, %s2173_s11 }
 0x516   : > { %2049 = vrcp.f32 %v715_v23 }
 0x520   : > { %v2050_v34 = vpop.eup %2049 }
 0x587   : > { %v730_v27 = vpop.permute.xlu1 %729 }
 0x588   : > { %v732_v28 = vadd.f32 %v730_v27, %v726_v24 }
 0x58a   : > { %2051 = vtanh.f32 %v732_v28  ;;  %v772_v30 = vrot.slane %v732_v28, %v2338_v55 }
 0x58c   : > { %v779_v32 = vrot.slane %v772_v30, %v2338_v55 }
 0x58e   : > { %v780_v33 = vcombine.high %v779_v32, %v779_v32 }
 0x590   : > { %781 = vrot.lane.b32.xlu1 %v780_v33, %s2173_s11 }
 0x594   : > { %v2052_v35 = vpop.eup %2051 }
 0x595   : > { %v734_v37 = vmul.f32 %v2052_v35, %v2050_v34  ;;  %v1821_v35 = vsel %vm903_vm15, 1.0, %v2172_v0  ;;  %vm1843_vm15 = vcmp.le.s32.totalorder %v2354_v61, 7 }
 0x597   : > { %v749_v38 = vrot.slane %v734_v37, %v2338_v55  ;;  %v927_v37 = vsub.f32 1.0, %v1821_v35 }
 0x599   : > { %v756_v39 = vrot.slane %v749_v38, %v2338_v55 }
 0x59b   : > { %v757_v40 = vcombine.high %v756_v39, %v756_v39 }
 0x59d   : > { %758 = vrot.lane.b32.xlu0 %v757_v40, %s2173_s11 }
 0x602   : > { %v782_v43 = vpop.permute.xlu1 %781 }
 0x603   : > { %v784_v45 = vmul.f32 %v1815_v41, %v782_v43 }
 0x605   : > { %v2421_v46 = vadd.f32 %v785_v44, %v784_v45 }
 0x607   : > { %v886_v47 = vrot.slane %v2421_v46, %v2274_v15  ;;  %v951_v39 = vmul.f32 %v927_v37, %v2421_v46 }
 0x609   : > { %887 = vrot.lane.b32.xlu0 %v886_v47, %s2173_s11 }
 0x60f   : > { %v759_v49 = vpop.permute.xlu0 %758 }
 0x610   : > { %v761_v51 = vmul.f32 %v1815_v41, %v759_v49 }
 0x612   : > { %v2428_v52 = vadd.f32 %v763_v50, %v761_v51  ;;  %v1627_v53 = vrot.slane %v761_v51, %v2274_v15 }
 0x614   : > { %v2432_v56 = vsel %vm1661_vm12, %v1660_v54, %v1627_v53  ;;  %1816 = vmatmul.mubr.msk.f32.vlgmr.msra.gmra.mrb[2].mxu1 %vm303_vm1, %v2428_v52  ;;  %v928_v44 = vmul.f32 %v927_v37, %v2428_v52  ;;  %vm1838_vm12 = vcmp.gt.s32.totalorder %v2356_v62, 6 }
 0x615   : > { %1932 = vmatpush1.bf16.msra.mxu1 %v2269_v10  ;;  %1184 = vmatprep.mubr.f32.mxu1 %v2172_v0  ;;  %vm1399_vm13 = vmand %vm1837_vm11, %vm1838_vm12 }
 0x616   : > { %1934 = vmatprep.subr.bf16.mxu1 %v2271_v11 }
 0x619   : > { %1936 = vmatpush1.bf16.msra.mxu1 %v2279_v17 }
 0x61a   : > { %1938 = vmatprep.subr.bf16.mxu1 %v2283_v18 }
 0x61d   : > { %1940 = vmatpush1.bf16.msra.mxu1 %v2291_v25 }
 0x61e   : > { %1942 = vmatprep.subr.bf16.mxu1 %v2295_v26 }
 0x621   : > { %1944 = vmatpush1.bf16.msra.mxu1 %v2300_v29 }
 0x622   : > { %1962 = vmatprep.subr.bf16.mxu1 %v2267_v6 }
 0x67b   : > { %v888_v12 = vpop.permute.xlu0 %887 }
 0x6e7   : > { %v856_v4 = vpop.f32.mrb[2].mxu1 }
 0x6e8   : > { %v863_v57 = vrot.slane %v856_v4, 5  ;;  %v858_v58 = vpop.f32.mrb[3].mxu1 }
 0x6e9   : > { %v864_v63 = vrot.slane %v858_v58, 5 }
 0x6ea   : > { %v867_v59 = vadd.f32 %v863_v57, %v2330_v31 }
 0x6eb   : > { %v868_v1 = vadd.f32 %v864_v63, %v2333_v36 }
 0x6ec   : > { %v1817_v60 = vmul.f32 -1.442695, %v867_v59 }
 0x6ed   : > { %v1818_v6 = vmul.f32 -1.442695, %v868_v1 }
 0x6ee   : > { %2053 = vpow2.f32 %v1817_v60 }
 0x6ef   : > { %2055 = vtanh.f32 %v868_v1 }
 0x6f8   : > { %v2054_v2 = vpop.eup %2053 }
 0x6f9   : > { %v872_v3 = vadd.f32 1.0, %v2054_v2  ;;  %v2056_v5 = vpop.eup %2055 }
 0x6fb   : > { %2057 = vrcp.f32 %v872_v3 }
 0x6fc   : > { %2059 = vpow2.f32 %v1818_v6 }
 0x705   : > { %v2058_v7 = vpop.eup %2057 }
 0x706   : > { %v891_v8 = vmul.f32 %v2058_v7, %v2056_v5  ;;  %v2060_v9 = vpop.eup %2059  ;;  %v890_v14 = vmul.f32 %v2058_v7, %v888_v12 }
 0x707   : > { %v879_v13 = vadd.f32 1.0, %v2060_v9 }
 0x708   : > { %893 = vrot.lane.b32.xlu1 %v891_v8, %s2173_s11 }
 0x709   : > { %2061 = vrcp.f32 %v879_v13 }
 0x713   : > { %v2062_v24 = vpop.eup %2061 }
 0x77a   : > { %v894_v16 = vpop.permute.xlu1 %893 }
 0x77b   : > { %v896_v19 = vadd.f32 %v894_v16, %v890_v14 }
 0x77d   : > { %2063 = vtanh.f32 %v896_v19  ;;  %v937_v20 = vrot.slane %v896_v19, %v2338_v55 }
 0x77f   : > { %v938_v21 = vcombine.high %v937_v20, %v937_v20 }
 0x781   : > { %v945_v22 = vrot.slane %v938_v21, %v2338_v55 }
 0x783   : > { %v946_v23 = vcombine.high %v945_v22, %v945_v22  ;;  %v1827_v22 = vsel %vm1069_vm5, 1.0, %v2172_v0 }
 0x785   : > { %947 = vrot.lane.b32.xlu1 %v946_v23, %s2173_s11  ;;  %v1092_v23 = vsub.f32 1.0, %v1827_v22 }
 0x787   : > { %v2064_v27 = vpop.eup %2063 }
 0x788   : > { %v898_v28 = vmul.f32 %v2064_v27, %v2062_v24 }
 0x78a   : > { %v913_v30 = vrot.slane %v898_v28, %v2338_v55 }
 0x78c   : > { %v914_v32 = vcombine.high %v913_v30, %v913_v30 }
 0x78e   : > { %v921_v33 = vrot.slane %v914_v32, %v2338_v55 }
 0x790   : > { %v922_v34 = vcombine.high %v921_v33, %v921_v33 }
 0x792   : > { %923 = vrot.lane.b32.xlu0 %v922_v34, %s2173_s11 }
 0x7f7   : > { %v948_v38 = vpop.permute.xlu1 %947 }
 0x7f8   : > { %v950_v40 = vmul.f32 %v1821_v35, %v948_v38 }
 0x7fa   : > { %v952_v41 = vadd.f32 %v951_v39, %v950_v40 }
 0x7fc   : > { %v1052_v42 = vrot.slane %v952_v41, %v2274_v15  ;;  %v1115_v27 = vmul.f32 %v1092_v23, %v952_v41 }
 0x7fe   : > { %1053 = vrot.lane.b32.xlu0 %v1052_v42, %s2173_s11 }
 0x804   : > { %v924_v43 = vpop.permute.xlu0 %923 }
 0x805   : > { %v926_v45 = vmul.f32 %v1821_v35, %v924_v43 }
 0x807   : > { %v929_v47 = vadd.f32 %v928_v44, %v926_v45  ;;  %v1633_v48 = vrot.slane %v926_v45, %v2274_v15 }
 0x809   : > { %v2463_v49 = vsel %vm1663_vm2, %v2432_v56, %v1633_v48  ;;  %1822 = vmatmul.mubr.msk.f32.vlgmr.msra.gmra.mrb[4].mxu0 %vm303_vm1, %v929_v47  ;;  %v1093_v34 = vmul.f32 %v1092_v23, %v929_v47  ;;  %vm1844_vm2 = vcmp.gt.s32.totalorder %v2356_v62, 7 }
 0x80a   : > { %1948 = vmatpush1.bf16.msra.mxu0 %v2269_v10  ;;  %1350 = vmatprep.mubr.f32.mxu0 %v2172_v0  ;;  %vm1565_vm3 = vmand %vm1843_vm15, %vm1844_vm2 }
 0x80b   : > { %1950 = vmatprep.subr.bf16.mxu0 %v2271_v11 }
 0x80e   : > { %1952 = vmatpush1.bf16.msra.mxu0 %v2279_v17 }
 0x80f   : > { %1954 = vmatprep.subr.bf16.mxu0 %v2283_v18 }
 0x812   : > { %1956 = vmatpush1.bf16.msra.mxu0 %v2291_v25 }
 0x813   : > { %1958 = vmatprep.subr.bf16.mxu0 %v2295_v26 }
 0x816   : > { %1960 = vmatpush1.bf16.msra.mxu0 %v2300_v29 }
 0x870   : > { %v1054_v2 = vpop.permute.xlu0 %1053 }
 0x8dc   : > { %v1022_v46 = vpop.f32.mrb[4].mxu0 }
 0x8dd   : > { %v1029_v50 = vrot.slane %v1022_v46, 4  ;;  %v1024_v51 = vpop.f32.mrb[5].mxu0 }
 0x8de   : > { %v1030_v54 = vrot.slane %v1024_v51, 4 }
 0x8df   : > { %v1033_v52 = vadd.f32 %v1029_v50, %v2330_v31 }
 0x8e0   : > { %v1034_v56 = vadd.f32 %v1030_v54, %v2333_v36 }
 0x8e1   : > { %v1823_v53 = vmul.f32 -1.442695, %v1033_v52 }
 0x8e2   : > { %v1824_v63 = vmul.f32 -1.442695, %v1034_v56 }
 0x8e3   : > { %2065 = vpow2.f32 %v1823_v53 }
 0x8e4   : > { %2067 = vtanh.f32 %v1034_v56 }
 0x8ed   : > { %v2066_v4 = vpop.eup %2065 }
 0x8ee   : > { %v1038_v57 = vadd.f32 1.0, %v2066_v4  ;;  %v2068_v58 = vpop.eup %2067 }
 0x8f0   : > { %2069 = vrcp.f32 %v1038_v57 }
 0x8f1   : > { %2071 = vpow2.f32 %v1824_v63 }
 0x8fa   : > { %v2070_v59 = vpop.eup %2069 }
 0x8fb   : > { %v1057_v60 = vmul.f32 %v2070_v59, %v2068_v58  ;;  %v2072_v1 = vpop.eup %2071  ;;  %v1056_v5 = vmul.f32 %v2070_v59, %v1054_v2  ;;  %v1833_v2 = vsel %vm1233_vm9, 1.0, %v2172_v0 }
 0x8fc   : > { %v1045_v3 = vadd.f32 1.0, %v2072_v1 }
 0x8fd   : > { %1059 = vrot.lane.b32.xlu1 %v1057_v60, %s2173_s11 }
 0x8fe   : > { %2073 = vrcp.f32 %v1045_v3  ;;  %v1257_v3 = vsub.f32 1.0, %v1833_v2 }
 0x908   : > { %v2074_v13 = vpop.eup %2073 }
 0x96f   : > { %v1060_v7 = vpop.permute.xlu1 %1059 }
 0x970   : > { %v1062_v8 = vadd.f32 %v1060_v7, %v1056_v5 }
 0x972   : > { %2075 = vtanh.f32 %v1062_v8  ;;  %v1096_v6 = vcombine.high %v1062_v8, %v1062_v8 }
 0x974   : > { %v1103_v9 = vrot.slane %v1096_v6, %v2338_v55 }
 0x976   : > { %v1110_v12 = vrot.slane %v1103_v9, %v2338_v55 }
 0x978   : > { %1111 = vrot.lane.b32.xlu1 %v1110_v12, %s2173_s11 }
 0x97c   : > { %v2076_v14 = vpop.eup %2075 }
 0x97d   : > { %v1064_v16 = vmul.f32 %v2076_v14, %v2074_v13 }
 0x97f   : > { %v1073_v19 = vcombine.high %v1064_v16, %v1064_v16 }
 0x981   : > { %v1080_v20 = vrot.slane %v1073_v19, %v2338_v55 }
 0x983   : > { %v1087_v21 = vrot.slane %v1080_v20, %v2338_v55 }
 0x985   : > { %1088 = vrot.lane.b32.xlu0 %v1087_v21, %s2173_s11 }
 0x9ea   : > { %v1112_v24 = vpop.permute.xlu1 %1111 }
 0x9eb   : > { %v1114_v28 = vmul.f32 %v1827_v22, %v1112_v24 }
 0x9ed   : > { %v2486_v30 = vadd.f32 %v1115_v27, %v1114_v28 }
 0x9ef   : > { %v1216_v32 = vrot.slane %v2486_v30, %v2274_v15  ;;  %v1281_v7 = vmul.f32 %v1257_v3, %v2486_v30 }
 0x9f1   : > { %1217 = vrot.lane.b32.xlu0 %v1216_v32, %s2173_s11 }
 0x9f7   : > { %v1089_v33 = vpop.permute.xlu0 %1088 }
 0x9f8   : > { %v1091_v35 = vmul.f32 %v1827_v22, %v1089_v33 }
 0x9fa   : > { %v2491_v37 = vadd.f32 %v1093_v34, %v1091_v35  ;;  %v1639_v38 = vrot.slane %v1091_v35, %v2274_v15 }
 0x9fc   : > { %v2495_v39 = vsel %vm1665_vm6, %v2463_v49, %v1639_v38  ;;  %1828 = vmatmul.mubr.msk.f32.vlgmr.msra.gmra.mrb[4].mxu1 %vm303_vm1, %v2491_v37  ;;  %v1258_v13 = vmul.f32 %v1257_v3, %v2491_v37 }
 0x9fd   : > { %1964 = vmatpush1.bf16.msra.mxu1 %v2269_v10  ;;  %1516 = vmatprep.mubr.f32.mxu1 %v2172_v0 }
 0x9fe   : > { %1966 = vmatprep.subr.bf16.mxu1 %v2271_v11 }
 0xa01   : > { %1968 = vmatpush1.bf16.msra.mxu1 %v2279_v17 }
 0xa02   : > { %1970 = vmatprep.subr.bf16.mxu1 %v2283_v18 }
 0xa05   : > { %1972 = vmatpush1.bf16.msra.mxu1 %v2291_v25 }
 0xa06   : > { %1974 = vmatprep.subr.bf16.mxu1 %v2295_v26 }
 0xa09   : > { %1976 = vmatpush1.bf16.msra.mxu1 %v2300_v29 }
 0xa63   : > { %v1218_v48 = vpop.permute.xlu0 %1217 }
 0xacf   : > { %v1186_v40 = vpop.f32.mrb[4].mxu1 }
 0xad0   : > { %v1193_v41 = vrot.slane %v1186_v40, 3  ;;  %v1188_v42 = vpop.f32.mrb[5].mxu1 }
 0xad1   : > { %v1194_v44 = vrot.slane %v1188_v42, 3 }
 0xad2   : > { %v1197_v43 = vadd.f32 %v1193_v41, %v2330_v31 }
 0xad3   : > { %v1198_v11 = vadd.f32 %v1194_v44, %v2333_v36 }
 0xad4   : > { %v1829_v10 = vmul.f32 -1.442695, %v1197_v43 }
 0xad5   : > { %v1830_v26 = vmul.f32 -1.442695, %v1198_v11 }
 0xad6   : > { %2077 = vpow2.f32 %v1829_v10 }
 0xad7   : > { %2079 = vtanh.f32 %v1198_v11 }
 0xae0   : > { %v2078_v45 = vpop.eup %2077 }
 0xae1   : > { %v1202_v17 = vadd.f32 1.0, %v2078_v45  ;;  %v2080_v18 = vpop.eup %2079 }
 0xae3   : > { %2081 = vrcp.f32 %v1202_v17 }
 0xae4   : > { %2083 = vpow2.f32 %v1830_v26 }
 0xaed   : > { %v2082_v25 = vpop.eup %2081 }
 0xaee   : > { %v1221_v47 = vmul.f32 %v2082_v25, %v2080_v18  ;;  %v2084_v29 = vpop.eup %2083  ;;  %v1220_v46 = vmul.f32 %v2082_v25, %v1218_v48 }
 0xaef   : > { %v1209_v49 = vadd.f32 1.0, %v2084_v29 }
 0xaf0   : > { %1223 = vrot.lane.b32.xlu1 %v1221_v47, %s2173_s11 }
 0xaf1   : > { %2085 = vrcp.f32 %v1209_v49 }
 0xafb   : > { %v2086_v4 = vpop.eup %2085 }
 0xb62   : > { %v1224_v50 = vpop.permute.xlu1 %1223 }
 0xb63   : > { %v1226_v51 = vadd.f32 %v1224_v50, %v1220_v46  ;;  %v1839_v46 = vsel %vm1399_vm13, 1.0, %v2172_v0 }
 0xb64   : > { %v1423_v50 = vsub.f32 1.0, %v1839_v46 }
 0xb65   : > { %2087 = vtanh.f32 %v1226_v51  ;;  %v1261_v52 = vcombine.high %v1226_v51, %v1226_v51 }
 0xb67   : > { %v1268_v53 = vrot.slane %v1261_v52, %v2338_v55 }
 0xb69   : > { %v1269_v54 = vcombine.high %v1268_v53, %v1268_v53 }
 0xb6b   : > { %v1276_v56 = vrot.slane %v1269_v54, %v2338_v55 }
 0xb6d   : > { %1277 = vrot.lane.b32.xlu1 %v1276_v56, %s2173_s11 }
 0xb6f   : > { %v2088_v57 = vpop.eup %2087 }
 0xb70   : > { %v1228_v58 = vmul.f32 %v2088_v57, %v2086_v4 }
 0xb72   : > { %v1237_v59 = vcombine.high %v1228_v58, %v1228_v58 }
 0xb74   : > { %v1244_v60 = vrot.slane %v1237_v59, %v2338_v55 }
 0xb76   : > { %v1245_v63 = vcombine.high %v1244_v60, %v1244_v60 }
 0xb78   : > { %v1252_v1 = vrot.slane %v1245_v63, %v2338_v55 }
 0xb7a   : > { %1253 = vrot.lane.b32.xlu0 %v1252_v1, %s2173_s11 }
 0xbdf   : > { %v1278_v5 = vpop.permute.xlu1 %1277 }
 0xbe0   : > { %v1280_v8 = vmul.f32 %v1833_v2, %v1278_v5 }
 0xbe2   : > { %v1282_v6 = vadd.f32 %v1281_v7, %v1280_v8 }
 0xbe4   : > { %v1382_v9 = vrot.slane %v1282_v6, %v2274_v15  ;;  %v1447_v52 = vmul.f32 %v1423_v50, %v1282_v6 }
 0xbe6   : > { %1383 = vrot.lane.b32.xlu0 %v1382_v9, %s2173_s11 }
 0xbec   : > { %v1254_v12 = vpop.permute.xlu0 %1253 }
 0xbed   : > { %v1256_v14 = vmul.f32 %v1833_v2, %v1254_v12 }
 0xbef   : > { %v1259_v16 = vadd.f32 %v1258_v13, %v1256_v14  ;;  %v1645_v19 = vrot.slane %v1256_v14, %v2274_v15 }
 0xbf1   : > { %v1668_v20 = vsel %vm1667_vm10, %v2495_v39, %v1645_v19  ;;  %1834 = vmatmul.mubr.msk.f32.vlgmr.msra.gmra.mrb[6].mxu0 %vm303_vm1, %v1259_v16  ;;  %v1424_v57 = vmul.f32 %v1423_v50, %v1259_v16 }
 0xc58   : > { %v1384_v40 = vpop.permute.xlu0 %1383 }
 0xcc4   : > { %v1352_v21 = vpop.f32.mrb[6].mxu0 }
 0xcc5   : > { %v1359_v22 = vrot.slane %v1352_v21, 2  ;;  %v1354_v23 = vpop.f32.mrb[7].mxu0 }
 0xcc6   : > { %v1360_v28 = vrot.slane %v1354_v23, 2 }
 0xcc7   : > { %v1363_v24 = vadd.f32 %v1359_v22, %v2330_v31 }
 0xcc8   : > { %v1364_v30 = vadd.f32 %v1360_v28, %v2333_v36 }
 0xcc9   : > { %v1835_v27 = vmul.f32 -1.442695, %v1363_v24 }
 0xcca   : > { %v1836_v38 = vmul.f32 -1.442695, %v1364_v30 }
 0xccb   : > { %2089 = vpow2.f32 %v1835_v27 }
 0xccc   : > { %2091 = vtanh.f32 %v1364_v30 }
 0xcd5   : > { %v2090_v32 = vpop.eup %2089 }
 0xcd6   : > { %v1368_v33 = vadd.f32 1.0, %v2090_v32  ;;  %v2092_v34 = vpop.eup %2091 }
 0xcd8   : > { %2093 = vrcp.f32 %v1368_v33 }
 0xcd9   : > { %2095 = vpow2.f32 %v1836_v38 }
 0xce2   : > { %v2094_v35 = vpop.eup %2093 }
 0xce3   : > { %v1387_v37 = vmul.f32 %v2094_v35, %v2092_v34  ;;  %v2096_v39 = vpop.eup %2095  ;;  %v1386_v42 = vmul.f32 %v2094_v35, %v1384_v40 }
 0xce4   : > { %v1375_v41 = vadd.f32 1.0, %v2096_v39 }
 0xce5   : > { %1389 = vrot.lane.b32.xlu1 %v1387_v37, %s2173_s11 }
 0xce6   : > { %2097 = vrcp.f32 %v1375_v41 }
 0xcf0   : > { %v2098_v18 = vpop.eup %2097 }
 0xd57   : > { %v1390_v43 = vpop.permute.xlu1 %1389 }
 0xd58   : > { %v1392_v10 = vadd.f32 %v1390_v43, %v1386_v42  ;;  %v1845_v42 = vsel %vm1565_vm3, 1.0, %v2172_v0 }
 0xd59   : > { %v1590_v43 = vsub.f32 1.0, %v1845_v42 }
 0xd5a   : > { %2099 = vtanh.f32 %v1392_v10  ;;  %v1427_v44 = vcombine.high %v1392_v10, %v1392_v10 }
 0xd5c   : > { %v1434_v11 = vrot.slane %v1427_v44, %v2338_v55 }
 0xd5e   : > { %v1441_v45 = vrot.slane %v1434_v11, %v2338_v55 }
 0xd60   : > { %v1442_v17 = vcombine.high %v1441_v45, %v1441_v45 }
 0xd62   : > { %1443 = vrot.lane.b32.xlu1 %v1442_v17, %s2173_s11 }
 0xd64   : > { %v2100_v25 = vpop.eup %2099 }
 0xd65   : > { %v1394_v47 = vmul.f32 %v2100_v25, %v2098_v18 }
 0xd67   : > { %v1403_v26 = vcombine.high %v1394_v47, %v1394_v47 }
 0xd69   : > { %v1410_v29 = vrot.slane %v1403_v26, %v2338_v55 }
 0xd6b   : > { %v1417_v48 = vrot.slane %v1410_v29, %v2338_v55 }
 0xd6d   : > { %v1418_v49 = vcombine.high %v1417_v48, %v1417_v48 }
 0xd6f   : > { %1419 = vrot.lane.b32.xlu0 %v1418_v49, %s2173_s11 }
 0xdd4   : > { %v1444_v51 = vpop.permute.xlu1 %1443 }
 0xdd5   : > { %v1446_v53 = vmul.f32 %v1839_v46, %v1444_v51 }
 0xdd7   : > { %v1448_v54 = vadd.f32 %v1447_v52, %v1446_v53 }
 0xdd9   : > { %v1548_v56 = vrot.slane %v1448_v54, %v2274_v15  ;;  %v1615_v44 = vmul.f32 %v1590_v43, %v1448_v54 }
 0xddb   : > { %1549 = vrot.lane.b32.xlu0 %v1548_v56, %s2173_s11 }
 0xde1   : > { %v1420_v4 = vpop.permute.xlu0 %1419 }
 0xde2   : > { %v1422_v58 = vmul.f32 %v1839_v46, %v1420_v4 }
 0xde4   : > { %v1425_v59 = vadd.f32 %v1424_v57, %v1422_v58  ;;  %v1651_v60 = vrot.slane %v1422_v58, %v2274_v15 }
 0xde6   : > { %v1670_v63 = vsel %vm1669_vm14, %v1668_v20, %v1651_v60  ;;  %1840 = vmatmul.mubr.msk.f32.vlgmr.msra.gmra.mrb[6].mxu1 %vm303_vm1, %v1425_v59 }
 0xe4d   : > { %v1550_v21 = vpop.permute.xlu0 %1549 }
 0xeb9   : > { %v1518_v1 = vpop.f32.mrb[6].mxu1 }
 0xeba   : > { %v1525_v2 = vrot.slane %v1518_v1, 1  ;;  %v1520_v3 = vpop.f32.mrb[7].mxu1 }
 0xebb   : > { %v1526_v8 = vrot.slane %v1520_v3, 1 }
 0xebc   : > { %v1529_v5 = vadd.f32 %v1525_v2, %v2330_v31 }
 0xebd   : > { %v1530_v6 = vadd.f32 %v1526_v8, %v2333_v36 }
 0xebe   : > { %v1841_v7 = vmul.f32 -1.442695, %v1529_v5 }
 0xebf   : > { %v1842_v19 = vmul.f32 -1.442695, %v1530_v6 }
 0xec0   : > { %2101 = vpow2.f32 %v1841_v7 }
 0xec1   : > { %2103 = vtanh.f32 %v1530_v6 }
 0xeca   : > { %v2102_v9 = vpop.eup %2101 }
 0xecb   : > { %v1534_v12 = vadd.f32 1.0, %v2102_v9  ;;  %v2104_v13 = vpop.eup %2103 }
 0xecd   : > { %2105 = vrcp.f32 %v1534_v12 }
 0xece   : > { %2107 = vpow2.f32 %v1842_v19 }
 0xed7   : > { %v2106_v14 = vpop.eup %2105 }
 0xed8   : > { %v1553_v16 = vmul.f32 %v2106_v14, %v2104_v13  ;;  %v2108_v20 = vpop.eup %2107  ;;  %v1552_v31 = vmul.f32 %v2106_v14, %v1550_v21 }
 0xed9   : > { %v1541_v22 = vadd.f32 1.0, %v2108_v20 }
 0xeda   : > { %1555 = vrot.lane.b32.xlu1 %v1553_v16, %s2173_s11 }
 0xedb   : > { %2109 = vrcp.f32 %v1541_v22 }
 0xee5   : > { %v2110_v33 = vpop.eup %2109 }
 0xf4c   : > { %v1556_v23 = vpop.permute.xlu1 %1555 }
 0xf4d   : > { %v1558_v24 = vadd.f32 %v1556_v23, %v1552_v31 }
 0xf4f   : > { %2111 = vtanh.f32 %v1558_v24  ;;  %v1594_v36 = vcombine.high %v1558_v24, %v1558_v24 }
 0xf51   : > { %v1601_v27 = vrot.slane %v1594_v36, %v2338_v55 }
 0xf53   : > { %v1602_v28 = vcombine.high %v1601_v27, %v1601_v27 }
 0xf55   : > { %v1609_v30 = vrot.slane %v1602_v28, %v2338_v55 }
 0xf57   : > { %v1610_v32 = vcombine.high %v1609_v30, %v1609_v30 }
 0xf59   : > { %v2112_v34 = vpop.eup %2111  ;;  %1611 = vrot.lane.b32.xlu1 %v1610_v32, %s2173_s11 }
 0xf5a   : > { %v1560_v35 = vmul.f32 %v2112_v34, %v2110_v33 }
 0xf5c   : > { %v1569_v37 = vcombine.high %v1560_v35, %v1560_v35 }
 0xf5e   : > { %v1576_v38 = vrot.slane %v1569_v37, %v2338_v55 }
 0xf60   : > { %v1577_v39 = vcombine.high %v1576_v38, %v1576_v38 }
 0xf62   : > { %v1584_v40 = vrot.slane %v1577_v39, %v2338_v55  ;;  %v1591_v55 = vmul.f32 %v1590_v43, %v1425_v59 }
 0xf64   : > { %v1585_v41 = vcombine.high %v1584_v40, %v1584_v40 }
 0xf66   : > { %1586 = vrot.lane.b32.xlu0 %v1585_v41, %s2173_s11 }
 0xfcb   : > { %v1612_v10 = vpop.permute.xlu1 %1611 }
 0xfcc   : > { %v1614_v11 = vmul.f32 %v1845_v42, %v1612_v10 }
 0xfce   : > { %v1616_v45 = vadd.f32 %v1615_v44, %v1614_v11 }
 0xfd0   : > { %1676 = vst.msk [vmem:[#allocation3] sm:$0x1] %vm277_vm0, %v1616_v45 }
 0xfd8   : > { %v1587_v17 = vpop.permute.xlu0 %1586 }
 0xfd9   : > { %v1589_v18 = vmul.f32 %v1845_v42, %v1587_v17 }
 0xfdb   : > { %v1592_v61 = vadd.f32 %v1591_v55, %v1589_v18  ;;  %v1657_v62 = vrot.slane %v1589_v18, %v2274_v15 }
 0xfdd   : > { %v1672_v0 = vsel %vm1671_vm4, %v1670_v63, %v1657_v62  ;;  %1675 = vst.msk [vmem:[#allocation2] sm:$0x1] %vm277_vm0, %v1592_v61 }
 0xfde   : > { %1673 = vst.msk [vmem:[%s272_s29] sm:$0xff] %vm303_vm1, %v1672_v0 }
 0xfdf PF: > { %s15_s17 = sadd.s32 1, %s2167_s17   ;;  %s2584_s15 = smov %s2163_s16 }
 0xfe0   : > { %p12_p4 = scmp.ge.s32.totalorder %s15_s17, 4   ;;  %s2585_s16 = smov %s2587_s19 }
 0xfe2   :  { %14 = sbr.rel (!%p12_p4) target bundleno = 2 (0x2), region = 81 }
 0xfe9   :  { %1702 = vsyncpa [#allocation5], 1 }
 0xfea   :  { %1704 = vsyncpa [#allocation5 + $0x1], 1 }

// kernel: final_lstm_forward.15
= control target key start
LH: loop header
LB: loop body
LE: loop exit
PB: predicated region body
PF: predicated region fallthrough
CT: control target
= control target key end

     0   :  { %9 = vsyncpa [#allocation3], 0  ;;  %s1089_s0 = inlined_call_operand.vmem [shape: f32[2,128], index: 0, kind: input, shape index: {}]   ;;  %s1090_s1 = inlined_call_operand.hbm [shape: bf16[128,4096], index: 1, kind: input, shape index: {}]   ;;  %s1091_s2 = inlined_call_operand.vmem [shape: f32[1,4096], index: 2, kind: input, shape index: {}]   ;;  %s1092_s3 = inlined_call_operand.vmem [shape: f32[1,4096], index: 3, kind: input, shape index: {}]   ;;  %s1093_s4 = inlined_call_operand.vmem [shape: f32[2,4096], index: 4, kind: output, shape index: {}]  }
   0x1   :  { %11 = vsyncpa [#allocation3 + $0x1], 0  ;;  %s936_s15 = smov 0   ;;  %s938_s16 = smov 0  }
   0x2   :  { %s940_s17 = smov 0   ;;  %s942_s18 = smov 0  }
   0x3 LB: > { %s699_s19 = sadd.s32 4294967295, %s903_s18   ;;  %s956_s20 = sadd.s32 1, %s903_s18   ;;  %s903_s18 = sphi %s942_s18, %s1099_s18   ;;  %s899_s17 = sphi %s940_s17, %s1098_s17   ;;  %s895_s16 = sphi %s938_s16, %s1097_s16   ;;  %s891_s15 = sphi %s936_s15, %s1096_s15  }
   0x4   : > { %s42_s21 = ssub.s32 %s903_s18, %s956_s20  ;;  %s45_s22 = sadd.s32 1, %s899_s17 }
   0x5   : > { %p43_p0 = scmp.eq.s32.totalorder %s42_s21, 0  ;;  %p52_p1 = scmp.ne.s32.totalorder %s899_s17, %s895_s16 }
   0x6   : > { %p53_p2 = scmp.eq.s32.totalorder %s903_s18, 0  ;;  %p58_p3 = scmp.ne.s32.totalorder %s895_s16, %s891_s15 }
   0x7   : > { %s966_s23 = scalar_select %p43_p0, %s899_s17, %s45_s22  }
   0x8   : > { %p54_p4 = por %p53_p2, %p52_p1  ;;  %p59_p5 = scmp.eq.s32.totalorder %s699_s19, 0 }
   0x9   : > { %p753_p6 = scmp.lt.s32.totalorder %s903_s18, 8  ;;  %s163_s25 = sand.u32 1, %s899_s17  }
   0xa   : > { %p971_p7 = por %p59_p5, %p58_p3  ;;  %s703_s26 = sshll.u32 %s163_s25, 8 }
   0xb   : > { %s746_s27 = sshll.u32 %s903_s18, 8  ;;  %s167_s5 = scalar_lea.vmem [#allocation2], %s703_s26 }
   0xc   : > { %s980_s30 = scalar_lea.hbm %s1090_s1, %s746_s27  ;;  %s174_s6 = sshll.u32 %s167_s5, 4  ;;  %s982_s6 = int_to_ptr.vmem [resolvable:$true] %s174_s6 }
   0xd   : > { %p984_p8 = pnand %p753_p6, %p54_p4  ;;  %s988_s8 = scalar_lea.sflag [#allocation3], %s163_s25 }
   0xe   : > { %s839_s9 = scalar_lea.hbm %s980_s30, 4096  ;;  %s844_s12 = scalar_lea.hbm %s1090_s1, 32768 }
   0xf   : > { %p840_p9 = scmp.ne.s32.totalorder %s980_s30, %s839_s9  ;;  %p841_p10 = pneg %p984_p8 }
  0x10   : > { %p845_p13 = scmp.lt.u32.totalorder %s980_s30, %s1090_s1  ;;  %p846_p0 = scmp.lt.u32.totalorder %s844_s12, %s839_s9 }
  0x11   : > { %p842_p11 = pnand %p841_p10, %p840_p9  ;;  %p848_p2 = scmp.lt.u32.totalorder %s839_s9, %s980_s30 }
  0x12   : > { %p847_p1 = por %p846_p0, %p845_p13 }
  0x13   : > { %p843_p12 = pneg %p842_p11 }
  0x14   : > { %p849_p3 = por %p848_p2, %p847_p1 }
  0x16   : > { %p850_p4 = pnand %p849_p3, %p843_p12 }
  0x18   : > { %853 = shalt.err (!%p850_p4)
}
  0x19   : > { %s854_s15 = scalar_lea.vmem %s982_s6, 4096  ;;  %s905_s21 = smov [#allocation2]  }
  0x1a   : > { %p855_p5 = scmp.ne.s32.totalorder %s982_s6, %s854_s15  ;;  %s859_s22 = sshll.u32 %s905_s21, 4  ;;  %s860_s22 = int_to_ptr.vmem [resolvable:$false] %s859_s22 }
  0x1b   : > { %s861_s25 = scalar_lea.vmem %s860_s22, 8192  ;;  %p862_p11 = scmp.lt.s32.totalorder %s982_s6, %s860_s22 }
  0x1c   : > { %p857_p6 = pnand %p855_p5, %p841_p10  ;;  %p863_p13 = scmp.lt.s32.totalorder %s861_s25, %s854_s15 }
  0x1e   : > { %p858_p9 = pneg %p857_p6  ;;  %p864_p0 = por %p863_p13, %p862_p11 }
  0x20   : > { %p865_p1 = pnand %p864_p0, %p858_p9 }
  0x22   : > { %868 = shalt.err (!%p865_p1)
}
  0x23   : > { %s906_s26 = smov 2048   ;;  %s907_s27 = smov 256  }
  0x24   : > { %s908_s28 = smov 16   ;;  %p706_p10 = scmp.ge.s32.totalorder %s903_s18, 1 }
  0x25   : > { %752 = dma.hbm_to_vmem [thread:$0]  (!%p984_p8), %s980_s30, 4096, %s982_s6, %s988_s8, %s906_s26, %s907_s27, %s908_s28  }
  0x26   : > { %p198_p12 = scmp.lt.s32.totalorder %s903_s18, 9 }
  0x28   : > { %p199_p2 = pnand %p706_p10, %p198_p12 }
  0x29   : > { %s204_s29 = sand.u32 (!%p199_p2), 1, %s895_s16  }
  0x2a   : > { %202 = sbr.rel (%p199_p2) target bundleno = 310 (0x136), region = 36  ;;  %s707_s5 = sshll.u32 (!%p199_p2), %s204_s29, 8 }
  0x2b   : > { %s205_s9 = scalar_lea.sflag (!%p199_p2), [#allocation3], %s204_s29  ;;  %s1019_s10 = scalar_lea.vmem (!%p199_p2), [#allocation2], %s707_s5 }
  0x31   : > { %886 = dma.done.wait (%p971_p7), %s205_s9, 4096  }
  0x32   : > { %888 = vsyncadd (%p971_p7), %s205_s9, 4294963200  ;;  %v909_v0 = vmov 0   ;;  %v791_v1 = vld [vmem:[%s1019_s10 + $0x4] ss:$16 sps:$4 sm:$0xff]   ;;  %v793_v2 = vld [vmem:[%s1019_s10 + $0xc] ss:$16 sps:$4 sm:$0xff]   ;;  %v537_v35 = vlaneseq }
  0x33   : > { %485 = vmatprep.mubr.bf16.mxu0 %v909_v0  ;;  %526 = vmatprep.mubr.bf16.mxu1 %v909_v0  ;;  %v795_v3 = vld [vmem:[%s1019_s10] ss:$16 sps:$4 sm:$0xff]   ;;  %v796_v4 = vld [vmem:[%s1019_s10 + $0x8] ss:$16 sps:$4 sm:$0xff]   ;;  %v797_v5 = vld [vmem:[%s1019_s10 + $0x24] ss:$16 sps:$4 sm:$0xff]  }
  0x34   : > { %453 = vmatprep.subr.bf16.mxu0 %v791_v1  ;;  %494 = vmatprep.subr.bf16.mxu1 %v793_v2  ;;  %v799_v6 = vld [vmem:[%s1019_s10 + $0x2c] ss:$16 sps:$4 sm:$0xff]   ;;  %v801_v7 = vld [vmem:[%s1019_s10 + $0x20] ss:$16 sps:$4 sm:$0xff]   ;;  %v802_v8 = vld [vmem:[%s1019_s10 + $0x28] ss:$16 sps:$4 sm:$0xff]  }
  0x35   : > { %454 = vmatpush1.bf16.msra.mxu0 %v795_v3  ;;  %495 = vmatpush1.bf16.msra.mxu1 %v796_v4  ;;  %v803_v9 = vld [vmem:[%s1019_s10 + $0x44] ss:$16 sps:$4 sm:$0xff]   ;;  %v805_v10 = vld [vmem:[%s1019_s10 + $0x4c] ss:$16 sps:$4 sm:$0xff]   ;;  %v807_v11 = vld [vmem:[%s1019_s10 + $0x40] ss:$16 sps:$4 sm:$0xff]  }
  0x36   : > { %455 = vmatprep.subr.bf16.mxu0 %v797_v5  ;;  %496 = vmatprep.subr.bf16.mxu1 %v799_v6  ;;  %v808_v12 = vld [vmem:[%s1019_s10 + $0x48] ss:$16 sps:$4 sm:$0xff]   ;;  %v809_v13 = vld [vmem:[%s1019_s10 + $0x64] ss:$16 sps:$4 sm:$0xff]   ;;  %v811_v14 = vld [vmem:[%s1019_s10 + $0x6c] ss:$16 sps:$4 sm:$0xff]  }
  0x37   : > { %v813_v15 = vld [vmem:[%s1019_s10 + $0x60] ss:$16 sps:$4 sm:$0xff]   ;;  %v814_v16 = vld [vmem:[%s1019_s10 + $0x68] ss:$16 sps:$4 sm:$0xff]   ;;  %v815_v17 = vld [vmem:[%s1019_s10 + $0x84] ss:$16 sps:$4 sm:$0xff]  }
  0x38   : > { %v817_v18 = vld [vmem:[%s1019_s10 + $0x8c] ss:$16 sps:$4 sm:$0xff]   ;;  %v819_v19 = vld [vmem:[%s1019_s10 + $0x80] ss:$16 sps:$4 sm:$0xff]   ;;  %v820_v20 = vld [vmem:[%s1019_s10 + $0x88] ss:$16 sps:$4 sm:$0xff]  }
  0x39   : > { %456 = vmatpush1.bf16.msra.mxu0 %v801_v7  ;;  %497 = vmatpush1.bf16.msra.mxu1 %v802_v8  ;;  %v821_v21 = vld [vmem:[%s1019_s10 + $0xa4] ss:$16 sps:$4 sm:$0xff]   ;;  %v823_v22 = vld [vmem:[%s1019_s10 + $0xac] ss:$16 sps:$4 sm:$0xff]   ;;  %v825_v23 = vld [vmem:[%s1019_s10 + $0xa0] ss:$16 sps:$4 sm:$0xff]  }
  0x3a   : > { %457 = vmatprep.subr.bf16.mxu0 %v803_v9  ;;  %498 = vmatprep.subr.bf16.mxu1 %v805_v10  ;;  %v826_v24 = vld [vmem:[%s1019_s10 + $0xa8] ss:$16 sps:$4 sm:$0xff]   ;;  %v827_v25 = vld [vmem:[%s1019_s10 + $0xc4] ss:$16 sps:$4 sm:$0xff]   ;;  %v829_v26 = vld [vmem:[%s1019_s10 + $0xcc] ss:$16 sps:$4 sm:$0xff]  }
  0x3b   : > { %v831_v27 = vld [vmem:[%s1019_s10 + $0xc0] ss:$16 sps:$4 sm:$0xff]   ;;  %v832_v28 = vld [vmem:[%s1019_s10 + $0xc8] ss:$16 sps:$4 sm:$0xff]   ;;  %v833_v29 = vld [vmem:[%s1019_s10 + $0xe4] ss:$16 sps:$4 sm:$0xff]  }
  0x3c   : > { %v835_v30 = vld [vmem:[%s1019_s10 + $0xec] ss:$16 sps:$4 sm:$0xff]   ;;  %v837_v31 = vld [vmem:[%s1019_s10 + $0xe0] ss:$16 sps:$4 sm:$0xff]   ;;  %v838_v32 = vld [vmem:[%s1019_s10 + $0xe8] ss:$16 sps:$4 sm:$0xff]  }
  0x3d   : > { %458 = vmatpush1.bf16.msra.mxu0 %v807_v11  ;;  %499 = vmatpush1.bf16.msra.mxu1 %v808_v12  ;;  %v259_v33 = vld [vmem:[%s1089_s0] sm:$0x3]  ;;  %s708_s6 = sshll.u32 %s699_s19, 2  ;;  %v538_v36 = vshrl.u32 %v537_v35, 7  ;;  %v910_v46 = vmov 1983009808  }
  0x3e   : > { %459 = vmatprep.subr.bf16.mxu0 %v809_v13  ;;  %500 = vmatprep.subr.bf16.mxu1 %v811_v14  ;;  %v260_v34 = vpack.c.bf16 %v259_v33, %v259_v33  ;;  %p243_p7 = scmp.lt.s32.totalorder %s708_s6, 31  ;;  %v598_v47 = vunpack.c.l.s4 %v910_v46 }
  0x3f   : > { %v539_v37 = vsub.s32 0, %v538_v36  ;;  %v547_v38 = vsub.s32 2, %v538_v36  ;;  %v543_v40 = vsub.s32 1, %v538_v36  ;;  %v551_v41 = vsub.s32 3, %v538_v36 }
  0x40   : > { %s1101_s6 = smov (!%p243_p7, %s708_s6), 31  ;;  %v599_v60 = vunpack.c.0.s8 %v598_v47 }
  0x41   : > { %460 = vmatpush1.bf16.msra.mxu0 %v813_v15  ;;  %501 = vmatpush1.bf16.msra.mxu1 %v814_v16  ;;  %s245_s11 = scalar_lea.vmem %s1091_s2, %s1101_s6  ;;  %s250_s14 = scalar_lea.vmem %s1092_s3, %s1101_s6 }
  0x42   : > { %461 = vmatprep.subr.bf16.mxu0 %v815_v17  ;;  %502 = vmatprep.subr.bf16.mxu1 %v817_v18  ;;  %v535_v39 = vld [vmem:[%s245_s11] sm:$0xf]  ;;  %v602_v9 = vsub.s32 %v599_v60, %v538_v36  ;;  %s711_s18 = sshll.u32 %s1101_s6, 1 }
  0x43   : > { %v561_v42 = vld [vmem:[%s250_s14] sm:$0xf]  ;;  %v540_v43 = vrot.slane %v535_v39, %v539_v37  ;;  %v548_v44 = vrot.slane %v535_v39, %v547_v38  ;;  %v544_v45 = vrot.slane %v535_v39, %v543_v40  ;;  %v552_v48 = vrot.slane %v535_v39, %v551_v41  ;;  %s256_s21 = scalar_lea.vmem %s1093_s4, %s711_s18 }
  0x44   : > { %v566_v49 = vrot.slane %v561_v42, %v539_v37  ;;  %v574_v50 = vrot.slane %v561_v42, %v547_v38  ;;  %v570_v53 = vrot.slane %v561_v42, %v543_v40  ;;  %v578_v54 = vrot.slane %v561_v42, %v551_v41 }
  0x45   : > { %462 = vmatpush1.bf16.msra.mxu0 %v819_v19  ;;  %503 = vmatpush1.bf16.msra.mxu1 %v820_v20 }
  0x46   : > { %463 = vmatprep.subr.bf16.mxu0 %v821_v21  ;;  %504 = vmatprep.subr.bf16.mxu1 %v823_v22 }
  0x49   : > { %464 = vmatpush1.bf16.msra.mxu0 %v825_v23  ;;  %505 = vmatpush1.bf16.msra.mxu1 %v826_v24 }
  0x4a   : > { %465 = vmatprep.subr.bf16.mxu0 %v827_v25  ;;  %506 = vmatprep.subr.bf16.mxu1 %v829_v26 }
  0x4d   : > { %466 = vmatpush1.bf16.msra.mxu0 %v831_v27  ;;  %507 = vmatpush1.bf16.msra.mxu1 %v832_v28 }
  0x4e   : > { %467 = vmatprep.subr.bf16.mxu0 %v833_v29  ;;  %508 = vmatprep.subr.bf16.mxu1 %v835_v30 }
  0x51   : > { %468 = vmatpush1.bf16.msra.mxu0 %v837_v31  ;;  %509 = vmatpush1.bf16.msra.mxu1 %v838_v32 }
  0x54   : > { %486 = vmatmul.mubr.bf16.vlgmr.msra.gmra.mrb[0].mxu0 %v260_v34  ;;  %527 = vmatmul.mubr.bf16.vlgmr.msra.gmra.mrb[0].mxu1 %v260_v34 }
 0x127   : > { %v487_v51 = vpop.f32.mrb[0].mxu0  ;;  %v528_v52 = vpop.f32.mrb[0].mxu1 }
 0x128   : > { %v557_v55 = vmul.f32 %v540_v43, %v487_v51  ;;  %v559_v56 = vmul.f32 %v548_v44, %v528_v52  ;;  %v489_v57 = vpop.f32.mrb[1].mxu0  ;;  %v530_v58 = vpop.f32.mrb[1].mxu1 }
 0x129   : > { %v558_v59 = vmul.f32 %v544_v45, %v489_v57  ;;  %v560_v61 = vmul.f32 %v552_v48, %v530_v58  ;;  %v491_v62 = vpop.f32.mrb[2].mxu0  ;;  %v532_v63 = vpop.f32.mrb[2].mxu1 }
 0x12a   : > { %v583_v0 = vadd.f32 %v566_v49, %v557_v55  ;;  %v585_v1 = vadd.f32 %v574_v50, %v559_v56  ;;  %v492_v2 = vpop.f32.mrb[3].mxu0  ;;  %v533_v3 = vpop.f32.mrb[3].mxu1 }
 0x12b   : > { %v584_v4 = vadd.f32 %v570_v53, %v558_v59  ;;  %v586_v5 = vadd.f32 %v578_v54, %v560_v61 }
 0x12c   : > { %v587_v6 = vmax.f32 %v583_v0, 0.0  ;;  %v589_v7 = vmax.f32 %v585_v1, 0.0 }
 0x12d   : > { %v588_v8 = vmax.f32 %v584_v4, 0.0  ;;  %v590_v10 = vmax.f32 %v586_v5, 0.0 }
 0x12f   : > { %v595_v11 = vcombine.low %v587_v6, %v588_v8  ;;  %v596_v12 = vcombine.low %v589_v7, %v590_v10 }
 0x131   : > { %v603_v13 = vrot.slane %v595_v11, %v602_v9  ;;  %v610_v14 = vrot.slane %v596_v12, %v602_v9 }
 0x133   : > { %v611_v15 = vcombine.low %v603_v13, %v610_v14 }
 0x135   : > { %613 = vst [vmem:[%s256_s21] sm:$0xff] %v611_v15 }
 0x136 PF: > { %p14_p8 = scmp.ge.s32.totalorder %s956_s20, 10   ;;  %s1096_s15 = smov %s895_s16 }
 0x137   : > { %s1097_s16 = smov %s899_s17  ;;  %s1098_s17 = smov %s966_s23 }
 0x138   : > { %s1099_s18 = smov %s956_s20  ;;  %16 = sbr.rel (!%p14_p8) target bundleno = 3 (0x3), region = 82 }
 0x13f   :  { %636 = vsyncpa [#allocation3], 1 }
 0x140   :  { %638 = vsyncpa [#allocation3 + $0x1], 1 }

// kernel: final_lstm_forward.17
= control target key start
LH: loop header
LB: loop body
LE: loop exit
PB: predicated region body
PF: predicated region fallthrough
CT: control target
= control target key end

     0   :  { %v31_v28 = vlaneseq  ;;  %v1967_v36 = vmov 1983009808   ;;  %s2418_s0 = inlined_call_operand.vmem [shape: f32[2,2048], index: 0, kind: input, shape index: {}]   ;;  %s2419_s1 = inlined_call_operand.vmem [shape: bf16[2048,8], index: 1, kind: input, shape index: {}]   ;;  %s2420_s2 = inlined_call_operand.vmem [shape: f32[1,8], index: 2, kind: input, shape index: {}]   ;;  %s2421_s3 = inlined_call_operand.vmem [shape: f32[1,8], index: 3, kind: input, shape index: {}]   ;;  %s2422_s4 = inlined_call_operand.hbm [shape: f32[2,8], index: 4, kind: output, shape index: {}]  }
   0x1   :  { %v1811_v0 = vld [vmem:[%s2419_s1 + $0x40] sm:$0xff]   ;;  %v1815_v4 = vld [vmem:[%s2419_s1 + $0x48] sm:$0xff]   ;;  %v1819_v8 = vld [vmem:[%s2419_s1 + $0x50] sm:$0xff]   ;;  %v29_v37 = vunpack.c.l.s4 %v1967_v36 }
   0x2   :  { %v1812_v1 = vld [vmem:[%s2419_s1 + $0xc0] sm:$0xff]   ;;  %1633 = vmatprep.subr.bf16.mxu0 %v1811_v0  ;;  %v1816_v5 = vld [vmem:[%s2419_s1 + $0xc8] sm:$0xff]   ;;  %v1820_v9 = vld [vmem:[%s2419_s1 + $0xd0] sm:$0xff]   ;;  %v32_v33 = vshrl.u32 %v31_v28, 7 }
   0x3   :  { %v1813_v2 = vld [vmem:[%s2419_s1] sm:$0xff]   ;;  %1655 = vmatprep.subr.bf16.mxu1 %v1812_v1  ;;  %v1817_v6 = vld [vmem:[%s2419_s1 + $0x8] sm:$0xff]   ;;  %v1821_v10 = vld [vmem:[%s2419_s1 + $0x10] sm:$0xff]   ;;  %v30_v39 = vunpack.c.0.s8 %v29_v37 }
   0x4   :  { %v1814_v3 = vld [vmem:[%s2419_s1 + $0x80] sm:$0xff]   ;;  %1634 = vmatpush3.bf16.msra.mxu0 %v1813_v2  ;;  %v1818_v7 = vld [vmem:[%s2419_s1 + $0x88] sm:$0xff]   ;;  %v1822_v11 = vld [vmem:[%s2419_s1 + $0x90] sm:$0xff]  }
   0x5   :  { %1656 = vmatpush3.bf16.msra.mxu1 %v1814_v3  ;;  %1635 = vmatprep.subr.bf16.mxu0 %v1815_v4  ;;  %v1823_v12 = vld [vmem:[%s2419_s1 + $0x58] sm:$0xff]   ;;  %v1827_v16 = vld [vmem:[%s2419_s1 + $0x60] sm:$0xff]   ;;  %v1831_v20 = vld [vmem:[%s2419_s1 + $0x68] sm:$0xff]   ;;  %v2099_v41 = vsub.s32 %v30_v39, %v32_v33 }
   0x6   :  { %1657 = vmatprep.subr.bf16.mxu1 %v1816_v5  ;;  %v1824_v13 = vld [vmem:[%s2419_s1 + $0xd8] sm:$0xff]   ;;  %v1828_v17 = vld [vmem:[%s2419_s1 + $0xe0] sm:$0xff]   ;;  %v1832_v21 = vld [vmem:[%s2419_s1 + $0xe8] sm:$0xff]  }
   0x7   :  { %v1825_v14 = vld [vmem:[%s2419_s1 + $0x18] sm:$0xff]   ;;  %v1829_v18 = vld [vmem:[%s2419_s1 + $0x20] sm:$0xff]   ;;  %v1833_v22 = vld [vmem:[%s2419_s1 + $0x28] sm:$0xff]  }
   0x8   :  { %1636 = vmatpush3.bf16.msra.mxu0 %v1817_v6  ;;  %v1826_v15 = vld [vmem:[%s2419_s1 + $0x98] sm:$0xff]   ;;  %v1830_v19 = vld [vmem:[%s2419_s1 + $0xa0] sm:$0xff]   ;;  %v1834_v23 = vld [vmem:[%s2419_s1 + $0xa8] sm:$0xff]  }
   0x9   :  { %1658 = vmatpush3.bf16.msra.mxu1 %v1818_v7  ;;  %1637 = vmatprep.subr.bf16.mxu0 %v1819_v8  ;;  %v1835_v24 = vld [vmem:[%s2419_s1 + $0x70] sm:$0xff]   ;;  %v1839_v29 = vld [vmem:[%s2419_s1 + $0x78] sm:$0xff]   ;;  %v19_v34 = vld [vmem:[%s2418_s0] sm:$0xff] }
   0xa   :  { %1659 = vmatprep.subr.bf16.mxu1 %v1820_v9  ;;  %v1836_v25 = vld [vmem:[%s2419_s1 + $0xf0] sm:$0xff]   ;;  %v1840_v30 = vld [vmem:[%s2419_s1 + $0xf8] sm:$0xff]   ;;  %v1844_v35 = vld [vmem:[%s2419_s1 + $0x140] sm:$0xff]   ;;  %v27_v40 = vcombine.high %v19_v34, %v19_v34  ;;  %v34_v42 = vrot.slane %v19_v34, %v2099_v41 }
   0xb   :  { %v1837_v26 = vld [vmem:[%s2419_s1 + $0x30] sm:$0xff]   ;;  %v1841_v31 = vld [vmem:[%s2419_s1 + $0x38] sm:$0xff]   ;;  %v1845_v38 = vld [vmem:[%s2419_s1 + $0x1c0] sm:$0xff]  }
   0xc   :  { %1638 = vmatpush3.bf16.msra.mxu0 %v1821_v10  ;;  %v1838_v27 = vld [vmem:[%s2419_s1 + $0xb0] sm:$0xff]   ;;  %v1842_v32 = vld [vmem:[%s2419_s1 + $0xb8] sm:$0xff]   ;;  %v41_v43 = vrot.slane %v27_v40, %v2099_v41  ;;  %v42_v44 = vcombine.high %v34_v42, %v34_v42  ;;  %v1846_v46 = vld [vmem:[%s2419_s1 + $0x100] sm:$0xff]   ;;  %v111_v47 = vpack.c.bf16 %v34_v42, %v34_v42 }
   0xd   :  { %1660 = vmatpush3.bf16.msra.mxu1 %v1822_v11  ;;  %1639 = vmatprep.subr.bf16.mxu0 %v1823_v12  ;;  %v1847_v49 = vld [vmem:[%s2419_s1 + $0x180] sm:$0xff]   ;;  %v1848_v52 = vld [vmem:[%s2419_s1 + $0x148] sm:$0xff]   ;;  %v1852_v56 = vld [vmem:[%s2419_s1 + $0x150] sm:$0xff]  }
   0xe   :  { %1661 = vmatprep.subr.bf16.mxu1 %v1824_v13  ;;  %v43_v45 = vcombine.high %v41_v43, %v41_v43  ;;  %v113_v48 = vpack.c.bf16 %v41_v43, %v41_v43  ;;  %v112_v50 = vpack.c.bf16 %v42_v44, %v42_v44  ;;  %v1849_v53 = vld [vmem:[%s2419_s1 + $0x1c8] sm:$0xff]   ;;  %v1853_v57 = vld [vmem:[%s2419_s1 + $0x1d0] sm:$0xff]   ;;  %v1856_v60 = vld [vmem:[%s2419_s1 + $0x158] sm:$0xff]  }
   0xf   :  { %v1850_v54 = vld [vmem:[%s2419_s1 + $0x108] sm:$0xff]   ;;  %v1854_v58 = vld [vmem:[%s2419_s1 + $0x110] sm:$0xff]   ;;  %v1857_v61 = vld [vmem:[%s2419_s1 + $0x1d8] sm:$0xff]  }
  0x10   :  { %1640 = vmatpush3.bf16.msra.mxu0 %v1825_v14  ;;  %v114_v51 = vpack.c.bf16 %v43_v45, %v43_v45  ;;  %1183 = vmatprep.mubr.bf16.mxu0 %v112_v50  ;;  %v1851_v55 = vld [vmem:[%s2419_s1 + $0x188] sm:$0xff]   ;;  %v1855_v59 = vld [vmem:[%s2419_s1 + $0x190] sm:$0xff]   ;;  %v1858_v62 = vld [vmem:[%s2419_s1 + $0x118] sm:$0xff]  }
  0x11   :  { %1662 = vmatpush3.bf16.msra.mxu1 %v1826_v15  ;;  %1641 = vmatprep.subr.bf16.mxu0 %v1827_v16  ;;  %v1859_v63 = vld [vmem:[%s2419_s1 + $0x198] sm:$0xff]   ;;  %v1860_v0 = vld [vmem:[%s2419_s1 + $0x160] sm:$0xff]   ;;  %v1864_v4 = vld [vmem:[%s2419_s1 + $0x168] sm:$0xff]  }
  0x12   :  { %1663 = vmatprep.subr.bf16.mxu1 %v1828_v17  ;;  %1223 = vmatprep.mubr.bf16.mxu1 %v114_v51  ;;  %v1861_v1 = vld [vmem:[%s2419_s1 + $0x1e0] sm:$0xff]   ;;  %v1865_v5 = vld [vmem:[%s2419_s1 + $0x1e8] sm:$0xff]   ;;  %v1868_v8 = vld [vmem:[%s2419_s1 + $0x170] sm:$0xff]  }
  0x13   :  { %v1862_v2 = vld [vmem:[%s2419_s1 + $0x120] sm:$0xff]   ;;  %v1866_v6 = vld [vmem:[%s2419_s1 + $0x128] sm:$0xff]   ;;  %v1869_v9 = vld [vmem:[%s2419_s1 + $0x1f0] sm:$0xff]  }
  0x14   :  { %1642 = vmatpush3.bf16.msra.mxu0 %v1829_v18  ;;  %v1863_v3 = vld [vmem:[%s2419_s1 + $0x1a0] sm:$0xff]   ;;  %v1867_v7 = vld [vmem:[%s2419_s1 + $0x1a8] sm:$0xff]   ;;  %v1870_v11 = vld [vmem:[%s2419_s1 + $0x130] sm:$0xff]  }
  0x15   :  { %1664 = vmatpush3.bf16.msra.mxu1 %v1830_v19  ;;  %1643 = vmatprep.subr.bf16.mxu0 %v1831_v20  ;;  %v20_v10 = vld [vmem:[%s2418_s0 + $0x8] sm:$0xff]  ;;  %v1871_v14 = vld [vmem:[%s2419_s1 + $0x1b0] sm:$0xff]   ;;  %v1872_v15 = vld [vmem:[%s2419_s1 + $0x178] sm:$0xff]  }
  0x16   :  { %1665 = vmatprep.subr.bf16.mxu1 %v1832_v21  ;;  %v51_v12 = vrot.slane %v20_v10, %v2099_v41  ;;  %v44_v13 = vcombine.high %v20_v10, %v20_v10  ;;  %v1873_v18 = vld [vmem:[%s2419_s1 + $0x1f8] sm:$0xff]   ;;  %v1884_v33 = vld [vmem:[%s2419_s1 + $0x288] sm:$0xff]   ;;  %v1885_v34 = vld [vmem:[%s2419_s1 + $0x250] sm:$0xff]  }
  0x17   :  { %v1874_v19 = vld [vmem:[%s2419_s1 + $0x138] sm:$0xff]   ;;  %v1887_v36 = vld [vmem:[%s2419_s1 + $0x210] sm:$0xff]   ;;  %v1893_v43 = vld [vmem:[%s2419_s1 + $0x260] sm:$0xff]  }
  0x18   :  { %1644 = vmatpush3.bf16.msra.mxu0 %v1833_v22  ;;  %v59_v16 = vcombine.high %v51_v12, %v51_v12  ;;  %v58_v17 = vrot.slane %v44_v13, %v2099_v41  ;;  %v1875_v22 = vld [vmem:[%s2419_s1 + $0x1b8] sm:$0xff]   ;;  %v1888_v37 = vld [vmem:[%s2419_s1 + $0x290] sm:$0xff]   ;;  %v1894_v44 = vld [vmem:[%s2419_s1 + $0x2e0] sm:$0xff]  }
  0x19   :  { %1666 = vmatpush3.bf16.msra.mxu1 %v1834_v23  ;;  %1645 = vmatprep.subr.bf16.mxu0 %v1835_v24  ;;  %v1877_v24 = vld [vmem:[%s2419_s1 + $0x240] sm:$0xff]   ;;  %v1890_v39 = vld [vmem:[%s2419_s1 + $0x2d8] sm:$0xff]   ;;  %v1900_v50 = vld [vmem:[%s2419_s1 + $0x2a8] sm:$0xff]  }
  0x1a   :  { %1667 = vmatprep.subr.bf16.mxu1 %v1836_v25  ;;  %v116_v20 = vpack.c.bf16 %v59_v16, %v59_v16  ;;  %v60_v21 = vcombine.high %v58_v17, %v58_v17  ;;  %v1878_v25 = vld [vmem:[%s2419_s1 + $0x2c0] sm:$0xff]   ;;  %v117_v28 = vpack.c.bf16 %v58_v17, %v58_v17  ;;  %v1891_v40 = vld [vmem:[%s2419_s1 + $0x218] sm:$0xff]   ;;  %v1901_v51 = vld [vmem:[%s2419_s1 + $0x270] sm:$0xff]  }
  0x1b   :  { %v1892_v42 = vld [vmem:[%s2419_s1 + $0x298] sm:$0xff]   ;;  %v1895_v45 = vld [vmem:[%s2419_s1 + $0x220] sm:$0xff]   ;;  %v1915_v10 = vld [vmem:[%s2419_s1 + $0x3c8] sm:$0xff]  }
  0x1c   :  { %1646 = vmatpush3.bf16.msra.mxu0 %v1837_v26  ;;  %v118_v23 = vpack.c.bf16 %v60_v21, %v60_v21  ;;  %v1879_v26 = vld [vmem:[%s2419_s1 + $0x200] sm:$0xff]   ;;  %v1918_v13 = vld [vmem:[%s2419_s1 + $0x350] sm:$0xff]   ;;  %v1922_v17 = vld [vmem:[%s2419_s1 + $0x358] sm:$0xff]  }
  0x1d   :  { %1668 = vmatpush3.bf16.msra.mxu1 %v1838_v27  ;;  %1647 = vmatprep.subr.bf16.mxu0 %v1839_v29  ;;  %v115_v27 = vpack.c.bf16 %v51_v12, %v51_v12  ;;  %v1880_v29 = vld [vmem:[%s2419_s1 + $0x280] sm:$0xff]   ;;  %v1917_v12 = vld [vmem:[%s2419_s1 + $0x388] sm:$0xff]   ;;  %v1921_v16 = vld [vmem:[%s2419_s1 + $0x390] sm:$0xff]  }
  0x1e   :  { %1669 = vmatprep.subr.bf16.mxu1 %v1840_v30  ;;  %v1881_v30 = vld [vmem:[%s2419_s1 + $0x248] sm:$0xff]   ;;  %v1926_v21 = vld [vmem:[%s2419_s1 + $0x360] sm:$0xff]  }
  0x20   :  { %1648 = vmatpush3.bf16.msra.mxu0 %v1841_v31  ;;  %v1882_v31 = vld [vmem:[%s2419_s1 + $0x2c8] sm:$0xff]  }
  0x21   :  { %1670 = vmatpush3.bf16.msra.mxu1 %v1842_v32  ;;  %1677 = vmatprep.subr.bf16.mxu0 %v1844_v35  ;;  %v1883_v32 = vld [vmem:[%s2419_s1 + $0x208] sm:$0xff]   ;;  %v1886_v35 = vld [vmem:[%s2419_s1 + $0x2d0] sm:$0xff]  }
  0x22   :  { %1699 = vmatprep.subr.bf16.mxu1 %v1845_v38  ;;  %v1889_v38 = vld [vmem:[%s2419_s1 + $0x258] sm:$0xff]  }
  0x23   :  { %1184 = vmatmul.mubr.bf16.vlgmr.msra.gmra.mrb[0].mxu0 %v111_v47  ;;  %v1897_v47 = vld [vmem:[%s2419_s1 + $0x268] sm:$0xff]  }
  0x24   :  { %1224 = vmatmul.mubr.bf16.vlgmr.msra.gmra.mrb[0].mxu1 %v113_v48  ;;  %1678 = vmatpush3.bf16.msra.mxu0 %v1846_v46  ;;  %v1896_v46 = vld [vmem:[%s2419_s1 + $0x2a0] sm:$0xff]   ;;  %v1898_v48 = vld [vmem:[%s2419_s1 + $0x2e8] sm:$0xff]  }
  0x25   :  { %1700 = vmatpush3.bf16.msra.mxu1 %v1847_v49  ;;  %1679 = vmatprep.subr.bf16.mxu0 %v1848_v52  ;;  %v1899_v49 = vld [vmem:[%s2419_s1 + $0x228] sm:$0xff]   ;;  %v1902_v52 = vld [vmem:[%s2419_s1 + $0x2f0] sm:$0xff]  }
  0x26   :  { %1701 = vmatprep.subr.bf16.mxu1 %v1849_v53  ;;  %1263 = vmatprep.mubr.bf16.mxu0 %v116_v20  ;;  %v21_v53 = vld [vmem:[%s2418_s0 + $0x10] sm:$0xff]  ;;  %v1925_v20 = vld [vmem:[%s2419_s1 + $0x398] sm:$0xff]  }
  0x27   :  { %1303 = vmatprep.mubr.bf16.mxu1 %v118_v23  ;;  %v1928_v23 = vld [vmem:[%s2419_s1 + $0x320] sm:$0xff]  }
  0x28   :  { %1680 = vmatpush3.bf16.msra.mxu0 %v1850_v54  ;;  %v1903_v54 = vld [vmem:[%s2419_s1 + $0x230] sm:$0xff]  }
  0x29   :  { %1702 = vmatpush3.bf16.msra.mxu1 %v1851_v55  ;;  %1681 = vmatprep.subr.bf16.mxu0 %v1852_v56  ;;  %v68_v55 = vrot.slane %v21_v53, %v2099_v41  ;;  %v61_v56 = vcombine.high %v21_v53, %v21_v53 }
  0x2a   :  { %1703 = vmatprep.subr.bf16.mxu1 %v1853_v57  ;;  %v1904_v57 = vld [vmem:[%s2419_s1 + $0x2b0] sm:$0xff]  }
  0x2c   :  { %1682 = vmatpush3.bf16.msra.mxu0 %v1854_v58  ;;  %v1905_v58 = vld [vmem:[%s2419_s1 + $0x278] sm:$0xff]  }
  0x2d   :  { %1704 = vmatpush3.bf16.msra.mxu1 %v1855_v59  ;;  %1683 = vmatprep.subr.bf16.mxu0 %v1856_v60  ;;  %v76_v59 = vcombine.high %v68_v55, %v68_v55  ;;  %v75_v60 = vrot.slane %v61_v56, %v2099_v41 }
  0x2e   :  { %1705 = vmatprep.subr.bf16.mxu1 %v1857_v61  ;;  %v1906_v61 = vld [vmem:[%s2419_s1 + $0x2f8] sm:$0xff]  }
  0x30   :  { %1684 = vmatpush3.bf16.msra.mxu0 %v1858_v62  ;;  %v1907_v62 = vld [vmem:[%s2419_s1 + $0x238] sm:$0xff]  }
  0x31   :  { %1706 = vmatpush3.bf16.msra.mxu1 %v1859_v63  ;;  %1685 = vmatprep.subr.bf16.mxu0 %v1860_v0  ;;  %v120_v63 = vpack.c.bf16 %v76_v59, %v76_v59  ;;  %v77_v0 = vcombine.high %v75_v60, %v75_v60 }
  0x32   :  { %1707 = vmatprep.subr.bf16.mxu1 %v1861_v1  ;;  %v1908_v1 = vld [vmem:[%s2419_s1 + $0x2b8] sm:$0xff]  }
  0x34   :  { %1686 = vmatpush3.bf16.msra.mxu0 %v1862_v2  ;;  %v122_v2 = vpack.c.bf16 %v77_v0, %v77_v0 }
  0x35   :  { %1708 = vmatpush3.bf16.msra.mxu1 %v1863_v3  ;;  %1687 = vmatprep.subr.bf16.mxu0 %v1864_v4  ;;  %v1910_v3 = vld [vmem:[%s2419_s1 + $0x340] sm:$0xff]  }
  0x36   :  { %1709 = vmatprep.subr.bf16.mxu1 %v1865_v5  ;;  %v1911_v4 = vld [vmem:[%s2419_s1 + $0x3c0] sm:$0xff]  }
  0x37   :  { %v1912_v5 = vld [vmem:[%s2419_s1 + $0x300] sm:$0xff]  }
  0x38   :  { %1688 = vmatpush3.bf16.msra.mxu0 %v1866_v6  ;;  %v119_v6 = vpack.c.bf16 %v68_v55, %v68_v55 }
  0x39   :  { %1710 = vmatpush3.bf16.msra.mxu1 %v1867_v7  ;;  %1689 = vmatprep.subr.bf16.mxu0 %v1868_v8  ;;  %v121_v7 = vpack.c.bf16 %v75_v60, %v75_v60  ;;  %v1913_v8 = vld [vmem:[%s2419_s1 + $0x380] sm:$0xff]  }
  0x3a   :  { %1711 = vmatprep.subr.bf16.mxu1 %v1869_v9  ;;  %v1914_v9 = vld [vmem:[%s2419_s1 + $0x348] sm:$0xff]  }
  0x3c   :  { %1690 = vmatpush3.bf16.msra.mxu0 %v1870_v11  ;;  %v1916_v11 = vld [vmem:[%s2419_s1 + $0x308] sm:$0xff]  }
  0x3d   :  { %1712 = vmatpush3.bf16.msra.mxu1 %v1871_v14  ;;  %1691 = vmatprep.subr.bf16.mxu0 %v1872_v15  ;;  %v1919_v14 = vld [vmem:[%s2419_s1 + $0x3d0] sm:$0xff]  }
  0x3e   :  { %1713 = vmatprep.subr.bf16.mxu1 %v1873_v18  ;;  %v1920_v15 = vld [vmem:[%s2419_s1 + $0x310] sm:$0xff]   ;;  %v1923_v18 = vld [vmem:[%s2419_s1 + $0x3d8] sm:$0xff]  }
  0x40   :  { %1692 = vmatpush3.bf16.msra.mxu0 %v1874_v19  ;;  %v1924_v19 = vld [vmem:[%s2419_s1 + $0x318] sm:$0xff]  }
  0x41   :  { %1714 = vmatpush3.bf16.msra.mxu1 %v1875_v22  ;;  %1721 = vmatprep.subr.bf16.mxu0 %v1877_v24  ;;  %v1927_v22 = vld [vmem:[%s2419_s1 + $0x3e0] sm:$0xff]  }
  0x42   :  { %1743 = vmatprep.subr.bf16.mxu1 %v1878_v25  ;;  %v1929_v24 = vld [vmem:[%s2419_s1 + $0x3a0] sm:$0xff]   ;;  %v1930_v25 = vld [vmem:[%s2419_s1 + $0x368] sm:$0xff]  }
  0x43   :  { %1264 = vmatmul.mubr.bf16.vlgmr.msra.gmra.mrb[4].mxu0 %v115_v27  ;;  %v1932_v27 = vld [vmem:[%s2419_s1 + $0x328] sm:$0xff]  }
  0x44   :  { %1304 = vmatmul.mubr.bf16.vlgmr.msra.gmra.mrb[4].mxu1 %v117_v28  ;;  %1722 = vmatpush3.bf16.msra.mxu0 %v1879_v26  ;;  %v1931_v26 = vld [vmem:[%s2419_s1 + $0x3e8] sm:$0xff]  }
  0x45   :  { %1744 = vmatpush3.bf16.msra.mxu1 %v1880_v29  ;;  %1723 = vmatprep.subr.bf16.mxu0 %v1881_v30  ;;  %v1933_v28 = vld [vmem:[%s2419_s1 + $0x3a8] sm:$0xff]   ;;  %v1934_v29 = vld [vmem:[%s2419_s1 + $0x370] sm:$0xff]  }
  0x46   :  { %1745 = vmatprep.subr.bf16.mxu1 %v1882_v31  ;;  %1343 = vmatprep.mubr.bf16.mxu0 %v120_v63  ;;  %v1935_v30 = vld [vmem:[%s2419_s1 + $0x3f0] sm:$0xff]   ;;  %v22_v31 = vld [vmem:[%s2418_s0 + $0x18] sm:$0xff] }
  0x47   :  { %1383 = vmatprep.mubr.bf16.mxu1 %v122_v2 }
  0x48   :  { %1724 = vmatpush3.bf16.msra.mxu0 %v1883_v32 }
  0x49   :  { %1746 = vmatpush3.bf16.msra.mxu1 %v1884_v33  ;;  %1725 = vmatprep.subr.bf16.mxu0 %v1885_v34 }
  0x4a   :  { %1747 = vmatprep.subr.bf16.mxu1 %v1886_v35 }
  0x4c   :  { %1726 = vmatpush3.bf16.msra.mxu0 %v1887_v36 }
  0x4d   :  { %1748 = vmatpush3.bf16.msra.mxu1 %v1888_v37  ;;  %1727 = vmatprep.subr.bf16.mxu0 %v1889_v38 }
  0x4e   :  { %1749 = vmatprep.subr.bf16.mxu1 %v1890_v39 }
  0x50   :  { %1728 = vmatpush3.bf16.msra.mxu0 %v1891_v40 }
  0x51   :  { %1750 = vmatpush3.bf16.msra.mxu1 %v1892_v42  ;;  %1729 = vmatprep.subr.bf16.mxu0 %v1893_v43 }
  0x52   :  { %1751 = vmatprep.subr.bf16.mxu1 %v1894_v44 }
  0x54   :  { %1730 = vmatpush3.bf16.msra.mxu0 %v1895_v45 }
  0x55   :  { %1752 = vmatpush3.bf16.msra.mxu1 %v1896_v46  ;;  %1731 = vmatprep.subr.bf16.mxu0 %v1897_v47 }
  0x56   :  { %1753 = vmatprep.subr.bf16.mxu1 %v1898_v48 }
  0x58   :  { %1732 = vmatpush3.bf16.msra.mxu0 %v1899_v49 }
  0x59   :  { %1754 = vmatpush3.bf16.msra.mxu1 %v1900_v50  ;;  %1733 = vmatprep.subr.bf16.mxu0 %v1901_v51 }
  0x5a   :  { %1755 = vmatprep.subr.bf16.mxu1 %v1902_v52 }
  0x5c   :  { %1734 = vmatpush3.bf16.msra.mxu0 %v1903_v54 }
  0x5d   :  { %1756 = vmatpush3.bf16.msra.mxu1 %v1904_v57  ;;  %1735 = vmatprep.subr.bf16.mxu0 %v1905_v58 }
  0x5e   :  { %1757 = vmatprep.subr.bf16.mxu1 %v1906_v61 }
  0x60   :  { %1736 = vmatpush3.bf16.msra.mxu0 %v1907_v62 }
  0x61   :  { %1758 = vmatpush3.bf16.msra.mxu1 %v1908_v1  ;;  %1765 = vmatprep.subr.bf16.mxu0 %v1910_v3 }
  0x62   :  { %1787 = vmatprep.subr.bf16.mxu1 %v1911_v4 }
  0x63   :  { %1344 = vmatmul.mubr.bf16.vlgmr.msra.gmra.mrb[8].mxu0 %v119_v6 }
  0x64   :  { %1384 = vmatmul.mubr.bf16.vlgmr.msra.gmra.mrb[8].mxu1 %v121_v7  ;;  %1766 = vmatpush3.bf16.msra.mxu0 %v1912_v5 }
  0x65   :  { %1788 = vmatpush3.bf16.msra.mxu1 %v1913_v8  ;;  %1767 = vmatprep.subr.bf16.mxu0 %v1914_v9 }
  0x66   :  { %1789 = vmatprep.subr.bf16.mxu1 %v1915_v10 }
  0x68   :  { %1768 = vmatpush3.bf16.msra.mxu0 %v1916_v11 }
  0x69   :  { %1790 = vmatpush3.bf16.msra.mxu1 %v1917_v12  ;;  %1769 = vmatprep.subr.bf16.mxu0 %v1918_v13 }
  0x6a   :  { %1791 = vmatprep.subr.bf16.mxu1 %v1919_v14 }
  0x6c   :  { %1770 = vmatpush3.bf16.msra.mxu0 %v1920_v15 }
  0x6d   :  { %1792 = vmatpush3.bf16.msra.mxu1 %v1921_v16  ;;  %1771 = vmatprep.subr.bf16.mxu0 %v1922_v17 }
  0x6e   :  { %1793 = vmatprep.subr.bf16.mxu1 %v1923_v18 }
  0x70   :  { %1772 = vmatpush3.bf16.msra.mxu0 %v1924_v19 }
  0x71   :  { %1794 = vmatpush3.bf16.msra.mxu1 %v1925_v20  ;;  %1773 = vmatprep.subr.bf16.mxu0 %v1926_v21 }
  0x72   :  { %1795 = vmatprep.subr.bf16.mxu1 %v1927_v22 }
  0x74   :  { %1774 = vmatpush3.bf16.msra.mxu0 %v1928_v23 }
  0x75   :  { %1796 = vmatpush3.bf16.msra.mxu1 %v1929_v24  ;;  %1775 = vmatprep.subr.bf16.mxu0 %v1930_v25 }
  0x76   :  { %1797 = vmatprep.subr.bf16.mxu1 %v1931_v26 }
  0x77   :  { %9 = vsyncpa [#allocation3], 0  ;;  %v85_v32 = vrot.slane %v22_v31, %v2099_v41  ;;  %v78_v33 = vcombine.high %v22_v31, %v22_v31  ;;  %v1936_v34 = vld [vmem:[%s2419_s1 + $0x330] sm:$0xff]   ;;  %v1938_v36 = vld [vmem:[%s2419_s1 + $0x378] sm:$0xff]   ;;  %s1968_s21 = smov [#allocation2]   ;;  %vm1487_vm0 = vcmask 58368  }
  0x78   :  { %1776 = vmatpush3.bf16.msra.mxu0 %v1932_v27  ;;  %v1937_v35 = vld [vmem:[%s2419_s1 + $0x3b0] sm:$0xff]   ;;  %v1939_v37 = vld [vmem:[%s2419_s1 + $0x3f8] sm:$0xff]   ;;  %v1632_v31 = vld [vmem:[%s2421_s3] ss:$0 sm:$0xff]  ;;  %s1495_s22 = sshll.u32 %s1968_s21, 4  ;;  %s1496_s22 = int_to_ptr.vmem [resolvable:$true] %s1495_s22 }
  0x79   :  { %1798 = vmatpush3.bf16.msra.mxu1 %v1933_v28  ;;  %1777 = vmatprep.subr.bf16.mxu0 %v1934_v29  ;;  %v93_v38 = vcombine.high %v85_v32, %v85_v32  ;;  %v92_v39 = vrot.slane %v78_v33, %v2099_v41  ;;  %v1940_v43 = vld [vmem:[%s2419_s1 + $0x338] sm:$0xff]   ;;  %v123_v46 = vpack.c.bf16 %v85_v32, %v85_v32  ;;  %v1631_v29 = vld [vmem:[%s2420_s2] ss:$0 sm:$0xff]  ;;  %s1943_s23 = scalar_lea.vmem %s1496_s22, 32  ;;  %p1948_p1 = scmp.lt.s32.totalorder %s1496_s22, %s1496_s22 }
  0x7a   :  { %1799 = vmatprep.subr.bf16.mxu1 %v1935_v30  ;;  %v1941_v44 = vld [vmem:[%s2419_s1 + $0x3b8] sm:$0xff]   ;;  %p1944_p0 = scmp.ne.s32.totalorder %s1496_s22, %s1943_s23  ;;  %p1949_p2 = scmp.lt.s32.totalorder %s1943_s23, %s1943_s23 }
  0x7b   :  { %v124_v40 = vpack.c.bf16 %v93_v38, %v93_v38  ;;  %v94_v42 = vcombine.high %v92_v39, %v92_v39  ;;  %v125_v47 = vpack.c.bf16 %v92_v39, %v92_v39 }
  0x7c   :  { %1778 = vmatpush3.bf16.msra.mxu0 %v1936_v34  ;;  %p1950_p3 = por %p1949_p2, %p1948_p1 }
  0x7d   :  { %1800 = vmatpush3.bf16.msra.mxu1 %v1937_v35  ;;  %1779 = vmatprep.subr.bf16.mxu0 %v1938_v36  ;;  %v126_v45 = vpack.c.bf16 %v94_v42, %v94_v42 }
  0x7e   :  { %1801 = vmatprep.subr.bf16.mxu1 %v1939_v37  ;;  %1423 = vmatprep.mubr.bf16.mxu0 %v124_v40  ;;  %p1951_p4 = pnand %p1950_p3, %p1944_p0 }
  0x7f   :  { %1463 = vmatprep.mubr.bf16.mxu1 %v126_v45 }
  0x80   :  { %1780 = vmatpush3.bf16.msra.mxu0 %v1940_v43 }
  0x81   :  { %1802 = vmatpush3.bf16.msra.mxu1 %v1941_v44 }
  0x83   :  { %1424 = vmatmul.mubr.bf16.vlgmr.msra.gmra.mrb[12].mxu0 %v123_v46 }
  0x84   :  { %1464 = vmatmul.mubr.bf16.vlgmr.msra.gmra.mrb[12].mxu1 %v125_v47 }
  0xf6   :  { %v1649_v41 = vpop.f32.mrb[0].mxu0 }
  0xf7   :  { %v1671_v48 = vpop.f32.mrb[0].mxu1  ;;  %v1650_v49 = vpop.f32.mrb[1].mxu0 }
  0xf8   :  { %v1672_v50 = vpop.f32.mrb[1].mxu1  ;;  %v1651_v51 = vadd.f32 %v1650_v49, %v1649_v41  ;;  %v1652_v53 = vpop.f32.mrb[2].mxu0 }
  0xf9   :  { %v1673_v52 = vadd.f32 %v1672_v50, %v1671_v48  ;;  %v1674_v54 = vpop.f32.mrb[2].mxu1  ;;  %v1653_v55 = vpop.f32.mrb[3].mxu0 }
  0xfa   :  { %v1675_v56 = vpop.f32.mrb[3].mxu1 }
  0xfb   :  { %v1226_v57 = vadd.f32 %v1673_v52, %v1651_v51 }
 0x116   :  { %v1693_v58 = vpop.f32.mrb[4].mxu0 }
 0x117   :  { %v1715_v59 = vpop.f32.mrb[4].mxu1  ;;  %v1694_v60 = vpop.f32.mrb[5].mxu0 }
 0x118   :  { %v1716_v61 = vpop.f32.mrb[5].mxu1  ;;  %v1695_v62 = vadd.f32 %v1694_v60, %v1693_v58  ;;  %v1696_v0 = vpop.f32.mrb[6].mxu0 }
 0x119   :  { %v1717_v63 = vadd.f32 %v1716_v61, %v1715_v59  ;;  %v1718_v1 = vpop.f32.mrb[6].mxu1  ;;  %v1697_v2 = vpop.f32.mrb[7].mxu0 }
 0x11a   :  { %v1719_v3 = vpop.f32.mrb[7].mxu1  ;;  %v1266_v4 = vadd.f32 %v1695_v62, %v1226_v57 }
 0x11c   :  { %v1306_v5 = vadd.f32 %v1717_v63, %v1266_v4 }
 0x136   :  { %v1737_v6 = vpop.f32.mrb[8].mxu0 }
 0x137   :  { %v1759_v7 = vpop.f32.mrb[8].mxu1  ;;  %v1738_v8 = vpop.f32.mrb[9].mxu0 }
 0x138   :  { %v1760_v9 = vpop.f32.mrb[9].mxu1  ;;  %v1739_v10 = vadd.f32 %v1738_v8, %v1737_v6  ;;  %v1740_v12 = vpop.f32.mrb[10].mxu0 }
 0x139   :  { %v1761_v11 = vadd.f32 %v1760_v9, %v1759_v7  ;;  %v1762_v13 = vpop.f32.mrb[10].mxu1  ;;  %v1741_v14 = vpop.f32.mrb[11].mxu0 }
 0x13a   :  { %v1763_v15 = vpop.f32.mrb[11].mxu1  ;;  %v1346_v16 = vadd.f32 %v1739_v10, %v1306_v5 }
 0x13c   :  { %v1386_v17 = vadd.f32 %v1761_v11, %v1346_v16 }
 0x156   :  { %v1781_v18 = vpop.f32.mrb[12].mxu0 }
 0x157   :  { %v1803_v19 = vpop.f32.mrb[12].mxu1  ;;  %v1782_v20 = vpop.f32.mrb[13].mxu0 }
 0x158   :  { %v1804_v21 = vpop.f32.mrb[13].mxu1  ;;  %v1783_v22 = vadd.f32 %v1782_v20, %v1781_v18  ;;  %v1784_v24 = vpop.f32.mrb[14].mxu0 }
 0x159   :  { %v1805_v23 = vadd.f32 %v1804_v21, %v1803_v19  ;;  %v1806_v25 = vpop.f32.mrb[14].mxu1  ;;  %v1785_v26 = vpop.f32.mrb[15].mxu0 }
 0x15a   :  { %v1807_v27 = vpop.f32.mrb[15].mxu1  ;;  %v1426_v28 = vadd.f32 %v1783_v22, %v1386_v17 }
 0x15c   :  { %v1466_v30 = vadd.f32 %v1805_v23, %v1426_v28 }
 0x15e   :  { %v1478_v32 = vmul.f32 %v1631_v29, %v1466_v30 }
 0x160   :  { %v1486_v33 = vadd.f32 %v1632_v31, %v1478_v32 }
 0x162   :  { %1488 = vst.msk [vmem:[#allocation2] sm:$0x3] %vm1487_vm0, %v1486_v33 }
 0x163   :  { %1954 = shalt.err (!%p1951_p4)
}
 0x164   :  { %s1955_s25 = scalar_lea.hbm %s2422_s4, 32 }
 0x165   :  { %p1956_p5 = scmp.ne.s32.totalorder %s2422_s4, %s1955_s25  ;;  %p1959_p6 = scmp.lt.u32.totalorder %s1955_s25, %s2422_s4 }
 0x167   :  { %p1961_p7 = pnand %p1959_p6, %p1956_p5 }
 0x169   :  { %1964 = shalt.err (!%p1961_p7)
}
 0x16a   :  { %1498 = dma.vmem_to_hbm [thread:$0]  %s1496_s22, 32, %s2422_s4, [#allocation3]  }
 0x16b   :  { %1965 = dma.done.wait [#allocation3], 32  }
 0x16c   :  { %1966 = vsyncadd [#allocation3], 4294967264 }
 0x16d   :  { %1502 = vsyncpa [#allocation3], 1 }

// kernel: final_lstm_forward.16
= control target key start
LH: loop header
LB: loop body
LE: loop exit
PB: predicated region body
PF: predicated region fallthrough
CT: control target
= control target key end

     0   :  { %9 = vsyncpa [#allocation3], 0  ;;  %s12255_s0 = inlined_call_operand.vmem [shape: f32[2,4096], index: 0, kind: input, shape index: {}]   ;;  %s12256_s1 = inlined_call_operand.hbm [shape: bf16[4096,2048], index: 1, kind: input, shape index: {}]   ;;  %s12257_s2 = inlined_call_operand.vmem [shape: f32[1,2048], index: 2, kind: input, shape index: {}]   ;;  %s12258_s3 = inlined_call_operand.vmem [shape: f32[1,2048], index: 3, kind: input, shape index: {}]   ;;  %s12259_s4 = inlined_call_operand.vmem [shape: f32[2,2048], index: 4, kind: output, shape index: {}]  }
   0x1   :  { %11 = vsyncpa [#allocation3 + $0x1], 0  ;;  %s10937_s15 = smov 0   ;;  %s10939_s16 = smov 0  }
   0x2   :  { %s10941_s17 = smov 0   ;;  %s10943_s18 = smov 0  }
   0x3 LB: > { %s8094_s19 = sadd.s32 4294967295, %s10905_s18   ;;  %s10957_s20 = sadd.s32 1, %s10905_s18   ;;  %s10905_s18 = sphi %s10943_s18, %s12265_s18   ;;  %s10901_s17 = sphi %s10941_s17, %s12264_s17   ;;  %s10897_s16 = sphi %s10939_s16, %s12263_s16   ;;  %s10893_s15 = sphi %s10937_s15, %s12262_s15  }
   0x4   : > { %s42_s21 = ssub.s32 %s10905_s18, %s10957_s20  ;;  %s45_s22 = sadd.s32 1, %s10901_s17 }
   0x5   : > { %p43_p0 = scmp.eq.s32.totalorder %s42_s21, 0  ;;  %p52_p1 = scmp.ne.s32.totalorder %s10901_s17, %s10897_s16 }
   0x6   : > { %p53_p2 = scmp.eq.s32.totalorder %s10905_s18, 0  ;;  %p58_p3 = scmp.ne.s32.totalorder %s10897_s16, %s10893_s15 }
   0x7   : > { %s10967_s23 = scalar_select %p43_p0, %s10901_s17, %s45_s22  }
   0x8   : > { %p54_p4 = por %p53_p2, %p52_p1  ;;  %p59_p5 = scmp.eq.s32.totalorder %s8094_s19, 0 }
   0x9   : > { %p9260_p6 = scmp.lt.s32.totalorder %s10905_s18, 4  ;;  %s163_s25 = sand.u32 1, %s10901_s17  }
   0xa   : > { %p10972_p7 = por %p59_p5, %p58_p3  ;;  %s8098_s26 = sshll.u32 %s163_s25, 13 }
   0xb   : > { %s9133_s27 = sshll.u32 %s10905_s18, 8  ;;  %s167_s5 = scalar_lea.vmem [#allocation2], %s8098_s26 }
   0xc   : > { %s10981_s30 = scalar_lea.hbm %s12256_s1, %s9133_s27  ;;  %s174_s6 = sshll.u32 %s167_s5, 4  ;;  %s10983_s6 = int_to_ptr.vmem [resolvable:$true] %s174_s6 }
   0xd   : > { %p10985_p8 = pnand %p9260_p6, %p54_p4  ;;  %s10989_s8 = scalar_lea.sflag [#allocation3], %s163_s25 }
   0xe   : > { %s10841_s9 = scalar_lea.hbm %s10981_s30, 131072  ;;  %s10846_s12 = scalar_lea.hbm %s12256_s1, 524288 }
   0xf   : > { %p10842_p9 = scmp.ne.s32.totalorder %s10981_s30, %s10841_s9  ;;  %p10843_p10 = pneg %p10985_p8 }
  0x10   : > { %p10847_p13 = scmp.lt.u32.totalorder %s10981_s30, %s12256_s1  ;;  %p10848_p0 = scmp.lt.u32.totalorder %s10846_s12, %s10841_s9 }
  0x11   : > { %p10844_p11 = pnand %p10843_p10, %p10842_p9  ;;  %p10850_p2 = scmp.lt.u32.totalorder %s10841_s9, %s10981_s30 }
  0x12   : > { %p10849_p1 = por %p10848_p0, %p10847_p13 }
  0x13   : > { %p10845_p12 = pneg %p10844_p11 }
  0x14   : > { %p10851_p3 = por %p10850_p2, %p10849_p1 }
  0x16   : > { %p10852_p4 = pnand %p10851_p3, %p10845_p12 }
  0x18   : > { %10855 = shalt.err (!%p10852_p4)
}
  0x19   : > { %s10856_s15 = scalar_lea.vmem %s10983_s6, 131072  ;;  %s10907_s21 = smov [#allocation2]  }
  0x1a   : > { %p10857_p5 = scmp.ne.s32.totalorder %s10983_s6, %s10856_s15  ;;  %s10861_s22 = sshll.u32 %s10907_s21, 4  ;;  %s10862_s22 = int_to_ptr.vmem [resolvable:$false] %s10861_s22 }
  0x1b   : > { %s10863_s25 = scalar_lea.vmem %s10862_s22, 262144  ;;  %p10864_p11 = scmp.lt.s32.totalorder %s10983_s6, %s10862_s22 }
  0x1c   : > { %p10859_p6 = pnand %p10857_p5, %p10843_p10  ;;  %p10865_p13 = scmp.lt.s32.totalorder %s10863_s25, %s10856_s15 }
  0x1e   : > { %p10860_p9 = pneg %p10859_p6  ;;  %p10866_p0 = por %p10865_p13, %p10864_p11 }
  0x20   : > { %p10867_p1 = pnand %p10866_p0, %p10860_p9 }
  0x22   : > { %10870 = shalt.err (!%p10867_p1)
}
  0x23   : > { %s10908_s26 = smov 1024   ;;  %s10909_s27 = smov 256  }
  0x24   : > { %s10910_s28 = smov 16   ;;  %p8101_p10 = scmp.ge.s32.totalorder %s10905_s18, 1 }
  0x25   : > { %9259 = dma.hbm_to_vmem [thread:$0]  (!%p10985_p8), %s10981_s30, 131072, %s10983_s6, %s10989_s8, %s10908_s26, %s10909_s27, %s10910_s28  }
  0x26   : > { %p198_p12 = scmp.lt.s32.totalorder %s10905_s18, 5 }
  0x28   : > { %p199_p2 = pnand %p8101_p10, %p198_p12 }
  0x29   : > { %s204_s29 = sand.u32 (!%p199_p2), 1, %s10897_s16  }
  0x2a   : > { %202 = sbr.rel (%p199_p2) target bundleno = 1301 (0x515), region = 36  ;;  %s8102_s5 = sshll.u32 (!%p199_p2), %s204_s29, 13 }
  0x2b   : > { %s205_s9 = scalar_lea.sflag (!%p199_p2), [#allocation3], %s204_s29  ;;  %s11020_s10 = scalar_lea.vmem (!%p199_p2), [#allocation2], %s8102_s5 }
  0x31   : > { %10888 = dma.done.wait (%p10972_p7), %s205_s9, 131072  }
  0x32   : > { %10890 = vsyncadd (%p10972_p7), %s205_s9, 4294836224  ;;  %v9297_v0 = vld [vmem:[%s11020_s10 + $0x4] ss:$16 sps:$4 sm:$0xff]   ;;  %v9299_v1 = vld [vmem:[%s11020_s10 + $0xc] ss:$16 sps:$4 sm:$0xff]   ;;  %v278_v38 = vlaneseq  ;;  %s8103_s29 = sshll.u32 %s8094_s19, 2 }
  0x33   : > { %6618 = vmatprep.subr.bf16.mxu0 %v9297_v0  ;;  %v9301_v2 = vld [vmem:[%s11020_s10] ss:$16 sps:$4 sm:$0xff]   ;;  %v9302_v3 = vld [vmem:[%s11020_s10 + $0x8] ss:$16 sps:$4 sm:$0xff]   ;;  %7274 = vmatprep.subr.bf16.mxu1 %v9299_v1  ;;  %v9303_v4 = vld [vmem:[%s11020_s10 + $0x24] ss:$16 sps:$4 sm:$0xff]  }
  0x34   : > { %6619 = vmatpush1.bf16.msra.mxu0 %v9301_v2  ;;  %7275 = vmatpush1.bf16.msra.mxu1 %v9302_v3  ;;  %v9305_v5 = vld [vmem:[%s11020_s10 + $0x2c] ss:$16 sps:$4 sm:$0xff]   ;;  %v9307_v6 = vld [vmem:[%s11020_s10 + $0x20] ss:$16 sps:$4 sm:$0xff]   ;;  %v9308_v7 = vld [vmem:[%s11020_s10 + $0x28] ss:$16 sps:$4 sm:$0xff]  }
  0x35   : > { %6620 = vmatprep.subr.bf16.mxu0 %v9303_v4  ;;  %7276 = vmatprep.subr.bf16.mxu1 %v9305_v5  ;;  %v9309_v8 = vld [vmem:[%s11020_s10 + $0x44] ss:$16 sps:$4 sm:$0xff]   ;;  %v9311_v9 = vld [vmem:[%s11020_s10 + $0x4c] ss:$16 sps:$4 sm:$0xff]   ;;  %v9313_v10 = vld [vmem:[%s11020_s10 + $0x40] ss:$16 sps:$4 sm:$0xff]  }
  0x36   : > { %v9314_v11 = vld [vmem:[%s11020_s10 + $0x48] ss:$16 sps:$4 sm:$0xff]   ;;  %v9315_v12 = vld [vmem:[%s11020_s10 + $0x64] ss:$16 sps:$4 sm:$0xff]   ;;  %v9317_v13 = vld [vmem:[%s11020_s10 + $0x6c] ss:$16 sps:$4 sm:$0xff]  }
  0x37   : > { %v9319_v14 = vld [vmem:[%s11020_s10 + $0x60] ss:$16 sps:$4 sm:$0xff]   ;;  %v9320_v15 = vld [vmem:[%s11020_s10 + $0x68] ss:$16 sps:$4 sm:$0xff]   ;;  %v9321_v16 = vld [vmem:[%s11020_s10 + $0x84] ss:$16 sps:$4 sm:$0xff]  }
  0x38   : > { %6621 = vmatpush1.bf16.msra.mxu0 %v9307_v6  ;;  %7277 = vmatpush1.bf16.msra.mxu1 %v9308_v7  ;;  %v9323_v17 = vld [vmem:[%s11020_s10 + $0x8c] ss:$16 sps:$4 sm:$0xff]   ;;  %v9325_v18 = vld [vmem:[%s11020_s10 + $0x80] ss:$16 sps:$4 sm:$0xff]   ;;  %v9326_v19 = vld [vmem:[%s11020_s10 + $0x88] ss:$16 sps:$4 sm:$0xff]  }
  0x39   : > { %6622 = vmatprep.subr.bf16.mxu0 %v9309_v8  ;;  %7278 = vmatprep.subr.bf16.mxu1 %v9311_v9  ;;  %v9327_v20 = vld [vmem:[%s11020_s10 + $0xa4] ss:$16 sps:$4 sm:$0xff]   ;;  %v9329_v21 = vld [vmem:[%s11020_s10 + $0xac] ss:$16 sps:$4 sm:$0xff]   ;;  %v9331_v22 = vld [vmem:[%s11020_s10 + $0xa0] ss:$16 sps:$4 sm:$0xff]  }
  0x3a   : > { %v9332_v23 = vld [vmem:[%s11020_s10 + $0xa8] ss:$16 sps:$4 sm:$0xff]   ;;  %v9333_v24 = vld [vmem:[%s11020_s10 + $0xc4] ss:$16 sps:$4 sm:$0xff]   ;;  %v9335_v25 = vld [vmem:[%s11020_s10 + $0xcc] ss:$16 sps:$4 sm:$0xff]  }
  0x3b   : > { %v9337_v26 = vld [vmem:[%s11020_s10 + $0xc0] ss:$16 sps:$4 sm:$0xff]   ;;  %v9338_v27 = vld [vmem:[%s11020_s10 + $0xc8] ss:$16 sps:$4 sm:$0xff]   ;;  %v9339_v28 = vld [vmem:[%s11020_s10 + $0xe4] ss:$16 sps:$4 sm:$0xff]  }
  0x3c   : > { %6623 = vmatpush1.bf16.msra.mxu0 %v9313_v10  ;;  %7279 = vmatpush1.bf16.msra.mxu1 %v9314_v11  ;;  %v9341_v29 = vld [vmem:[%s11020_s10 + $0xec] ss:$16 sps:$4 sm:$0xff]   ;;  %v9343_v30 = vld [vmem:[%s11020_s10 + $0xe0] ss:$16 sps:$4 sm:$0xff]   ;;  %v9344_v31 = vld [vmem:[%s11020_s10 + $0xe8] ss:$16 sps:$4 sm:$0xff]  }
  0x3d   : > { %6624 = vmatprep.subr.bf16.mxu0 %v9315_v12  ;;  %7280 = vmatprep.subr.bf16.mxu1 %v9317_v13  ;;  %v9345_v32 = vld [vmem:[%s11020_s10 + $0x104] ss:$16 sps:$4 sm:$0xff]   ;;  %v9347_v33 = vld [vmem:[%s11020_s10 + $0x10c] ss:$16 sps:$4 sm:$0xff]   ;;  %v9349_v34 = vld [vmem:[%s11020_s10 + $0x100] ss:$16 sps:$4 sm:$0xff]  }
  0x3e   : > { %v9350_v35 = vld [vmem:[%s11020_s10 + $0x108] ss:$16 sps:$4 sm:$0xff]   ;;  %v10911_v36 = vmov 1983009808   ;;  %v9351_v39 = vld [vmem:[%s11020_s10 + $0x124] ss:$16 sps:$4 sm:$0xff]  }
  0x3f   : > { %v276_v37 = vunpack.c.l.s4 %v10911_v36  ;;  %v9353_v40 = vld [vmem:[%s11020_s10 + $0x12c] ss:$16 sps:$4 sm:$0xff]   ;;  %v9355_v41 = vld [vmem:[%s11020_s10 + $0x120] ss:$16 sps:$4 sm:$0xff]   ;;  %v11065_v43 = vshrl.u32 %v278_v38, 7  ;;  %p243_p7 = scmp.lt.s32.totalorder %s8103_s29, 15 }
  0x40   : > { %6625 = vmatpush1.bf16.msra.mxu0 %v9319_v14  ;;  %7281 = vmatpush1.bf16.msra.mxu1 %v9320_v15  ;;  %v9356_v44 = vld [vmem:[%s11020_s10 + $0x128] ss:$16 sps:$4 sm:$0xff]   ;;  %v9357_v45 = vld [vmem:[%s11020_s10 + $0x144] ss:$16 sps:$4 sm:$0xff]   ;;  %v9359_v46 = vld [vmem:[%s11020_s10 + $0x14c] ss:$16 sps:$4 sm:$0xff]  }
  0x41   : > { %6626 = vmatprep.subr.bf16.mxu0 %v9321_v16  ;;  %7282 = vmatprep.subr.bf16.mxu1 %v9323_v17  ;;  %v277_v42 = vunpack.c.0.s8 %v276_v37  ;;  %v9361_v47 = vld [vmem:[%s11020_s10 + $0x140] ss:$16 sps:$4 sm:$0xff]   ;;  %v9362_v48 = vld [vmem:[%s11020_s10 + $0x148] ss:$16 sps:$4 sm:$0xff]   ;;  %v9363_v50 = vld [vmem:[%s11020_s10 + $0x164] ss:$16 sps:$4 sm:$0xff]  }
  0x42   : > { %v9365_v51 = vld [vmem:[%s11020_s10 + $0x16c] ss:$16 sps:$4 sm:$0xff]   ;;  %v258_v52 = vld [vmem:[%s12255_s0] sm:$0xff]  ;;  %v9368_v55 = vld [vmem:[%s11020_s10 + $0x168] ss:$16 sps:$4 sm:$0xff]   ;;  %s12267_s29 = smov (!%p243_p7, %s8103_s29), 15 }
  0x43   : > { %v11073_v49 = vsub.s32 %v277_v42, %v11065_v43  ;;  %v9367_v53 = vld [vmem:[%s11020_s10 + $0x160] ss:$16 sps:$4 sm:$0xff]   ;;  %v9369_v56 = vld [vmem:[%s11020_s10 + $0x184] ss:$16 sps:$4 sm:$0xff]   ;;  %v9371_v57 = vld [vmem:[%s11020_s10 + $0x18c] ss:$16 sps:$4 sm:$0xff]   ;;  %v274_v4 = vcombine.high %v258_v52, %v258_v52  ;;  %s250_s6 = scalar_lea.vmem %s12258_s3, %s12267_s29 }
  0x44   : > { %6627 = vmatpush1.bf16.msra.mxu0 %v9325_v18  ;;  %7283 = vmatpush1.bf16.msra.mxu1 %v9326_v19  ;;  %v9373_v59 = vld [vmem:[%s11020_s10 + $0x180] ss:$16 sps:$4 sm:$0xff]   ;;  %v9374_v61 = vld [vmem:[%s11020_s10 + $0x188] ss:$16 sps:$4 sm:$0xff]   ;;  %v9375_v62 = vld [vmem:[%s11020_s10 + $0x1a4] ss:$16 sps:$4 sm:$0xff]  }
  0x45   : > { %6628 = vmatprep.subr.bf16.mxu0 %v9327_v20  ;;  %7284 = vmatprep.subr.bf16.mxu1 %v9329_v21  ;;  %v281_v54 = vrot.slane %v258_v52, %v11073_v49  ;;  %v9377_v63 = vld [vmem:[%s11020_s10 + $0x1ac] ss:$16 sps:$4 sm:$0xff]   ;;  %v9379_v0 = vld [vmem:[%s11020_s10 + $0x1a0] ss:$16 sps:$4 sm:$0xff]   ;;  %v9380_v1 = vld [vmem:[%s11020_s10 + $0x1a8] ss:$16 sps:$4 sm:$0xff]   ;;  %v11098_v9 = vrot.slane %v274_v4, %v11073_v49 }
  0x46   : > { %v9381_v2 = vld [vmem:[%s11020_s10 + $0x1c4] ss:$16 sps:$4 sm:$0xff]   ;;  %v9383_v3 = vld [vmem:[%s11020_s10 + $0x1cc] ss:$16 sps:$4 sm:$0xff]   ;;  %v9385_v5 = vld [vmem:[%s11020_s10 + $0x1c0] ss:$16 sps:$4 sm:$0xff]  }
  0x47   : > { %v289_v58 = vcombine.high %v281_v54, %v281_v54  ;;  %v9386_v6 = vld [vmem:[%s11020_s10 + $0x1c8] ss:$16 sps:$4 sm:$0xff]   ;;  %v9387_v7 = vld [vmem:[%s11020_s10 + $0x1e4] ss:$16 sps:$4 sm:$0xff]   ;;  %v9389_v8 = vld [vmem:[%s11020_s10 + $0x1ec] ss:$16 sps:$4 sm:$0xff]   ;;  %v290_v14 = vcombine.high %v11098_v9, %v11098_v9  ;;  %v442_v16 = vpack.c.bf16 %v281_v54, %v281_v54 }
  0x48   : > { %6629 = vmatpush1.bf16.msra.mxu0 %v9331_v22  ;;  %7285 = vmatpush1.bf16.msra.mxu1 %v9332_v23  ;;  %v9391_v10 = vld [vmem:[%s11020_s10 + $0x1e0] ss:$16 sps:$4 sm:$0xff]   ;;  %v9392_v11 = vld [vmem:[%s11020_s10 + $0x1e8] ss:$16 sps:$4 sm:$0xff]   ;;  %v9396_v12 = vld [vmem:[%s11020_s10 + $0x204] ss:$16 sps:$4 sm:$0xff]  }
  0x49   : > { %6630 = vmatprep.subr.bf16.mxu0 %v9333_v24  ;;  %7286 = vmatprep.subr.bf16.mxu1 %v9335_v25  ;;  %v443_v60 = vpack.c.bf16 %v289_v58, %v289_v58  ;;  %v9399_v13 = vld [vmem:[%s11020_s10 + $0x20c] ss:$16 sps:$4 sm:$0xff]   ;;  %v9394_v15 = vld [vmem:[%s11020_s10 + $0x200] ss:$16 sps:$4 sm:$0xff]   ;;  %v9397_v17 = vld [vmem:[%s11020_s10 + $0x208] ss:$16 sps:$4 sm:$0xff]   ;;  %v445_v20 = vpack.c.bf16 %v290_v14, %v290_v14 }
  0x4a   : > { %v9402_v18 = vld [vmem:[%s11020_s10 + $0x224] ss:$16 sps:$4 sm:$0xff]   ;;  %v9405_v19 = vld [vmem:[%s11020_s10 + $0x22c] ss:$16 sps:$4 sm:$0xff]   ;;  %v9400_v21 = vld [vmem:[%s11020_s10 + $0x220] ss:$16 sps:$4 sm:$0xff]  }
  0x4b   : > { %6650 = vmatprep.mubr.bf16.mxu0 %v443_v60  ;;  %7306 = vmatprep.mubr.bf16.mxu1 %v443_v60  ;;  %v9403_v22 = vld [vmem:[%s11020_s10 + $0x228] ss:$16 sps:$4 sm:$0xff]   ;;  %v9408_v23 = vld [vmem:[%s11020_s10 + $0x244] ss:$16 sps:$4 sm:$0xff]   ;;  %v9411_v24 = vld [vmem:[%s11020_s10 + $0x24c] ss:$16 sps:$4 sm:$0xff]  }
  0x4c   : > { %6631 = vmatpush1.bf16.msra.mxu0 %v9337_v26  ;;  %7287 = vmatpush1.bf16.msra.mxu1 %v9338_v27  ;;  %v9406_v25 = vld [vmem:[%s11020_s10 + $0x240] ss:$16 sps:$4 sm:$0xff]   ;;  %v9409_v26 = vld [vmem:[%s11020_s10 + $0x248] ss:$16 sps:$4 sm:$0xff]   ;;  %v9414_v27 = vld [vmem:[%s11020_s10 + $0x264] ss:$16 sps:$4 sm:$0xff]  }
  0x4d   : > { %6632 = vmatprep.subr.bf16.mxu0 %v9339_v28  ;;  %7288 = vmatprep.subr.bf16.mxu1 %v9341_v29  ;;  %v9417_v28 = vld [vmem:[%s11020_s10 + $0x26c] ss:$16 sps:$4 sm:$0xff]   ;;  %v9412_v29 = vld [vmem:[%s11020_s10 + $0x260] ss:$16 sps:$4 sm:$0xff]   ;;  %v9427_v38 = vld [vmem:[%s11020_s10 + $0x2a8] ss:$16 sps:$4 sm:$0xff]  }
  0x4e   : > { %v9429_v36 = vld [vmem:[%s11020_s10 + $0x2ac] ss:$16 sps:$4 sm:$0xff]   ;;  %v9424_v37 = vld [vmem:[%s11020_s10 + $0x2a0] ss:$16 sps:$4 sm:$0xff]   ;;  %v9433_v42 = vld [vmem:[%s11020_s10 + $0x2c8] ss:$16 sps:$4 sm:$0xff]  }
  0x4f   : > { %v9445_v52 = vld [vmem:[%s11020_s10 + $0x308] ss:$16 sps:$4 sm:$0xff]   ;;  %v9453_v54 = vld [vmem:[%s11020_s10 + $0x32c] ss:$16 sps:$4 sm:$0xff]   ;;  %v9486_v14 = vld [vmem:[%s11020_s10 + $0x3e4] ss:$16 sps:$4 sm:$0xff]  }
  0x50   : > { %6633 = vmatpush1.bf16.msra.mxu0 %v9343_v30  ;;  %7289 = vmatpush1.bf16.msra.mxu1 %v9344_v31  ;;  %v9415_v30 = vld [vmem:[%s11020_s10 + $0x268] ss:$16 sps:$4 sm:$0xff]   ;;  %v9420_v31 = vld [vmem:[%s11020_s10 + $0x284] ss:$16 sps:$4 sm:$0xff]   ;;  %v9459_v58 = vld [vmem:[%s11020_s10 + $0x34c] ss:$16 sps:$4 sm:$0xff]  }
  0x51   : > { %6634 = vmatprep.subr.bf16.mxu0 %v9345_v32  ;;  %7290 = vmatprep.subr.bf16.mxu1 %v9347_v33  ;;  %v9423_v32 = vld [vmem:[%s11020_s10 + $0x28c] ss:$16 sps:$4 sm:$0xff]   ;;  %v9418_v33 = vld [vmem:[%s11020_s10 + $0x280] ss:$16 sps:$4 sm:$0xff]   ;;  %v9457_v60 = vld [vmem:[%s11020_s10 + $0x348] ss:$16 sps:$4 sm:$0xff]  }
  0x52   : > { %v9469_v4 = vld [vmem:[%s11020_s10 + $0x388] ss:$16 sps:$4 sm:$0xff]   ;;  %s8106_s18 = sshll.u32 %s12267_s29, 1 }
  0x53   : > { %s256_s8 = scalar_lea.vmem %s12259_s4, %s8106_s18 }
  0x54   : > { %6635 = vmatpush1.bf16.msra.mxu0 %v9349_v34  ;;  %7291 = vmatpush1.bf16.msra.mxu1 %v9350_v35  ;;  %v9421_v34 = vld [vmem:[%s11020_s10 + $0x288] ss:$16 sps:$4 sm:$0xff]   ;;  %v9426_v35 = vld [vmem:[%s11020_s10 + $0x2a4] ss:$16 sps:$4 sm:$0xff]  }
  0x55   : > { %6636 = vmatprep.subr.bf16.mxu0 %v9351_v39  ;;  %7292 = vmatprep.subr.bf16.mxu1 %v9353_v40  ;;  %v9432_v39 = vld [vmem:[%s11020_s10 + $0x2c4] ss:$16 sps:$4 sm:$0xff]   ;;  %v9435_v40 = vld [vmem:[%s11020_s10 + $0x2cc] ss:$16 sps:$4 sm:$0xff]  }
  0x58   : > { %6637 = vmatpush1.bf16.msra.mxu0 %v9355_v41  ;;  %7293 = vmatpush1.bf16.msra.mxu1 %v9356_v44  ;;  %v9430_v41 = vld [vmem:[%s11020_s10 + $0x2c0] ss:$16 sps:$4 sm:$0xff]   ;;  %v9438_v44 = vld [vmem:[%s11020_s10 + $0x2e4] ss:$16 sps:$4 sm:$0xff]  }
  0x59   : > { %6638 = vmatprep.subr.bf16.mxu0 %v9357_v45  ;;  %7294 = vmatprep.subr.bf16.mxu1 %v9359_v46  ;;  %v9441_v45 = vld [vmem:[%s11020_s10 + $0x2ec] ss:$16 sps:$4 sm:$0xff]   ;;  %v9436_v46 = vld [vmem:[%s11020_s10 + $0x2e0] ss:$16 sps:$4 sm:$0xff]  }
  0x5c   : > { %6639 = vmatpush1.bf16.msra.mxu0 %v9361_v47  ;;  %7295 = vmatpush1.bf16.msra.mxu1 %v9362_v48  ;;  %v9439_v47 = vld [vmem:[%s11020_s10 + $0x2e8] ss:$16 sps:$4 sm:$0xff]   ;;  %v9444_v48 = vld [vmem:[%s11020_s10 + $0x304] ss:$16 sps:$4 sm:$0xff]  }
  0x5d   : > { %6640 = vmatprep.subr.bf16.mxu0 %v9363_v50  ;;  %7296 = vmatprep.subr.bf16.mxu1 %v9365_v51  ;;  %v9447_v50 = vld [vmem:[%s11020_s10 + $0x30c] ss:$16 sps:$4 sm:$0xff]   ;;  %v9442_v51 = vld [vmem:[%s11020_s10 + $0x300] ss:$16 sps:$4 sm:$0xff]  }
  0x60   : > { %6641 = vmatpush1.bf16.msra.mxu0 %v9367_v53  ;;  %7297 = vmatpush1.bf16.msra.mxu1 %v9368_v55  ;;  %v9450_v53 = vld [vmem:[%s11020_s10 + $0x324] ss:$16 sps:$4 sm:$0xff]   ;;  %v9448_v55 = vld [vmem:[%s11020_s10 + $0x320] ss:$16 sps:$4 sm:$0xff]  }
  0x61   : > { %6642 = vmatprep.subr.bf16.mxu0 %v9369_v56  ;;  %7298 = vmatprep.subr.bf16.mxu1 %v9371_v57  ;;  %v9451_v56 = vld [vmem:[%s11020_s10 + $0x328] ss:$16 sps:$4 sm:$0xff]   ;;  %v9456_v57 = vld [vmem:[%s11020_s10 + $0x344] ss:$16 sps:$4 sm:$0xff]  }
  0x64   : > { %6643 = vmatpush1.bf16.msra.mxu0 %v9373_v59  ;;  %7299 = vmatpush1.bf16.msra.mxu1 %v9374_v61  ;;  %v9454_v59 = vld [vmem:[%s11020_s10 + $0x340] ss:$16 sps:$4 sm:$0xff]   ;;  %v9462_v61 = vld [vmem:[%s11020_s10 + $0x364] ss:$16 sps:$4 sm:$0xff]  }
  0x65   : > { %6644 = vmatprep.subr.bf16.mxu0 %v9375_v62  ;;  %7300 = vmatprep.subr.bf16.mxu1 %v9377_v63  ;;  %v9465_v62 = vld [vmem:[%s11020_s10 + $0x36c] ss:$16 sps:$4 sm:$0xff]   ;;  %v9460_v63 = vld [vmem:[%s11020_s10 + $0x360] ss:$16 sps:$4 sm:$0xff]  }
  0x68   : > { %6645 = vmatpush1.bf16.msra.mxu0 %v9379_v0  ;;  %7301 = vmatpush1.bf16.msra.mxu1 %v9380_v1  ;;  %v9463_v0 = vld [vmem:[%s11020_s10 + $0x368] ss:$16 sps:$4 sm:$0xff]   ;;  %v9468_v1 = vld [vmem:[%s11020_s10 + $0x384] ss:$16 sps:$4 sm:$0xff]  }
  0x69   : > { %6646 = vmatprep.subr.bf16.mxu0 %v9381_v2  ;;  %7302 = vmatprep.subr.bf16.mxu1 %v9383_v3  ;;  %v9471_v2 = vld [vmem:[%s11020_s10 + $0x38c] ss:$16 sps:$4 sm:$0xff]   ;;  %v9466_v3 = vld [vmem:[%s11020_s10 + $0x380] ss:$16 sps:$4 sm:$0xff]  }
  0x6c   : > { %6647 = vmatpush1.bf16.msra.mxu0 %v9385_v5  ;;  %7303 = vmatpush1.bf16.msra.mxu1 %v9386_v6  ;;  %v9474_v5 = vld [vmem:[%s11020_s10 + $0x3a4] ss:$16 sps:$4 sm:$0xff]   ;;  %v9477_v6 = vld [vmem:[%s11020_s10 + $0x3ac] ss:$16 sps:$4 sm:$0xff]  }
  0x6d   : > { %6648 = vmatprep.subr.bf16.mxu0 %v9387_v7  ;;  %7304 = vmatprep.subr.bf16.mxu1 %v9389_v8  ;;  %v9472_v7 = vld [vmem:[%s11020_s10 + $0x3a0] ss:$16 sps:$4 sm:$0xff]   ;;  %v9475_v8 = vld [vmem:[%s11020_s10 + $0x3a8] ss:$16 sps:$4 sm:$0xff]  }
  0x70   : > { %6649 = vmatpush1.bf16.msra.mxu0 %v9391_v10  ;;  %7305 = vmatpush1.bf16.msra.mxu1 %v9392_v11  ;;  %v9480_v10 = vld [vmem:[%s11020_s10 + $0x3c4] ss:$16 sps:$4 sm:$0xff]   ;;  %v9483_v11 = vld [vmem:[%s11020_s10 + $0x3cc] ss:$16 sps:$4 sm:$0xff]  }
  0x71   : > { %6659 = vmatprep.subr.bf16.mxu0 %v9396_v12  ;;  %7315 = vmatprep.subr.bf16.mxu1 %v9399_v13  ;;  %v9478_v12 = vld [vmem:[%s11020_s10 + $0x3c0] ss:$16 sps:$4 sm:$0xff]   ;;  %v9481_v13 = vld [vmem:[%s11020_s10 + $0x3c8] ss:$16 sps:$4 sm:$0xff]  }
  0x73   : > { %6651 = vmatmul.mubr.bf16.vlgmr.msra.gmra.mrb[0].mxu0 %v442_v16  ;;  %7307 = vmatmul.mubr.bf16.vlgmr.msra.gmra.mrb[0].mxu1 %v442_v16  ;;  %v9484_v16 = vld [vmem:[%s11020_s10 + $0x3e0] ss:$16 sps:$4 sm:$0xff]  }
  0x74   : > { %6660 = vmatpush1.bf16.msra.mxu0 %v9394_v15  ;;  %7316 = vmatpush1.bf16.msra.mxu1 %v9397_v17  ;;  %v9489_v15 = vld [vmem:[%s11020_s10 + $0x3ec] ss:$16 sps:$4 sm:$0xff]   ;;  %v9487_v17 = vld [vmem:[%s11020_s10 + $0x3e8] ss:$16 sps:$4 sm:$0xff]  }
  0x75   : > { %6661 = vmatprep.subr.bf16.mxu0 %v9402_v18  ;;  %7317 = vmatprep.subr.bf16.mxu1 %v9405_v19  ;;  %v9492_v18 = vld [vmem:[%s11020_s10 + $0x404] ss:$16 sps:$4 sm:$0xff]   ;;  %v9495_v19 = vld [vmem:[%s11020_s10 + $0x40c] ss:$16 sps:$4 sm:$0xff]  }
  0x76   : > { %6691 = vmatprep.mubr.bf16.mxu0 %v445_v20  ;;  %7347 = vmatprep.mubr.bf16.mxu1 %v445_v20  ;;  %v9490_v20 = vld [vmem:[%s11020_s10 + $0x400] ss:$16 sps:$4 sm:$0xff]  }
  0x78   : > { %6662 = vmatpush1.bf16.msra.mxu0 %v9400_v21  ;;  %7318 = vmatpush1.bf16.msra.mxu1 %v9403_v22  ;;  %v444_v21 = vpack.c.bf16 %v11098_v9, %v11098_v9  ;;  %v9493_v22 = vld [vmem:[%s11020_s10 + $0x408] ss:$16 sps:$4 sm:$0xff]  }
  0x79   : > { %6663 = vmatprep.subr.bf16.mxu0 %v9408_v23  ;;  %7319 = vmatprep.subr.bf16.mxu1 %v9411_v24  ;;  %v11177_v23 = vld [vmem:[%s12255_s0 + $0x8] sm:$0xff]  ;;  %v9498_v24 = vld [vmem:[%s11020_s10 + $0x424] ss:$16 sps:$4 sm:$0xff]  }
  0x7c   : > { %6664 = vmatpush1.bf16.msra.mxu0 %v9406_v25  ;;  %7320 = vmatpush1.bf16.msra.mxu1 %v9409_v26  ;;  %v9501_v25 = vld [vmem:[%s11020_s10 + $0x42c] ss:$16 sps:$4 sm:$0xff]   ;;  %v11183_v26 = vrot.slane %v11177_v23, %v11073_v49 }
  0x7d   : > { %6665 = vmatprep.subr.bf16.mxu0 %v9414_v27  ;;  %7321 = vmatprep.subr.bf16.mxu1 %v9417_v28  ;;  %v9496_v27 = vld [vmem:[%s11020_s10 + $0x420] ss:$16 sps:$4 sm:$0xff]   ;;  %v9499_v28 = vld [vmem:[%s11020_s10 + $0x428] ss:$16 sps:$4 sm:$0xff]  }
  0x7e   : > { %v306_v9 = vcombine.high %v11183_v26, %v11183_v26 }
  0x80   : > { %6666 = vmatpush1.bf16.msra.mxu0 %v9412_v29  ;;  %7322 = vmatpush1.bf16.msra.mxu1 %v9415_v30  ;;  %v9504_v29 = vld [vmem:[%s11020_s10 + $0x444] ss:$16 sps:$4 sm:$0xff]   ;;  %v9507_v30 = vld [vmem:[%s11020_s10 + $0x44c] ss:$16 sps:$4 sm:$0xff]  }
  0x81   : > { %6667 = vmatprep.subr.bf16.mxu0 %v9420_v31  ;;  %7323 = vmatprep.subr.bf16.mxu1 %v9423_v32  ;;  %v447_v31 = vpack.c.bf16 %v306_v9, %v306_v9  ;;  %v9502_v32 = vld [vmem:[%s11020_s10 + $0x440] ss:$16 sps:$4 sm:$0xff]   ;;  %v9583_v9 = vld [vmem:[%s11020_s10 + $0x5e8] ss:$16 sps:$4 sm:$0xff]  }
  0x84   : > { %6668 = vmatpush1.bf16.msra.mxu0 %v9418_v33  ;;  %7324 = vmatpush1.bf16.msra.mxu1 %v9421_v34  ;;  %v9505_v33 = vld [vmem:[%s11020_s10 + $0x448] ss:$16 sps:$4 sm:$0xff]   ;;  %v9510_v34 = vld [vmem:[%s11020_s10 + $0x464] ss:$16 sps:$4 sm:$0xff]  }
  0x85   : > { %6669 = vmatprep.subr.bf16.mxu0 %v9426_v35  ;;  %7325 = vmatprep.subr.bf16.mxu1 %v9429_v36  ;;  %v9513_v35 = vld [vmem:[%s11020_s10 + $0x46c] ss:$16 sps:$4 sm:$0xff]   ;;  %v9508_v36 = vld [vmem:[%s11020_s10 + $0x460] ss:$16 sps:$4 sm:$0xff]  }
  0x88   : > { %6670 = vmatpush1.bf16.msra.mxu0 %v9424_v37  ;;  %7326 = vmatpush1.bf16.msra.mxu1 %v9427_v38  ;;  %v9511_v37 = vld [vmem:[%s11020_s10 + $0x468] ss:$16 sps:$4 sm:$0xff]   ;;  %v9516_v38 = vld [vmem:[%s11020_s10 + $0x484] ss:$16 sps:$4 sm:$0xff]  }
  0x89   : > { %6671 = vmatprep.subr.bf16.mxu0 %v9432_v39  ;;  %7327 = vmatprep.subr.bf16.mxu1 %v9435_v40  ;;  %v9519_v39 = vld [vmem:[%s11020_s10 + $0x48c] ss:$16 sps:$4 sm:$0xff]   ;;  %v9514_v40 = vld [vmem:[%s11020_s10 + $0x480] ss:$16 sps:$4 sm:$0xff]  }
  0x8c   : > { %6672 = vmatpush1.bf16.msra.mxu0 %v9430_v41  ;;  %7328 = vmatpush1.bf16.msra.mxu1 %v9433_v42  ;;  %v9517_v41 = vld [vmem:[%s11020_s10 + $0x488] ss:$16 sps:$4 sm:$0xff]   ;;  %v9522_v42 = vld [vmem:[%s11020_s10 + $0x4a4] ss:$16 sps:$4 sm:$0xff]  }
  0x8d   : > { %6673 = vmatprep.subr.bf16.mxu0 %v9438_v44  ;;  %7329 = vmatprep.subr.bf16.mxu1 %v9441_v45  ;;  %v9525_v44 = vld [vmem:[%s11020_s10 + $0x4ac] ss:$16 sps:$4 sm:$0xff]   ;;  %v9520_v45 = vld [vmem:[%s11020_s10 + $0x4a0] ss:$16 sps:$4 sm:$0xff]  }
  0x90   : > { %6674 = vmatpush1.bf16.msra.mxu0 %v9436_v46  ;;  %7330 = vmatpush1.bf16.msra.mxu1 %v9439_v47  ;;  %v9523_v46 = vld [vmem:[%s11020_s10 + $0x4a8] ss:$16 sps:$4 sm:$0xff]   ;;  %v9528_v47 = vld [vmem:[%s11020_s10 + $0x4c4] ss:$16 sps:$4 sm:$0xff]  }
  0x91   : > { %6675 = vmatprep.subr.bf16.mxu0 %v9444_v48  ;;  %7331 = vmatprep.subr.bf16.mxu1 %v9447_v50  ;;  %v9531_v48 = vld [vmem:[%s11020_s10 + $0x4cc] ss:$16 sps:$4 sm:$0xff]   ;;  %v9526_v50 = vld [vmem:[%s11020_s10 + $0x4c0] ss:$16 sps:$4 sm:$0xff]  }
  0x94   : > { %6676 = vmatpush1.bf16.msra.mxu0 %v9442_v51  ;;  %7332 = vmatpush1.bf16.msra.mxu1 %v9445_v52  ;;  %v9529_v51 = vld [vmem:[%s11020_s10 + $0x4c8] ss:$16 sps:$4 sm:$0xff]   ;;  %v9534_v52 = vld [vmem:[%s11020_s10 + $0x4e4] ss:$16 sps:$4 sm:$0xff]  }
  0x95   : > { %6677 = vmatprep.subr.bf16.mxu0 %v9450_v53  ;;  %7333 = vmatprep.subr.bf16.mxu1 %v9453_v54  ;;  %v9537_v53 = vld [vmem:[%s11020_s10 + $0x4ec] ss:$16 sps:$4 sm:$0xff]   ;;  %v9532_v54 = vld [vmem:[%s11020_s10 + $0x4e0] ss:$16 sps:$4 sm:$0xff]  }
  0x98   : > { %6678 = vmatpush1.bf16.msra.mxu0 %v9448_v55  ;;  %7334 = vmatpush1.bf16.msra.mxu1 %v9451_v56  ;;  %v9535_v55 = vld [vmem:[%s11020_s10 + $0x4e8] ss:$16 sps:$4 sm:$0xff]   ;;  %v9540_v56 = vld [vmem:[%s11020_s10 + $0x504] ss:$16 sps:$4 sm:$0xff]  }
  0x99   : > { %6679 = vmatprep.subr.bf16.mxu0 %v9456_v57  ;;  %7335 = vmatprep.subr.bf16.mxu1 %v9459_v58  ;;  %v9543_v57 = vld [vmem:[%s11020_s10 + $0x50c] ss:$16 sps:$4 sm:$0xff]   ;;  %v9538_v58 = vld [vmem:[%s11020_s10 + $0x500] ss:$16 sps:$4 sm:$0xff]  }
  0x9c   : > { %6680 = vmatpush1.bf16.msra.mxu0 %v9454_v59  ;;  %7336 = vmatpush1.bf16.msra.mxu1 %v9457_v60  ;;  %v9541_v59 = vld [vmem:[%s11020_s10 + $0x508] ss:$16 sps:$4 sm:$0xff]   ;;  %v9546_v60 = vld [vmem:[%s11020_s10 + $0x524] ss:$16 sps:$4 sm:$0xff]  }
  0x9d   : > { %6681 = vmatprep.subr.bf16.mxu0 %v9462_v61  ;;  %7337 = vmatprep.subr.bf16.mxu1 %v9465_v62  ;;  %v9549_v61 = vld [vmem:[%s11020_s10 + $0x52c] ss:$16 sps:$4 sm:$0xff]   ;;  %v9544_v62 = vld [vmem:[%s11020_s10 + $0x520] ss:$16 sps:$4 sm:$0xff]  }
  0xa0   : > { %6682 = vmatpush1.bf16.msra.mxu0 %v9460_v63  ;;  %7338 = vmatpush1.bf16.msra.mxu1 %v9463_v0  ;;  %v9547_v63 = vld [vmem:[%s11020_s10 + $0x528] ss:$16 sps:$4 sm:$0xff]   ;;  %v9552_v0 = vld [vmem:[%s11020_s10 + $0x544] ss:$16 sps:$4 sm:$0xff]  }
  0xa1   : > { %6683 = vmatprep.subr.bf16.mxu0 %v9468_v1  ;;  %7339 = vmatprep.subr.bf16.mxu1 %v9471_v2  ;;  %v9555_v1 = vld [vmem:[%s11020_s10 + $0x54c] ss:$16 sps:$4 sm:$0xff]   ;;  %v9550_v2 = vld [vmem:[%s11020_s10 + $0x540] ss:$16 sps:$4 sm:$0xff]  }
  0xa4   : > { %6684 = vmatpush1.bf16.msra.mxu0 %v9466_v3  ;;  %7340 = vmatpush1.bf16.msra.mxu1 %v9469_v4  ;;  %v9553_v3 = vld [vmem:[%s11020_s10 + $0x548] ss:$16 sps:$4 sm:$0xff]   ;;  %v9558_v4 = vld [vmem:[%s11020_s10 + $0x564] ss:$16 sps:$4 sm:$0xff]  }
  0xa5   : > { %6685 = vmatprep.subr.bf16.mxu0 %v9474_v5  ;;  %7341 = vmatprep.subr.bf16.mxu1 %v9477_v6  ;;  %v9561_v5 = vld [vmem:[%s11020_s10 + $0x56c] ss:$16 sps:$4 sm:$0xff]   ;;  %v9556_v6 = vld [vmem:[%s11020_s10 + $0x560] ss:$16 sps:$4 sm:$0xff]  }
  0xa8   : > { %6686 = vmatpush1.bf16.msra.mxu0 %v9472_v7  ;;  %7342 = vmatpush1.bf16.msra.mxu1 %v9475_v8  ;;  %v9559_v7 = vld [vmem:[%s11020_s10 + $0x568] ss:$16 sps:$4 sm:$0xff]   ;;  %v9564_v8 = vld [vmem:[%s11020_s10 + $0x584] ss:$16 sps:$4 sm:$0xff]  }
  0xa9   : > { %6687 = vmatprep.subr.bf16.mxu0 %v9480_v10  ;;  %7343 = vmatprep.subr.bf16.mxu1 %v9483_v11  ;;  %v9567_v10 = vld [vmem:[%s11020_s10 + $0x58c] ss:$16 sps:$4 sm:$0xff]   ;;  %v9562_v11 = vld [vmem:[%s11020_s10 + $0x580] ss:$16 sps:$4 sm:$0xff]  }
  0xac   : > { %6688 = vmatpush1.bf16.msra.mxu0 %v9478_v12  ;;  %7344 = vmatpush1.bf16.msra.mxu1 %v9481_v13  ;;  %v9565_v12 = vld [vmem:[%s11020_s10 + $0x588] ss:$16 sps:$4 sm:$0xff]   ;;  %v9570_v13 = vld [vmem:[%s11020_s10 + $0x5a4] ss:$16 sps:$4 sm:$0xff]  }
  0xad   : > { %6689 = vmatprep.subr.bf16.mxu0 %v9486_v14  ;;  %7345 = vmatprep.subr.bf16.mxu1 %v9489_v15  ;;  %v9573_v14 = vld [vmem:[%s11020_s10 + $0x5ac] ss:$16 sps:$4 sm:$0xff]   ;;  %v9568_v15 = vld [vmem:[%s11020_s10 + $0x5a0] ss:$16 sps:$4 sm:$0xff]  }
  0xb0   : > { %6690 = vmatpush1.bf16.msra.mxu0 %v9484_v16  ;;  %7346 = vmatpush1.bf16.msra.mxu1 %v9487_v17  ;;  %v9571_v16 = vld [vmem:[%s11020_s10 + $0x5a8] ss:$16 sps:$4 sm:$0xff]   ;;  %v9576_v17 = vld [vmem:[%s11020_s10 + $0x5c4] ss:$16 sps:$4 sm:$0xff]  }
  0xb1   : > { %6700 = vmatprep.subr.bf16.mxu0 %v9492_v18  ;;  %7356 = vmatprep.subr.bf16.mxu1 %v9495_v19  ;;  %v9579_v18 = vld [vmem:[%s11020_s10 + $0x5cc] ss:$16 sps:$4 sm:$0xff]   ;;  %v291_v19 = vcombine.high %v11177_v23, %v11177_v23  ;;  %v9580_v23 = vld [vmem:[%s11020_s10 + $0x5e0] ss:$16 sps:$4 sm:$0xff]  }
  0xb3   : > { %6692 = vmatmul.mubr.bf16.vlgmr.msra.gmra.mrb[0].mxu0 %v444_v21  ;;  %7348 = vmatmul.mubr.bf16.vlgmr.msra.gmra.mrb[0].mxu1 %v444_v21  ;;  %v9577_v21 = vld [vmem:[%s11020_s10 + $0x5c8] ss:$16 sps:$4 sm:$0xff]  }
  0xb4   : > { %6701 = vmatpush1.bf16.msra.mxu0 %v9490_v20  ;;  %7357 = vmatpush1.bf16.msra.mxu1 %v9493_v22  ;;  %v9574_v20 = vld [vmem:[%s11020_s10 + $0x5c0] ss:$16 sps:$4 sm:$0xff]   ;;  %v9582_v22 = vld [vmem:[%s11020_s10 + $0x5e4] ss:$16 sps:$4 sm:$0xff]  }
  0xb5   : > { %6702 = vmatprep.subr.bf16.mxu0 %v9498_v24  ;;  %7358 = vmatprep.subr.bf16.mxu1 %v9501_v25  ;;  %v9585_v24 = vld [vmem:[%s11020_s10 + $0x5ec] ss:$16 sps:$4 sm:$0xff]   ;;  %v11246_v25 = vrot.slane %v291_v19, %v11073_v49  ;;  %v9661_v19 = vld [vmem:[%s11020_s10 + $0x788] ss:$16 sps:$4 sm:$0xff]  }
  0xb6   : > { %6732 = vmatprep.mubr.bf16.mxu0 %v447_v31  ;;  %7388 = vmatprep.mubr.bf16.mxu1 %v447_v31  ;;  %v9586_v31 = vld [vmem:[%s11020_s10 + $0x600] ss:$16 sps:$4 sm:$0xff]  }
  0xb8   : > { %6703 = vmatpush1.bf16.msra.mxu0 %v9496_v27  ;;  %7359 = vmatpush1.bf16.msra.mxu1 %v9499_v28  ;;  %v9588_v27 = vld [vmem:[%s11020_s10 + $0x604] ss:$16 sps:$4 sm:$0xff]   ;;  %v9591_v28 = vld [vmem:[%s11020_s10 + $0x60c] ss:$16 sps:$4 sm:$0xff]  }
  0xb9   : > { %6704 = vmatprep.subr.bf16.mxu0 %v9504_v29  ;;  %7360 = vmatprep.subr.bf16.mxu1 %v9507_v30  ;;  %v307_v29 = vcombine.high %v11246_v25, %v11246_v25  ;;  %v446_v30 = vpack.c.bf16 %v11183_v26, %v11183_v26  ;;  %v9592_v26 = vld [vmem:[%s11020_s10 + $0x620] ss:$16 sps:$4 sm:$0xff]  }
  0xbc   : > { %6705 = vmatpush1.bf16.msra.mxu0 %v9502_v32  ;;  %7361 = vmatpush1.bf16.msra.mxu1 %v9505_v33  ;;  %v9589_v32 = vld [vmem:[%s11020_s10 + $0x608] ss:$16 sps:$4 sm:$0xff]   ;;  %v9594_v33 = vld [vmem:[%s11020_s10 + $0x624] ss:$16 sps:$4 sm:$0xff]  }
  0xbd   : > { %6706 = vmatprep.subr.bf16.mxu0 %v9510_v34  ;;  %7362 = vmatprep.subr.bf16.mxu1 %v9513_v35  ;;  %v9597_v34 = vld [vmem:[%s11020_s10 + $0x62c] ss:$16 sps:$4 sm:$0xff]   ;;  %v449_v35 = vpack.c.bf16 %v307_v29, %v307_v29  ;;  %v9673_v29 = vld [vmem:[%s11020_s10 + $0x7c8] ss:$16 sps:$4 sm:$0xff]  }
  0xc0   : > { %6707 = vmatpush1.bf16.msra.mxu0 %v9508_v36  ;;  %7363 = vmatpush1.bf16.msra.mxu1 %v9511_v37  ;;  %v9595_v36 = vld [vmem:[%s11020_s10 + $0x628] ss:$16 sps:$4 sm:$0xff]   ;;  %v9600_v37 = vld [vmem:[%s11020_s10 + $0x644] ss:$16 sps:$4 sm:$0xff]  }
  0xc1   : > { %6708 = vmatprep.subr.bf16.mxu0 %v9516_v38  ;;  %7364 = vmatprep.subr.bf16.mxu1 %v9519_v39  ;;  %v9603_v38 = vld [vmem:[%s11020_s10 + $0x64c] ss:$16 sps:$4 sm:$0xff]   ;;  %v9598_v39 = vld [vmem:[%s11020_s10 + $0x640] ss:$16 sps:$4 sm:$0xff]  }
  0xc4   : > { %6709 = vmatpush1.bf16.msra.mxu0 %v9514_v40  ;;  %7365 = vmatpush1.bf16.msra.mxu1 %v9517_v41  ;;  %v9601_v40 = vld [vmem:[%s11020_s10 + $0x648] ss:$16 sps:$4 sm:$0xff]   ;;  %v9606_v41 = vld [vmem:[%s11020_s10 + $0x664] ss:$16 sps:$4 sm:$0xff]  }
  0xc5   : > { %6710 = vmatprep.subr.bf16.mxu0 %v9522_v42  ;;  %7366 = vmatprep.subr.bf16.mxu1 %v9525_v44  ;;  %v9609_v42 = vld [vmem:[%s11020_s10 + $0x66c] ss:$16 sps:$4 sm:$0xff]   ;;  %v9604_v44 = vld [vmem:[%s11020_s10 + $0x660] ss:$16 sps:$4 sm:$0xff]  }
  0xc8   : > { %6711 = vmatpush1.bf16.msra.mxu0 %v9520_v45  ;;  %7367 = vmatpush1.bf16.msra.mxu1 %v9523_v46  ;;  %v9607_v45 = vld [vmem:[%s11020_s10 + $0x668] ss:$16 sps:$4 sm:$0xff]   ;;  %v9612_v46 = vld [vmem:[%s11020_s10 + $0x684] ss:$16 sps:$4 sm:$0xff]  }
  0xc9   : > { %6712 = vmatprep.subr.bf16.mxu0 %v9528_v47  ;;  %7368 = vmatprep.subr.bf16.mxu1 %v9531_v48  ;;  %v9615_v47 = vld [vmem:[%s11020_s10 + $0x68c] ss:$16 sps:$4 sm:$0xff]   ;;  %v9610_v48 = vld [vmem:[%s11020_s10 + $0x680] ss:$16 sps:$4 sm:$0xff]  }
  0xcc   : > { %6713 = vmatpush1.bf16.msra.mxu0 %v9526_v50  ;;  %7369 = vmatpush1.bf16.msra.mxu1 %v9529_v51  ;;  %v9613_v50 = vld [vmem:[%s11020_s10 + $0x688] ss:$16 sps:$4 sm:$0xff]   ;;  %v9618_v51 = vld [vmem:[%s11020_s10 + $0x6a4] ss:$16 sps:$4 sm:$0xff]  }
  0xcd   : > { %6714 = vmatprep.subr.bf16.mxu0 %v9534_v52  ;;  %7370 = vmatprep.subr.bf16.mxu1 %v9537_v53  ;;  %v9621_v52 = vld [vmem:[%s11020_s10 + $0x6ac] ss:$16 sps:$4 sm:$0xff]   ;;  %v9616_v53 = vld [vmem:[%s11020_s10 + $0x6a0] ss:$16 sps:$4 sm:$0xff]  }
  0xd0   : > { %6715 = vmatpush1.bf16.msra.mxu0 %v9532_v54  ;;  %7371 = vmatpush1.bf16.msra.mxu1 %v9535_v55  ;;  %v9619_v54 = vld [vmem:[%s11020_s10 + $0x6a8] ss:$16 sps:$4 sm:$0xff]   ;;  %v9624_v55 = vld [vmem:[%s11020_s10 + $0x6c4] ss:$16 sps:$4 sm:$0xff]  }
  0xd1   : > { %6716 = vmatprep.subr.bf16.mxu0 %v9540_v56  ;;  %7372 = vmatprep.subr.bf16.mxu1 %v9543_v57  ;;  %v9627_v56 = vld [vmem:[%s11020_s10 + $0x6cc] ss:$16 sps:$4 sm:$0xff]   ;;  %v9622_v57 = vld [vmem:[%s11020_s10 + $0x6c0] ss:$16 sps:$4 sm:$0xff]  }
  0xd4   : > { %6717 = vmatpush1.bf16.msra.mxu0 %v9538_v58  ;;  %7373 = vmatpush1.bf16.msra.mxu1 %v9541_v59  ;;  %v9625_v58 = vld [vmem:[%s11020_s10 + $0x6c8] ss:$16 sps:$4 sm:$0xff]   ;;  %v9630_v59 = vld [vmem:[%s11020_s10 + $0x6e4] ss:$16 sps:$4 sm:$0xff]  }
  0xd5   : > { %6718 = vmatprep.subr.bf16.mxu0 %v9546_v60  ;;  %7374 = vmatprep.subr.bf16.mxu1 %v9549_v61  ;;  %v9633_v60 = vld [vmem:[%s11020_s10 + $0x6ec] ss:$16 sps:$4 sm:$0xff]   ;;  %v9628_v61 = vld [vmem:[%s11020_s10 + $0x6e0] ss:$16 sps:$4 sm:$0xff]  }
  0xd8   : > { %6719 = vmatpush1.bf16.msra.mxu0 %v9544_v62  ;;  %7375 = vmatpush1.bf16.msra.mxu1 %v9547_v63  ;;  %v9631_v62 = vld [vmem:[%s11020_s10 + $0x6e8] ss:$16 sps:$4 sm:$0xff]   ;;  %v9636_v63 = vld [vmem:[%s11020_s10 + $0x704] ss:$16 sps:$4 sm:$0xff]  }
  0xd9   : > { %6720 = vmatprep.subr.bf16.mxu0 %v9552_v0  ;;  %7376 = vmatprep.subr.bf16.mxu1 %v9555_v1  ;;  %v9639_v0 = vld [vmem:[%s11020_s10 + $0x70c] ss:$16 sps:$4 sm:$0xff]   ;;  %v9634_v1 = vld [vmem:[%s11020_s10 + $0x700] ss:$16 sps:$4 sm:$0xff]  }
  0xdc   : > { %6721 = vmatpush1.bf16.msra.mxu0 %v9550_v2  ;;  %7377 = vmatpush1.bf16.msra.mxu1 %v9553_v3  ;;  %v9637_v2 = vld [vmem:[%s11020_s10 + $0x708] ss:$16 sps:$4 sm:$0xff]   ;;  %v9642_v3 = vld [vmem:[%s11020_s10 + $0x724] ss:$16 sps:$4 sm:$0xff]  }
  0xdd   : > { %6722 = vmatprep.subr.bf16.mxu0 %v9558_v4  ;;  %7378 = vmatprep.subr.bf16.mxu1 %v9561_v5  ;;  %v9645_v4 = vld [vmem:[%s11020_s10 + $0x72c] ss:$16 sps:$4 sm:$0xff]   ;;  %v9640_v5 = vld [vmem:[%s11020_s10 + $0x720] ss:$16 sps:$4 sm:$0xff]  }
  0xe0   : > { %6723 = vmatpush1.bf16.msra.mxu0 %v9556_v6  ;;  %7379 = vmatpush1.bf16.msra.mxu1 %v9559_v7  ;;  %v9643_v6 = vld [vmem:[%s11020_s10 + $0x728] ss:$16 sps:$4 sm:$0xff]   ;;  %v9648_v7 = vld [vmem:[%s11020_s10 + $0x744] ss:$16 sps:$4 sm:$0xff]  }
  0xe1   : > { %6724 = vmatprep.subr.bf16.mxu0 %v9564_v8  ;;  %7380 = vmatprep.subr.bf16.mxu1 %v9567_v10  ;;  %v9651_v8 = vld [vmem:[%s11020_s10 + $0x74c] ss:$16 sps:$4 sm:$0xff]   ;;  %v9646_v10 = vld [vmem:[%s11020_s10 + $0x740] ss:$16 sps:$4 sm:$0xff]  }
  0xe4   : > { %6725 = vmatpush1.bf16.msra.mxu0 %v9562_v11  ;;  %7381 = vmatpush1.bf16.msra.mxu1 %v9565_v12  ;;  %v9649_v11 = vld [vmem:[%s11020_s10 + $0x748] ss:$16 sps:$4 sm:$0xff]   ;;  %v9654_v12 = vld [vmem:[%s11020_s10 + $0x764] ss:$16 sps:$4 sm:$0xff]  }
  0xe5   : > { %6726 = vmatprep.subr.bf16.mxu0 %v9570_v13  ;;  %7382 = vmatprep.subr.bf16.mxu1 %v9573_v14  ;;  %v9657_v13 = vld [vmem:[%s11020_s10 + $0x76c] ss:$16 sps:$4 sm:$0xff]   ;;  %v9652_v14 = vld [vmem:[%s11020_s10 + $0x760] ss:$16 sps:$4 sm:$0xff]  }
  0xe8   : > { %6727 = vmatpush1.bf16.msra.mxu0 %v9568_v15  ;;  %7383 = vmatpush1.bf16.msra.mxu1 %v9571_v16  ;;  %v9655_v15 = vld [vmem:[%s11020_s10 + $0x768] ss:$16 sps:$4 sm:$0xff]   ;;  %v9660_v16 = vld [vmem:[%s11020_s10 + $0x784] ss:$16 sps:$4 sm:$0xff]  }
  0xe9   : > { %6728 = vmatprep.subr.bf16.mxu0 %v9576_v17  ;;  %7384 = vmatprep.subr.bf16.mxu1 %v9579_v18  ;;  %v9663_v17 = vld [vmem:[%s11020_s10 + $0x78c] ss:$16 sps:$4 sm:$0xff]   ;;  %v9658_v18 = vld [vmem:[%s11020_s10 + $0x780] ss:$16 sps:$4 sm:$0xff]  }
  0xec   : > { %6729 = vmatpush1.bf16.msra.mxu0 %v9574_v20  ;;  %7385 = vmatpush1.bf16.msra.mxu1 %v9577_v21  ;;  %v9666_v20 = vld [vmem:[%s11020_s10 + $0x7a4] ss:$16 sps:$4 sm:$0xff]   ;;  %v9669_v21 = vld [vmem:[%s11020_s10 + $0x7ac] ss:$16 sps:$4 sm:$0xff]  }
  0xed   : > { %6730 = vmatprep.subr.bf16.mxu0 %v9582_v22  ;;  %7386 = vmatprep.subr.bf16.mxu1 %v9585_v24  ;;  %v9664_v22 = vld [vmem:[%s11020_s10 + $0x7a0] ss:$16 sps:$4 sm:$0xff]   ;;  %v9667_v24 = vld [vmem:[%s11020_s10 + $0x7a8] ss:$16 sps:$4 sm:$0xff]  }
  0xf0   : > { %6731 = vmatpush1.bf16.msra.mxu0 %v9580_v23  ;;  %7387 = vmatpush1.bf16.msra.mxu1 %v9583_v9  ;;  %v9672_v23 = vld [vmem:[%s11020_s10 + $0x7c4] ss:$16 sps:$4 sm:$0xff]   ;;  %v9675_v9 = vld [vmem:[%s11020_s10 + $0x7cc] ss:$16 sps:$4 sm:$0xff]  }
  0xf1   : > { %6741 = vmatprep.subr.bf16.mxu0 %v9588_v27  ;;  %7397 = vmatprep.subr.bf16.mxu1 %v9591_v28  ;;  %v9670_v27 = vld [vmem:[%s11020_s10 + $0x7c0] ss:$16 sps:$4 sm:$0xff]  }
  0xf2   : > { %v11316_v28 = vld [vmem:[%s12255_s0 + $0x10] sm:$0xff] }
  0xf3   : > { %6733 = vmatmul.mubr.bf16.vlgmr.msra.gmra.mrb[0].mxu0 %v446_v30  ;;  %7389 = vmatmul.mubr.bf16.vlgmr.msra.gmra.mrb[0].mxu1 %v446_v30  ;;  %v9678_v30 = vld [vmem:[%s11020_s10 + $0x7e4] ss:$16 sps:$4 sm:$0xff]  }
  0xf4   : > { %6742 = vmatpush1.bf16.msra.mxu0 %v9586_v31  ;;  %7398 = vmatpush1.bf16.msra.mxu1 %v9589_v32  ;;  %v9681_v31 = vld [vmem:[%s11020_s10 + $0x7ec] ss:$16 sps:$4 sm:$0xff]   ;;  %v11323_v32 = vrot.slane %v11316_v28, %v11073_v49 }
  0xf5   : > { %6743 = vmatprep.subr.bf16.mxu0 %v9594_v33  ;;  %7399 = vmatprep.subr.bf16.mxu1 %v9597_v34  ;;  %v9676_v33 = vld [vmem:[%s11020_s10 + $0x7e0] ss:$16 sps:$4 sm:$0xff]   ;;  %v9679_v34 = vld [vmem:[%s11020_s10 + $0x7e8] ss:$16 sps:$4 sm:$0xff]  }
  0xf6   : > { %6773 = vmatprep.mubr.bf16.mxu0 %v449_v35  ;;  %7429 = vmatprep.mubr.bf16.mxu1 %v449_v35  ;;  %v9685_v35 = vld [vmem:[%s11020_s10 + $0x804] ss:$16 sps:$4 sm:$0xff]  }
  0xf8   : > { %6744 = vmatpush1.bf16.msra.mxu0 %v9592_v26  ;;  %7400 = vmatpush1.bf16.msra.mxu1 %v9595_v36  ;;  %v9688_v26 = vld [vmem:[%s11020_s10 + $0x80c] ss:$16 sps:$4 sm:$0xff]   ;;  %v323_v36 = vcombine.high %v11323_v32, %v11323_v32 }
  0xf9   : > { %6745 = vmatprep.subr.bf16.mxu0 %v9600_v37  ;;  %7401 = vmatprep.subr.bf16.mxu1 %v9603_v38  ;;  %v9683_v37 = vld [vmem:[%s11020_s10 + $0x800] ss:$16 sps:$4 sm:$0xff]   ;;  %v448_v38 = vpack.c.bf16 %v11246_v25, %v11246_v25  ;;  %v9697_v25 = vld [vmem:[%s11020_s10 + $0x844] ss:$16 sps:$4 sm:$0xff]  }
  0xfc   : > { %6746 = vmatpush1.bf16.msra.mxu0 %v9598_v39  ;;  %7402 = vmatpush1.bf16.msra.mxu1 %v9601_v40  ;;  %v9686_v39 = vld [vmem:[%s11020_s10 + $0x808] ss:$16 sps:$4 sm:$0xff]   ;;  %v9691_v40 = vld [vmem:[%s11020_s10 + $0x824] ss:$16 sps:$4 sm:$0xff]  }
  0xfd   : > { %6747 = vmatprep.subr.bf16.mxu0 %v9606_v41  ;;  %7403 = vmatprep.subr.bf16.mxu1 %v9609_v42  ;;  %v9694_v41 = vld [vmem:[%s11020_s10 + $0x82c] ss:$16 sps:$4 sm:$0xff]   ;;  %v451_v42 = vpack.c.bf16 %v323_v36, %v323_v36  ;;  %v9767_v36 = vld [vmem:[%s11020_s10 + $0x9c0] ss:$16 sps:$4 sm:$0xff]  }
 0x100   : > { %6748 = vmatpush1.bf16.msra.mxu0 %v9604_v44  ;;  %7404 = vmatpush1.bf16.msra.mxu1 %v9607_v45  ;;  %v9689_v44 = vld [vmem:[%s11020_s10 + $0x820] ss:$16 sps:$4 sm:$0xff]   ;;  %v9692_v45 = vld [vmem:[%s11020_s10 + $0x828] ss:$16 sps:$4 sm:$0xff]  }
 0x101   : > { %6749 = vmatprep.subr.bf16.mxu0 %v9612_v46  ;;  %7405 = vmatprep.subr.bf16.mxu1 %v9615_v47  ;;  %v9700_v46 = vld [vmem:[%s11020_s10 + $0x84c] ss:$16 sps:$4 sm:$0xff]   ;;  %v9695_v47 = vld [vmem:[%s11020_s10 + $0x840] ss:$16 sps:$4 sm:$0xff]  }
 0x104   : > { %6750 = vmatpush1.bf16.msra.mxu0 %v9610_v48  ;;  %7406 = vmatpush1.bf16.msra.mxu1 %v9613_v50  ;;  %v9698_v48 = vld [vmem:[%s11020_s10 + $0x848] ss:$16 sps:$4 sm:$0xff]   ;;  %v9703_v50 = vld [vmem:[%s11020_s10 + $0x864] ss:$16 sps:$4 sm:$0xff]  }
 0x105   : > { %6751 = vmatprep.subr.bf16.mxu0 %v9618_v51  ;;  %7407 = vmatprep.subr.bf16.mxu1 %v9621_v52  ;;  %v9706_v51 = vld [vmem:[%s11020_s10 + $0x86c] ss:$16 sps:$4 sm:$0xff]   ;;  %v9701_v52 = vld [vmem:[%s11020_s10 + $0x860] ss:$16 sps:$4 sm:$0xff]  }
 0x108   : > { %6752 = vmatpush1.bf16.msra.mxu0 %v9616_v53  ;;  %7408 = vmatpush1.bf16.msra.mxu1 %v9619_v54  ;;  %v9704_v53 = vld [vmem:[%s11020_s10 + $0x868] ss:$16 sps:$4 sm:$0xff]   ;;  %v9709_v54 = vld [vmem:[%s11020_s10 + $0x884] ss:$16 sps:$4 sm:$0xff]  }
 0x109   : > { %6753 = vmatprep.subr.bf16.mxu0 %v9624_v55  ;;  %7409 = vmatprep.subr.bf16.mxu1 %v9627_v56  ;;  %v9712_v55 = vld [vmem:[%s11020_s10 + $0x88c] ss:$16 sps:$4 sm:$0xff]   ;;  %v9707_v56 = vld [vmem:[%s11020_s10 + $0x880] ss:$16 sps:$4 sm:$0xff]  }
 0x10c   : > { %6754 = vmatpush1.bf16.msra.mxu0 %v9622_v57  ;;  %7410 = vmatpush1.bf16.msra.mxu1 %v9625_v58  ;;  %v9710_v57 = vld [vmem:[%s11020_s10 + $0x888] ss:$16 sps:$4 sm:$0xff]   ;;  %v9715_v58 = vld [vmem:[%s11020_s10 + $0x8a4] ss:$16 sps:$4 sm:$0xff]  }
 0x10d   : > { %6755 = vmatprep.subr.bf16.mxu0 %v9630_v59  ;;  %7411 = vmatprep.subr.bf16.mxu1 %v9633_v60  ;;  %v9718_v59 = vld [vmem:[%s11020_s10 + $0x8ac] ss:$16 sps:$4 sm:$0xff]   ;;  %v9713_v60 = vld [vmem:[%s11020_s10 + $0x8a0] ss:$16 sps:$4 sm:$0xff]  }
 0x110   : > { %6756 = vmatpush1.bf16.msra.mxu0 %v9628_v61  ;;  %7412 = vmatpush1.bf16.msra.mxu1 %v9631_v62  ;;  %v9716_v61 = vld [vmem:[%s11020_s10 + $0x8a8] ss:$16 sps:$4 sm:$0xff]   ;;  %v9721_v62 = vld [vmem:[%s11020_s10 + $0x8c4] ss:$16 sps:$4 sm:$0xff]  }
 0x111   : > { %6757 = vmatprep.subr.bf16.mxu0 %v9636_v63  ;;  %7413 = vmatprep.subr.bf16.mxu1 %v9639_v0  ;;  %v9724_v63 = vld [vmem:[%s11020_s10 + $0x8cc] ss:$16 sps:$4 sm:$0xff]   ;;  %v9719_v0 = vld [vmem:[%s11020_s10 + $0x8c0] ss:$16 sps:$4 sm:$0xff]  }
 0x114   : > { %6758 = vmatpush1.bf16.msra.mxu0 %v9634_v1  ;;  %7414 = vmatpush1.bf16.msra.mxu1 %v9637_v2  ;;  %v9722_v1 = vld [vmem:[%s11020_s10 + $0x8c8] ss:$16 sps:$4 sm:$0xff]   ;;  %v9727_v2 = vld [vmem:[%s11020_s10 + $0x8e4] ss:$16 sps:$4 sm:$0xff]  }
 0x115   : > { %6759 = vmatprep.subr.bf16.mxu0 %v9642_v3  ;;  %7415 = vmatprep.subr.bf16.mxu1 %v9645_v4  ;;  %v9730_v3 = vld [vmem:[%s11020_s10 + $0x8ec] ss:$16 sps:$4 sm:$0xff]   ;;  %v9725_v4 = vld [vmem:[%s11020_s10 + $0x8e0] ss:$16 sps:$4 sm:$0xff]  }
 0x118   : > { %6760 = vmatpush1.bf16.msra.mxu0 %v9640_v5  ;;  %7416 = vmatpush1.bf16.msra.mxu1 %v9643_v6  ;;  %v9728_v5 = vld [vmem:[%s11020_s10 + $0x8e8] ss:$16 sps:$4 sm:$0xff]   ;;  %v9733_v6 = vld [vmem:[%s11020_s10 + $0x904] ss:$16 sps:$4 sm:$0xff]  }
 0x119   : > { %6761 = vmatprep.subr.bf16.mxu0 %v9648_v7  ;;  %7417 = vmatprep.subr.bf16.mxu1 %v9651_v8  ;;  %v9736_v7 = vld [vmem:[%s11020_s10 + $0x90c] ss:$16 sps:$4 sm:$0xff]   ;;  %v9731_v8 = vld [vmem:[%s11020_s10 + $0x900] ss:$16 sps:$4 sm:$0xff]  }
 0x11c   : > { %6762 = vmatpush1.bf16.msra.mxu0 %v9646_v10  ;;  %7418 = vmatpush1.bf16.msra.mxu1 %v9649_v11  ;;  %v9734_v10 = vld [vmem:[%s11020_s10 + $0x908] ss:$16 sps:$4 sm:$0xff]   ;;  %v9739_v11 = vld [vmem:[%s11020_s10 + $0x924] ss:$16 sps:$4 sm:$0xff]  }
 0x11d   : > { %6763 = vmatprep.subr.bf16.mxu0 %v9654_v12  ;;  %7419 = vmatprep.subr.bf16.mxu1 %v9657_v13  ;;  %v9742_v12 = vld [vmem:[%s11020_s10 + $0x92c] ss:$16 sps:$4 sm:$0xff]   ;;  %v9737_v13 = vld [vmem:[%s11020_s10 + $0x920] ss:$16 sps:$4 sm:$0xff]  }
 0x120   : > { %6764 = vmatpush1.bf16.msra.mxu0 %v9652_v14  ;;  %7420 = vmatpush1.bf16.msra.mxu1 %v9655_v15  ;;  %v9740_v14 = vld [vmem:[%s11020_s10 + $0x928] ss:$16 sps:$4 sm:$0xff]   ;;  %v9745_v15 = vld [vmem:[%s11020_s10 + $0x944] ss:$16 sps:$4 sm:$0xff]  }
 0x121   : > { %6765 = vmatprep.subr.bf16.mxu0 %v9660_v16  ;;  %7421 = vmatprep.subr.bf16.mxu1 %v9663_v17  ;;  %v9748_v16 = vld [vmem:[%s11020_s10 + $0x94c] ss:$16 sps:$4 sm:$0xff]   ;;  %v9743_v17 = vld [vmem:[%s11020_s10 + $0x940] ss:$16 sps:$4 sm:$0xff]  }
 0x124   : > { %6766 = vmatpush1.bf16.msra.mxu0 %v9658_v18  ;;  %7422 = vmatpush1.bf16.msra.mxu1 %v9661_v19  ;;  %v9746_v18 = vld [vmem:[%s11020_s10 + $0x948] ss:$16 sps:$4 sm:$0xff]   ;;  %v9751_v19 = vld [vmem:[%s11020_s10 + $0x964] ss:$16 sps:$4 sm:$0xff]  }
 0x125   : > { %6767 = vmatprep.subr.bf16.mxu0 %v9666_v20  ;;  %7423 = vmatprep.subr.bf16.mxu1 %v9669_v21  ;;  %v9754_v20 = vld [vmem:[%s11020_s10 + $0x96c] ss:$16 sps:$4 sm:$0xff]   ;;  %v9749_v21 = vld [vmem:[%s11020_s10 + $0x960] ss:$16 sps:$4 sm:$0xff]  }
 0x128   : > { %6768 = vmatpush1.bf16.msra.mxu0 %v9664_v22  ;;  %7424 = vmatpush1.bf16.msra.mxu1 %v9667_v24  ;;  %v9752_v22 = vld [vmem:[%s11020_s10 + $0x968] ss:$16 sps:$4 sm:$0xff]   ;;  %v9757_v24 = vld [vmem:[%s11020_s10 + $0x984] ss:$16 sps:$4 sm:$0xff]  }
 0x129   : > { %6769 = vmatprep.subr.bf16.mxu0 %v9672_v23  ;;  %7425 = vmatprep.subr.bf16.mxu1 %v9675_v9  ;;  %v9760_v23 = vld [vmem:[%s11020_s10 + $0x98c] ss:$16 sps:$4 sm:$0xff]   ;;  %v9755_v9 = vld [vmem:[%s11020_s10 + $0x980] ss:$16 sps:$4 sm:$0xff]  }
 0x12c   : > { %6770 = vmatpush1.bf16.msra.mxu0 %v9670_v27  ;;  %7426 = vmatpush1.bf16.msra.mxu1 %v9673_v29  ;;  %v9758_v27 = vld [vmem:[%s11020_s10 + $0x988] ss:$16 sps:$4 sm:$0xff]   ;;  %v9763_v29 = vld [vmem:[%s11020_s10 + $0x9a4] ss:$16 sps:$4 sm:$0xff]  }
 0x12d   : > { %6771 = vmatprep.subr.bf16.mxu0 %v9678_v30  ;;  %7427 = vmatprep.subr.bf16.mxu1 %v9681_v31  ;;  %v9766_v30 = vld [vmem:[%s11020_s10 + $0x9ac] ss:$16 sps:$4 sm:$0xff]   ;;  %v9761_v31 = vld [vmem:[%s11020_s10 + $0x9a0] ss:$16 sps:$4 sm:$0xff]  }
 0x130   : > { %6772 = vmatpush1.bf16.msra.mxu0 %v9676_v33  ;;  %7428 = vmatpush1.bf16.msra.mxu1 %v9679_v34  ;;  %v9764_v33 = vld [vmem:[%s11020_s10 + $0x9a8] ss:$16 sps:$4 sm:$0xff]   ;;  %v9769_v34 = vld [vmem:[%s11020_s10 + $0x9c4] ss:$16 sps:$4 sm:$0xff]  }
 0x131   : > { %6782 = vmatprep.subr.bf16.mxu0 %v9685_v35  ;;  %7438 = vmatprep.subr.bf16.mxu1 %v9688_v26  ;;  %v9772_v35 = vld [vmem:[%s11020_s10 + $0x9cc] ss:$16 sps:$4 sm:$0xff]   ;;  %v308_v26 = vcombine.high %v11316_v28, %v11316_v28  ;;  %v9773_v28 = vld [vmem:[%s11020_s10 + $0x9e0] ss:$16 sps:$4 sm:$0xff]  }
 0x133   : > { %6774 = vmatmul.mubr.bf16.vlgmr.msra.gmra.mrb[0].mxu0 %v448_v38  ;;  %7430 = vmatmul.mubr.bf16.vlgmr.msra.gmra.mrb[0].mxu1 %v448_v38  ;;  %v9775_v38 = vld [vmem:[%s11020_s10 + $0x9e4] ss:$16 sps:$4 sm:$0xff]  }
 0x134   : > { %6783 = vmatpush1.bf16.msra.mxu0 %v9683_v37  ;;  %7439 = vmatpush1.bf16.msra.mxu1 %v9686_v39  ;;  %v9770_v37 = vld [vmem:[%s11020_s10 + $0x9c8] ss:$16 sps:$4 sm:$0xff]   ;;  %v9778_v39 = vld [vmem:[%s11020_s10 + $0x9ec] ss:$16 sps:$4 sm:$0xff]  }
 0x135   : > { %6784 = vmatprep.subr.bf16.mxu0 %v9691_v40  ;;  %7440 = vmatprep.subr.bf16.mxu1 %v9694_v41  ;;  %v11396_v40 = vrot.slane %v308_v26, %v11073_v49  ;;  %v9776_v41 = vld [vmem:[%s11020_s10 + $0x9e8] ss:$16 sps:$4 sm:$0xff]  }
 0x136   : > { %6814 = vmatprep.mubr.bf16.mxu0 %v451_v42  ;;  %7470 = vmatprep.mubr.bf16.mxu1 %v451_v42  ;;  %v9781_v42 = vld [vmem:[%s11020_s10 + $0xa04] ss:$16 sps:$4 sm:$0xff]   ;;  %v9854_v26 = vld [vmem:[%s11020_s10 + $0xb88] ss:$16 sps:$4 sm:$0xff]  }
 0x138   : > { %6785 = vmatpush1.bf16.msra.mxu0 %v9689_v44  ;;  %7441 = vmatpush1.bf16.msra.mxu1 %v9692_v45  ;;  %v9784_v44 = vld [vmem:[%s11020_s10 + $0xa0c] ss:$16 sps:$4 sm:$0xff]   ;;  %v324_v45 = vcombine.high %v11396_v40, %v11396_v40 }
 0x139   : > { %6786 = vmatprep.subr.bf16.mxu0 %v9697_v25  ;;  %7442 = vmatprep.subr.bf16.mxu1 %v9700_v46  ;;  %v450_v25 = vpack.c.bf16 %v11323_v32, %v11323_v32  ;;  %v9779_v46 = vld [vmem:[%s11020_s10 + $0xa00] ss:$16 sps:$4 sm:$0xff]  }
 0x13a   : > { %v9785_v32 = vld [vmem:[%s11020_s10 + $0xa20] ss:$16 sps:$4 sm:$0xff]  }
 0x13c   : > { %6787 = vmatpush1.bf16.msra.mxu0 %v9695_v47  ;;  %7443 = vmatpush1.bf16.msra.mxu1 %v9698_v48  ;;  %v9782_v47 = vld [vmem:[%s11020_s10 + $0xa08] ss:$16 sps:$4 sm:$0xff]   ;;  %v9787_v48 = vld [vmem:[%s11020_s10 + $0xa24] ss:$16 sps:$4 sm:$0xff]  }
 0x13d   : > { %6788 = vmatprep.subr.bf16.mxu0 %v9703_v50  ;;  %7444 = vmatprep.subr.bf16.mxu1 %v9706_v51  ;;  %v9790_v50 = vld [vmem:[%s11020_s10 + $0xa2c] ss:$16 sps:$4 sm:$0xff]   ;;  %v453_v51 = vpack.c.bf16 %v324_v45, %v324_v45  ;;  %v9866_v45 = vld [vmem:[%s11020_s10 + $0xbc8] ss:$16 sps:$4 sm:$0xff]  }
 0x140   : > { %6789 = vmatpush1.bf16.msra.mxu0 %v9701_v52  ;;  %7445 = vmatpush1.bf16.msra.mxu1 %v9704_v53  ;;  %v9788_v52 = vld [vmem:[%s11020_s10 + $0xa28] ss:$16 sps:$4 sm:$0xff]   ;;  %v9793_v53 = vld [vmem:[%s11020_s10 + $0xa44] ss:$16 sps:$4 sm:$0xff]  }
 0x141   : > { %6790 = vmatprep.subr.bf16.mxu0 %v9709_v54  ;;  %7446 = vmatprep.subr.bf16.mxu1 %v9712_v55  ;;  %v9796_v54 = vld [vmem:[%s11020_s10 + $0xa4c] ss:$16 sps:$4 sm:$0xff]   ;;  %v9791_v55 = vld [vmem:[%s11020_s10 + $0xa40] ss:$16 sps:$4 sm:$0xff]  }
 0x144   : > { %6791 = vmatpush1.bf16.msra.mxu0 %v9707_v56  ;;  %7447 = vmatpush1.bf16.msra.mxu1 %v9710_v57  ;;  %v9794_v56 = vld [vmem:[%s11020_s10 + $0xa48] ss:$16 sps:$4 sm:$0xff]   ;;  %v9799_v57 = vld [vmem:[%s11020_s10 + $0xa64] ss:$16 sps:$4 sm:$0xff]  }
 0x145   : > { %6792 = vmatprep.subr.bf16.mxu0 %v9715_v58  ;;  %7448 = vmatprep.subr.bf16.mxu1 %v9718_v59  ;;  %v9802_v58 = vld [vmem:[%s11020_s10 + $0xa6c] ss:$16 sps:$4 sm:$0xff]   ;;  %v9797_v59 = vld [vmem:[%s11020_s10 + $0xa60] ss:$16 sps:$4 sm:$0xff]  }
 0x148   : > { %6793 = vmatpush1.bf16.msra.mxu0 %v9713_v60  ;;  %7449 = vmatpush1.bf16.msra.mxu1 %v9716_v61  ;;  %v9800_v60 = vld [vmem:[%s11020_s10 + $0xa68] ss:$16 sps:$4 sm:$0xff]   ;;  %v9805_v61 = vld [vmem:[%s11020_s10 + $0xa84] ss:$16 sps:$4 sm:$0xff]  }
 0x149   : > { %6794 = vmatprep.subr.bf16.mxu0 %v9721_v62  ;;  %7450 = vmatprep.subr.bf16.mxu1 %v9724_v63  ;;  %v9808_v62 = vld [vmem:[%s11020_s10 + $0xa8c] ss:$16 sps:$4 sm:$0xff]   ;;  %v9803_v63 = vld [vmem:[%s11020_s10 + $0xa80] ss:$16 sps:$4 sm:$0xff]  }
 0x14c   : > { %6795 = vmatpush1.bf16.msra.mxu0 %v9719_v0  ;;  %7451 = vmatpush1.bf16.msra.mxu1 %v9722_v1  ;;  %v9806_v0 = vld [vmem:[%s11020_s10 + $0xa88] ss:$16 sps:$4 sm:$0xff]   ;;  %v9811_v1 = vld [vmem:[%s11020_s10 + $0xaa4] ss:$16 sps:$4 sm:$0xff]  }
 0x14d   : > { %6796 = vmatprep.subr.bf16.mxu0 %v9727_v2  ;;  %7452 = vmatprep.subr.bf16.mxu1 %v9730_v3  ;;  %v9814_v2 = vld [vmem:[%s11020_s10 + $0xaac] ss:$16 sps:$4 sm:$0xff]   ;;  %v9809_v3 = vld [vmem:[%s11020_s10 + $0xaa0] ss:$16 sps:$4 sm:$0xff]  }
 0x150   : > { %6797 = vmatpush1.bf16.msra.mxu0 %v9725_v4  ;;  %7453 = vmatpush1.bf16.msra.mxu1 %v9728_v5  ;;  %v9812_v4 = vld [vmem:[%s11020_s10 + $0xaa8] ss:$16 sps:$4 sm:$0xff]   ;;  %v9817_v5 = vld [vmem:[%s11020_s10 + $0xac4] ss:$16 sps:$4 sm:$0xff]  }
 0x151   : > { %6798 = vmatprep.subr.bf16.mxu0 %v9733_v6  ;;  %7454 = vmatprep.subr.bf16.mxu1 %v9736_v7  ;;  %v9820_v6 = vld [vmem:[%s11020_s10 + $0xacc] ss:$16 sps:$4 sm:$0xff]   ;;  %v9815_v7 = vld [vmem:[%s11020_s10 + $0xac0] ss:$16 sps:$4 sm:$0xff]  }
 0x154   : > { %6799 = vmatpush1.bf16.msra.mxu0 %v9731_v8  ;;  %7455 = vmatpush1.bf16.msra.mxu1 %v9734_v10  ;;  %v9818_v8 = vld [vmem:[%s11020_s10 + $0xac8] ss:$16 sps:$4 sm:$0xff]   ;;  %v9823_v10 = vld [vmem:[%s11020_s10 + $0xae4] ss:$16 sps:$4 sm:$0xff]  }
 0x155   : > { %6800 = vmatprep.subr.bf16.mxu0 %v9739_v11  ;;  %7456 = vmatprep.subr.bf16.mxu1 %v9742_v12  ;;  %v9826_v11 = vld [vmem:[%s11020_s10 + $0xaec] ss:$16 sps:$4 sm:$0xff]   ;;  %v9821_v12 = vld [vmem:[%s11020_s10 + $0xae0] ss:$16 sps:$4 sm:$0xff]  }
 0x158   : > { %6801 = vmatpush1.bf16.msra.mxu0 %v9737_v13  ;;  %7457 = vmatpush1.bf16.msra.mxu1 %v9740_v14  ;;  %v9824_v13 = vld [vmem:[%s11020_s10 + $0xae8] ss:$16 sps:$4 sm:$0xff]   ;;  %v9829_v14 = vld [vmem:[%s11020_s10 + $0xb04] ss:$16 sps:$4 sm:$0xff]  }
 0x159   : > { %6802 = vmatprep.subr.bf16.mxu0 %v9745_v15  ;;  %7458 = vmatprep.subr.bf16.mxu1 %v9748_v16  ;;  %v9832_v15 = vld [vmem:[%s11020_s10 + $0xb0c] ss:$16 sps:$4 sm:$0xff]   ;;  %v9827_v16 = vld [vmem:[%s11020_s10 + $0xb00] ss:$16 sps:$4 sm:$0xff]  }
 0x15c   : > { %6803 = vmatpush1.bf16.msra.mxu0 %v9743_v17  ;;  %7459 = vmatpush1.bf16.msra.mxu1 %v9746_v18  ;;  %v9830_v17 = vld [vmem:[%s11020_s10 + $0xb08] ss:$16 sps:$4 sm:$0xff]   ;;  %v9835_v18 = vld [vmem:[%s11020_s10 + $0xb24] ss:$16 sps:$4 sm:$0xff]  }
 0x15d   : > { %6804 = vmatprep.subr.bf16.mxu0 %v9751_v19  ;;  %7460 = vmatprep.subr.bf16.mxu1 %v9754_v20  ;;  %v9838_v19 = vld [vmem:[%s11020_s10 + $0xb2c] ss:$16 sps:$4 sm:$0xff]   ;;  %v9833_v20 = vld [vmem:[%s11020_s10 + $0xb20] ss:$16 sps:$4 sm:$0xff]  }
 0x160   : > { %6805 = vmatpush1.bf16.msra.mxu0 %v9749_v21  ;;  %7461 = vmatpush1.bf16.msra.mxu1 %v9752_v22  ;;  %v9836_v21 = vld [vmem:[%s11020_s10 + $0xb28] ss:$16 sps:$4 sm:$0xff]   ;;  %v9841_v22 = vld [vmem:[%s11020_s10 + $0xb44] ss:$16 sps:$4 sm:$0xff]  }
 0x161   : > { %6806 = vmatprep.subr.bf16.mxu0 %v9757_v24  ;;  %7462 = vmatprep.subr.bf16.mxu1 %v9760_v23  ;;  %v9844_v24 = vld [vmem:[%s11020_s10 + $0xb4c] ss:$16 sps:$4 sm:$0xff]   ;;  %v9839_v23 = vld [vmem:[%s11020_s10 + $0xb40] ss:$16 sps:$4 sm:$0xff]  }
 0x164   : > { %6807 = vmatpush1.bf16.msra.mxu0 %v9755_v9  ;;  %7463 = vmatpush1.bf16.msra.mxu1 %v9758_v27  ;;  %v9842_v9 = vld [vmem:[%s11020_s10 + $0xb48] ss:$16 sps:$4 sm:$0xff]   ;;  %v9847_v27 = vld [vmem:[%s11020_s10 + $0xb64] ss:$16 sps:$4 sm:$0xff]  }
 0x165   : > { %6808 = vmatprep.subr.bf16.mxu0 %v9763_v29  ;;  %7464 = vmatprep.subr.bf16.mxu1 %v9766_v30  ;;  %v9850_v29 = vld [vmem:[%s11020_s10 + $0xb6c] ss:$16 sps:$4 sm:$0xff]   ;;  %v9845_v30 = vld [vmem:[%s11020_s10 + $0xb60] ss:$16 sps:$4 sm:$0xff]  }
 0x168   : > { %6809 = vmatpush1.bf16.msra.mxu0 %v9761_v31  ;;  %7465 = vmatpush1.bf16.msra.mxu1 %v9764_v33  ;;  %v9848_v31 = vld [vmem:[%s11020_s10 + $0xb68] ss:$16 sps:$4 sm:$0xff]   ;;  %v9853_v33 = vld [vmem:[%s11020_s10 + $0xb84] ss:$16 sps:$4 sm:$0xff]  }
 0x169   : > { %6810 = vmatprep.subr.bf16.mxu0 %v9769_v34  ;;  %7466 = vmatprep.subr.bf16.mxu1 %v9772_v35  ;;  %v9856_v34 = vld [vmem:[%s11020_s10 + $0xb8c] ss:$16 sps:$4 sm:$0xff]   ;;  %v9851_v35 = vld [vmem:[%s11020_s10 + $0xb80] ss:$16 sps:$4 sm:$0xff]  }
 0x16c   : > { %6811 = vmatpush1.bf16.msra.mxu0 %v9767_v36  ;;  %7467 = vmatpush1.bf16.msra.mxu1 %v9770_v37  ;;  %v9859_v36 = vld [vmem:[%s11020_s10 + $0xba4] ss:$16 sps:$4 sm:$0xff]   ;;  %v9862_v37 = vld [vmem:[%s11020_s10 + $0xbac] ss:$16 sps:$4 sm:$0xff]  }
 0x16d   : > { %6812 = vmatprep.subr.bf16.mxu0 %v9775_v38  ;;  %7468 = vmatprep.subr.bf16.mxu1 %v9778_v39  ;;  %v9857_v38 = vld [vmem:[%s11020_s10 + $0xba0] ss:$16 sps:$4 sm:$0xff]   ;;  %v9860_v39 = vld [vmem:[%s11020_s10 + $0xba8] ss:$16 sps:$4 sm:$0xff]  }
 0x170   : > { %6813 = vmatpush1.bf16.msra.mxu0 %v9773_v28  ;;  %7469 = vmatpush1.bf16.msra.mxu1 %v9776_v41  ;;  %v9865_v28 = vld [vmem:[%s11020_s10 + $0xbc4] ss:$16 sps:$4 sm:$0xff]   ;;  %v9868_v41 = vld [vmem:[%s11020_s10 + $0xbcc] ss:$16 sps:$4 sm:$0xff]  }
 0x171   : > { %6823 = vmatprep.subr.bf16.mxu0 %v9781_v42  ;;  %7479 = vmatprep.subr.bf16.mxu1 %v9784_v44  ;;  %v11465_v42 = vld [vmem:[%s12255_s0 + $0x18] sm:$0xff]  ;;  %v9863_v44 = vld [vmem:[%s11020_s10 + $0xbc0] ss:$16 sps:$4 sm:$0xff]  }
 0x173   : > { %6815 = vmatmul.mubr.bf16.vlgmr.msra.gmra.mrb[0].mxu0 %v450_v25  ;;  %7471 = vmatmul.mubr.bf16.vlgmr.msra.gmra.mrb[0].mxu1 %v450_v25  ;;  %v9871_v25 = vld [vmem:[%s11020_s10 + $0xbe4] ss:$16 sps:$4 sm:$0xff]  }
 0x174   : > { %6824 = vmatpush1.bf16.msra.mxu0 %v9779_v46  ;;  %7480 = vmatpush1.bf16.msra.mxu1 %v9782_v47  ;;  %v9874_v46 = vld [vmem:[%s11020_s10 + $0xbec] ss:$16 sps:$4 sm:$0xff]   ;;  %v11473_v47 = vrot.slane %v11465_v42, %v11073_v49 }
 0x175   : > { %6825 = vmatprep.subr.bf16.mxu0 %v9787_v48  ;;  %7481 = vmatprep.subr.bf16.mxu1 %v9790_v50  ;;  %v9869_v48 = vld [vmem:[%s11020_s10 + $0xbe0] ss:$16 sps:$4 sm:$0xff]   ;;  %v9872_v50 = vld [vmem:[%s11020_s10 + $0xbe8] ss:$16 sps:$4 sm:$0xff]  }
 0x176   : > { %6855 = vmatprep.mubr.bf16.mxu0 %v453_v51  ;;  %7511 = vmatprep.mubr.bf16.mxu1 %v453_v51  ;;  %v9878_v51 = vld [vmem:[%s11020_s10 + $0xc04] ss:$16 sps:$4 sm:$0xff]  }
 0x178   : > { %6826 = vmatpush1.bf16.msra.mxu0 %v9785_v32  ;;  %7482 = vmatpush1.bf16.msra.mxu1 %v9788_v52  ;;  %v9881_v32 = vld [vmem:[%s11020_s10 + $0xc0c] ss:$16 sps:$4 sm:$0xff]   ;;  %v340_v52 = vcombine.high %v11473_v47, %v11473_v47 }
 0x179   : > { %6827 = vmatprep.subr.bf16.mxu0 %v9793_v53  ;;  %7483 = vmatprep.subr.bf16.mxu1 %v9796_v54  ;;  %v452_v53 = vpack.c.bf16 %v11396_v40, %v11396_v40  ;;  %v9876_v54 = vld [vmem:[%s11020_s10 + $0xc00] ss:$16 sps:$4 sm:$0xff]  }
 0x17a   : > { %v9882_v40 = vld [vmem:[%s11020_s10 + $0xc20] ss:$16 sps:$4 sm:$0xff]  }
 0x17c   : > { %6828 = vmatpush1.bf16.msra.mxu0 %v9791_v55  ;;  %7484 = vmatpush1.bf16.msra.mxu1 %v9794_v56  ;;  %v9879_v55 = vld [vmem:[%s11020_s10 + $0xc08] ss:$16 sps:$4 sm:$0xff]   ;;  %v9884_v56 = vld [vmem:[%s11020_s10 + $0xc24] ss:$16 sps:$4 sm:$0xff]  }
 0x17d   : > { %6829 = vmatprep.subr.bf16.mxu0 %v9799_v57  ;;  %7485 = vmatprep.subr.bf16.mxu1 %v9802_v58  ;;  %v9887_v57 = vld [vmem:[%s11020_s10 + $0xc2c] ss:$16 sps:$4 sm:$0xff]   ;;  %v455_v58 = vpack.c.bf16 %v340_v52, %v340_v52  ;;  %v9960_v52 = vld [vmem:[%s11020_s10 + $0xdc0] ss:$16 sps:$4 sm:$0xff]  }
 0x180   : > { %6830 = vmatpush1.bf16.msra.mxu0 %v9797_v59  ;;  %7486 = vmatpush1.bf16.msra.mxu1 %v9800_v60  ;;  %v9885_v59 = vld [vmem:[%s11020_s10 + $0xc28] ss:$16 sps:$4 sm:$0xff]   ;;  %v9890_v60 = vld [vmem:[%s11020_s10 + $0xc44] ss:$16 sps:$4 sm:$0xff]  }
 0x181   : > { %6831 = vmatprep.subr.bf16.mxu0 %v9805_v61  ;;  %7487 = vmatprep.subr.bf16.mxu1 %v9808_v62  ;;  %v9893_v61 = vld [vmem:[%s11020_s10 + $0xc4c] ss:$16 sps:$4 sm:$0xff]   ;;  %v9888_v62 = vld [vmem:[%s11020_s10 + $0xc40] ss:$16 sps:$4 sm:$0xff]  }
 0x184   : > { %6832 = vmatpush1.bf16.msra.mxu0 %v9803_v63  ;;  %7488 = vmatpush1.bf16.msra.mxu1 %v9806_v0  ;;  %v9891_v63 = vld [vmem:[%s11020_s10 + $0xc48] ss:$16 sps:$4 sm:$0xff]   ;;  %v9896_v0 = vld [vmem:[%s11020_s10 + $0xc64] ss:$16 sps:$4 sm:$0xff]  }
 0x185   : > { %6833 = vmatprep.subr.bf16.mxu0 %v9811_v1  ;;  %7489 = vmatprep.subr.bf16.mxu1 %v9814_v2  ;;  %v9899_v1 = vld [vmem:[%s11020_s10 + $0xc6c] ss:$16 sps:$4 sm:$0xff]   ;;  %v9894_v2 = vld [vmem:[%s11020_s10 + $0xc60] ss:$16 sps:$4 sm:$0xff]  }
 0x188   : > { %6834 = vmatpush1.bf16.msra.mxu0 %v9809_v3  ;;  %7490 = vmatpush1.bf16.msra.mxu1 %v9812_v4  ;;  %v9897_v3 = vld [vmem:[%s11020_s10 + $0xc68] ss:$16 sps:$4 sm:$0xff]   ;;  %v9902_v4 = vld [vmem:[%s11020_s10 + $0xc84] ss:$16 sps:$4 sm:$0xff]  }
 0x189   : > { %6835 = vmatprep.subr.bf16.mxu0 %v9817_v5  ;;  %7491 = vmatprep.subr.bf16.mxu1 %v9820_v6  ;;  %v9905_v5 = vld [vmem:[%s11020_s10 + $0xc8c] ss:$16 sps:$4 sm:$0xff]   ;;  %v9900_v6 = vld [vmem:[%s11020_s10 + $0xc80] ss:$16 sps:$4 sm:$0xff]  }
 0x18c   : > { %6836 = vmatpush1.bf16.msra.mxu0 %v9815_v7  ;;  %7492 = vmatpush1.bf16.msra.mxu1 %v9818_v8  ;;  %v9903_v7 = vld [vmem:[%s11020_s10 + $0xc88] ss:$16 sps:$4 sm:$0xff]   ;;  %v9908_v8 = vld [vmem:[%s11020_s10 + $0xca4] ss:$16 sps:$4 sm:$0xff]  }
 0x18d   : > { %6837 = vmatprep.subr.bf16.mxu0 %v9823_v10  ;;  %7493 = vmatprep.subr.bf16.mxu1 %v9826_v11  ;;  %v9911_v10 = vld [vmem:[%s11020_s10 + $0xcac] ss:$16 sps:$4 sm:$0xff]   ;;  %v9906_v11 = vld [vmem:[%s11020_s10 + $0xca0] ss:$16 sps:$4 sm:$0xff]  }
 0x190   : > { %6838 = vmatpush1.bf16.msra.mxu0 %v9821_v12  ;;  %7494 = vmatpush1.bf16.msra.mxu1 %v9824_v13  ;;  %v9909_v12 = vld [vmem:[%s11020_s10 + $0xca8] ss:$16 sps:$4 sm:$0xff]   ;;  %v9914_v13 = vld [vmem:[%s11020_s10 + $0xcc4] ss:$16 sps:$4 sm:$0xff]  }
 0x191   : > { %6839 = vmatprep.subr.bf16.mxu0 %v9829_v14  ;;  %7495 = vmatprep.subr.bf16.mxu1 %v9832_v15  ;;  %v9917_v14 = vld [vmem:[%s11020_s10 + $0xccc] ss:$16 sps:$4 sm:$0xff]   ;;  %v9912_v15 = vld [vmem:[%s11020_s10 + $0xcc0] ss:$16 sps:$4 sm:$0xff]  }
 0x194   : > { %6840 = vmatpush1.bf16.msra.mxu0 %v9827_v16  ;;  %7496 = vmatpush1.bf16.msra.mxu1 %v9830_v17  ;;  %v9915_v16 = vld [vmem:[%s11020_s10 + $0xcc8] ss:$16 sps:$4 sm:$0xff]   ;;  %v9920_v17 = vld [vmem:[%s11020_s10 + $0xce4] ss:$16 sps:$4 sm:$0xff]  }
 0x195   : > { %6841 = vmatprep.subr.bf16.mxu0 %v9835_v18  ;;  %7497 = vmatprep.subr.bf16.mxu1 %v9838_v19  ;;  %v9923_v18 = vld [vmem:[%s11020_s10 + $0xcec] ss:$16 sps:$4 sm:$0xff]   ;;  %v9918_v19 = vld [vmem:[%s11020_s10 + $0xce0] ss:$16 sps:$4 sm:$0xff]  }
 0x198   : > { %6842 = vmatpush1.bf16.msra.mxu0 %v9833_v20  ;;  %7498 = vmatpush1.bf16.msra.mxu1 %v9836_v21  ;;  %v9921_v20 = vld [vmem:[%s11020_s10 + $0xce8] ss:$16 sps:$4 sm:$0xff]   ;;  %v9926_v21 = vld [vmem:[%s11020_s10 + $0xd04] ss:$16 sps:$4 sm:$0xff]  }
 0x199   : > { %6843 = vmatprep.subr.bf16.mxu0 %v9841_v22  ;;  %7499 = vmatprep.subr.bf16.mxu1 %v9844_v24  ;;  %v9929_v22 = vld [vmem:[%s11020_s10 + $0xd0c] ss:$16 sps:$4 sm:$0xff]   ;;  %v9924_v24 = vld [vmem:[%s11020_s10 + $0xd00] ss:$16 sps:$4 sm:$0xff]  }
 0x19c   : > { %6844 = vmatpush1.bf16.msra.mxu0 %v9839_v23  ;;  %7500 = vmatpush1.bf16.msra.mxu1 %v9842_v9  ;;  %v9927_v23 = vld [vmem:[%s11020_s10 + $0xd08] ss:$16 sps:$4 sm:$0xff]   ;;  %v9932_v9 = vld [vmem:[%s11020_s10 + $0xd24] ss:$16 sps:$4 sm:$0xff]  }
 0x19d   : > { %6845 = vmatprep.subr.bf16.mxu0 %v9847_v27  ;;  %7501 = vmatprep.subr.bf16.mxu1 %v9850_v29  ;;  %v9935_v27 = vld [vmem:[%s11020_s10 + $0xd2c] ss:$16 sps:$4 sm:$0xff]   ;;  %v9930_v29 = vld [vmem:[%s11020_s10 + $0xd20] ss:$16 sps:$4 sm:$0xff]  }
 0x1a0   : > { %6846 = vmatpush1.bf16.msra.mxu0 %v9845_v30  ;;  %7502 = vmatpush1.bf16.msra.mxu1 %v9848_v31  ;;  %v9933_v30 = vld [vmem:[%s11020_s10 + $0xd28] ss:$16 sps:$4 sm:$0xff]   ;;  %v9938_v31 = vld [vmem:[%s11020_s10 + $0xd44] ss:$16 sps:$4 sm:$0xff]  }
 0x1a1   : > { %6847 = vmatprep.subr.bf16.mxu0 %v9853_v33  ;;  %7503 = vmatprep.subr.bf16.mxu1 %v9856_v34  ;;  %v9941_v33 = vld [vmem:[%s11020_s10 + $0xd4c] ss:$16 sps:$4 sm:$0xff]   ;;  %v9936_v34 = vld [vmem:[%s11020_s10 + $0xd40] ss:$16 sps:$4 sm:$0xff]  }
 0x1a4   : > { %6848 = vmatpush1.bf16.msra.mxu0 %v9851_v35  ;;  %7504 = vmatpush1.bf16.msra.mxu1 %v9854_v26  ;;  %v9939_v35 = vld [vmem:[%s11020_s10 + $0xd48] ss:$16 sps:$4 sm:$0xff]   ;;  %v9944_v26 = vld [vmem:[%s11020_s10 + $0xd64] ss:$16 sps:$4 sm:$0xff]  }
 0x1a5   : > { %6849 = vmatprep.subr.bf16.mxu0 %v9859_v36  ;;  %7505 = vmatprep.subr.bf16.mxu1 %v9862_v37  ;;  %v9947_v36 = vld [vmem:[%s11020_s10 + $0xd6c] ss:$16 sps:$4 sm:$0xff]   ;;  %v9942_v37 = vld [vmem:[%s11020_s10 + $0xd60] ss:$16 sps:$4 sm:$0xff]  }
 0x1a8   : > { %6850 = vmatpush1.bf16.msra.mxu0 %v9857_v38  ;;  %7506 = vmatpush1.bf16.msra.mxu1 %v9860_v39  ;;  %v9945_v38 = vld [vmem:[%s11020_s10 + $0xd68] ss:$16 sps:$4 sm:$0xff]   ;;  %v9950_v39 = vld [vmem:[%s11020_s10 + $0xd84] ss:$16 sps:$4 sm:$0xff]  }
 0x1a9   : > { %6851 = vmatprep.subr.bf16.mxu0 %v9865_v28  ;;  %7507 = vmatprep.subr.bf16.mxu1 %v9868_v41  ;;  %v9953_v28 = vld [vmem:[%s11020_s10 + $0xd8c] ss:$16 sps:$4 sm:$0xff]   ;;  %v9948_v41 = vld [vmem:[%s11020_s10 + $0xd80] ss:$16 sps:$4 sm:$0xff]  }
 0x1ac   : > { %6852 = vmatpush1.bf16.msra.mxu0 %v9863_v44  ;;  %7508 = vmatpush1.bf16.msra.mxu1 %v9866_v45  ;;  %v9951_v44 = vld [vmem:[%s11020_s10 + $0xd88] ss:$16 sps:$4 sm:$0xff]   ;;  %v9956_v45 = vld [vmem:[%s11020_s10 + $0xda4] ss:$16 sps:$4 sm:$0xff]  }
 0x1ad   : > { %6853 = vmatprep.subr.bf16.mxu0 %v9871_v25  ;;  %7509 = vmatprep.subr.bf16.mxu1 %v9874_v46  ;;  %v9959_v25 = vld [vmem:[%s11020_s10 + $0xdac] ss:$16 sps:$4 sm:$0xff]   ;;  %v9954_v46 = vld [vmem:[%s11020_s10 + $0xda0] ss:$16 sps:$4 sm:$0xff]  }
 0x1b0   : > { %6854 = vmatpush1.bf16.msra.mxu0 %v9869_v48  ;;  %7510 = vmatpush1.bf16.msra.mxu1 %v9872_v50  ;;  %v9957_v48 = vld [vmem:[%s11020_s10 + $0xda8] ss:$16 sps:$4 sm:$0xff]   ;;  %v9962_v50 = vld [vmem:[%s11020_s10 + $0xdc4] ss:$16 sps:$4 sm:$0xff]  }
 0x1b1   : > { %6864 = vmatprep.subr.bf16.mxu0 %v9878_v51  ;;  %7520 = vmatprep.subr.bf16.mxu1 %v9881_v32  ;;  %v9965_v51 = vld [vmem:[%s11020_s10 + $0xdcc] ss:$16 sps:$4 sm:$0xff]   ;;  %v325_v32 = vcombine.high %v11465_v42, %v11465_v42  ;;  %v9966_v42 = vld [vmem:[%s11020_s10 + $0xde0] ss:$16 sps:$4 sm:$0xff]  }
 0x1b3   : > { %6856 = vmatmul.mubr.bf16.vlgmr.msra.gmra.mrb[0].mxu0 %v452_v53  ;;  %7512 = vmatmul.mubr.bf16.vlgmr.msra.gmra.mrb[0].mxu1 %v452_v53  ;;  %v9963_v53 = vld [vmem:[%s11020_s10 + $0xdc8] ss:$16 sps:$4 sm:$0xff]  }
 0x1b4   : > { %6865 = vmatpush1.bf16.msra.mxu0 %v9876_v54  ;;  %7521 = vmatpush1.bf16.msra.mxu1 %v9879_v55  ;;  %v9968_v54 = vld [vmem:[%s11020_s10 + $0xde4] ss:$16 sps:$4 sm:$0xff]   ;;  %v9971_v55 = vld [vmem:[%s11020_s10 + $0xdec] ss:$16 sps:$4 sm:$0xff]  }
 0x1b5   : > { %6866 = vmatprep.subr.bf16.mxu0 %v9884_v56  ;;  %7522 = vmatprep.subr.bf16.mxu1 %v9887_v57  ;;  %v11546_v56 = vrot.slane %v325_v32, %v11073_v49  ;;  %v9969_v57 = vld [vmem:[%s11020_s10 + $0xde8] ss:$16 sps:$4 sm:$0xff]  }
 0x1b6   : > { %6896 = vmatprep.mubr.bf16.mxu0 %v455_v58  ;;  %7552 = vmatprep.mubr.bf16.mxu1 %v455_v58  ;;  %v9974_v58 = vld [vmem:[%s11020_s10 + $0xe04] ss:$16 sps:$4 sm:$0xff]   ;;  %v10047_v32 = vld [vmem:[%s11020_s10 + $0xf88] ss:$16 sps:$4 sm:$0xff]  }
 0x1b8   : > { %6867 = vmatpush1.bf16.msra.mxu0 %v9882_v40  ;;  %7523 = vmatpush1.bf16.msra.mxu1 %v9885_v59  ;;  %v9977_v40 = vld [vmem:[%s11020_s10 + $0xe0c] ss:$16 sps:$4 sm:$0xff]   ;;  %v341_v59 = vcombine.high %v11546_v56, %v11546_v56 }
 0x1b9   : > { %6868 = vmatprep.subr.bf16.mxu0 %v9890_v60  ;;  %7524 = vmatprep.subr.bf16.mxu1 %v9893_v61  ;;  %v454_v60 = vpack.c.bf16 %v11473_v47, %v11473_v47  ;;  %v9972_v61 = vld [vmem:[%s11020_s10 + $0xe00] ss:$16 sps:$4 sm:$0xff]  }
 0x1ba   : > { %v9978_v47 = vld [vmem:[%s11020_s10 + $0xe20] ss:$16 sps:$4 sm:$0xff]  }
 0x1bc   : > { %6869 = vmatpush1.bf16.msra.mxu0 %v9888_v62  ;;  %7525 = vmatpush1.bf16.msra.mxu1 %v9891_v63  ;;  %v9975_v62 = vld [vmem:[%s11020_s10 + $0xe08] ss:$16 sps:$4 sm:$0xff]   ;;  %v9980_v63 = vld [vmem:[%s11020_s10 + $0xe24] ss:$16 sps:$4 sm:$0xff]  }
 0x1bd   : > { %6870 = vmatprep.subr.bf16.mxu0 %v9896_v0  ;;  %7526 = vmatprep.subr.bf16.mxu1 %v9899_v1  ;;  %v9983_v0 = vld [vmem:[%s11020_s10 + $0xe2c] ss:$16 sps:$4 sm:$0xff]   ;;  %v457_v1 = vpack.c.bf16 %v341_v59, %v341_v59  ;;  %v10059_v59 = vld [vmem:[%s11020_s10 + $0xfc8] ss:$16 sps:$4 sm:$0xff]  }
 0x1c0   : > { %6871 = vmatpush1.bf16.msra.mxu0 %v9894_v2  ;;  %7527 = vmatpush1.bf16.msra.mxu1 %v9897_v3  ;;  %v9981_v2 = vld [vmem:[%s11020_s10 + $0xe28] ss:$16 sps:$4 sm:$0xff]   ;;  %v9986_v3 = vld [vmem:[%s11020_s10 + $0xe44] ss:$16 sps:$4 sm:$0xff]  }
 0x1c1   : > { %6872 = vmatprep.subr.bf16.mxu0 %v9902_v4  ;;  %7528 = vmatprep.subr.bf16.mxu1 %v9905_v5  ;;  %v9989_v4 = vld [vmem:[%s11020_s10 + $0xe4c] ss:$16 sps:$4 sm:$0xff]   ;;  %v9984_v5 = vld [vmem:[%s11020_s10 + $0xe40] ss:$16 sps:$4 sm:$0xff]  }
 0x1c4   : > { %6873 = vmatpush1.bf16.msra.mxu0 %v9900_v6  ;;  %7529 = vmatpush1.bf16.msra.mxu1 %v9903_v7  ;;  %v9987_v6 = vld [vmem:[%s11020_s10 + $0xe48] ss:$16 sps:$4 sm:$0xff]   ;;  %v9992_v7 = vld [vmem:[%s11020_s10 + $0xe64] ss:$16 sps:$4 sm:$0xff]  }
 0x1c5   : > { %6874 = vmatprep.subr.bf16.mxu0 %v9908_v8  ;;  %7530 = vmatprep.subr.bf16.mxu1 %v9911_v10  ;;  %v9995_v8 = vld [vmem:[%s11020_s10 + $0xe6c] ss:$16 sps:$4 sm:$0xff]   ;;  %v9990_v10 = vld [vmem:[%s11020_s10 + $0xe60] ss:$16 sps:$4 sm:$0xff]  }
 0x1c8   : > { %6875 = vmatpush1.bf16.msra.mxu0 %v9906_v11  ;;  %7531 = vmatpush1.bf16.msra.mxu1 %v9909_v12  ;;  %v9993_v11 = vld [vmem:[%s11020_s10 + $0xe68] ss:$16 sps:$4 sm:$0xff]   ;;  %v9998_v12 = vld [vmem:[%s11020_s10 + $0xe84] ss:$16 sps:$4 sm:$0xff]  }
 0x1c9   : > { %6876 = vmatprep.subr.bf16.mxu0 %v9914_v13  ;;  %7532 = vmatprep.subr.bf16.mxu1 %v9917_v14  ;;  %v10001_v13 = vld [vmem:[%s11020_s10 + $0xe8c] ss:$16 sps:$4 sm:$0xff]   ;;  %v9996_v14 = vld [vmem:[%s11020_s10 + $0xe80] ss:$16 sps:$4 sm:$0xff]  }
 0x1cc   : > { %6877 = vmatpush1.bf16.msra.mxu0 %v9912_v15  ;;  %7533 = vmatpush1.bf16.msra.mxu1 %v9915_v16  ;;  %v9999_v15 = vld [vmem:[%s11020_s10 + $0xe88] ss:$16 sps:$4 sm:$0xff]   ;;  %v10004_v16 = vld [vmem:[%s11020_s10 + $0xea4] ss:$16 sps:$4 sm:$0xff]  }
 0x1cd   : > { %6878 = vmatprep.subr.bf16.mxu0 %v9920_v17  ;;  %7534 = vmatprep.subr.bf16.mxu1 %v9923_v18  ;;  %v10007_v17 = vld [vmem:[%s11020_s10 + $0xeac] ss:$16 sps:$4 sm:$0xff]   ;;  %v10002_v18 = vld [vmem:[%s11020_s10 + $0xea0] ss:$16 sps:$4 sm:$0xff]  }
 0x1d0   : > { %6879 = vmatpush1.bf16.msra.mxu0 %v9918_v19  ;;  %7535 = vmatpush1.bf16.msra.mxu1 %v9921_v20  ;;  %v10005_v19 = vld [vmem:[%s11020_s10 + $0xea8] ss:$16 sps:$4 sm:$0xff]   ;;  %v10010_v20 = vld [vmem:[%s11020_s10 + $0xec4] ss:$16 sps:$4 sm:$0xff]  }
 0x1d1   : > { %6880 = vmatprep.subr.bf16.mxu0 %v9926_v21  ;;  %7536 = vmatprep.subr.bf16.mxu1 %v9929_v22  ;;  %v10013_v21 = vld [vmem:[%s11020_s10 + $0xecc] ss:$16 sps:$4 sm:$0xff]   ;;  %v10008_v22 = vld [vmem:[%s11020_s10 + $0xec0] ss:$16 sps:$4 sm:$0xff]  }
 0x1d4   : > { %6881 = vmatpush1.bf16.msra.mxu0 %v9924_v24  ;;  %7537 = vmatpush1.bf16.msra.mxu1 %v9927_v23  ;;  %v10011_v24 = vld [vmem:[%s11020_s10 + $0xec8] ss:$16 sps:$4 sm:$0xff]   ;;  %v10016_v23 = vld [vmem:[%s11020_s10 + $0xee4] ss:$16 sps:$4 sm:$0xff]  }
 0x1d5   : > { %6882 = vmatprep.subr.bf16.mxu0 %v9932_v9  ;;  %7538 = vmatprep.subr.bf16.mxu1 %v9935_v27  ;;  %v10019_v9 = vld [vmem:[%s11020_s10 + $0xeec] ss:$16 sps:$4 sm:$0xff]   ;;  %v10014_v27 = vld [vmem:[%s11020_s10 + $0xee0] ss:$16 sps:$4 sm:$0xff]  }
 0x1d8   : > { %6883 = vmatpush1.bf16.msra.mxu0 %v9930_v29  ;;  %7539 = vmatpush1.bf16.msra.mxu1 %v9933_v30  ;;  %v10017_v29 = vld [vmem:[%s11020_s10 + $0xee8] ss:$16 sps:$4 sm:$0xff]   ;;  %v10022_v30 = vld [vmem:[%s11020_s10 + $0xf04] ss:$16 sps:$4 sm:$0xff]  }
 0x1d9   : > { %6884 = vmatprep.subr.bf16.mxu0 %v9938_v31  ;;  %7540 = vmatprep.subr.bf16.mxu1 %v9941_v33  ;;  %v10025_v31 = vld [vmem:[%s11020_s10 + $0xf0c] ss:$16 sps:$4 sm:$0xff]   ;;  %v10020_v33 = vld [vmem:[%s11020_s10 + $0xf00] ss:$16 sps:$4 sm:$0xff]  }
 0x1dc   : > { %6885 = vmatpush1.bf16.msra.mxu0 %v9936_v34  ;;  %7541 = vmatpush1.bf16.msra.mxu1 %v9939_v35  ;;  %v10023_v34 = vld [vmem:[%s11020_s10 + $0xf08] ss:$16 sps:$4 sm:$0xff]   ;;  %v10028_v35 = vld [vmem:[%s11020_s10 + $0xf24] ss:$16 sps:$4 sm:$0xff]  }
 0x1dd   : > { %6886 = vmatprep.subr.bf16.mxu0 %v9944_v26  ;;  %7542 = vmatprep.subr.bf16.mxu1 %v9947_v36  ;;  %v10031_v26 = vld [vmem:[%s11020_s10 + $0xf2c] ss:$16 sps:$4 sm:$0xff]   ;;  %v10026_v36 = vld [vmem:[%s11020_s10 + $0xf20] ss:$16 sps:$4 sm:$0xff]  }
 0x1e0   : > { %6887 = vmatpush1.bf16.msra.mxu0 %v9942_v37  ;;  %7543 = vmatpush1.bf16.msra.mxu1 %v9945_v38  ;;  %v10029_v37 = vld [vmem:[%s11020_s10 + $0xf28] ss:$16 sps:$4 sm:$0xff]   ;;  %v10034_v38 = vld [vmem:[%s11020_s10 + $0xf44] ss:$16 sps:$4 sm:$0xff]  }
 0x1e1   : > { %6888 = vmatprep.subr.bf16.mxu0 %v9950_v39  ;;  %7544 = vmatprep.subr.bf16.mxu1 %v9953_v28  ;;  %v10037_v39 = vld [vmem:[%s11020_s10 + $0xf4c] ss:$16 sps:$4 sm:$0xff]   ;;  %v10032_v28 = vld [vmem:[%s11020_s10 + $0xf40] ss:$16 sps:$4 sm:$0xff]  }
 0x1e4   : > { %6889 = vmatpush1.bf16.msra.mxu0 %v9948_v41  ;;  %7545 = vmatpush1.bf16.msra.mxu1 %v9951_v44  ;;  %v10035_v41 = vld [vmem:[%s11020_s10 + $0xf48] ss:$16 sps:$4 sm:$0xff]   ;;  %v10040_v44 = vld [vmem:[%s11020_s10 + $0xf64] ss:$16 sps:$4 sm:$0xff]  }
 0x1e5   : > { %6890 = vmatprep.subr.bf16.mxu0 %v9956_v45  ;;  %7546 = vmatprep.subr.bf16.mxu1 %v9959_v25  ;;  %v10043_v45 = vld [vmem:[%s11020_s10 + $0xf6c] ss:$16 sps:$4 sm:$0xff]   ;;  %v10038_v25 = vld [vmem:[%s11020_s10 + $0xf60] ss:$16 sps:$4 sm:$0xff]  }
 0x1e8   : > { %6891 = vmatpush1.bf16.msra.mxu0 %v9954_v46  ;;  %7547 = vmatpush1.bf16.msra.mxu1 %v9957_v48  ;;  %v10041_v46 = vld [vmem:[%s11020_s10 + $0xf68] ss:$16 sps:$4 sm:$0xff]   ;;  %v10046_v48 = vld [vmem:[%s11020_s10 + $0xf84] ss:$16 sps:$4 sm:$0xff]  }
 0x1e9   : > { %6892 = vmatprep.subr.bf16.mxu0 %v9962_v50  ;;  %7548 = vmatprep.subr.bf16.mxu1 %v9965_v51  ;;  %v10049_v50 = vld [vmem:[%s11020_s10 + $0xf8c] ss:$16 sps:$4 sm:$0xff]   ;;  %v10044_v51 = vld [vmem:[%s11020_s10 + $0xf80] ss:$16 sps:$4 sm:$0xff]  }
 0x1ec   : > { %6893 = vmatpush1.bf16.msra.mxu0 %v9960_v52  ;;  %7549 = vmatpush1.bf16.msra.mxu1 %v9963_v53  ;;  %v10052_v52 = vld [vmem:[%s11020_s10 + $0xfa4] ss:$16 sps:$4 sm:$0xff]   ;;  %v10055_v53 = vld [vmem:[%s11020_s10 + $0xfac] ss:$16 sps:$4 sm:$0xff]  }
 0x1ed   : > { %6894 = vmatprep.subr.bf16.mxu0 %v9968_v54  ;;  %7550 = vmatprep.subr.bf16.mxu1 %v9971_v55  ;;  %v10050_v54 = vld [vmem:[%s11020_s10 + $0xfa0] ss:$16 sps:$4 sm:$0xff]   ;;  %v10053_v55 = vld [vmem:[%s11020_s10 + $0xfa8] ss:$16 sps:$4 sm:$0xff]  }
 0x1f0   : > { %6895 = vmatpush1.bf16.msra.mxu0 %v9966_v42  ;;  %7551 = vmatpush1.bf16.msra.mxu1 %v9969_v57  ;;  %v10058_v42 = vld [vmem:[%s11020_s10 + $0xfc4] ss:$16 sps:$4 sm:$0xff]   ;;  %v10061_v57 = vld [vmem:[%s11020_s10 + $0xfcc] ss:$16 sps:$4 sm:$0xff]  }
 0x1f1   : > { %6905 = vmatprep.subr.bf16.mxu0 %v9974_v58  ;;  %7561 = vmatprep.subr.bf16.mxu1 %v9977_v40  ;;  %v11615_v58 = vld [vmem:[%s12255_s0 + $0x20] sm:$0xff] }
 0x1f2   : > { %v10056_v40 = vld [vmem:[%s11020_s10 + $0xfc0] ss:$16 sps:$4 sm:$0xff]  }
 0x1f3   : > { %6897 = vmatmul.mubr.bf16.vlgmr.msra.gmra.mrb[0].mxu0 %v454_v60  ;;  %7553 = vmatmul.mubr.bf16.vlgmr.msra.gmra.mrb[0].mxu1 %v454_v60  ;;  %v10064_v60 = vld [vmem:[%s11020_s10 + $0xfe4] ss:$16 sps:$4 sm:$0xff]  }
 0x1f4   : > { %6906 = vmatpush1.bf16.msra.mxu0 %v9972_v61  ;;  %7562 = vmatpush1.bf16.msra.mxu1 %v9975_v62  ;;  %v10067_v61 = vld [vmem:[%s11020_s10 + $0xfec] ss:$16 sps:$4 sm:$0xff]   ;;  %v11623_v62 = vrot.slane %v11615_v58, %v11073_v49 }
 0x1f5   : > { %6907 = vmatprep.subr.bf16.mxu0 %v9980_v63  ;;  %7563 = vmatprep.subr.bf16.mxu1 %v9983_v0  ;;  %v10062_v63 = vld [vmem:[%s11020_s10 + $0xfe0] ss:$16 sps:$4 sm:$0xff]   ;;  %v10065_v0 = vld [vmem:[%s11020_s10 + $0xfe8] ss:$16 sps:$4 sm:$0xff]  }
 0x1f6   : > { %6937 = vmatprep.mubr.bf16.mxu0 %v457_v1  ;;  %7593 = vmatprep.mubr.bf16.mxu1 %v457_v1  ;;  %v10071_v1 = vld [vmem:[%s11020_s10 + $0x1004] ss:$16 sps:$4 sm:$0xff]  }
 0x1f8   : > { %6908 = vmatpush1.bf16.msra.mxu0 %v9978_v47  ;;  %7564 = vmatpush1.bf16.msra.mxu1 %v9981_v2  ;;  %v10074_v47 = vld [vmem:[%s11020_s10 + $0x100c] ss:$16 sps:$4 sm:$0xff]   ;;  %v357_v2 = vcombine.high %v11623_v62, %v11623_v62 }
 0x1f9   : > { %6909 = vmatprep.subr.bf16.mxu0 %v9986_v3  ;;  %7565 = vmatprep.subr.bf16.mxu1 %v9989_v4  ;;  %v456_v3 = vpack.c.bf16 %v11546_v56, %v11546_v56  ;;  %v10069_v4 = vld [vmem:[%s11020_s10 + $0x1000] ss:$16 sps:$4 sm:$0xff]  }
 0x1fa   : > { %v10075_v56 = vld [vmem:[%s11020_s10 + $0x1020] ss:$16 sps:$4 sm:$0xff]  }
 0x1fc   : > { %6910 = vmatpush1.bf16.msra.mxu0 %v9984_v5  ;;  %7566 = vmatpush1.bf16.msra.mxu1 %v9987_v6  ;;  %v10072_v5 = vld [vmem:[%s11020_s10 + $0x1008] ss:$16 sps:$4 sm:$0xff]   ;;  %v10077_v6 = vld [vmem:[%s11020_s10 + $0x1024] ss:$16 sps:$4 sm:$0xff]  }
 0x1fd   : > { %6911 = vmatprep.subr.bf16.mxu0 %v9992_v7  ;;  %7567 = vmatprep.subr.bf16.mxu1 %v9995_v8  ;;  %v10080_v7 = vld [vmem:[%s11020_s10 + $0x102c] ss:$16 sps:$4 sm:$0xff]   ;;  %v459_v8 = vpack.c.bf16 %v357_v2, %v357_v2  ;;  %v10153_v2 = vld [vmem:[%s11020_s10 + $0x11c0] ss:$16 sps:$4 sm:$0xff]  }
 0x200   : > { %6912 = vmatpush1.bf16.msra.mxu0 %v9990_v10  ;;  %7568 = vmatpush1.bf16.msra.mxu1 %v9993_v11  ;;  %v10078_v10 = vld [vmem:[%s11020_s10 + $0x1028] ss:$16 sps:$4 sm:$0xff]   ;;  %v10083_v11 = vld [vmem:[%s11020_s10 + $0x1044] ss:$16 sps:$4 sm:$0xff]  }
 0x201   : > { %6913 = vmatprep.subr.bf16.mxu0 %v9998_v12  ;;  %7569 = vmatprep.subr.bf16.mxu1 %v10001_v13  ;;  %v10086_v12 = vld [vmem:[%s11020_s10 + $0x104c] ss:$16 sps:$4 sm:$0xff]   ;;  %v10081_v13 = vld [vmem:[%s11020_s10 + $0x1040] ss:$16 sps:$4 sm:$0xff]  }
 0x204   : > { %6914 = vmatpush1.bf16.msra.mxu0 %v9996_v14  ;;  %7570 = vmatpush1.bf16.msra.mxu1 %v9999_v15  ;;  %v10084_v14 = vld [vmem:[%s11020_s10 + $0x1048] ss:$16 sps:$4 sm:$0xff]   ;;  %v10089_v15 = vld [vmem:[%s11020_s10 + $0x1064] ss:$16 sps:$4 sm:$0xff]  }
 0x205   : > { %6915 = vmatprep.subr.bf16.mxu0 %v10004_v16  ;;  %7571 = vmatprep.subr.bf16.mxu1 %v10007_v17  ;;  %v10092_v16 = vld [vmem:[%s11020_s10 + $0x106c] ss:$16 sps:$4 sm:$0xff]   ;;  %v10087_v17 = vld [vmem:[%s11020_s10 + $0x1060] ss:$16 sps:$4 sm:$0xff]  }
 0x208   : > { %6916 = vmatpush1.bf16.msra.mxu0 %v10002_v18  ;;  %7572 = vmatpush1.bf16.msra.mxu1 %v10005_v19  ;;  %v10090_v18 = vld [vmem:[%s11020_s10 + $0x1068] ss:$16 sps:$4 sm:$0xff]   ;;  %v10095_v19 = vld [vmem:[%s11020_s10 + $0x1084] ss:$16 sps:$4 sm:$0xff]  }
 0x209   : > { %6917 = vmatprep.subr.bf16.mxu0 %v10010_v20  ;;  %7573 = vmatprep.subr.bf16.mxu1 %v10013_v21  ;;  %v10098_v20 = vld [vmem:[%s11020_s10 + $0x108c] ss:$16 sps:$4 sm:$0xff]   ;;  %v10093_v21 = vld [vmem:[%s11020_s10 + $0x1080] ss:$16 sps:$4 sm:$0xff]  }
 0x20c   : > { %6918 = vmatpush1.bf16.msra.mxu0 %v10008_v22  ;;  %7574 = vmatpush1.bf16.msra.mxu1 %v10011_v24  ;;  %v10096_v22 = vld [vmem:[%s11020_s10 + $0x1088] ss:$16 sps:$4 sm:$0xff]   ;;  %v10101_v24 = vld [vmem:[%s11020_s10 + $0x10a4] ss:$16 sps:$4 sm:$0xff]  }
 0x20d   : > { %6919 = vmatprep.subr.bf16.mxu0 %v10016_v23  ;;  %7575 = vmatprep.subr.bf16.mxu1 %v10019_v9  ;;  %v10104_v23 = vld [vmem:[%s11020_s10 + $0x10ac] ss:$16 sps:$4 sm:$0xff]   ;;  %v10099_v9 = vld [vmem:[%s11020_s10 + $0x10a0] ss:$16 sps:$4 sm:$0xff]  }
 0x210   : > { %6920 = vmatpush1.bf16.msra.mxu0 %v10014_v27  ;;  %7576 = vmatpush1.bf16.msra.mxu1 %v10017_v29  ;;  %v10102_v27 = vld [vmem:[%s11020_s10 + $0x10a8] ss:$16 sps:$4 sm:$0xff]   ;;  %v10107_v29 = vld [vmem:[%s11020_s10 + $0x10c4] ss:$16 sps:$4 sm:$0xff]  }
 0x211   : > { %6921 = vmatprep.subr.bf16.mxu0 %v10022_v30  ;;  %7577 = vmatprep.subr.bf16.mxu1 %v10025_v31  ;;  %v10110_v30 = vld [vmem:[%s11020_s10 + $0x10cc] ss:$16 sps:$4 sm:$0xff]   ;;  %v10105_v31 = vld [vmem:[%s11020_s10 + $0x10c0] ss:$16 sps:$4 sm:$0xff]  }
 0x214   : > { %6922 = vmatpush1.bf16.msra.mxu0 %v10020_v33  ;;  %7578 = vmatpush1.bf16.msra.mxu1 %v10023_v34  ;;  %v10108_v33 = vld [vmem:[%s11020_s10 + $0x10c8] ss:$16 sps:$4 sm:$0xff]   ;;  %v10113_v34 = vld [vmem:[%s11020_s10 + $0x10e4] ss:$16 sps:$4 sm:$0xff]  }
 0x215   : > { %6923 = vmatprep.subr.bf16.mxu0 %v10028_v35  ;;  %7579 = vmatprep.subr.bf16.mxu1 %v10031_v26  ;;  %v10116_v35 = vld [vmem:[%s11020_s10 + $0x10ec] ss:$16 sps:$4 sm:$0xff]   ;;  %v10111_v26 = vld [vmem:[%s11020_s10 + $0x10e0] ss:$16 sps:$4 sm:$0xff]  }
 0x218   : > { %6924 = vmatpush1.bf16.msra.mxu0 %v10026_v36  ;;  %7580 = vmatpush1.bf16.msra.mxu1 %v10029_v37  ;;  %v10114_v36 = vld [vmem:[%s11020_s10 + $0x10e8] ss:$16 sps:$4 sm:$0xff]   ;;  %v10119_v37 = vld [vmem:[%s11020_s10 + $0x1104] ss:$16 sps:$4 sm:$0xff]  }
 0x219   : > { %6925 = vmatprep.subr.bf16.mxu0 %v10034_v38  ;;  %7581 = vmatprep.subr.bf16.mxu1 %v10037_v39  ;;  %v10122_v38 = vld [vmem:[%s11020_s10 + $0x110c] ss:$16 sps:$4 sm:$0xff]   ;;  %v10117_v39 = vld [vmem:[%s11020_s10 + $0x1100] ss:$16 sps:$4 sm:$0xff]  }
 0x21c   : > { %6926 = vmatpush1.bf16.msra.mxu0 %v10032_v28  ;;  %7582 = vmatpush1.bf16.msra.mxu1 %v10035_v41  ;;  %v10120_v28 = vld [vmem:[%s11020_s10 + $0x1108] ss:$16 sps:$4 sm:$0xff]   ;;  %v10125_v41 = vld [vmem:[%s11020_s10 + $0x1124] ss:$16 sps:$4 sm:$0xff]  }
 0x21d   : > { %6927 = vmatprep.subr.bf16.mxu0 %v10040_v44  ;;  %7583 = vmatprep.subr.bf16.mxu1 %v10043_v45  ;;  %v10128_v44 = vld [vmem:[%s11020_s10 + $0x112c] ss:$16 sps:$4 sm:$0xff]   ;;  %v10123_v45 = vld [vmem:[%s11020_s10 + $0x1120] ss:$16 sps:$4 sm:$0xff]  }
 0x220   : > { %6928 = vmatpush1.bf16.msra.mxu0 %v10038_v25  ;;  %7584 = vmatpush1.bf16.msra.mxu1 %v10041_v46  ;;  %v10126_v25 = vld [vmem:[%s11020_s10 + $0x1128] ss:$16 sps:$4 sm:$0xff]   ;;  %v10131_v46 = vld [vmem:[%s11020_s10 + $0x1144] ss:$16 sps:$4 sm:$0xff]  }
 0x221   : > { %6929 = vmatprep.subr.bf16.mxu0 %v10046_v48  ;;  %7585 = vmatprep.subr.bf16.mxu1 %v10049_v50  ;;  %v10134_v48 = vld [vmem:[%s11020_s10 + $0x114c] ss:$16 sps:$4 sm:$0xff]   ;;  %v10129_v50 = vld [vmem:[%s11020_s10 + $0x1140] ss:$16 sps:$4 sm:$0xff]  }
 0x224   : > { %6930 = vmatpush1.bf16.msra.mxu0 %v10044_v51  ;;  %7586 = vmatpush1.bf16.msra.mxu1 %v10047_v32  ;;  %v10132_v51 = vld [vmem:[%s11020_s10 + $0x1148] ss:$16 sps:$4 sm:$0xff]   ;;  %v10137_v32 = vld [vmem:[%s11020_s10 + $0x1164] ss:$16 sps:$4 sm:$0xff]  }
 0x225   : > { %6931 = vmatprep.subr.bf16.mxu0 %v10052_v52  ;;  %7587 = vmatprep.subr.bf16.mxu1 %v10055_v53  ;;  %v10140_v52 = vld [vmem:[%s11020_s10 + $0x116c] ss:$16 sps:$4 sm:$0xff]   ;;  %v10135_v53 = vld [vmem:[%s11020_s10 + $0x1160] ss:$16 sps:$4 sm:$0xff]  }
 0x228   : > { %6932 = vmatpush1.bf16.msra.mxu0 %v10050_v54  ;;  %7588 = vmatpush1.bf16.msra.mxu1 %v10053_v55  ;;  %v10138_v54 = vld [vmem:[%s11020_s10 + $0x1168] ss:$16 sps:$4 sm:$0xff]   ;;  %v10143_v55 = vld [vmem:[%s11020_s10 + $0x1184] ss:$16 sps:$4 sm:$0xff]  }
 0x229   : > { %6933 = vmatprep.subr.bf16.mxu0 %v10058_v42  ;;  %7589 = vmatprep.subr.bf16.mxu1 %v10061_v57  ;;  %v10146_v42 = vld [vmem:[%s11020_s10 + $0x118c] ss:$16 sps:$4 sm:$0xff]   ;;  %v10141_v57 = vld [vmem:[%s11020_s10 + $0x1180] ss:$16 sps:$4 sm:$0xff]  }
 0x22c   : > { %6934 = vmatpush1.bf16.msra.mxu0 %v10056_v40  ;;  %7590 = vmatpush1.bf16.msra.mxu1 %v10059_v59  ;;  %v10144_v40 = vld [vmem:[%s11020_s10 + $0x1188] ss:$16 sps:$4 sm:$0xff]   ;;  %v10149_v59 = vld [vmem:[%s11020_s10 + $0x11a4] ss:$16 sps:$4 sm:$0xff]  }
 0x22d   : > { %6935 = vmatprep.subr.bf16.mxu0 %v10064_v60  ;;  %7591 = vmatprep.subr.bf16.mxu1 %v10067_v61  ;;  %v10152_v60 = vld [vmem:[%s11020_s10 + $0x11ac] ss:$16 sps:$4 sm:$0xff]   ;;  %v10147_v61 = vld [vmem:[%s11020_s10 + $0x11a0] ss:$16 sps:$4 sm:$0xff]  }
 0x230   : > { %6936 = vmatpush1.bf16.msra.mxu0 %v10062_v63  ;;  %7592 = vmatpush1.bf16.msra.mxu1 %v10065_v0  ;;  %v10150_v63 = vld [vmem:[%s11020_s10 + $0x11a8] ss:$16 sps:$4 sm:$0xff]   ;;  %v10155_v0 = vld [vmem:[%s11020_s10 + $0x11c4] ss:$16 sps:$4 sm:$0xff]  }
 0x231   : > { %6946 = vmatprep.subr.bf16.mxu0 %v10071_v1  ;;  %7602 = vmatprep.subr.bf16.mxu1 %v10074_v47  ;;  %v10158_v1 = vld [vmem:[%s11020_s10 + $0x11cc] ss:$16 sps:$4 sm:$0xff]   ;;  %v342_v47 = vcombine.high %v11615_v58, %v11615_v58  ;;  %v10159_v58 = vld [vmem:[%s11020_s10 + $0x11e0] ss:$16 sps:$4 sm:$0xff]  }
 0x233   : > { %6938 = vmatmul.mubr.bf16.vlgmr.msra.gmra.mrb[0].mxu0 %v456_v3  ;;  %7594 = vmatmul.mubr.bf16.vlgmr.msra.gmra.mrb[0].mxu1 %v456_v3  ;;  %v10156_v3 = vld [vmem:[%s11020_s10 + $0x11c8] ss:$16 sps:$4 sm:$0xff]  }
 0x234   : > { %6947 = vmatpush1.bf16.msra.mxu0 %v10069_v4  ;;  %7603 = vmatpush1.bf16.msra.mxu1 %v10072_v5  ;;  %v10161_v4 = vld [vmem:[%s11020_s10 + $0x11e4] ss:$16 sps:$4 sm:$0xff]   ;;  %v10164_v5 = vld [vmem:[%s11020_s10 + $0x11ec] ss:$16 sps:$4 sm:$0xff]  }
 0x235   : > { %6948 = vmatprep.subr.bf16.mxu0 %v10077_v6  ;;  %7604 = vmatprep.subr.bf16.mxu1 %v10080_v7  ;;  %v11696_v6 = vrot.slane %v342_v47, %v11073_v49  ;;  %v10162_v7 = vld [vmem:[%s11020_s10 + $0x11e8] ss:$16 sps:$4 sm:$0xff]  }
 0x236   : > { %6978 = vmatprep.mubr.bf16.mxu0 %v459_v8  ;;  %7634 = vmatprep.mubr.bf16.mxu1 %v459_v8  ;;  %v10167_v8 = vld [vmem:[%s11020_s10 + $0x1204] ss:$16 sps:$4 sm:$0xff]   ;;  %v10240_v47 = vld [vmem:[%s11020_s10 + $0x1388] ss:$16 sps:$4 sm:$0xff]  }
 0x238   : > { %6949 = vmatpush1.bf16.msra.mxu0 %v10075_v56  ;;  %7605 = vmatpush1.bf16.msra.mxu1 %v10078_v10  ;;  %v10170_v56 = vld [vmem:[%s11020_s10 + $0x120c] ss:$16 sps:$4 sm:$0xff]   ;;  %v358_v10 = vcombine.high %v11696_v6, %v11696_v6 }
 0x239   : > { %6950 = vmatprep.subr.bf16.mxu0 %v10083_v11  ;;  %7606 = vmatprep.subr.bf16.mxu1 %v10086_v12  ;;  %v458_v11 = vpack.c.bf16 %v11623_v62, %v11623_v62  ;;  %v10165_v12 = vld [vmem:[%s11020_s10 + $0x1200] ss:$16 sps:$4 sm:$0xff]  }
 0x23a   : > { %v10171_v62 = vld [vmem:[%s11020_s10 + $0x1220] ss:$16 sps:$4 sm:$0xff]  }
 0x23c   : > { %6951 = vmatpush1.bf16.msra.mxu0 %v10081_v13  ;;  %7607 = vmatpush1.bf16.msra.mxu1 %v10084_v14  ;;  %v10168_v13 = vld [vmem:[%s11020_s10 + $0x1208] ss:$16 sps:$4 sm:$0xff]   ;;  %v10173_v14 = vld [vmem:[%s11020_s10 + $0x1224] ss:$16 sps:$4 sm:$0xff]  }
 0x23d   : > { %6952 = vmatprep.subr.bf16.mxu0 %v10089_v15  ;;  %7608 = vmatprep.subr.bf16.mxu1 %v10092_v16  ;;  %v10176_v15 = vld [vmem:[%s11020_s10 + $0x122c] ss:$16 sps:$4 sm:$0xff]   ;;  %v461_v16 = vpack.c.bf16 %v358_v10, %v358_v10  ;;  %v10252_v10 = vld [vmem:[%s11020_s10 + $0x13c8] ss:$16 sps:$4 sm:$0xff]  }
 0x240   : > { %6953 = vmatpush1.bf16.msra.mxu0 %v10087_v17  ;;  %7609 = vmatpush1.bf16.msra.mxu1 %v10090_v18  ;;  %v10174_v17 = vld [vmem:[%s11020_s10 + $0x1228] ss:$16 sps:$4 sm:$0xff]   ;;  %v10179_v18 = vld [vmem:[%s11020_s10 + $0x1244] ss:$16 sps:$4 sm:$0xff]  }
 0x241   : > { %6954 = vmatprep.subr.bf16.mxu0 %v10095_v19  ;;  %7610 = vmatprep.subr.bf16.mxu1 %v10098_v20  ;;  %v10182_v19 = vld [vmem:[%s11020_s10 + $0x124c] ss:$16 sps:$4 sm:$0xff]   ;;  %v10177_v20 = vld [vmem:[%s11020_s10 + $0x1240] ss:$16 sps:$4 sm:$0xff]  }
 0x244   : > { %6955 = vmatpush1.bf16.msra.mxu0 %v10093_v21  ;;  %7611 = vmatpush1.bf16.msra.mxu1 %v10096_v22  ;;  %v10180_v21 = vld [vmem:[%s11020_s10 + $0x1248] ss:$16 sps:$4 sm:$0xff]   ;;  %v10185_v22 = vld [vmem:[%s11020_s10 + $0x1264] ss:$16 sps:$4 sm:$0xff]  }
 0x245   : > { %6956 = vmatprep.subr.bf16.mxu0 %v10101_v24  ;;  %7612 = vmatprep.subr.bf16.mxu1 %v10104_v23  ;;  %v10188_v24 = vld [vmem:[%s11020_s10 + $0x126c] ss:$16 sps:$4 sm:$0xff]   ;;  %v10183_v23 = vld [vmem:[%s11020_s10 + $0x1260] ss:$16 sps:$4 sm:$0xff]  }
 0x248   : > { %6957 = vmatpush1.bf16.msra.mxu0 %v10099_v9  ;;  %7613 = vmatpush1.bf16.msra.mxu1 %v10102_v27  ;;  %v10186_v9 = vld [vmem:[%s11020_s10 + $0x1268] ss:$16 sps:$4 sm:$0xff]   ;;  %v10191_v27 = vld [vmem:[%s11020_s10 + $0x1284] ss:$16 sps:$4 sm:$0xff]  }
 0x249   : > { %6958 = vmatprep.subr.bf16.mxu0 %v10107_v29  ;;  %7614 = vmatprep.subr.bf16.mxu1 %v10110_v30  ;;  %v10194_v29 = vld [vmem:[%s11020_s10 + $0x128c] ss:$16 sps:$4 sm:$0xff]   ;;  %v10189_v30 = vld [vmem:[%s11020_s10 + $0x1280] ss:$16 sps:$4 sm:$0xff]  }
 0x24c   : > { %6959 = vmatpush1.bf16.msra.mxu0 %v10105_v31  ;;  %7615 = vmatpush1.bf16.msra.mxu1 %v10108_v33  ;;  %v10192_v31 = vld [vmem:[%s11020_s10 + $0x1288] ss:$16 sps:$4 sm:$0xff]   ;;  %v10197_v33 = vld [vmem:[%s11020_s10 + $0x12a4] ss:$16 sps:$4 sm:$0xff]  }
 0x24d   : > { %6960 = vmatprep.subr.bf16.mxu0 %v10113_v34  ;;  %7616 = vmatprep.subr.bf16.mxu1 %v10116_v35  ;;  %v10200_v34 = vld [vmem:[%s11020_s10 + $0x12ac] ss:$16 sps:$4 sm:$0xff]   ;;  %v10195_v35 = vld [vmem:[%s11020_s10 + $0x12a0] ss:$16 sps:$4 sm:$0xff]  }
 0x250   : > { %6961 = vmatpush1.bf16.msra.mxu0 %v10111_v26  ;;  %7617 = vmatpush1.bf16.msra.mxu1 %v10114_v36  ;;  %v10198_v26 = vld [vmem:[%s11020_s10 + $0x12a8] ss:$16 sps:$4 sm:$0xff]   ;;  %v10203_v36 = vld [vmem:[%s11020_s10 + $0x12c4] ss:$16 sps:$4 sm:$0xff]  }
 0x251   : > { %6962 = vmatprep.subr.bf16.mxu0 %v10119_v37  ;;  %7618 = vmatprep.subr.bf16.mxu1 %v10122_v38  ;;  %v10206_v37 = vld [vmem:[%s11020_s10 + $0x12cc] ss:$16 sps:$4 sm:$0xff]   ;;  %v10201_v38 = vld [vmem:[%s11020_s10 + $0x12c0] ss:$16 sps:$4 sm:$0xff]  }
 0x254   : > { %6963 = vmatpush1.bf16.msra.mxu0 %v10117_v39  ;;  %7619 = vmatpush1.bf16.msra.mxu1 %v10120_v28  ;;  %v10204_v39 = vld [vmem:[%s11020_s10 + $0x12c8] ss:$16 sps:$4 sm:$0xff]   ;;  %v10209_v28 = vld [vmem:[%s11020_s10 + $0x12e4] ss:$16 sps:$4 sm:$0xff]  }
 0x255   : > { %6964 = vmatprep.subr.bf16.mxu0 %v10125_v41  ;;  %7620 = vmatprep.subr.bf16.mxu1 %v10128_v44  ;;  %v10212_v41 = vld [vmem:[%s11020_s10 + $0x12ec] ss:$16 sps:$4 sm:$0xff]   ;;  %v10207_v44 = vld [vmem:[%s11020_s10 + $0x12e0] ss:$16 sps:$4 sm:$0xff]  }
 0x258   : > { %6965 = vmatpush1.bf16.msra.mxu0 %v10123_v45  ;;  %7621 = vmatpush1.bf16.msra.mxu1 %v10126_v25  ;;  %v10210_v45 = vld [vmem:[%s11020_s10 + $0x12e8] ss:$16 sps:$4 sm:$0xff]   ;;  %v10215_v25 = vld [vmem:[%s11020_s10 + $0x1304] ss:$16 sps:$4 sm:$0xff]  }
 0x259   : > { %6966 = vmatprep.subr.bf16.mxu0 %v10131_v46  ;;  %7622 = vmatprep.subr.bf16.mxu1 %v10134_v48  ;;  %v10218_v46 = vld [vmem:[%s11020_s10 + $0x130c] ss:$16 sps:$4 sm:$0xff]   ;;  %v10213_v48 = vld [vmem:[%s11020_s10 + $0x1300] ss:$16 sps:$4 sm:$0xff]  }
 0x25c   : > { %6967 = vmatpush1.bf16.msra.mxu0 %v10129_v50  ;;  %7623 = vmatpush1.bf16.msra.mxu1 %v10132_v51  ;;  %v10216_v50 = vld [vmem:[%s11020_s10 + $0x1308] ss:$16 sps:$4 sm:$0xff]   ;;  %v10221_v51 = vld [vmem:[%s11020_s10 + $0x1324] ss:$16 sps:$4 sm:$0xff]  }
 0x25d   : > { %6968 = vmatprep.subr.bf16.mxu0 %v10137_v32  ;;  %7624 = vmatprep.subr.bf16.mxu1 %v10140_v52  ;;  %v10224_v32 = vld [vmem:[%s11020_s10 + $0x132c] ss:$16 sps:$4 sm:$0xff]   ;;  %v10219_v52 = vld [vmem:[%s11020_s10 + $0x1320] ss:$16 sps:$4 sm:$0xff]  }
 0x260   : > { %6969 = vmatpush1.bf16.msra.mxu0 %v10135_v53  ;;  %7625 = vmatpush1.bf16.msra.mxu1 %v10138_v54  ;;  %v10222_v53 = vld [vmem:[%s11020_s10 + $0x1328] ss:$16 sps:$4 sm:$0xff]   ;;  %v10227_v54 = vld [vmem:[%s11020_s10 + $0x1344] ss:$16 sps:$4 sm:$0xff]  }
 0x261   : > { %6970 = vmatprep.subr.bf16.mxu0 %v10143_v55  ;;  %7626 = vmatprep.subr.bf16.mxu1 %v10146_v42  ;;  %v10230_v55 = vld [vmem:[%s11020_s10 + $0x134c] ss:$16 sps:$4 sm:$0xff]   ;;  %v10225_v42 = vld [vmem:[%s11020_s10 + $0x1340] ss:$16 sps:$4 sm:$0xff]  }
 0x264   : > { %6971 = vmatpush1.bf16.msra.mxu0 %v10141_v57  ;;  %7627 = vmatpush1.bf16.msra.mxu1 %v10144_v40  ;;  %v10228_v57 = vld [vmem:[%s11020_s10 + $0x1348] ss:$16 sps:$4 sm:$0xff]   ;;  %v10233_v40 = vld [vmem:[%s11020_s10 + $0x1364] ss:$16 sps:$4 sm:$0xff]  }
 0x265   : > { %6972 = vmatprep.subr.bf16.mxu0 %v10149_v59  ;;  %7628 = vmatprep.subr.bf16.mxu1 %v10152_v60  ;;  %v10236_v59 = vld [vmem:[%s11020_s10 + $0x136c] ss:$16 sps:$4 sm:$0xff]   ;;  %v10231_v60 = vld [vmem:[%s11020_s10 + $0x1360] ss:$16 sps:$4 sm:$0xff]  }
 0x268   : > { %6973 = vmatpush1.bf16.msra.mxu0 %v10147_v61  ;;  %7629 = vmatpush1.bf16.msra.mxu1 %v10150_v63  ;;  %v10234_v61 = vld [vmem:[%s11020_s10 + $0x1368] ss:$16 sps:$4 sm:$0xff]   ;;  %v10239_v63 = vld [vmem:[%s11020_s10 + $0x1384] ss:$16 sps:$4 sm:$0xff]  }
 0x269   : > { %6974 = vmatprep.subr.bf16.mxu0 %v10155_v0  ;;  %7630 = vmatprep.subr.bf16.mxu1 %v10158_v1  ;;  %v10242_v0 = vld [vmem:[%s11020_s10 + $0x138c] ss:$16 sps:$4 sm:$0xff]   ;;  %v10237_v1 = vld [vmem:[%s11020_s10 + $0x1380] ss:$16 sps:$4 sm:$0xff]  }
 0x26c   : > { %6975 = vmatpush1.bf16.msra.mxu0 %v10153_v2  ;;  %7631 = vmatpush1.bf16.msra.mxu1 %v10156_v3  ;;  %v10245_v2 = vld [vmem:[%s11020_s10 + $0x13a4] ss:$16 sps:$4 sm:$0xff]   ;;  %v10248_v3 = vld [vmem:[%s11020_s10 + $0x13ac] ss:$16 sps:$4 sm:$0xff]  }
 0x26d   : > { %6976 = vmatprep.subr.bf16.mxu0 %v10161_v4  ;;  %7632 = vmatprep.subr.bf16.mxu1 %v10164_v5  ;;  %v10243_v4 = vld [vmem:[%s11020_s10 + $0x13a0] ss:$16 sps:$4 sm:$0xff]   ;;  %v10246_v5 = vld [vmem:[%s11020_s10 + $0x13a8] ss:$16 sps:$4 sm:$0xff]  }
 0x270   : > { %6977 = vmatpush1.bf16.msra.mxu0 %v10159_v58  ;;  %7633 = vmatpush1.bf16.msra.mxu1 %v10162_v7  ;;  %v10251_v58 = vld [vmem:[%s11020_s10 + $0x13c4] ss:$16 sps:$4 sm:$0xff]   ;;  %v10254_v7 = vld [vmem:[%s11020_s10 + $0x13cc] ss:$16 sps:$4 sm:$0xff]  }
 0x271   : > { %6987 = vmatprep.subr.bf16.mxu0 %v10167_v8  ;;  %7643 = vmatprep.subr.bf16.mxu1 %v10170_v56  ;;  %v11765_v8 = vld [vmem:[%s12255_s0 + $0x28] sm:$0xff]  ;;  %v10249_v56 = vld [vmem:[%s11020_s10 + $0x13c0] ss:$16 sps:$4 sm:$0xff]  }
 0x273   : > { %6979 = vmatmul.mubr.bf16.vlgmr.msra.gmra.mrb[0].mxu0 %v458_v11  ;;  %7635 = vmatmul.mubr.bf16.vlgmr.msra.gmra.mrb[0].mxu1 %v458_v11  ;;  %v10257_v11 = vld [vmem:[%s11020_s10 + $0x13e4] ss:$16 sps:$4 sm:$0xff]  }
 0x274   : > { %6988 = vmatpush1.bf16.msra.mxu0 %v10165_v12  ;;  %7644 = vmatpush1.bf16.msra.mxu1 %v10168_v13  ;;  %v10260_v12 = vld [vmem:[%s11020_s10 + $0x13ec] ss:$16 sps:$4 sm:$0xff]   ;;  %v11773_v13 = vrot.slane %v11765_v8, %v11073_v49 }
 0x275   : > { %6989 = vmatprep.subr.bf16.mxu0 %v10173_v14  ;;  %7645 = vmatprep.subr.bf16.mxu1 %v10176_v15  ;;  %v10255_v14 = vld [vmem:[%s11020_s10 + $0x13e0] ss:$16 sps:$4 sm:$0xff]   ;;  %v10258_v15 = vld [vmem:[%s11020_s10 + $0x13e8] ss:$16 sps:$4 sm:$0xff]  }
 0x276   : > { %7019 = vmatprep.mubr.bf16.mxu0 %v461_v16  ;;  %7675 = vmatprep.mubr.bf16.mxu1 %v461_v16  ;;  %v10264_v16 = vld [vmem:[%s11020_s10 + $0x1404] ss:$16 sps:$4 sm:$0xff]  }
 0x278   : > { %6990 = vmatpush1.bf16.msra.mxu0 %v10171_v62  ;;  %7646 = vmatpush1.bf16.msra.mxu1 %v10174_v17  ;;  %v10267_v62 = vld [vmem:[%s11020_s10 + $0x140c] ss:$16 sps:$4 sm:$0xff]   ;;  %v374_v17 = vcombine.high %v11773_v13, %v11773_v13 }
 0x279   : > { %6991 = vmatprep.subr.bf16.mxu0 %v10179_v18  ;;  %7647 = vmatprep.subr.bf16.mxu1 %v10182_v19  ;;  %v460_v18 = vpack.c.bf16 %v11696_v6, %v11696_v6  ;;  %v10262_v19 = vld [vmem:[%s11020_s10 + $0x1400] ss:$16 sps:$4 sm:$0xff]  }
 0x27a   : > { %v10268_v6 = vld [vmem:[%s11020_s10 + $0x1420] ss:$16 sps:$4 sm:$0xff]  }
 0x27c   : > { %6992 = vmatpush1.bf16.msra.mxu0 %v10177_v20  ;;  %7648 = vmatpush1.bf16.msra.mxu1 %v10180_v21  ;;  %v10265_v20 = vld [vmem:[%s11020_s10 + $0x1408] ss:$16 sps:$4 sm:$0xff]   ;;  %v10270_v21 = vld [vmem:[%s11020_s10 + $0x1424] ss:$16 sps:$4 sm:$0xff]  }
 0x27d   : > { %6993 = vmatprep.subr.bf16.mxu0 %v10185_v22  ;;  %7649 = vmatprep.subr.bf16.mxu1 %v10188_v24  ;;  %v10273_v22 = vld [vmem:[%s11020_s10 + $0x142c] ss:$16 sps:$4 sm:$0xff]   ;;  %v463_v24 = vpack.c.bf16 %v374_v17, %v374_v17  ;;  %v10346_v17 = vld [vmem:[%s11020_s10 + $0x15c0] ss:$16 sps:$4 sm:$0xff]  }
 0x280   : > { %6994 = vmatpush1.bf16.msra.mxu0 %v10183_v23  ;;  %7650 = vmatpush1.bf16.msra.mxu1 %v10186_v9  ;;  %v10271_v23 = vld [vmem:[%s11020_s10 + $0x1428] ss:$16 sps:$4 sm:$0xff]   ;;  %v10276_v9 = vld [vmem:[%s11020_s10 + $0x1444] ss:$16 sps:$4 sm:$0xff]  }
 0x281   : > { %6995 = vmatprep.subr.bf16.mxu0 %v10191_v27  ;;  %7651 = vmatprep.subr.bf16.mxu1 %v10194_v29  ;;  %v10279_v27 = vld [vmem:[%s11020_s10 + $0x144c] ss:$16 sps:$4 sm:$0xff]   ;;  %v10274_v29 = vld [vmem:[%s11020_s10 + $0x1440] ss:$16 sps:$4 sm:$0xff]  }
 0x284   : > { %6996 = vmatpush1.bf16.msra.mxu0 %v10189_v30  ;;  %7652 = vmatpush1.bf16.msra.mxu1 %v10192_v31  ;;  %v10277_v30 = vld [vmem:[%s11020_s10 + $0x1448] ss:$16 sps:$4 sm:$0xff]   ;;  %v10282_v31 = vld [vmem:[%s11020_s10 + $0x1464] ss:$16 sps:$4 sm:$0xff]  }
 0x285   : > { %6997 = vmatprep.subr.bf16.mxu0 %v10197_v33  ;;  %7653 = vmatprep.subr.bf16.mxu1 %v10200_v34  ;;  %v10285_v33 = vld [vmem:[%s11020_s10 + $0x146c] ss:$16 sps:$4 sm:$0xff]   ;;  %v10280_v34 = vld [vmem:[%s11020_s10 + $0x1460] ss:$16 sps:$4 sm:$0xff]  }
 0x288   : > { %6998 = vmatpush1.bf16.msra.mxu0 %v10195_v35  ;;  %7654 = vmatpush1.bf16.msra.mxu1 %v10198_v26  ;;  %v10283_v35 = vld [vmem:[%s11020_s10 + $0x1468] ss:$16 sps:$4 sm:$0xff]   ;;  %v10288_v26 = vld [vmem:[%s11020_s10 + $0x1484] ss:$16 sps:$4 sm:$0xff]  }
 0x289   : > { %6999 = vmatprep.subr.bf16.mxu0 %v10203_v36  ;;  %7655 = vmatprep.subr.bf16.mxu1 %v10206_v37  ;;  %v10291_v36 = vld [vmem:[%s11020_s10 + $0x148c] ss:$16 sps:$4 sm:$0xff]   ;;  %v10286_v37 = vld [vmem:[%s11020_s10 + $0x1480] ss:$16 sps:$4 sm:$0xff]  }
 0x28c   : > { %7000 = vmatpush1.bf16.msra.mxu0 %v10201_v38  ;;  %7656 = vmatpush1.bf16.msra.mxu1 %v10204_v39  ;;  %v10289_v38 = vld [vmem:[%s11020_s10 + $0x1488] ss:$16 sps:$4 sm:$0xff]   ;;  %v10294_v39 = vld [vmem:[%s11020_s10 + $0x14a4] ss:$16 sps:$4 sm:$0xff]  }
 0x28d   : > { %7001 = vmatprep.subr.bf16.mxu0 %v10209_v28  ;;  %7657 = vmatprep.subr.bf16.mxu1 %v10212_v41  ;;  %v10297_v28 = vld [vmem:[%s11020_s10 + $0x14ac] ss:$16 sps:$4 sm:$0xff]   ;;  %v10292_v41 = vld [vmem:[%s11020_s10 + $0x14a0] ss:$16 sps:$4 sm:$0xff]  }
 0x290   : > { %7002 = vmatpush1.bf16.msra.mxu0 %v10207_v44  ;;  %7658 = vmatpush1.bf16.msra.mxu1 %v10210_v45  ;;  %v10295_v44 = vld [vmem:[%s11020_s10 + $0x14a8] ss:$16 sps:$4 sm:$0xff]   ;;  %v10300_v45 = vld [vmem:[%s11020_s10 + $0x14c4] ss:$16 sps:$4 sm:$0xff]  }
 0x291   : > { %7003 = vmatprep.subr.bf16.mxu0 %v10215_v25  ;;  %7659 = vmatprep.subr.bf16.mxu1 %v10218_v46  ;;  %v10303_v25 = vld [vmem:[%s11020_s10 + $0x14cc] ss:$16 sps:$4 sm:$0xff]   ;;  %v10298_v46 = vld [vmem:[%s11020_s10 + $0x14c0] ss:$16 sps:$4 sm:$0xff]  }
 0x294   : > { %7004 = vmatpush1.bf16.msra.mxu0 %v10213_v48  ;;  %7660 = vmatpush1.bf16.msra.mxu1 %v10216_v50  ;;  %v10301_v48 = vld [vmem:[%s11020_s10 + $0x14c8] ss:$16 sps:$4 sm:$0xff]   ;;  %v10306_v50 = vld [vmem:[%s11020_s10 + $0x14e4] ss:$16 sps:$4 sm:$0xff]  }
 0x295   : > { %7005 = vmatprep.subr.bf16.mxu0 %v10221_v51  ;;  %7661 = vmatprep.subr.bf16.mxu1 %v10224_v32  ;;  %v10309_v51 = vld [vmem:[%s11020_s10 + $0x14ec] ss:$16 sps:$4 sm:$0xff]   ;;  %v10304_v32 = vld [vmem:[%s11020_s10 + $0x14e0] ss:$16 sps:$4 sm:$0xff]  }
 0x298   : > { %7006 = vmatpush1.bf16.msra.mxu0 %v10219_v52  ;;  %7662 = vmatpush1.bf16.msra.mxu1 %v10222_v53  ;;  %v10307_v52 = vld [vmem:[%s11020_s10 + $0x14e8] ss:$16 sps:$4 sm:$0xff]   ;;  %v10312_v53 = vld [vmem:[%s11020_s10 + $0x1504] ss:$16 sps:$4 sm:$0xff]  }
 0x299   : > { %7007 = vmatprep.subr.bf16.mxu0 %v10227_v54  ;;  %7663 = vmatprep.subr.bf16.mxu1 %v10230_v55  ;;  %v10315_v54 = vld [vmem:[%s11020_s10 + $0x150c] ss:$16 sps:$4 sm:$0xff]   ;;  %v10310_v55 = vld [vmem:[%s11020_s10 + $0x1500] ss:$16 sps:$4 sm:$0xff]  }
 0x29c   : > { %7008 = vmatpush1.bf16.msra.mxu0 %v10225_v42  ;;  %7664 = vmatpush1.bf16.msra.mxu1 %v10228_v57  ;;  %v10313_v42 = vld [vmem:[%s11020_s10 + $0x1508] ss:$16 sps:$4 sm:$0xff]   ;;  %v10318_v57 = vld [vmem:[%s11020_s10 + $0x1524] ss:$16 sps:$4 sm:$0xff]  }
 0x29d   : > { %7009 = vmatprep.subr.bf16.mxu0 %v10233_v40  ;;  %7665 = vmatprep.subr.bf16.mxu1 %v10236_v59  ;;  %v10321_v40 = vld [vmem:[%s11020_s10 + $0x152c] ss:$16 sps:$4 sm:$0xff]   ;;  %v10316_v59 = vld [vmem:[%s11020_s10 + $0x1520] ss:$16 sps:$4 sm:$0xff]  }
 0x2a0   : > { %7010 = vmatpush1.bf16.msra.mxu0 %v10231_v60  ;;  %7666 = vmatpush1.bf16.msra.mxu1 %v10234_v61  ;;  %v10319_v60 = vld [vmem:[%s11020_s10 + $0x1528] ss:$16 sps:$4 sm:$0xff]   ;;  %v10324_v61 = vld [vmem:[%s11020_s10 + $0x1544] ss:$16 sps:$4 sm:$0xff]  }
 0x2a1   : > { %7011 = vmatprep.subr.bf16.mxu0 %v10239_v63  ;;  %7667 = vmatprep.subr.bf16.mxu1 %v10242_v0  ;;  %v10327_v63 = vld [vmem:[%s11020_s10 + $0x154c] ss:$16 sps:$4 sm:$0xff]   ;;  %v10322_v0 = vld [vmem:[%s11020_s10 + $0x1540] ss:$16 sps:$4 sm:$0xff]  }
 0x2a4   : > { %7012 = vmatpush1.bf16.msra.mxu0 %v10237_v1  ;;  %7668 = vmatpush1.bf16.msra.mxu1 %v10240_v47  ;;  %v10325_v1 = vld [vmem:[%s11020_s10 + $0x1548] ss:$16 sps:$4 sm:$0xff]   ;;  %v10330_v47 = vld [vmem:[%s11020_s10 + $0x1564] ss:$16 sps:$4 sm:$0xff]  }
 0x2a5   : > { %7013 = vmatprep.subr.bf16.mxu0 %v10245_v2  ;;  %7669 = vmatprep.subr.bf16.mxu1 %v10248_v3  ;;  %v10333_v2 = vld [vmem:[%s11020_s10 + $0x156c] ss:$16 sps:$4 sm:$0xff]   ;;  %v10328_v3 = vld [vmem:[%s11020_s10 + $0x1560] ss:$16 sps:$4 sm:$0xff]  }
 0x2a8   : > { %7014 = vmatpush1.bf16.msra.mxu0 %v10243_v4  ;;  %7670 = vmatpush1.bf16.msra.mxu1 %v10246_v5  ;;  %v10331_v4 = vld [vmem:[%s11020_s10 + $0x1568] ss:$16 sps:$4 sm:$0xff]   ;;  %v10336_v5 = vld [vmem:[%s11020_s10 + $0x1584] ss:$16 sps:$4 sm:$0xff]  }
 0x2a9   : > { %7015 = vmatprep.subr.bf16.mxu0 %v10251_v58  ;;  %7671 = vmatprep.subr.bf16.mxu1 %v10254_v7  ;;  %v10339_v58 = vld [vmem:[%s11020_s10 + $0x158c] ss:$16 sps:$4 sm:$0xff]   ;;  %v10334_v7 = vld [vmem:[%s11020_s10 + $0x1580] ss:$16 sps:$4 sm:$0xff]  }
 0x2ac   : > { %7016 = vmatpush1.bf16.msra.mxu0 %v10249_v56  ;;  %7672 = vmatpush1.bf16.msra.mxu1 %v10252_v10  ;;  %v10337_v56 = vld [vmem:[%s11020_s10 + $0x1588] ss:$16 sps:$4 sm:$0xff]   ;;  %v10342_v10 = vld [vmem:[%s11020_s10 + $0x15a4] ss:$16 sps:$4 sm:$0xff]  }
 0x2ad   : > { %7017 = vmatprep.subr.bf16.mxu0 %v10257_v11  ;;  %7673 = vmatprep.subr.bf16.mxu1 %v10260_v12  ;;  %v10345_v11 = vld [vmem:[%s11020_s10 + $0x15ac] ss:$16 sps:$4 sm:$0xff]   ;;  %v10340_v12 = vld [vmem:[%s11020_s10 + $0x15a0] ss:$16 sps:$4 sm:$0xff]  }
 0x2b0   : > { %7018 = vmatpush1.bf16.msra.mxu0 %v10255_v14  ;;  %7674 = vmatpush1.bf16.msra.mxu1 %v10258_v15  ;;  %v10343_v14 = vld [vmem:[%s11020_s10 + $0x15a8] ss:$16 sps:$4 sm:$0xff]   ;;  %v10348_v15 = vld [vmem:[%s11020_s10 + $0x15c4] ss:$16 sps:$4 sm:$0xff]  }
 0x2b1   : > { %7028 = vmatprep.subr.bf16.mxu0 %v10264_v16  ;;  %7684 = vmatprep.subr.bf16.mxu1 %v10267_v62  ;;  %v10351_v16 = vld [vmem:[%s11020_s10 + $0x15cc] ss:$16 sps:$4 sm:$0xff]   ;;  %v359_v62 = vcombine.high %v11765_v8, %v11765_v8  ;;  %v10352_v8 = vld [vmem:[%s11020_s10 + $0x15e0] ss:$16 sps:$4 sm:$0xff]  }
 0x2b3   : > { %7020 = vmatmul.mubr.bf16.vlgmr.msra.gmra.mrb[0].mxu0 %v460_v18  ;;  %7676 = vmatmul.mubr.bf16.vlgmr.msra.gmra.mrb[0].mxu1 %v460_v18  ;;  %v10349_v18 = vld [vmem:[%s11020_s10 + $0x15c8] ss:$16 sps:$4 sm:$0xff]  }
 0x2b4   : > { %7029 = vmatpush1.bf16.msra.mxu0 %v10262_v19  ;;  %7685 = vmatpush1.bf16.msra.mxu1 %v10265_v20  ;;  %v10354_v19 = vld [vmem:[%s11020_s10 + $0x15e4] ss:$16 sps:$4 sm:$0xff]   ;;  %v10357_v20 = vld [vmem:[%s11020_s10 + $0x15ec] ss:$16 sps:$4 sm:$0xff]  }
 0x2b5   : > { %7030 = vmatprep.subr.bf16.mxu0 %v10270_v21  ;;  %7686 = vmatprep.subr.bf16.mxu1 %v10273_v22  ;;  %v11846_v21 = vrot.slane %v359_v62, %v11073_v49  ;;  %v10355_v22 = vld [vmem:[%s11020_s10 + $0x15e8] ss:$16 sps:$4 sm:$0xff]  }
 0x2b6   : > { %7060 = vmatprep.mubr.bf16.mxu0 %v463_v24  ;;  %7716 = vmatprep.mubr.bf16.mxu1 %v463_v24  ;;  %v10360_v24 = vld [vmem:[%s11020_s10 + $0x1604] ss:$16 sps:$4 sm:$0xff]   ;;  %v10433_v62 = vld [vmem:[%s11020_s10 + $0x1788] ss:$16 sps:$4 sm:$0xff]  }
 0x2b8   : > { %7031 = vmatpush1.bf16.msra.mxu0 %v10268_v6  ;;  %7687 = vmatpush1.bf16.msra.mxu1 %v10271_v23  ;;  %v10363_v6 = vld [vmem:[%s11020_s10 + $0x160c] ss:$16 sps:$4 sm:$0xff]   ;;  %v375_v23 = vcombine.high %v11846_v21, %v11846_v21 }
 0x2b9   : > { %7032 = vmatprep.subr.bf16.mxu0 %v10276_v9  ;;  %7688 = vmatprep.subr.bf16.mxu1 %v10279_v27  ;;  %v462_v9 = vpack.c.bf16 %v11773_v13, %v11773_v13  ;;  %v10358_v27 = vld [vmem:[%s11020_s10 + $0x1600] ss:$16 sps:$4 sm:$0xff]  }
 0x2ba   : > { %v10364_v13 = vld [vmem:[%s11020_s10 + $0x1620] ss:$16 sps:$4 sm:$0xff]  }
 0x2bc   : > { %7033 = vmatpush1.bf16.msra.mxu0 %v10274_v29  ;;  %7689 = vmatpush1.bf16.msra.mxu1 %v10277_v30  ;;  %v10361_v29 = vld [vmem:[%s11020_s10 + $0x1608] ss:$16 sps:$4 sm:$0xff]   ;;  %v10366_v30 = vld [vmem:[%s11020_s10 + $0x1624] ss:$16 sps:$4 sm:$0xff]  }
 0x2bd   : > { %7034 = vmatprep.subr.bf16.mxu0 %v10282_v31  ;;  %7690 = vmatprep.subr.bf16.mxu1 %v10285_v33  ;;  %v10369_v31 = vld [vmem:[%s11020_s10 + $0x162c] ss:$16 sps:$4 sm:$0xff]   ;;  %v465_v33 = vpack.c.bf16 %v375_v23, %v375_v23  ;;  %v10445_v23 = vld [vmem:[%s11020_s10 + $0x17c8] ss:$16 sps:$4 sm:$0xff]  }
 0x2c0   : > { %7035 = vmatpush1.bf16.msra.mxu0 %v10280_v34  ;;  %7691 = vmatpush1.bf16.msra.mxu1 %v10283_v35  ;;  %v10367_v34 = vld [vmem:[%s11020_s10 + $0x1628] ss:$16 sps:$4 sm:$0xff]   ;;  %v10372_v35 = vld [vmem:[%s11020_s10 + $0x1644] ss:$16 sps:$4 sm:$0xff]  }
 0x2c1   : > { %7036 = vmatprep.subr.bf16.mxu0 %v10288_v26  ;;  %7692 = vmatprep.subr.bf16.mxu1 %v10291_v36  ;;  %v10375_v26 = vld [vmem:[%s11020_s10 + $0x164c] ss:$16 sps:$4 sm:$0xff]   ;;  %v10370_v36 = vld [vmem:[%s11020_s10 + $0x1640] ss:$16 sps:$4 sm:$0xff]  }
 0x2c4   : > { %7037 = vmatpush1.bf16.msra.mxu0 %v10286_v37  ;;  %7693 = vmatpush1.bf16.msra.mxu1 %v10289_v38  ;;  %v10373_v37 = vld [vmem:[%s11020_s10 + $0x1648] ss:$16 sps:$4 sm:$0xff]   ;;  %v10378_v38 = vld [vmem:[%s11020_s10 + $0x1664] ss:$16 sps:$4 sm:$0xff]  }
 0x2c5   : > { %7038 = vmatprep.subr.bf16.mxu0 %v10294_v39  ;;  %7694 = vmatprep.subr.bf16.mxu1 %v10297_v28  ;;  %v10381_v39 = vld [vmem:[%s11020_s10 + $0x166c] ss:$16 sps:$4 sm:$0xff]   ;;  %v10376_v28 = vld [vmem:[%s11020_s10 + $0x1660] ss:$16 sps:$4 sm:$0xff]  }
 0x2c8   : > { %7039 = vmatpush1.bf16.msra.mxu0 %v10292_v41  ;;  %7695 = vmatpush1.bf16.msra.mxu1 %v10295_v44  ;;  %v10379_v41 = vld [vmem:[%s11020_s10 + $0x1668] ss:$16 sps:$4 sm:$0xff]   ;;  %v10384_v44 = vld [vmem:[%s11020_s10 + $0x1684] ss:$16 sps:$4 sm:$0xff]  }
 0x2c9   : > { %7040 = vmatprep.subr.bf16.mxu0 %v10300_v45  ;;  %7696 = vmatprep.subr.bf16.mxu1 %v10303_v25  ;;  %v10387_v45 = vld [vmem:[%s11020_s10 + $0x168c] ss:$16 sps:$4 sm:$0xff]   ;;  %v10382_v25 = vld [vmem:[%s11020_s10 + $0x1680] ss:$16 sps:$4 sm:$0xff]  }
 0x2cc   : > { %7041 = vmatpush1.bf16.msra.mxu0 %v10298_v46  ;;  %7697 = vmatpush1.bf16.msra.mxu1 %v10301_v48  ;;  %v10385_v46 = vld [vmem:[%s11020_s10 + $0x1688] ss:$16 sps:$4 sm:$0xff]   ;;  %v10390_v48 = vld [vmem:[%s11020_s10 + $0x16a4] ss:$16 sps:$4 sm:$0xff]  }
 0x2cd   : > { %7042 = vmatprep.subr.bf16.mxu0 %v10306_v50  ;;  %7698 = vmatprep.subr.bf16.mxu1 %v10309_v51  ;;  %v10393_v50 = vld [vmem:[%s11020_s10 + $0x16ac] ss:$16 sps:$4 sm:$0xff]   ;;  %v10388_v51 = vld [vmem:[%s11020_s10 + $0x16a0] ss:$16 sps:$4 sm:$0xff]  }
 0x2d0   : > { %7043 = vmatpush1.bf16.msra.mxu0 %v10304_v32  ;;  %7699 = vmatpush1.bf16.msra.mxu1 %v10307_v52  ;;  %v10391_v32 = vld [vmem:[%s11020_s10 + $0x16a8] ss:$16 sps:$4 sm:$0xff]   ;;  %v10396_v52 = vld [vmem:[%s11020_s10 + $0x16c4] ss:$16 sps:$4 sm:$0xff]  }
 0x2d1   : > { %7044 = vmatprep.subr.bf16.mxu0 %v10312_v53  ;;  %7700 = vmatprep.subr.bf16.mxu1 %v10315_v54  ;;  %v10399_v53 = vld [vmem:[%s11020_s10 + $0x16cc] ss:$16 sps:$4 sm:$0xff]   ;;  %v10394_v54 = vld [vmem:[%s11020_s10 + $0x16c0] ss:$16 sps:$4 sm:$0xff]  }
 0x2d4   : > { %7045 = vmatpush1.bf16.msra.mxu0 %v10310_v55  ;;  %7701 = vmatpush1.bf16.msra.mxu1 %v10313_v42  ;;  %v10397_v55 = vld [vmem:[%s11020_s10 + $0x16c8] ss:$16 sps:$4 sm:$0xff]   ;;  %v10402_v42 = vld [vmem:[%s11020_s10 + $0x16e4] ss:$16 sps:$4 sm:$0xff]  }
 0x2d5   : > { %7046 = vmatprep.subr.bf16.mxu0 %v10318_v57  ;;  %7702 = vmatprep.subr.bf16.mxu1 %v10321_v40  ;;  %v10405_v57 = vld [vmem:[%s11020_s10 + $0x16ec] ss:$16 sps:$4 sm:$0xff]   ;;  %v10400_v40 = vld [vmem:[%s11020_s10 + $0x16e0] ss:$16 sps:$4 sm:$0xff]  }
 0x2d8   : > { %7047 = vmatpush1.bf16.msra.mxu0 %v10316_v59  ;;  %7703 = vmatpush1.bf16.msra.mxu1 %v10319_v60  ;;  %v10403_v59 = vld [vmem:[%s11020_s10 + $0x16e8] ss:$16 sps:$4 sm:$0xff]   ;;  %v10408_v60 = vld [vmem:[%s11020_s10 + $0x1704] ss:$16 sps:$4 sm:$0xff]  }
 0x2d9   : > { %7048 = vmatprep.subr.bf16.mxu0 %v10324_v61  ;;  %7704 = vmatprep.subr.bf16.mxu1 %v10327_v63  ;;  %v10411_v61 = vld [vmem:[%s11020_s10 + $0x170c] ss:$16 sps:$4 sm:$0xff]   ;;  %v10406_v63 = vld [vmem:[%s11020_s10 + $0x1700] ss:$16 sps:$4 sm:$0xff]  }
 0x2dc   : > { %7049 = vmatpush1.bf16.msra.mxu0 %v10322_v0  ;;  %7705 = vmatpush1.bf16.msra.mxu1 %v10325_v1  ;;  %v10409_v0 = vld [vmem:[%s11020_s10 + $0x1708] ss:$16 sps:$4 sm:$0xff]   ;;  %v10414_v1 = vld [vmem:[%s11020_s10 + $0x1724] ss:$16 sps:$4 sm:$0xff]  }
 0x2dd   : > { %7050 = vmatprep.subr.bf16.mxu0 %v10330_v47  ;;  %7706 = vmatprep.subr.bf16.mxu1 %v10333_v2  ;;  %v10417_v47 = vld [vmem:[%s11020_s10 + $0x172c] ss:$16 sps:$4 sm:$0xff]   ;;  %v10412_v2 = vld [vmem:[%s11020_s10 + $0x1720] ss:$16 sps:$4 sm:$0xff]  }
 0x2e0   : > { %7051 = vmatpush1.bf16.msra.mxu0 %v10328_v3  ;;  %7707 = vmatpush1.bf16.msra.mxu1 %v10331_v4  ;;  %v10415_v3 = vld [vmem:[%s11020_s10 + $0x1728] ss:$16 sps:$4 sm:$0xff]   ;;  %v10420_v4 = vld [vmem:[%s11020_s10 + $0x1744] ss:$16 sps:$4 sm:$0xff]  }
 0x2e1   : > { %7052 = vmatprep.subr.bf16.mxu0 %v10336_v5  ;;  %7708 = vmatprep.subr.bf16.mxu1 %v10339_v58  ;;  %v10423_v5 = vld [vmem:[%s11020_s10 + $0x174c] ss:$16 sps:$4 sm:$0xff]   ;;  %v10418_v58 = vld [vmem:[%s11020_s10 + $0x1740] ss:$16 sps:$4 sm:$0xff]  }
 0x2e4   : > { %7053 = vmatpush1.bf16.msra.mxu0 %v10334_v7  ;;  %7709 = vmatpush1.bf16.msra.mxu1 %v10337_v56  ;;  %v10421_v7 = vld [vmem:[%s11020_s10 + $0x1748] ss:$16 sps:$4 sm:$0xff]   ;;  %v10426_v56 = vld [vmem:[%s11020_s10 + $0x1764] ss:$16 sps:$4 sm:$0xff]  }
 0x2e5   : > { %7054 = vmatprep.subr.bf16.mxu0 %v10342_v10  ;;  %7710 = vmatprep.subr.bf16.mxu1 %v10345_v11  ;;  %v10429_v10 = vld [vmem:[%s11020_s10 + $0x176c] ss:$16 sps:$4 sm:$0xff]   ;;  %v10424_v11 = vld [vmem:[%s11020_s10 + $0x1760] ss:$16 sps:$4 sm:$0xff]  }
 0x2e8   : > { %7055 = vmatpush1.bf16.msra.mxu0 %v10340_v12  ;;  %7711 = vmatpush1.bf16.msra.mxu1 %v10343_v14  ;;  %v10427_v12 = vld [vmem:[%s11020_s10 + $0x1768] ss:$16 sps:$4 sm:$0xff]   ;;  %v10432_v14 = vld [vmem:[%s11020_s10 + $0x1784] ss:$16 sps:$4 sm:$0xff]  }
 0x2e9   : > { %7056 = vmatprep.subr.bf16.mxu0 %v10348_v15  ;;  %7712 = vmatprep.subr.bf16.mxu1 %v10351_v16  ;;  %v10435_v15 = vld [vmem:[%s11020_s10 + $0x178c] ss:$16 sps:$4 sm:$0xff]   ;;  %v10430_v16 = vld [vmem:[%s11020_s10 + $0x1780] ss:$16 sps:$4 sm:$0xff]  }
 0x2ec   : > { %7057 = vmatpush1.bf16.msra.mxu0 %v10346_v17  ;;  %7713 = vmatpush1.bf16.msra.mxu1 %v10349_v18  ;;  %v10438_v17 = vld [vmem:[%s11020_s10 + $0x17a4] ss:$16 sps:$4 sm:$0xff]   ;;  %v10441_v18 = vld [vmem:[%s11020_s10 + $0x17ac] ss:$16 sps:$4 sm:$0xff]  }
 0x2ed   : > { %7058 = vmatprep.subr.bf16.mxu0 %v10354_v19  ;;  %7714 = vmatprep.subr.bf16.mxu1 %v10357_v20  ;;  %v10436_v19 = vld [vmem:[%s11020_s10 + $0x17a0] ss:$16 sps:$4 sm:$0xff]   ;;  %v10439_v20 = vld [vmem:[%s11020_s10 + $0x17a8] ss:$16 sps:$4 sm:$0xff]  }
 0x2f0   : > { %7059 = vmatpush1.bf16.msra.mxu0 %v10352_v8  ;;  %7715 = vmatpush1.bf16.msra.mxu1 %v10355_v22  ;;  %v10444_v8 = vld [vmem:[%s11020_s10 + $0x17c4] ss:$16 sps:$4 sm:$0xff]   ;;  %v10447_v22 = vld [vmem:[%s11020_s10 + $0x17cc] ss:$16 sps:$4 sm:$0xff]  }
 0x2f1   : > { %7069 = vmatprep.subr.bf16.mxu0 %v10360_v24  ;;  %7725 = vmatprep.subr.bf16.mxu1 %v10363_v6  ;;  %v11915_v24 = vld [vmem:[%s12255_s0 + $0x30] sm:$0xff] }
 0x2f2   : > { %v10442_v6 = vld [vmem:[%s11020_s10 + $0x17c0] ss:$16 sps:$4 sm:$0xff]  }
 0x2f3   : > { %7061 = vmatmul.mubr.bf16.vlgmr.msra.gmra.mrb[0].mxu0 %v462_v9  ;;  %7717 = vmatmul.mubr.bf16.vlgmr.msra.gmra.mrb[0].mxu1 %v462_v9  ;;  %v10450_v9 = vld [vmem:[%s11020_s10 + $0x17e4] ss:$16 sps:$4 sm:$0xff]  }
 0x2f4   : > { %7070 = vmatpush1.bf16.msra.mxu0 %v10358_v27  ;;  %7726 = vmatpush1.bf16.msra.mxu1 %v10361_v29  ;;  %v10453_v27 = vld [vmem:[%s11020_s10 + $0x17ec] ss:$16 sps:$4 sm:$0xff]   ;;  %v11923_v29 = vrot.slane %v11915_v24, %v11073_v49 }
 0x2f5   : > { %7071 = vmatprep.subr.bf16.mxu0 %v10366_v30  ;;  %7727 = vmatprep.subr.bf16.mxu1 %v10369_v31  ;;  %v10448_v30 = vld [vmem:[%s11020_s10 + $0x17e0] ss:$16 sps:$4 sm:$0xff]   ;;  %v10451_v31 = vld [vmem:[%s11020_s10 + $0x17e8] ss:$16 sps:$4 sm:$0xff]  }
 0x2f6   : > { %7101 = vmatprep.mubr.bf16.mxu0 %v465_v33  ;;  %7757 = vmatprep.mubr.bf16.mxu1 %v465_v33  ;;  %v10457_v33 = vld [vmem:[%s11020_s10 + $0x1804] ss:$16 sps:$4 sm:$0xff]  }
 0x2f8   : > { %7072 = vmatpush1.bf16.msra.mxu0 %v10364_v13  ;;  %7728 = vmatpush1.bf16.msra.mxu1 %v10367_v34  ;;  %v10460_v13 = vld [vmem:[%s11020_s10 + $0x180c] ss:$16 sps:$4 sm:$0xff]   ;;  %v391_v34 = vcombine.high %v11923_v29, %v11923_v29 }
 0x2f9   : > { %7073 = vmatprep.subr.bf16.mxu0 %v10372_v35  ;;  %7729 = vmatprep.subr.bf16.mxu1 %v10375_v26  ;;  %v464_v35 = vpack.c.bf16 %v11846_v21, %v11846_v21  ;;  %v10455_v26 = vld [vmem:[%s11020_s10 + $0x1800] ss:$16 sps:$4 sm:$0xff]  }
 0x2fa   : > { %v10461_v21 = vld [vmem:[%s11020_s10 + $0x1820] ss:$16 sps:$4 sm:$0xff]  }
 0x2fc   : > { %7074 = vmatpush1.bf16.msra.mxu0 %v10370_v36  ;;  %7730 = vmatpush1.bf16.msra.mxu1 %v10373_v37  ;;  %v10458_v36 = vld [vmem:[%s11020_s10 + $0x1808] ss:$16 sps:$4 sm:$0xff]   ;;  %v10463_v37 = vld [vmem:[%s11020_s10 + $0x1824] ss:$16 sps:$4 sm:$0xff]  }
 0x2fd   : > { %7075 = vmatprep.subr.bf16.mxu0 %v10378_v38  ;;  %7731 = vmatprep.subr.bf16.mxu1 %v10381_v39  ;;  %v10466_v38 = vld [vmem:[%s11020_s10 + $0x182c] ss:$16 sps:$4 sm:$0xff]   ;;  %v467_v39 = vpack.c.bf16 %v391_v34, %v391_v34  ;;  %v10539_v34 = vld [vmem:[%s11020_s10 + $0x19c0] ss:$16 sps:$4 sm:$0xff]  }
 0x300   : > { %7076 = vmatpush1.bf16.msra.mxu0 %v10376_v28  ;;  %7732 = vmatpush1.bf16.msra.mxu1 %v10379_v41  ;;  %v10464_v28 = vld [vmem:[%s11020_s10 + $0x1828] ss:$16 sps:$4 sm:$0xff]   ;;  %v10469_v41 = vld [vmem:[%s11020_s10 + $0x1844] ss:$16 sps:$4 sm:$0xff]  }
 0x301   : > { %7077 = vmatprep.subr.bf16.mxu0 %v10384_v44  ;;  %7733 = vmatprep.subr.bf16.mxu1 %v10387_v45  ;;  %v10472_v44 = vld [vmem:[%s11020_s10 + $0x184c] ss:$16 sps:$4 sm:$0xff]   ;;  %v10467_v45 = vld [vmem:[%s11020_s10 + $0x1840] ss:$16 sps:$4 sm:$0xff]  }
 0x304   : > { %7078 = vmatpush1.bf16.msra.mxu0 %v10382_v25  ;;  %7734 = vmatpush1.bf16.msra.mxu1 %v10385_v46  ;;  %v10470_v25 = vld [vmem:[%s11020_s10 + $0x1848] ss:$16 sps:$4 sm:$0xff]   ;;  %v10475_v46 = vld [vmem:[%s11020_s10 + $0x1864] ss:$16 sps:$4 sm:$0xff]  }
 0x305   : > { %7079 = vmatprep.subr.bf16.mxu0 %v10390_v48  ;;  %7735 = vmatprep.subr.bf16.mxu1 %v10393_v50  ;;  %v10478_v48 = vld [vmem:[%s11020_s10 + $0x186c] ss:$16 sps:$4 sm:$0xff]   ;;  %v10473_v50 = vld [vmem:[%s11020_s10 + $0x1860] ss:$16 sps:$4 sm:$0xff]  }
 0x308   : > { %7080 = vmatpush1.bf16.msra.mxu0 %v10388_v51  ;;  %7736 = vmatpush1.bf16.msra.mxu1 %v10391_v32  ;;  %v10476_v51 = vld [vmem:[%s11020_s10 + $0x1868] ss:$16 sps:$4 sm:$0xff]   ;;  %v10481_v32 = vld [vmem:[%s11020_s10 + $0x1884] ss:$16 sps:$4 sm:$0xff]  }
 0x309   : > { %7081 = vmatprep.subr.bf16.mxu0 %v10396_v52  ;;  %7737 = vmatprep.subr.bf16.mxu1 %v10399_v53  ;;  %v10484_v52 = vld [vmem:[%s11020_s10 + $0x188c] ss:$16 sps:$4 sm:$0xff]   ;;  %v10479_v53 = vld [vmem:[%s11020_s10 + $0x1880] ss:$16 sps:$4 sm:$0xff]  }
 0x30c   : > { %7082 = vmatpush1.bf16.msra.mxu0 %v10394_v54  ;;  %7738 = vmatpush1.bf16.msra.mxu1 %v10397_v55  ;;  %v10482_v54 = vld [vmem:[%s11020_s10 + $0x1888] ss:$16 sps:$4 sm:$0xff]   ;;  %v10487_v55 = vld [vmem:[%s11020_s10 + $0x18a4] ss:$16 sps:$4 sm:$0xff]  }
 0x30d   : > { %7083 = vmatprep.subr.bf16.mxu0 %v10402_v42  ;;  %7739 = vmatprep.subr.bf16.mxu1 %v10405_v57  ;;  %v10490_v42 = vld [vmem:[%s11020_s10 + $0x18ac] ss:$16 sps:$4 sm:$0xff]   ;;  %v10485_v57 = vld [vmem:[%s11020_s10 + $0x18a0] ss:$16 sps:$4 sm:$0xff]  }
 0x310   : > { %7084 = vmatpush1.bf16.msra.mxu0 %v10400_v40  ;;  %7740 = vmatpush1.bf16.msra.mxu1 %v10403_v59  ;;  %v10488_v40 = vld [vmem:[%s11020_s10 + $0x18a8] ss:$16 sps:$4 sm:$0xff]   ;;  %v10493_v59 = vld [vmem:[%s11020_s10 + $0x18c4] ss:$16 sps:$4 sm:$0xff]  }
 0x311   : > { %7085 = vmatprep.subr.bf16.mxu0 %v10408_v60  ;;  %7741 = vmatprep.subr.bf16.mxu1 %v10411_v61  ;;  %v10496_v60 = vld [vmem:[%s11020_s10 + $0x18cc] ss:$16 sps:$4 sm:$0xff]   ;;  %v10491_v61 = vld [vmem:[%s11020_s10 + $0x18c0] ss:$16 sps:$4 sm:$0xff]  }
 0x314   : > { %7086 = vmatpush1.bf16.msra.mxu0 %v10406_v63  ;;  %7742 = vmatpush1.bf16.msra.mxu1 %v10409_v0  ;;  %v10494_v63 = vld [vmem:[%s11020_s10 + $0x18c8] ss:$16 sps:$4 sm:$0xff]   ;;  %v10499_v0 = vld [vmem:[%s11020_s10 + $0x18e4] ss:$16 sps:$4 sm:$0xff]  }
 0x315   : > { %7087 = vmatprep.subr.bf16.mxu0 %v10414_v1  ;;  %7743 = vmatprep.subr.bf16.mxu1 %v10417_v47  ;;  %v10502_v1 = vld [vmem:[%s11020_s10 + $0x18ec] ss:$16 sps:$4 sm:$0xff]   ;;  %v10497_v47 = vld [vmem:[%s11020_s10 + $0x18e0] ss:$16 sps:$4 sm:$0xff]  }
 0x318   : > { %7088 = vmatpush1.bf16.msra.mxu0 %v10412_v2  ;;  %7744 = vmatpush1.bf16.msra.mxu1 %v10415_v3  ;;  %v10500_v2 = vld [vmem:[%s11020_s10 + $0x18e8] ss:$16 sps:$4 sm:$0xff]   ;;  %v10505_v3 = vld [vmem:[%s11020_s10 + $0x1904] ss:$16 sps:$4 sm:$0xff]  }
 0x319   : > { %7089 = vmatprep.subr.bf16.mxu0 %v10420_v4  ;;  %7745 = vmatprep.subr.bf16.mxu1 %v10423_v5  ;;  %v10508_v4 = vld [vmem:[%s11020_s10 + $0x190c] ss:$16 sps:$4 sm:$0xff]   ;;  %v10503_v5 = vld [vmem:[%s11020_s10 + $0x1900] ss:$16 sps:$4 sm:$0xff]  }
 0x31c   : > { %7090 = vmatpush1.bf16.msra.mxu0 %v10418_v58  ;;  %7746 = vmatpush1.bf16.msra.mxu1 %v10421_v7  ;;  %v10506_v58 = vld [vmem:[%s11020_s10 + $0x1908] ss:$16 sps:$4 sm:$0xff]   ;;  %v10511_v7 = vld [vmem:[%s11020_s10 + $0x1924] ss:$16 sps:$4 sm:$0xff]  }
 0x31d   : > { %7091 = vmatprep.subr.bf16.mxu0 %v10426_v56  ;;  %7747 = vmatprep.subr.bf16.mxu1 %v10429_v10  ;;  %v10514_v56 = vld [vmem:[%s11020_s10 + $0x192c] ss:$16 sps:$4 sm:$0xff]   ;;  %v10509_v10 = vld [vmem:[%s11020_s10 + $0x1920] ss:$16 sps:$4 sm:$0xff]  }
 0x320   : > { %7092 = vmatpush1.bf16.msra.mxu0 %v10424_v11  ;;  %7748 = vmatpush1.bf16.msra.mxu1 %v10427_v12  ;;  %v10512_v11 = vld [vmem:[%s11020_s10 + $0x1928] ss:$16 sps:$4 sm:$0xff]   ;;  %v10517_v12 = vld [vmem:[%s11020_s10 + $0x1944] ss:$16 sps:$4 sm:$0xff]  }
 0x321   : > { %7093 = vmatprep.subr.bf16.mxu0 %v10432_v14  ;;  %7749 = vmatprep.subr.bf16.mxu1 %v10435_v15  ;;  %v10520_v14 = vld [vmem:[%s11020_s10 + $0x194c] ss:$16 sps:$4 sm:$0xff]   ;;  %v10515_v15 = vld [vmem:[%s11020_s10 + $0x1940] ss:$16 sps:$4 sm:$0xff]  }
 0x324   : > { %7094 = vmatpush1.bf16.msra.mxu0 %v10430_v16  ;;  %7750 = vmatpush1.bf16.msra.mxu1 %v10433_v62  ;;  %v10518_v16 = vld [vmem:[%s11020_s10 + $0x1948] ss:$16 sps:$4 sm:$0xff]   ;;  %v10523_v62 = vld [vmem:[%s11020_s10 + $0x1964] ss:$16 sps:$4 sm:$0xff]  }
 0x325   : > { %7095 = vmatprep.subr.bf16.mxu0 %v10438_v17  ;;  %7751 = vmatprep.subr.bf16.mxu1 %v10441_v18  ;;  %v10526_v17 = vld [vmem:[%s11020_s10 + $0x196c] ss:$16 sps:$4 sm:$0xff]   ;;  %v10521_v18 = vld [vmem:[%s11020_s10 + $0x1960] ss:$16 sps:$4 sm:$0xff]  }
 0x328   : > { %7096 = vmatpush1.bf16.msra.mxu0 %v10436_v19  ;;  %7752 = vmatpush1.bf16.msra.mxu1 %v10439_v20  ;;  %v10524_v19 = vld [vmem:[%s11020_s10 + $0x1968] ss:$16 sps:$4 sm:$0xff]   ;;  %v10529_v20 = vld [vmem:[%s11020_s10 + $0x1984] ss:$16 sps:$4 sm:$0xff]  }
 0x329   : > { %7097 = vmatprep.subr.bf16.mxu0 %v10444_v8  ;;  %7753 = vmatprep.subr.bf16.mxu1 %v10447_v22  ;;  %v10532_v8 = vld [vmem:[%s11020_s10 + $0x198c] ss:$16 sps:$4 sm:$0xff]   ;;  %v10527_v22 = vld [vmem:[%s11020_s10 + $0x1980] ss:$16 sps:$4 sm:$0xff]  }
 0x32c   : > { %7098 = vmatpush1.bf16.msra.mxu0 %v10442_v6  ;;  %7754 = vmatpush1.bf16.msra.mxu1 %v10445_v23  ;;  %v10530_v6 = vld [vmem:[%s11020_s10 + $0x1988] ss:$16 sps:$4 sm:$0xff]   ;;  %v10535_v23 = vld [vmem:[%s11020_s10 + $0x19a4] ss:$16 sps:$4 sm:$0xff]  }
 0x32d   : > { %7099 = vmatprep.subr.bf16.mxu0 %v10450_v9  ;;  %7755 = vmatprep.subr.bf16.mxu1 %v10453_v27  ;;  %v10538_v9 = vld [vmem:[%s11020_s10 + $0x19ac] ss:$16 sps:$4 sm:$0xff]   ;;  %v10533_v27 = vld [vmem:[%s11020_s10 + $0x19a0] ss:$16 sps:$4 sm:$0xff]  }
 0x330   : > { %7100 = vmatpush1.bf16.msra.mxu0 %v10448_v30  ;;  %7756 = vmatpush1.bf16.msra.mxu1 %v10451_v31  ;;  %v10536_v30 = vld [vmem:[%s11020_s10 + $0x19a8] ss:$16 sps:$4 sm:$0xff]   ;;  %v10541_v31 = vld [vmem:[%s11020_s10 + $0x19c4] ss:$16 sps:$4 sm:$0xff]  }
 0x331   : > { %7110 = vmatprep.subr.bf16.mxu0 %v10457_v33  ;;  %7766 = vmatprep.subr.bf16.mxu1 %v10460_v13  ;;  %v10544_v33 = vld [vmem:[%s11020_s10 + $0x19cc] ss:$16 sps:$4 sm:$0xff]   ;;  %v376_v13 = vcombine.high %v11915_v24, %v11915_v24  ;;  %v10545_v24 = vld [vmem:[%s11020_s10 + $0x19e0] ss:$16 sps:$4 sm:$0xff]  }
 0x333   : > { %7102 = vmatmul.mubr.bf16.vlgmr.msra.gmra.mrb[0].mxu0 %v464_v35  ;;  %7758 = vmatmul.mubr.bf16.vlgmr.msra.gmra.mrb[0].mxu1 %v464_v35  ;;  %v10542_v35 = vld [vmem:[%s11020_s10 + $0x19c8] ss:$16 sps:$4 sm:$0xff]  }
 0x334   : > { %7111 = vmatpush1.bf16.msra.mxu0 %v10455_v26  ;;  %7767 = vmatpush1.bf16.msra.mxu1 %v10458_v36  ;;  %v10547_v26 = vld [vmem:[%s11020_s10 + $0x19e4] ss:$16 sps:$4 sm:$0xff]   ;;  %v10550_v36 = vld [vmem:[%s11020_s10 + $0x19ec] ss:$16 sps:$4 sm:$0xff]  }
 0x335   : > { %7112 = vmatprep.subr.bf16.mxu0 %v10463_v37  ;;  %7768 = vmatprep.subr.bf16.mxu1 %v10466_v38  ;;  %v11996_v37 = vrot.slane %v376_v13, %v11073_v49  ;;  %v10548_v38 = vld [vmem:[%s11020_s10 + $0x19e8] ss:$16 sps:$4 sm:$0xff]  }
 0x336   : > { %7142 = vmatprep.mubr.bf16.mxu0 %v467_v39  ;;  %7798 = vmatprep.mubr.bf16.mxu1 %v467_v39  ;;  %v10553_v39 = vld [vmem:[%s11020_s10 + $0x1a04] ss:$16 sps:$4 sm:$0xff]   ;;  %v10626_v13 = vld [vmem:[%s11020_s10 + $0x1b88] ss:$16 sps:$4 sm:$0xff]  }
 0x338   : > { %7113 = vmatpush1.bf16.msra.mxu0 %v10461_v21  ;;  %7769 = vmatpush1.bf16.msra.mxu1 %v10464_v28  ;;  %v10556_v21 = vld [vmem:[%s11020_s10 + $0x1a0c] ss:$16 sps:$4 sm:$0xff]   ;;  %v392_v28 = vcombine.high %v11996_v37, %v11996_v37 }
 0x339   : > { %7114 = vmatprep.subr.bf16.mxu0 %v10469_v41  ;;  %7770 = vmatprep.subr.bf16.mxu1 %v10472_v44  ;;  %v466_v41 = vpack.c.bf16 %v11923_v29, %v11923_v29  ;;  %v10551_v44 = vld [vmem:[%s11020_s10 + $0x1a00] ss:$16 sps:$4 sm:$0xff]  }
 0x33a   : > { %v10557_v29 = vld [vmem:[%s11020_s10 + $0x1a20] ss:$16 sps:$4 sm:$0xff]  }
 0x33c   : > { %7115 = vmatpush1.bf16.msra.mxu0 %v10467_v45  ;;  %7771 = vmatpush1.bf16.msra.mxu1 %v10470_v25  ;;  %v10554_v45 = vld [vmem:[%s11020_s10 + $0x1a08] ss:$16 sps:$4 sm:$0xff]   ;;  %v10559_v25 = vld [vmem:[%s11020_s10 + $0x1a24] ss:$16 sps:$4 sm:$0xff]  }
 0x33d   : > { %7116 = vmatprep.subr.bf16.mxu0 %v10475_v46  ;;  %7772 = vmatprep.subr.bf16.mxu1 %v10478_v48  ;;  %v10562_v46 = vld [vmem:[%s11020_s10 + $0x1a2c] ss:$16 sps:$4 sm:$0xff]   ;;  %v469_v48 = vpack.c.bf16 %v392_v28, %v392_v28  ;;  %v10638_v28 = vld [vmem:[%s11020_s10 + $0x1bc8] ss:$16 sps:$4 sm:$0xff]  }
 0x340   : > { %7117 = vmatpush1.bf16.msra.mxu0 %v10473_v50  ;;  %7773 = vmatpush1.bf16.msra.mxu1 %v10476_v51  ;;  %v10560_v50 = vld [vmem:[%s11020_s10 + $0x1a28] ss:$16 sps:$4 sm:$0xff]   ;;  %v10565_v51 = vld [vmem:[%s11020_s10 + $0x1a44] ss:$16 sps:$4 sm:$0xff]  }
 0x341   : > { %7118 = vmatprep.subr.bf16.mxu0 %v10481_v32  ;;  %7774 = vmatprep.subr.bf16.mxu1 %v10484_v52  ;;  %v10568_v32 = vld [vmem:[%s11020_s10 + $0x1a4c] ss:$16 sps:$4 sm:$0xff]   ;;  %v10563_v52 = vld [vmem:[%s11020_s10 + $0x1a40] ss:$16 sps:$4 sm:$0xff]  }
 0x344   : > { %7119 = vmatpush1.bf16.msra.mxu0 %v10479_v53  ;;  %7775 = vmatpush1.bf16.msra.mxu1 %v10482_v54  ;;  %v10566_v53 = vld [vmem:[%s11020_s10 + $0x1a48] ss:$16 sps:$4 sm:$0xff]   ;;  %v10571_v54 = vld [vmem:[%s11020_s10 + $0x1a64] ss:$16 sps:$4 sm:$0xff]  }
 0x345   : > { %7120 = vmatprep.subr.bf16.mxu0 %v10487_v55  ;;  %7776 = vmatprep.subr.bf16.mxu1 %v10490_v42  ;;  %v10574_v55 = vld [vmem:[%s11020_s10 + $0x1a6c] ss:$16 sps:$4 sm:$0xff]   ;;  %v10569_v42 = vld [vmem:[%s11020_s10 + $0x1a60] ss:$16 sps:$4 sm:$0xff]  }
 0x348   : > { %7121 = vmatpush1.bf16.msra.mxu0 %v10485_v57  ;;  %7777 = vmatpush1.bf16.msra.mxu1 %v10488_v40  ;;  %v10572_v57 = vld [vmem:[%s11020_s10 + $0x1a68] ss:$16 sps:$4 sm:$0xff]   ;;  %v10577_v40 = vld [vmem:[%s11020_s10 + $0x1a84] ss:$16 sps:$4 sm:$0xff]  }
 0x349   : > { %7122 = vmatprep.subr.bf16.mxu0 %v10493_v59  ;;  %7778 = vmatprep.subr.bf16.mxu1 %v10496_v60  ;;  %v10580_v59 = vld [vmem:[%s11020_s10 + $0x1a8c] ss:$16 sps:$4 sm:$0xff]   ;;  %v10575_v60 = vld [vmem:[%s11020_s10 + $0x1a80] ss:$16 sps:$4 sm:$0xff]  }
 0x34c   : > { %7123 = vmatpush1.bf16.msra.mxu0 %v10491_v61  ;;  %7779 = vmatpush1.bf16.msra.mxu1 %v10494_v63  ;;  %v10578_v61 = vld [vmem:[%s11020_s10 + $0x1a88] ss:$16 sps:$4 sm:$0xff]   ;;  %v10583_v63 = vld [vmem:[%s11020_s10 + $0x1aa4] ss:$16 sps:$4 sm:$0xff]  }
 0x34d   : > { %7124 = vmatprep.subr.bf16.mxu0 %v10499_v0  ;;  %7780 = vmatprep.subr.bf16.mxu1 %v10502_v1  ;;  %v10586_v0 = vld [vmem:[%s11020_s10 + $0x1aac] ss:$16 sps:$4 sm:$0xff]   ;;  %v10581_v1 = vld [vmem:[%s11020_s10 + $0x1aa0] ss:$16 sps:$4 sm:$0xff]  }
 0x350   : > { %7125 = vmatpush1.bf16.msra.mxu0 %v10497_v47  ;;  %7781 = vmatpush1.bf16.msra.mxu1 %v10500_v2  ;;  %v10584_v47 = vld [vmem:[%s11020_s10 + $0x1aa8] ss:$16 sps:$4 sm:$0xff]   ;;  %v10589_v2 = vld [vmem:[%s11020_s10 + $0x1ac4] ss:$16 sps:$4 sm:$0xff]  }
 0x351   : > { %7126 = vmatprep.subr.bf16.mxu0 %v10505_v3  ;;  %7782 = vmatprep.subr.bf16.mxu1 %v10508_v4  ;;  %v10592_v3 = vld [vmem:[%s11020_s10 + $0x1acc] ss:$16 sps:$4 sm:$0xff]   ;;  %v10587_v4 = vld [vmem:[%s11020_s10 + $0x1ac0] ss:$16 sps:$4 sm:$0xff]  }
 0x354   : > { %7127 = vmatpush1.bf16.msra.mxu0 %v10503_v5  ;;  %7783 = vmatpush1.bf16.msra.mxu1 %v10506_v58  ;;  %v10590_v5 = vld [vmem:[%s11020_s10 + $0x1ac8] ss:$16 sps:$4 sm:$0xff]   ;;  %v10595_v58 = vld [vmem:[%s11020_s10 + $0x1ae4] ss:$16 sps:$4 sm:$0xff]  }
 0x355   : > { %7128 = vmatprep.subr.bf16.mxu0 %v10511_v7  ;;  %7784 = vmatprep.subr.bf16.mxu1 %v10514_v56  ;;  %v10598_v7 = vld [vmem:[%s11020_s10 + $0x1aec] ss:$16 sps:$4 sm:$0xff]   ;;  %v10593_v56 = vld [vmem:[%s11020_s10 + $0x1ae0] ss:$16 sps:$4 sm:$0xff]  }
 0x358   : > { %7129 = vmatpush1.bf16.msra.mxu0 %v10509_v10  ;;  %7785 = vmatpush1.bf16.msra.mxu1 %v10512_v11  ;;  %v10596_v10 = vld [vmem:[%s11020_s10 + $0x1ae8] ss:$16 sps:$4 sm:$0xff]   ;;  %v10601_v11 = vld [vmem:[%s11020_s10 + $0x1b04] ss:$16 sps:$4 sm:$0xff]  }
 0x359   : > { %7130 = vmatprep.subr.bf16.mxu0 %v10517_v12  ;;  %7786 = vmatprep.subr.bf16.mxu1 %v10520_v14  ;;  %v10604_v12 = vld [vmem:[%s11020_s10 + $0x1b0c] ss:$16 sps:$4 sm:$0xff]   ;;  %v10599_v14 = vld [vmem:[%s11020_s10 + $0x1b00] ss:$16 sps:$4 sm:$0xff]  }
 0x35c   : > { %7131 = vmatpush1.bf16.msra.mxu0 %v10515_v15  ;;  %7787 = vmatpush1.bf16.msra.mxu1 %v10518_v16  ;;  %v10602_v15 = vld [vmem:[%s11020_s10 + $0x1b08] ss:$16 sps:$4 sm:$0xff]   ;;  %v10607_v16 = vld [vmem:[%s11020_s10 + $0x1b24] ss:$16 sps:$4 sm:$0xff]  }
 0x35d   : > { %7132 = vmatprep.subr.bf16.mxu0 %v10523_v62  ;;  %7788 = vmatprep.subr.bf16.mxu1 %v10526_v17  ;;  %v10610_v62 = vld [vmem:[%s11020_s10 + $0x1b2c] ss:$16 sps:$4 sm:$0xff]   ;;  %v10605_v17 = vld [vmem:[%s11020_s10 + $0x1b20] ss:$16 sps:$4 sm:$0xff]  }
 0x360   : > { %7133 = vmatpush1.bf16.msra.mxu0 %v10521_v18  ;;  %7789 = vmatpush1.bf16.msra.mxu1 %v10524_v19  ;;  %v10608_v18 = vld [vmem:[%s11020_s10 + $0x1b28] ss:$16 sps:$4 sm:$0xff]   ;;  %v10613_v19 = vld [vmem:[%s11020_s10 + $0x1b44] ss:$16 sps:$4 sm:$0xff]  }
 0x361   : > { %7134 = vmatprep.subr.bf16.mxu0 %v10529_v20  ;;  %7790 = vmatprep.subr.bf16.mxu1 %v10532_v8  ;;  %v10616_v20 = vld [vmem:[%s11020_s10 + $0x1b4c] ss:$16 sps:$4 sm:$0xff]   ;;  %v10611_v8 = vld [vmem:[%s11020_s10 + $0x1b40] ss:$16 sps:$4 sm:$0xff]  }
 0x364   : > { %7135 = vmatpush1.bf16.msra.mxu0 %v10527_v22  ;;  %7791 = vmatpush1.bf16.msra.mxu1 %v10530_v6  ;;  %v10614_v22 = vld [vmem:[%s11020_s10 + $0x1b48] ss:$16 sps:$4 sm:$0xff]   ;;  %v10619_v6 = vld [vmem:[%s11020_s10 + $0x1b64] ss:$16 sps:$4 sm:$0xff]  }
 0x365   : > { %7136 = vmatprep.subr.bf16.mxu0 %v10535_v23  ;;  %7792 = vmatprep.subr.bf16.mxu1 %v10538_v9  ;;  %v10622_v23 = vld [vmem:[%s11020_s10 + $0x1b6c] ss:$16 sps:$4 sm:$0xff]   ;;  %v10617_v9 = vld [vmem:[%s11020_s10 + $0x1b60] ss:$16 sps:$4 sm:$0xff]  }
 0x368   : > { %7137 = vmatpush1.bf16.msra.mxu0 %v10533_v27  ;;  %7793 = vmatpush1.bf16.msra.mxu1 %v10536_v30  ;;  %v10620_v27 = vld [vmem:[%s11020_s10 + $0x1b68] ss:$16 sps:$4 sm:$0xff]   ;;  %v10625_v30 = vld [vmem:[%s11020_s10 + $0x1b84] ss:$16 sps:$4 sm:$0xff]  }
 0x369   : > { %7138 = vmatprep.subr.bf16.mxu0 %v10541_v31  ;;  %7794 = vmatprep.subr.bf16.mxu1 %v10544_v33  ;;  %v10628_v31 = vld [vmem:[%s11020_s10 + $0x1b8c] ss:$16 sps:$4 sm:$0xff]   ;;  %v10623_v33 = vld [vmem:[%s11020_s10 + $0x1b80] ss:$16 sps:$4 sm:$0xff]  }
 0x36c   : > { %7139 = vmatpush1.bf16.msra.mxu0 %v10539_v34  ;;  %7795 = vmatpush1.bf16.msra.mxu1 %v10542_v35  ;;  %v10631_v34 = vld [vmem:[%s11020_s10 + $0x1ba4] ss:$16 sps:$4 sm:$0xff]   ;;  %v10634_v35 = vld [vmem:[%s11020_s10 + $0x1bac] ss:$16 sps:$4 sm:$0xff]  }
 0x36d   : > { %7140 = vmatprep.subr.bf16.mxu0 %v10547_v26  ;;  %7796 = vmatprep.subr.bf16.mxu1 %v10550_v36  ;;  %v10629_v26 = vld [vmem:[%s11020_s10 + $0x1ba0] ss:$16 sps:$4 sm:$0xff]   ;;  %v10632_v36 = vld [vmem:[%s11020_s10 + $0x1ba8] ss:$16 sps:$4 sm:$0xff]  }
 0x370   : > { %7141 = vmatpush1.bf16.msra.mxu0 %v10545_v24  ;;  %7797 = vmatpush1.bf16.msra.mxu1 %v10548_v38  ;;  %v10637_v24 = vld [vmem:[%s11020_s10 + $0x1bc4] ss:$16 sps:$4 sm:$0xff]   ;;  %v10640_v38 = vld [vmem:[%s11020_s10 + $0x1bcc] ss:$16 sps:$4 sm:$0xff]  }
 0x371   : > { %7151 = vmatprep.subr.bf16.mxu0 %v10553_v39  ;;  %7807 = vmatprep.subr.bf16.mxu1 %v10556_v21  ;;  %v12065_v39 = vld [vmem:[%s12255_s0 + $0x38] sm:$0xff]  ;;  %v10635_v21 = vld [vmem:[%s11020_s10 + $0x1bc0] ss:$16 sps:$4 sm:$0xff]  }
 0x373   : > { %7143 = vmatmul.mubr.bf16.vlgmr.msra.gmra.mrb[0].mxu0 %v466_v41  ;;  %7799 = vmatmul.mubr.bf16.vlgmr.msra.gmra.mrb[0].mxu1 %v466_v41  ;;  %v10643_v41 = vld [vmem:[%s11020_s10 + $0x1be4] ss:$16 sps:$4 sm:$0xff]  }
 0x374   : > { %7152 = vmatpush1.bf16.msra.mxu0 %v10551_v44  ;;  %7808 = vmatpush1.bf16.msra.mxu1 %v10554_v45  ;;  %v10646_v44 = vld [vmem:[%s11020_s10 + $0x1bec] ss:$16 sps:$4 sm:$0xff]   ;;  %v12073_v45 = vrot.slane %v12065_v39, %v11073_v49 }
 0x375   : > { %7153 = vmatprep.subr.bf16.mxu0 %v10559_v25  ;;  %7809 = vmatprep.subr.bf16.mxu1 %v10562_v46  ;;  %v10641_v25 = vld [vmem:[%s11020_s10 + $0x1be0] ss:$16 sps:$4 sm:$0xff]   ;;  %v10644_v46 = vld [vmem:[%s11020_s10 + $0x1be8] ss:$16 sps:$4 sm:$0xff]  }
 0x376   : > { %7183 = vmatprep.mubr.bf16.mxu0 %v469_v48  ;;  %7839 = vmatprep.mubr.bf16.mxu1 %v469_v48  ;;  %v10650_v48 = vld [vmem:[%s11020_s10 + $0x1c04] ss:$16 sps:$4 sm:$0xff]  }
 0x378   : > { %7154 = vmatpush1.bf16.msra.mxu0 %v10557_v29  ;;  %7810 = vmatpush1.bf16.msra.mxu1 %v10560_v50  ;;  %v10653_v29 = vld [vmem:[%s11020_s10 + $0x1c0c] ss:$16 sps:$4 sm:$0xff]   ;;  %v408_v50 = vcombine.high %v12073_v45, %v12073_v45 }
 0x379   : > { %7155 = vmatprep.subr.bf16.mxu0 %v10565_v51  ;;  %7811 = vmatprep.subr.bf16.mxu1 %v10568_v32  ;;  %v468_v51 = vpack.c.bf16 %v11996_v37, %v11996_v37  ;;  %v10648_v32 = vld [vmem:[%s11020_s10 + $0x1c00] ss:$16 sps:$4 sm:$0xff]  }
 0x37a   : > { %v10654_v37 = vld [vmem:[%s11020_s10 + $0x1c20] ss:$16 sps:$4 sm:$0xff]  }
 0x37c   : > { %7156 = vmatpush1.bf16.msra.mxu0 %v10563_v52  ;;  %7812 = vmatpush1.bf16.msra.mxu1 %v10566_v53  ;;  %v10651_v52 = vld [vmem:[%s11020_s10 + $0x1c08] ss:$16 sps:$4 sm:$0xff]   ;;  %v10656_v53 = vld [vmem:[%s11020_s10 + $0x1c24] ss:$16 sps:$4 sm:$0xff]  }
 0x37d   : > { %7157 = vmatprep.subr.bf16.mxu0 %v10571_v54  ;;  %7813 = vmatprep.subr.bf16.mxu1 %v10574_v55  ;;  %v10659_v54 = vld [vmem:[%s11020_s10 + $0x1c2c] ss:$16 sps:$4 sm:$0xff]   ;;  %v471_v55 = vpack.c.bf16 %v408_v50, %v408_v50  ;;  %v10732_v50 = vld [vmem:[%s11020_s10 + $0x1dc0] ss:$16 sps:$4 sm:$0xff]  }
 0x380   : > { %7158 = vmatpush1.bf16.msra.mxu0 %v10569_v42  ;;  %7814 = vmatpush1.bf16.msra.mxu1 %v10572_v57  ;;  %v10657_v42 = vld [vmem:[%s11020_s10 + $0x1c28] ss:$16 sps:$4 sm:$0xff]   ;;  %v10662_v57 = vld [vmem:[%s11020_s10 + $0x1c44] ss:$16 sps:$4 sm:$0xff]  }
 0x381   : > { %7159 = vmatprep.subr.bf16.mxu0 %v10577_v40  ;;  %7815 = vmatprep.subr.bf16.mxu1 %v10580_v59  ;;  %v10665_v40 = vld [vmem:[%s11020_s10 + $0x1c4c] ss:$16 sps:$4 sm:$0xff]   ;;  %v10660_v59 = vld [vmem:[%s11020_s10 + $0x1c40] ss:$16 sps:$4 sm:$0xff]  }
 0x384   : > { %7160 = vmatpush1.bf16.msra.mxu0 %v10575_v60  ;;  %7816 = vmatpush1.bf16.msra.mxu1 %v10578_v61  ;;  %v10663_v60 = vld [vmem:[%s11020_s10 + $0x1c48] ss:$16 sps:$4 sm:$0xff]   ;;  %v10668_v61 = vld [vmem:[%s11020_s10 + $0x1c64] ss:$16 sps:$4 sm:$0xff]  }
 0x385   : > { %7161 = vmatprep.subr.bf16.mxu0 %v10583_v63  ;;  %7817 = vmatprep.subr.bf16.mxu1 %v10586_v0  ;;  %v10671_v63 = vld [vmem:[%s11020_s10 + $0x1c6c] ss:$16 sps:$4 sm:$0xff]   ;;  %v10666_v0 = vld [vmem:[%s11020_s10 + $0x1c60] ss:$16 sps:$4 sm:$0xff]  }
 0x388   : > { %7162 = vmatpush1.bf16.msra.mxu0 %v10581_v1  ;;  %7818 = vmatpush1.bf16.msra.mxu1 %v10584_v47  ;;  %v10669_v1 = vld [vmem:[%s11020_s10 + $0x1c68] ss:$16 sps:$4 sm:$0xff]   ;;  %v10674_v47 = vld [vmem:[%s11020_s10 + $0x1c84] ss:$16 sps:$4 sm:$0xff]  }
 0x389   : > { %7163 = vmatprep.subr.bf16.mxu0 %v10589_v2  ;;  %7819 = vmatprep.subr.bf16.mxu1 %v10592_v3  ;;  %v10677_v2 = vld [vmem:[%s11020_s10 + $0x1c8c] ss:$16 sps:$4 sm:$0xff]   ;;  %v10672_v3 = vld [vmem:[%s11020_s10 + $0x1c80] ss:$16 sps:$4 sm:$0xff]  }
 0x38c   : > { %7164 = vmatpush1.bf16.msra.mxu0 %v10587_v4  ;;  %7820 = vmatpush1.bf16.msra.mxu1 %v10590_v5  ;;  %v10675_v4 = vld [vmem:[%s11020_s10 + $0x1c88] ss:$16 sps:$4 sm:$0xff]   ;;  %v10680_v5 = vld [vmem:[%s11020_s10 + $0x1ca4] ss:$16 sps:$4 sm:$0xff]  }
 0x38d   : > { %7165 = vmatprep.subr.bf16.mxu0 %v10595_v58  ;;  %7821 = vmatprep.subr.bf16.mxu1 %v10598_v7  ;;  %v10683_v58 = vld [vmem:[%s11020_s10 + $0x1cac] ss:$16 sps:$4 sm:$0xff]   ;;  %v10678_v7 = vld [vmem:[%s11020_s10 + $0x1ca0] ss:$16 sps:$4 sm:$0xff]  }
 0x390   : > { %7166 = vmatpush1.bf16.msra.mxu0 %v10593_v56  ;;  %7822 = vmatpush1.bf16.msra.mxu1 %v10596_v10  ;;  %v10681_v56 = vld [vmem:[%s11020_s10 + $0x1ca8] ss:$16 sps:$4 sm:$0xff]   ;;  %v10686_v10 = vld [vmem:[%s11020_s10 + $0x1cc4] ss:$16 sps:$4 sm:$0xff]  }
 0x391   : > { %7167 = vmatprep.subr.bf16.mxu0 %v10601_v11  ;;  %7823 = vmatprep.subr.bf16.mxu1 %v10604_v12  ;;  %v10689_v11 = vld [vmem:[%s11020_s10 + $0x1ccc] ss:$16 sps:$4 sm:$0xff]   ;;  %v10684_v12 = vld [vmem:[%s11020_s10 + $0x1cc0] ss:$16 sps:$4 sm:$0xff]  }
 0x394   : > { %7168 = vmatpush1.bf16.msra.mxu0 %v10599_v14  ;;  %7824 = vmatpush1.bf16.msra.mxu1 %v10602_v15  ;;  %v10687_v14 = vld [vmem:[%s11020_s10 + $0x1cc8] ss:$16 sps:$4 sm:$0xff]   ;;  %v10692_v15 = vld [vmem:[%s11020_s10 + $0x1ce4] ss:$16 sps:$4 sm:$0xff]  }
 0x395   : > { %7169 = vmatprep.subr.bf16.mxu0 %v10607_v16  ;;  %7825 = vmatprep.subr.bf16.mxu1 %v10610_v62  ;;  %v10695_v16 = vld [vmem:[%s11020_s10 + $0x1cec] ss:$16 sps:$4 sm:$0xff]   ;;  %v10690_v62 = vld [vmem:[%s11020_s10 + $0x1ce0] ss:$16 sps:$4 sm:$0xff]  }
 0x398   : > { %7170 = vmatpush1.bf16.msra.mxu0 %v10605_v17  ;;  %7826 = vmatpush1.bf16.msra.mxu1 %v10608_v18  ;;  %v10693_v17 = vld [vmem:[%s11020_s10 + $0x1ce8] ss:$16 sps:$4 sm:$0xff]   ;;  %v10698_v18 = vld [vmem:[%s11020_s10 + $0x1d04] ss:$16 sps:$4 sm:$0xff]  }
 0x399   : > { %7171 = vmatprep.subr.bf16.mxu0 %v10613_v19  ;;  %7827 = vmatprep.subr.bf16.mxu1 %v10616_v20  ;;  %v10701_v19 = vld [vmem:[%s11020_s10 + $0x1d0c] ss:$16 sps:$4 sm:$0xff]   ;;  %v10696_v20 = vld [vmem:[%s11020_s10 + $0x1d00] ss:$16 sps:$4 sm:$0xff]  }
 0x39c   : > { %7172 = vmatpush1.bf16.msra.mxu0 %v10611_v8  ;;  %7828 = vmatpush1.bf16.msra.mxu1 %v10614_v22  ;;  %v10699_v8 = vld [vmem:[%s11020_s10 + $0x1d08] ss:$16 sps:$4 sm:$0xff]   ;;  %v10704_v22 = vld [vmem:[%s11020_s10 + $0x1d24] ss:$16 sps:$4 sm:$0xff]  }
 0x39d   : > { %7173 = vmatprep.subr.bf16.mxu0 %v10619_v6  ;;  %7829 = vmatprep.subr.bf16.mxu1 %v10622_v23  ;;  %v10707_v6 = vld [vmem:[%s11020_s10 + $0x1d2c] ss:$16 sps:$4 sm:$0xff]   ;;  %v10702_v23 = vld [vmem:[%s11020_s10 + $0x1d20] ss:$16 sps:$4 sm:$0xff]  }
 0x3a0   : > { %7174 = vmatpush1.bf16.msra.mxu0 %v10617_v9  ;;  %7830 = vmatpush1.bf16.msra.mxu1 %v10620_v27  ;;  %v10705_v9 = vld [vmem:[%s11020_s10 + $0x1d28] ss:$16 sps:$4 sm:$0xff]   ;;  %v10710_v27 = vld [vmem:[%s11020_s10 + $0x1d44] ss:$16 sps:$4 sm:$0xff]  }
 0x3a1   : > { %7175 = vmatprep.subr.bf16.mxu0 %v10625_v30  ;;  %7831 = vmatprep.subr.bf16.mxu1 %v10628_v31  ;;  %v10713_v30 = vld [vmem:[%s11020_s10 + $0x1d4c] ss:$16 sps:$4 sm:$0xff]   ;;  %v10708_v31 = vld [vmem:[%s11020_s10 + $0x1d40] ss:$16 sps:$4 sm:$0xff]  }
 0x3a4   : > { %7176 = vmatpush1.bf16.msra.mxu0 %v10623_v33  ;;  %7832 = vmatpush1.bf16.msra.mxu1 %v10626_v13  ;;  %v10711_v33 = vld [vmem:[%s11020_s10 + $0x1d48] ss:$16 sps:$4 sm:$0xff]   ;;  %v10716_v13 = vld [vmem:[%s11020_s10 + $0x1d64] ss:$16 sps:$4 sm:$0xff]  }
 0x3a5   : > { %7177 = vmatprep.subr.bf16.mxu0 %v10631_v34  ;;  %7833 = vmatprep.subr.bf16.mxu1 %v10634_v35  ;;  %v10719_v34 = vld [vmem:[%s11020_s10 + $0x1d6c] ss:$16 sps:$4 sm:$0xff]   ;;  %v10714_v35 = vld [vmem:[%s11020_s10 + $0x1d60] ss:$16 sps:$4 sm:$0xff]  }
 0x3a8   : > { %7178 = vmatpush1.bf16.msra.mxu0 %v10629_v26  ;;  %7834 = vmatpush1.bf16.msra.mxu1 %v10632_v36  ;;  %v10717_v26 = vld [vmem:[%s11020_s10 + $0x1d68] ss:$16 sps:$4 sm:$0xff]   ;;  %v10722_v36 = vld [vmem:[%s11020_s10 + $0x1d84] ss:$16 sps:$4 sm:$0xff]  }
 0x3a9   : > { %7179 = vmatprep.subr.bf16.mxu0 %v10637_v24  ;;  %7835 = vmatprep.subr.bf16.mxu1 %v10640_v38  ;;  %v10725_v24 = vld [vmem:[%s11020_s10 + $0x1d8c] ss:$16 sps:$4 sm:$0xff]   ;;  %v10720_v38 = vld [vmem:[%s11020_s10 + $0x1d80] ss:$16 sps:$4 sm:$0xff]  }
 0x3ac   : > { %7180 = vmatpush1.bf16.msra.mxu0 %v10635_v21  ;;  %7836 = vmatpush1.bf16.msra.mxu1 %v10638_v28  ;;  %v10723_v21 = vld [vmem:[%s11020_s10 + $0x1d88] ss:$16 sps:$4 sm:$0xff]   ;;  %v10728_v28 = vld [vmem:[%s11020_s10 + $0x1da4] ss:$16 sps:$4 sm:$0xff]  }
 0x3ad   : > { %7181 = vmatprep.subr.bf16.mxu0 %v10643_v41  ;;  %7837 = vmatprep.subr.bf16.mxu1 %v10646_v44  ;;  %v10731_v41 = vld [vmem:[%s11020_s10 + $0x1dac] ss:$16 sps:$4 sm:$0xff]   ;;  %v10726_v44 = vld [vmem:[%s11020_s10 + $0x1da0] ss:$16 sps:$4 sm:$0xff]  }
 0x3b0   : > { %7182 = vmatpush1.bf16.msra.mxu0 %v10641_v25  ;;  %7838 = vmatpush1.bf16.msra.mxu1 %v10644_v46  ;;  %v10729_v25 = vld [vmem:[%s11020_s10 + $0x1da8] ss:$16 sps:$4 sm:$0xff]   ;;  %v10734_v46 = vld [vmem:[%s11020_s10 + $0x1dc4] ss:$16 sps:$4 sm:$0xff]  }
 0x3b1   : > { %7192 = vmatprep.subr.bf16.mxu0 %v10650_v48  ;;  %7848 = vmatprep.subr.bf16.mxu1 %v10653_v29  ;;  %v10737_v48 = vld [vmem:[%s11020_s10 + $0x1dcc] ss:$16 sps:$4 sm:$0xff]   ;;  %v393_v29 = vcombine.high %v12065_v39, %v12065_v39  ;;  %v10738_v39 = vld [vmem:[%s11020_s10 + $0x1de0] ss:$16 sps:$4 sm:$0xff]  }
 0x3b3   : > { %7184 = vmatmul.mubr.bf16.vlgmr.msra.gmra.mrb[0].mxu0 %v468_v51  ;;  %7840 = vmatmul.mubr.bf16.vlgmr.msra.gmra.mrb[0].mxu1 %v468_v51  ;;  %v10735_v51 = vld [vmem:[%s11020_s10 + $0x1dc8] ss:$16 sps:$4 sm:$0xff]  }
 0x3b4   : > { %7193 = vmatpush1.bf16.msra.mxu0 %v10648_v32  ;;  %7849 = vmatpush1.bf16.msra.mxu1 %v10651_v52  ;;  %v10740_v32 = vld [vmem:[%s11020_s10 + $0x1de4] ss:$16 sps:$4 sm:$0xff]   ;;  %v10743_v52 = vld [vmem:[%s11020_s10 + $0x1dec] ss:$16 sps:$4 sm:$0xff]  }
 0x3b5   : > { %7194 = vmatprep.subr.bf16.mxu0 %v10656_v53  ;;  %7850 = vmatprep.subr.bf16.mxu1 %v10659_v54  ;;  %v12146_v53 = vrot.slane %v393_v29, %v11073_v49  ;;  %v10741_v54 = vld [vmem:[%s11020_s10 + $0x1de8] ss:$16 sps:$4 sm:$0xff]  }
 0x3b6   : > { %7224 = vmatprep.mubr.bf16.mxu0 %v471_v55  ;;  %7880 = vmatprep.mubr.bf16.mxu1 %v471_v55  ;;  %v10746_v55 = vld [vmem:[%s11020_s10 + $0x1e04] ss:$16 sps:$4 sm:$0xff]   ;;  %v10819_v29 = vld [vmem:[%s11020_s10 + $0x1f88] ss:$16 sps:$4 sm:$0xff]  }
 0x3b8   : > { %7195 = vmatpush1.bf16.msra.mxu0 %v10654_v37  ;;  %7851 = vmatpush1.bf16.msra.mxu1 %v10657_v42  ;;  %v10749_v37 = vld [vmem:[%s11020_s10 + $0x1e0c] ss:$16 sps:$4 sm:$0xff]   ;;  %v409_v42 = vcombine.high %v12146_v53, %v12146_v53 }
 0x3b9   : > { %7196 = vmatprep.subr.bf16.mxu0 %v10662_v57  ;;  %7852 = vmatprep.subr.bf16.mxu1 %v10665_v40  ;;  %v470_v57 = vpack.c.bf16 %v12073_v45, %v12073_v45  ;;  %v10744_v40 = vld [vmem:[%s11020_s10 + $0x1e00] ss:$16 sps:$4 sm:$0xff]  }
 0x3ba   : > { %v10750_v45 = vld [vmem:[%s11020_s10 + $0x1e20] ss:$16 sps:$4 sm:$0xff]  }
 0x3bc   : > { %7197 = vmatpush1.bf16.msra.mxu0 %v10660_v59  ;;  %7853 = vmatpush1.bf16.msra.mxu1 %v10663_v60  ;;  %v10747_v59 = vld [vmem:[%s11020_s10 + $0x1e08] ss:$16 sps:$4 sm:$0xff]   ;;  %v10752_v60 = vld [vmem:[%s11020_s10 + $0x1e24] ss:$16 sps:$4 sm:$0xff]  }
 0x3bd   : > { %7198 = vmatprep.subr.bf16.mxu0 %v10668_v61  ;;  %7854 = vmatprep.subr.bf16.mxu1 %v10671_v63  ;;  %v10755_v61 = vld [vmem:[%s11020_s10 + $0x1e2c] ss:$16 sps:$4 sm:$0xff]   ;;  %v473_v63 = vpack.c.bf16 %v409_v42, %v409_v42  ;;  %v10836_v42 = vld [vmem:[%s11020_s10 + $0x1fe4] ss:$16 sps:$4 sm:$0xff]  }
 0x3c0   : > { %7199 = vmatpush1.bf16.msra.mxu0 %v10666_v0  ;;  %7855 = vmatpush1.bf16.msra.mxu1 %v10669_v1  ;;  %v10753_v0 = vld [vmem:[%s11020_s10 + $0x1e28] ss:$16 sps:$4 sm:$0xff]   ;;  %v10758_v1 = vld [vmem:[%s11020_s10 + $0x1e44] ss:$16 sps:$4 sm:$0xff]  }
 0x3c1   : > { %7200 = vmatprep.subr.bf16.mxu0 %v10674_v47  ;;  %7856 = vmatprep.subr.bf16.mxu1 %v10677_v2  ;;  %v10761_v47 = vld [vmem:[%s11020_s10 + $0x1e4c] ss:$16 sps:$4 sm:$0xff]   ;;  %v10756_v2 = vld [vmem:[%s11020_s10 + $0x1e40] ss:$16 sps:$4 sm:$0xff]  }
 0x3c4   : > { %7201 = vmatpush1.bf16.msra.mxu0 %v10672_v3  ;;  %7857 = vmatpush1.bf16.msra.mxu1 %v10675_v4  ;;  %v10759_v3 = vld [vmem:[%s11020_s10 + $0x1e48] ss:$16 sps:$4 sm:$0xff]   ;;  %v10764_v4 = vld [vmem:[%s11020_s10 + $0x1e64] ss:$16 sps:$4 sm:$0xff]  }
 0x3c5   : > { %7202 = vmatprep.subr.bf16.mxu0 %v10680_v5  ;;  %7858 = vmatprep.subr.bf16.mxu1 %v10683_v58  ;;  %v10767_v5 = vld [vmem:[%s11020_s10 + $0x1e6c] ss:$16 sps:$4 sm:$0xff]   ;;  %v10762_v58 = vld [vmem:[%s11020_s10 + $0x1e60] ss:$16 sps:$4 sm:$0xff]  }
 0x3c8   : > { %7203 = vmatpush1.bf16.msra.mxu0 %v10678_v7  ;;  %7859 = vmatpush1.bf16.msra.mxu1 %v10681_v56  ;;  %v10765_v7 = vld [vmem:[%s11020_s10 + $0x1e68] ss:$16 sps:$4 sm:$0xff]   ;;  %v10770_v56 = vld [vmem:[%s11020_s10 + $0x1e84] ss:$16 sps:$4 sm:$0xff]  }
 0x3c9   : > { %7204 = vmatprep.subr.bf16.mxu0 %v10686_v10  ;;  %7860 = vmatprep.subr.bf16.mxu1 %v10689_v11  ;;  %v10773_v10 = vld [vmem:[%s11020_s10 + $0x1e8c] ss:$16 sps:$4 sm:$0xff]   ;;  %v10768_v11 = vld [vmem:[%s11020_s10 + $0x1e80] ss:$16 sps:$4 sm:$0xff]  }
 0x3cc   : > { %7205 = vmatpush1.bf16.msra.mxu0 %v10684_v12  ;;  %7861 = vmatpush1.bf16.msra.mxu1 %v10687_v14  ;;  %v10771_v12 = vld [vmem:[%s11020_s10 + $0x1e88] ss:$16 sps:$4 sm:$0xff]   ;;  %v10776_v14 = vld [vmem:[%s11020_s10 + $0x1ea4] ss:$16 sps:$4 sm:$0xff]  }
 0x3cd   : > { %7206 = vmatprep.subr.bf16.mxu0 %v10692_v15  ;;  %7862 = vmatprep.subr.bf16.mxu1 %v10695_v16  ;;  %v10779_v15 = vld [vmem:[%s11020_s10 + $0x1eac] ss:$16 sps:$4 sm:$0xff]   ;;  %v10774_v16 = vld [vmem:[%s11020_s10 + $0x1ea0] ss:$16 sps:$4 sm:$0xff]  }
 0x3d0   : > { %7207 = vmatpush1.bf16.msra.mxu0 %v10690_v62  ;;  %7863 = vmatpush1.bf16.msra.mxu1 %v10693_v17  ;;  %v10777_v62 = vld [vmem:[%s11020_s10 + $0x1ea8] ss:$16 sps:$4 sm:$0xff]   ;;  %v10782_v17 = vld [vmem:[%s11020_s10 + $0x1ec4] ss:$16 sps:$4 sm:$0xff]  }
 0x3d1   : > { %7208 = vmatprep.subr.bf16.mxu0 %v10698_v18  ;;  %7864 = vmatprep.subr.bf16.mxu1 %v10701_v19  ;;  %v10785_v18 = vld [vmem:[%s11020_s10 + $0x1ecc] ss:$16 sps:$4 sm:$0xff]   ;;  %v10780_v19 = vld [vmem:[%s11020_s10 + $0x1ec0] ss:$16 sps:$4 sm:$0xff]  }
 0x3d4   : > { %7209 = vmatpush1.bf16.msra.mxu0 %v10696_v20  ;;  %7865 = vmatpush1.bf16.msra.mxu1 %v10699_v8  ;;  %v10783_v20 = vld [vmem:[%s11020_s10 + $0x1ec8] ss:$16 sps:$4 sm:$0xff]   ;;  %v10788_v8 = vld [vmem:[%s11020_s10 + $0x1ee4] ss:$16 sps:$4 sm:$0xff]  }
 0x3d5   : > { %7210 = vmatprep.subr.bf16.mxu0 %v10704_v22  ;;  %7866 = vmatprep.subr.bf16.mxu1 %v10707_v6  ;;  %v10791_v22 = vld [vmem:[%s11020_s10 + $0x1eec] ss:$16 sps:$4 sm:$0xff]   ;;  %v10786_v6 = vld [vmem:[%s11020_s10 + $0x1ee0] ss:$16 sps:$4 sm:$0xff]  }
 0x3d8   : > { %7211 = vmatpush1.bf16.msra.mxu0 %v10702_v23  ;;  %7867 = vmatpush1.bf16.msra.mxu1 %v10705_v9  ;;  %v10789_v23 = vld [vmem:[%s11020_s10 + $0x1ee8] ss:$16 sps:$4 sm:$0xff]   ;;  %v10794_v9 = vld [vmem:[%s11020_s10 + $0x1f04] ss:$16 sps:$4 sm:$0xff]  }
 0x3d9   : > { %7212 = vmatprep.subr.bf16.mxu0 %v10710_v27  ;;  %7868 = vmatprep.subr.bf16.mxu1 %v10713_v30  ;;  %v10797_v27 = vld [vmem:[%s11020_s10 + $0x1f0c] ss:$16 sps:$4 sm:$0xff]   ;;  %v10792_v30 = vld [vmem:[%s11020_s10 + $0x1f00] ss:$16 sps:$4 sm:$0xff]  }
 0x3dc   : > { %7213 = vmatpush1.bf16.msra.mxu0 %v10708_v31  ;;  %7869 = vmatpush1.bf16.msra.mxu1 %v10711_v33  ;;  %v10795_v31 = vld [vmem:[%s11020_s10 + $0x1f08] ss:$16 sps:$4 sm:$0xff]   ;;  %v10800_v33 = vld [vmem:[%s11020_s10 + $0x1f24] ss:$16 sps:$4 sm:$0xff]  }
 0x3dd   : > { %7214 = vmatprep.subr.bf16.mxu0 %v10716_v13  ;;  %7870 = vmatprep.subr.bf16.mxu1 %v10719_v34  ;;  %v10803_v13 = vld [vmem:[%s11020_s10 + $0x1f2c] ss:$16 sps:$4 sm:$0xff]   ;;  %v10798_v34 = vld [vmem:[%s11020_s10 + $0x1f20] ss:$16 sps:$4 sm:$0xff]  }
 0x3e0   : > { %7215 = vmatpush1.bf16.msra.mxu0 %v10714_v35  ;;  %7871 = vmatpush1.bf16.msra.mxu1 %v10717_v26  ;;  %v10801_v35 = vld [vmem:[%s11020_s10 + $0x1f28] ss:$16 sps:$4 sm:$0xff]   ;;  %v10806_v26 = vld [vmem:[%s11020_s10 + $0x1f44] ss:$16 sps:$4 sm:$0xff]  }
 0x3e1   : > { %7216 = vmatprep.subr.bf16.mxu0 %v10722_v36  ;;  %7872 = vmatprep.subr.bf16.mxu1 %v10725_v24  ;;  %v10809_v36 = vld [vmem:[%s11020_s10 + $0x1f4c] ss:$16 sps:$4 sm:$0xff]   ;;  %v10804_v24 = vld [vmem:[%s11020_s10 + $0x1f40] ss:$16 sps:$4 sm:$0xff]  }
 0x3e4   : > { %7217 = vmatpush1.bf16.msra.mxu0 %v10720_v38  ;;  %7873 = vmatpush1.bf16.msra.mxu1 %v10723_v21  ;;  %v10807_v38 = vld [vmem:[%s11020_s10 + $0x1f48] ss:$16 sps:$4 sm:$0xff]   ;;  %v10812_v21 = vld [vmem:[%s11020_s10 + $0x1f64] ss:$16 sps:$4 sm:$0xff]  }
 0x3e5   : > { %7218 = vmatprep.subr.bf16.mxu0 %v10728_v28  ;;  %7874 = vmatprep.subr.bf16.mxu1 %v10731_v41  ;;  %v10815_v28 = vld [vmem:[%s11020_s10 + $0x1f6c] ss:$16 sps:$4 sm:$0xff]   ;;  %v10810_v41 = vld [vmem:[%s11020_s10 + $0x1f60] ss:$16 sps:$4 sm:$0xff]  }
 0x3e8   : > { %7219 = vmatpush1.bf16.msra.mxu0 %v10726_v44  ;;  %7875 = vmatpush1.bf16.msra.mxu1 %v10729_v25  ;;  %v10813_v44 = vld [vmem:[%s11020_s10 + $0x1f68] ss:$16 sps:$4 sm:$0xff]   ;;  %v10818_v25 = vld [vmem:[%s11020_s10 + $0x1f84] ss:$16 sps:$4 sm:$0xff]  }
 0x3e9   : > { %7220 = vmatprep.subr.bf16.mxu0 %v10734_v46  ;;  %7876 = vmatprep.subr.bf16.mxu1 %v10737_v48  ;;  %v10821_v46 = vld [vmem:[%s11020_s10 + $0x1f8c] ss:$16 sps:$4 sm:$0xff]   ;;  %v10816_v48 = vld [vmem:[%s11020_s10 + $0x1f80] ss:$16 sps:$4 sm:$0xff]  }
 0x3ec   : > { %7221 = vmatpush1.bf16.msra.mxu0 %v10732_v50  ;;  %7877 = vmatpush1.bf16.msra.mxu1 %v10735_v51  ;;  %v10824_v50 = vld [vmem:[%s11020_s10 + $0x1fa4] ss:$16 sps:$4 sm:$0xff]   ;;  %v10827_v51 = vld [vmem:[%s11020_s10 + $0x1fac] ss:$16 sps:$4 sm:$0xff]  }
 0x3ed   : > { %7222 = vmatprep.subr.bf16.mxu0 %v10740_v32  ;;  %7878 = vmatprep.subr.bf16.mxu1 %v10743_v52  ;;  %v10822_v32 = vld [vmem:[%s11020_s10 + $0x1fa0] ss:$16 sps:$4 sm:$0xff]   ;;  %v10825_v52 = vld [vmem:[%s11020_s10 + $0x1fa8] ss:$16 sps:$4 sm:$0xff]  }
 0x3f0   : > { %7223 = vmatpush1.bf16.msra.mxu0 %v10738_v39  ;;  %7879 = vmatpush1.bf16.msra.mxu1 %v10741_v54  ;;  %v10830_v39 = vld [vmem:[%s11020_s10 + $0x1fc4] ss:$16 sps:$4 sm:$0xff]   ;;  %v10833_v54 = vld [vmem:[%s11020_s10 + $0x1fcc] ss:$16 sps:$4 sm:$0xff]  }
 0x3f1   : > { %7233 = vmatprep.subr.bf16.mxu0 %v10746_v55  ;;  %7889 = vmatprep.subr.bf16.mxu1 %v10749_v37  ;;  %v10828_v55 = vld [vmem:[%s11020_s10 + $0x1fc0] ss:$16 sps:$4 sm:$0xff]   ;;  %v10831_v37 = vld [vmem:[%s11020_s10 + $0x1fc8] ss:$16 sps:$4 sm:$0xff]  }
 0x3f3   : > { %7225 = vmatmul.mubr.bf16.vlgmr.msra.gmra.mrb[0].mxu0 %v470_v57  ;;  %7881 = vmatmul.mubr.bf16.vlgmr.msra.gmra.mrb[0].mxu1 %v470_v57  ;;  %v10839_v57 = vld [vmem:[%s11020_s10 + $0x1fec] ss:$16 sps:$4 sm:$0xff]  }
 0x3f4   : > { %7234 = vmatpush1.bf16.msra.mxu0 %v10744_v40  ;;  %7890 = vmatpush1.bf16.msra.mxu1 %v10747_v59  ;;  %v10834_v40 = vld [vmem:[%s11020_s10 + $0x1fe0] ss:$16 sps:$4 sm:$0xff]   ;;  %v10837_v59 = vld [vmem:[%s11020_s10 + $0x1fe8] ss:$16 sps:$4 sm:$0xff]   ;;  %s245_s10 = scalar_lea.vmem %s12257_s2, %s12267_s29 }
 0x3f5   : > { %7235 = vmatprep.subr.bf16.mxu0 %v10752_v60  ;;  %7891 = vmatprep.subr.bf16.mxu1 %v10755_v61  ;;  %v472_v60 = vpack.c.bf16 %v12146_v53, %v12146_v53  ;;  %v7934_v53 = vsub.s32 0, %v11065_v43  ;;  %v7942_v61 = vsub.s32 2, %v11065_v43 }
 0x3f6   : > { %7265 = vmatprep.mubr.bf16.mxu0 %v473_v63  ;;  %7921 = vmatprep.mubr.bf16.mxu1 %v473_v63  ;;  %v7930_v63 = vld [vmem:[%s245_s10] sm:$0xf] }
 0x3f8   : > { %7236 = vmatpush1.bf16.msra.mxu0 %v10750_v45  ;;  %7892 = vmatpush1.bf16.msra.mxu1 %v10753_v0  ;;  %v7938_v45 = vsub.s32 1, %v11065_v43  ;;  %v7946_v0 = vsub.s32 3, %v11065_v43 }
 0x3f9   : > { %7237 = vmatprep.subr.bf16.mxu0 %v10758_v1  ;;  %7893 = vmatprep.subr.bf16.mxu1 %v10761_v47  ;;  %v7956_v1 = vld [vmem:[%s250_s6] sm:$0xf]  ;;  %v7935_v47 = vrot.slane %v7930_v63, %v7934_v53 }
 0x3fc   : > { %7238 = vmatpush1.bf16.msra.mxu0 %v10756_v2  ;;  %7894 = vmatpush1.bf16.msra.mxu1 %v10759_v3  ;;  %v7943_v2 = vrot.slane %v7930_v63, %v7942_v61  ;;  %v7939_v3 = vrot.slane %v7930_v63, %v7938_v45 }
 0x3fd   : > { %7239 = vmatprep.subr.bf16.mxu0 %v10764_v4  ;;  %7895 = vmatprep.subr.bf16.mxu1 %v10767_v5  ;;  %v7947_v4 = vrot.slane %v7930_v63, %v7946_v0  ;;  %v7961_v5 = vrot.slane %v7956_v1, %v7934_v53 }
 0x400   : > { %7240 = vmatpush1.bf16.msra.mxu0 %v10762_v58  ;;  %7896 = vmatpush1.bf16.msra.mxu1 %v10765_v7  ;;  %v7969_v58 = vrot.slane %v7956_v1, %v7942_v61 }
 0x401   : > { %7241 = vmatprep.subr.bf16.mxu0 %v10770_v56  ;;  %7897 = vmatprep.subr.bf16.mxu1 %v10773_v10  ;;  %v7965_v10 = vrot.slane %v7956_v1, %v7938_v45 }
 0x404   : > { %7242 = vmatpush1.bf16.msra.mxu0 %v10768_v11  ;;  %7898 = vmatpush1.bf16.msra.mxu1 %v10771_v12  ;;  %v7973_v11 = vrot.slane %v7956_v1, %v7946_v0 }
 0x405   : > { %7243 = vmatprep.subr.bf16.mxu0 %v10776_v14  ;;  %7899 = vmatprep.subr.bf16.mxu1 %v10779_v15 }
 0x408   : > { %7244 = vmatpush1.bf16.msra.mxu0 %v10774_v16  ;;  %7900 = vmatpush1.bf16.msra.mxu1 %v10777_v62 }
 0x409   : > { %7245 = vmatprep.subr.bf16.mxu0 %v10782_v17  ;;  %7901 = vmatprep.subr.bf16.mxu1 %v10785_v18 }
 0x40c   : > { %7246 = vmatpush1.bf16.msra.mxu0 %v10780_v19  ;;  %7902 = vmatpush1.bf16.msra.mxu1 %v10783_v20 }
 0x40d   : > { %7247 = vmatprep.subr.bf16.mxu0 %v10788_v8  ;;  %7903 = vmatprep.subr.bf16.mxu1 %v10791_v22 }
 0x410   : > { %7248 = vmatpush1.bf16.msra.mxu0 %v10786_v6  ;;  %7904 = vmatpush1.bf16.msra.mxu1 %v10789_v23 }
 0x411   : > { %7249 = vmatprep.subr.bf16.mxu0 %v10794_v9  ;;  %7905 = vmatprep.subr.bf16.mxu1 %v10797_v27 }
 0x414   : > { %7250 = vmatpush1.bf16.msra.mxu0 %v10792_v30  ;;  %7906 = vmatpush1.bf16.msra.mxu1 %v10795_v31 }
 0x415   : > { %7251 = vmatprep.subr.bf16.mxu0 %v10800_v33  ;;  %7907 = vmatprep.subr.bf16.mxu1 %v10803_v13 }
 0x418   : > { %7252 = vmatpush1.bf16.msra.mxu0 %v10798_v34  ;;  %7908 = vmatpush1.bf16.msra.mxu1 %v10801_v35 }
 0x419   : > { %7253 = vmatprep.subr.bf16.mxu0 %v10806_v26  ;;  %7909 = vmatprep.subr.bf16.mxu1 %v10809_v36 }
 0x41c   : > { %7254 = vmatpush1.bf16.msra.mxu0 %v10804_v24  ;;  %7910 = vmatpush1.bf16.msra.mxu1 %v10807_v38 }
 0x41d   : > { %7255 = vmatprep.subr.bf16.mxu0 %v10812_v21  ;;  %7911 = vmatprep.subr.bf16.mxu1 %v10815_v28 }
 0x420   : > { %7256 = vmatpush1.bf16.msra.mxu0 %v10810_v41  ;;  %7912 = vmatpush1.bf16.msra.mxu1 %v10813_v44 }
 0x421   : > { %7257 = vmatprep.subr.bf16.mxu0 %v10818_v25  ;;  %7913 = vmatprep.subr.bf16.mxu1 %v10821_v46 }
 0x424   : > { %7258 = vmatpush1.bf16.msra.mxu0 %v10816_v48  ;;  %7914 = vmatpush1.bf16.msra.mxu1 %v10819_v29 }
 0x425   : > { %7259 = vmatprep.subr.bf16.mxu0 %v10824_v50  ;;  %7915 = vmatprep.subr.bf16.mxu1 %v10827_v51 }
 0x428   : > { %7260 = vmatpush1.bf16.msra.mxu0 %v10822_v32  ;;  %7916 = vmatpush1.bf16.msra.mxu1 %v10825_v52 }
 0x429   : > { %7261 = vmatprep.subr.bf16.mxu0 %v10830_v39  ;;  %7917 = vmatprep.subr.bf16.mxu1 %v10833_v54 }
 0x42c   : > { %7262 = vmatpush1.bf16.msra.mxu0 %v10828_v55  ;;  %7918 = vmatpush1.bf16.msra.mxu1 %v10831_v37 }
 0x42d   : > { %7263 = vmatprep.subr.bf16.mxu0 %v10836_v42  ;;  %7919 = vmatprep.subr.bf16.mxu1 %v10839_v57 }
 0x430   : > { %7264 = vmatpush1.bf16.msra.mxu0 %v10834_v40  ;;  %7920 = vmatpush1.bf16.msra.mxu1 %v10837_v59 }
 0x433   : > { %7266 = vmatmul.mubr.bf16.vlgmr.msra.gmra.mrb[0].mxu0 %v472_v60  ;;  %7922 = vmatmul.mubr.bf16.vlgmr.msra.gmra.mrb[0].mxu1 %v472_v60 }
 0x506   : > { %v7267_v7 = vpop.f32.mrb[0].mxu0  ;;  %v7923_v56 = vpop.f32.mrb[0].mxu1 }
 0x507   : > { %v7952_v12 = vmul.f32 %v7935_v47, %v7267_v7  ;;  %v7954_v14 = vmul.f32 %v7943_v2, %v7923_v56  ;;  %v7269_v15 = vpop.f32.mrb[1].mxu0  ;;  %v7925_v16 = vpop.f32.mrb[1].mxu1 }
 0x508   : > { %v7953_v62 = vmul.f32 %v7939_v3, %v7269_v15  ;;  %v7955_v17 = vmul.f32 %v7947_v4, %v7925_v16  ;;  %v7271_v18 = vpop.f32.mrb[2].mxu0  ;;  %v7927_v43 = vpop.f32.mrb[2].mxu1 }
 0x509   : > { %v7978_v19 = vadd.f32 %v7961_v5, %v7952_v12  ;;  %v7980_v20 = vadd.f32 %v7969_v58, %v7954_v14  ;;  %v7272_v8 = vpop.f32.mrb[3].mxu0  ;;  %v7928_v22 = vpop.f32.mrb[3].mxu1 }
 0x50a   : > { %v7979_v6 = vadd.f32 %v7965_v10, %v7953_v62  ;;  %v7981_v23 = vadd.f32 %v7973_v11, %v7955_v17 }
 0x50b   : > { %v7982_v9 = vmax.f32 %v7978_v19, 0.0  ;;  %v7984_v27 = vmax.f32 %v7980_v20, 0.0 }
 0x50c   : > { %v7983_v30 = vmax.f32 %v7979_v6, 0.0  ;;  %v7985_v31 = vmax.f32 %v7981_v23, 0.0 }
 0x50e   : > { %v7990_v33 = vcombine.low %v7982_v9, %v7983_v30  ;;  %v7991_v13 = vcombine.low %v7984_v27, %v7985_v31 }
 0x510   : > { %v7998_v34 = vrot.slane %v7990_v33, %v11073_v49  ;;  %v8005_v35 = vrot.slane %v7991_v13, %v11073_v49 }
 0x512   : > { %v8006_v26 = vcombine.low %v7998_v34, %v8005_v35 }
 0x514   : > { %8008 = vst [vmem:[%s256_s8] sm:$0xff] %v8006_v26 }
 0x515 PF: > { %p14_p8 = scmp.ge.s32.totalorder %s10957_s20, 6   ;;  %s12262_s15 = smov %s10897_s16 }
 0x516   : > { %s12263_s16 = smov %s10901_s17  ;;  %s12264_s17 = smov %s10967_s23 }
 0x517   : > { %s12265_s18 = smov %s10957_s20  ;;  %16 = sbr.rel (!%p14_p8) target bundleno = 3 (0x3), region = 82 }
 0x51e   :  { %8031 = vsyncpa [#allocation3], 1 }
 0x51f   :  { %8033 = vsyncpa [#allocation3 + $0x1], 1 }

</bundles_post_ra>
